<compile_context>
chip_gen: v7x
topology: tpu7x:2x2x1
jax: 0.10.0
libtpu: 0.0.40
codegen_flags: <defaults>
</compile_context>

<pallas_src>
import functools

import jax
import jax.numpy as jnp
import numpy as np
from jax.experimental import pallas as pl
from jax.experimental.pallas import tpu as pltpu


# ----------------------------------------------------------------------------
# Single fused kernel: batched 2-layer encoder (2B streams), masked FAVOR+ attention,
# batched 2-layer encoder2 (B streams), SEClassifier head + start/end CE loss.
# ----------------------------------------------------------------------------
def _fused_forward_kernel(x_ref,                       # (2B*Tc, E) time-major embedded streams
                          e1w, e1u, e1b,               # encoder  layer1: (E,4H),(H,4H),(1,4H)
                          e2w, e2u, e2b,               # encoder  layer2: (H,4H),(H,4H),(1,4H)
                          f1w, f1u, f1b,               # encoder2 layer1
                          f2w, f2u, f2b,               # encoder2 layer2
                          proj_ref,                    # (H, Rp)  FAVOR projection (zero-padded)
                          attmask_ref,                 # (2B*Tc, 2B*Tc) f32 block mask
                          sew_ref, seb_ref,            # (2, H), (2, 1)  SEClassifier linear
                          starts_ref, ends_ref,        # SMEM (B,) int32 targets
                          loss_ref,                    # SMEM (1, 1) f32
                          logits_ref,                  # (2, B*Tc) f32 [start ; end] logits
                          h1_buf, h2_buf,              # VMEM (2B*Tc, H) encoder layer outputs
                          g1_buf, out_buf,             # VMEM (B*Tc, H)  encoder2 layer outputs
                          *, B, Tc, Tq, r):
    f32 = jnp.float32
    H = e1u.shape[0]
    Rp = proj_ref.shape[1]
    twoB = 2 * B

    # --------------- batched LSTM layer: streams along sublanes, gates along lanes ----
    def lstm_chain(xz, u_ref, nstreams, step_stride, store):
        """xz: (Tc*step_stride, 4H) hoisted input projection (+ bias), time-major.
        Recurrence keeps h, c as (nstreams, H): one (nstreams,H)@(H,4H) matmul per step,
        gate nonlinearities on a full (nstreams, 4H=128)-lane block.  Gate order i,f,g,o."""
        u = u_ref[...]                                                   # (H, 4H)
        h = jnp.zeros((nstreams, H), f32)
        c = jnp.zeros((nstreams, H), f32)
        for t in range(Tc):                   # unrolled; only h @ Whh is serial
            z = xz[t * step_stride: t * step_stride + nstreams, :] + \
                jnp.dot(h, u, preferred_element_type=f32)                # (nstreams, 4H)
            sz = jax.nn.sigmoid(z)            # single full-128-lane EUP op for i/f/o
            i_g = sz[:, 0:H]
            f_g = sz[:, H:2 * H]
            o_g = sz[:, 3 * H:4 * H]
            g_g = jnp.tanh(z[:, 2 * H:3 * H])
            c = f_g * c + i_g * g_g
            h = o_g * jnp.tanh(c)
            store(t, h)

    def store_h1(t, h):
        h1_buf[pl.ds(t * twoB, twoB), :] = h          # contiguous (2B,H) block per step

    def store_h2(t, h):
        h2_buf[pl.ds(t * twoB, twoB), :] = h

    def store_g1(t, h):
        g1_buf[pl.ds(t * B, B), :] = h                # contiguous (B,H) block per step

    def store_out(t, h):
        for b in range(B):                            # stream-major for the lane-dense head
            out_buf[pl.ds(b * Tc + t, 1), :] = h[b:b + 1, :]

    # --------------- shared encoder over all 2B streams (batched) ---------------------
    xz = jnp.dot(x_ref[...], e1w[...], preferred_element_type=f32) + e1b[...]   # (2B*Tc,4H)
    lstm_chain(xz, e1u, twoB, twoB, store_h1)
    xz = jnp.dot(h1_buf[...], e2w[...], preferred_element_type=f32) + e2b[...]  # (2B*Tc,4H)
    lstm_chain(xz, e2u, twoB, twoB, store_h2)

    # --------------- FAVOR+ softmax-kernel self-attention, batched via block mask -----
    # attmask[i, j] = 1 iff positions i, j belong to the same batch element and both
    # participate (context: all t;  question: t < Tq).  Stabilizer constants cancel in
    # num/denom (up to the +eps regularizer), so one global key-stabilizer is used.
    x_all = h2_buf[...]                                                  # (2B*Tc, H)
    proj = proj_ref[...]                                                 # (H, Rp)
    dn = float(H) ** -0.25
    ratio = float(r) ** -0.5
    half_dn2 = 0.5 * dn * dn
    eps = 1e-6

    xd = dn * jnp.dot(x_all, proj, preferred_element_type=f32)           # (2B*Tc, Rp)
    diag = half_dn2 * jnp.sum(x_all * x_all, axis=-1, keepdims=True)     # (2B*Tc, 1)
    q_prime = ratio * (jnp.exp(xd - diag - jnp.max(xd, axis=-1, keepdims=True)) + eps)
    k_prime = ratio * (jnp.exp(xd - diag - jnp.max(xd)) + eps)
    # mask the zero-padded feature columns (r .. Rp) out of the key features
    colmask = (jax.lax.broadcasted_iota(jnp.int32, (1, Rp), 1) < r).astype(f32)
    k_prime = k_prime * colmask

    a = jax.lax.dot_general(q_prime, k_prime, (((1,), (1,)), ((), ())),
                            preferred_element_type=f32)                  # (2B*Tc, 2B*Tc)
    a = a * attmask_ref[...]
    num = jnp.dot(a, x_all, preferred_element_type=f32)                  # (2B*Tc, H)
    den = jnp.sum(a, axis=-1, keepdims=True)                             # (2B*Tc, 1)
    att = num / jnp.maximum(den, 1e-30)        # non-participating rows -> 0 (never read)

    # --------------- encoder2 over the B context streams (batched) --------------------
    # The hoisted projection runs on all 2B*Tc rows (half discarded -- cheaper than a
    # gather); the recurrence slices only the context rows of each timestep.
    xz = jnp.dot(att, f1w[...], preferred_element_type=f32) + f1b[...]   # (2B*Tc, 4H)
    lstm_chain(xz, f1u, B, twoB, store_g1)
    xz = jnp.dot(g1_buf[...], f2w[...], preferred_element_type=f32) + f2b[...]  # (B*Tc, 4H)
    lstm_chain(xz, f2u, B, B, store_out)

    # --------------- SEClassifier head + start/end CrossEntropy(ignore_index=Tc) ------
    sew = sew_ref[...]                                                   # (2, H)
    seb = seb_ref[...]                                                   # (2, 1)
    lin = jax.lax.dot_general(sew, out_buf[...], (((1,), (1,)), ((), ())),
                              preferred_element_type=f32) + seb          # (2, B*Tc)
    lg = jax.nn.sigmoid(lin)
    logits_ref[...] = lg                                                 # one lane-dense store

    idx_lane = jax.lax.broadcasted_iota(jnp.int32, (1, Tc), 1)

    def ce(row, tgt):
        # nn.CrossEntropyLoss(ignore_index=Tc) on one (1, Tc) row; target clamped [0, Tc].
        tgt = jnp.clip(tgt, 0, Tc)
        m = jnp.max(row)
        lse = m + jnp.log(jnp.sum(jnp.exp(row - m)))
        picked = jnp.sum(jnp.where(idx_lane == tgt, row, 0.0))
        valid = (tgt < Tc).astype(f32)
        return (lse - picked) * valid, valid

    s_num = 0.0
    s_cnt = 0.0
    e_num = 0.0
    e_cnt = 0.0
    for b in range(B):
        s_row = lg[0:1, b * Tc:(b + 1) * Tc]
        e_row = lg[1:2, b * Tc:(b + 1) * Tc]
        ls, vs = ce(s_row, starts_ref[b])
        le, ve = ce(e_row, ends_ref[b])
        s_num += ls
        s_cnt += vs
        e_num += le
        e_cnt += ve

    start_loss = s_num / jnp.maximum(s_cnt, 1.0)
    end_loss = e_num / jnp.maximum(e_cnt, 1.0)
    loss_ref[0, 0] = 0.5 * (start_loss + end_loss)


# ----------------------------------------------------------------------------
# Wrapper: embedding lookup, layout plumbing (time-major streams, padded projection,
# attention block mask) and one fused pallas_call.
# ----------------------------------------------------------------------------
def model_forward(params, context_ids, q_ids, start_pos, end_pos):
    B, Tc = context_ids.shape
    Tq = q_ids.shape[1]
    twoB = 2 * B
    emb = params["embedding"]

    # Right-pad the question to Tc (causal LSTM -> its first Tq outputs are unchanged),
    # so ctx and q share one batched set of encoder streams.
    q_pad = jnp.zeros((B, Tc), dtype=q_ids.dtype).at[:, :Tq].set(q_ids)
    ids = jnp.concatenate([context_ids, q_pad], axis=0)                  # (2B, Tc)
    x = jnp.take(emb, ids, axis=0).astype(jnp.float32)                   # (2B, Tc, E)
    # Time-major layout: row t*2B + j  <->  stream j at timestep t.
    x_tm = jnp.transpose(x, (1, 0, 2)).reshape(Tc * twoB, -1)            # (2B*Tc, E)

    (e1, e2) = params["encoder"]
    (f1, f2) = params["encoder2"]
    H = e1[1].shape[0]

    # FAVOR projection padded to a lane-friendly width; padded columns masked in-kernel.
    proj = params["att_proj"]
    r = proj.shape[1]
    Rp = ((r + 63) // 64) * 64
    proj_p = jnp.zeros((H, Rp), jnp.float32).at[:, :r].set(proj)

    # Block mask for the batched attention (compile-time constant).
    N = Tc * twoB
    idx = np.arange(N)
    jj = idx % twoB                       # stream id
    tt = idx // twoB                      # timestep
    part = (jj < B) | (tt < Tq)           # context: all t; question: only t < Tq
    bat = jj % B                          # batch element of the stream
    attmask = ((bat[:, None] == bat[None, :]) & part[:, None] & part[None, :])
    attmask = jnp.asarray(attmask.astype(np.float32))                    # (N, N)

    vmem = pl.BlockSpec(memory_space=pltpu.MemorySpace.VMEM)
    smem = pl.BlockSpec(memory_space=pltpu.MemorySpace.SMEM)

    loss, logits = pl.pallas_call(
        functools.partial(_fused_forward_kernel, B=B, Tc=Tc, Tq=Tq, r=r),
        out_shape=(jax.ShapeDtypeStruct((1, 1), jnp.float32),
                   jax.ShapeDtypeStruct((2, B * Tc), jnp.float32)),
        in_specs=[vmem] * 17 + [smem, smem],
        out_specs=(smem, vmem),
        scratch_shapes=[pltpu.VMEM((twoB * Tc, H), jnp.float32),   # encoder layer-1 out
                        pltpu.VMEM((twoB * Tc, H), jnp.float32),   # encoder layer-2 out
                        pltpu.VMEM((B * Tc, H), jnp.float32),      # encoder2 layer-1 out
                        pltpu.VMEM((B * Tc, H), jnp.float32)],     # encoder2 layer-2 out
    )(x_tm,
      e1[0], e1[1], e1[2], e2[0], e2[1], e2[2],
      f1[0], f1[1], f1[2], f2[0], f2[1], f2[2],
      proj_p, attmask, params["se_w"], params["se_b"],
      start_pos.astype(jnp.int32), end_pos.astype(jnp.int32))

    start_logits = logits[0].reshape(B, Tc)
    end_logits = logits[1].reshape(B, Tc)
    return loss[0, 0], start_logits, end_logits


# ----------------------------------------------------------------------------
# Deterministic synthetic parameters
# ----------------------------------------------------------------------------
def init_lstm_layer(key, in_size, hidden):
    """Fused-gate layout: Wih (In, 4H), Whh (H, 4H), bias (1, 4H); gate order i,f,g,o."""
    k1, k2, k3, k4 = jax.random.split(key, 4)
    s = 1.0 / float(hidden) ** 0.5
    wih = jax.random.uniform(k1, (in_size, 4 * hidden), minval=-s, maxval=s)
    whh = jax.random.uniform(k2, (hidden, 4 * hidden), minval=-s, maxval=s)
    b = (jax.random.uniform(k3, (1, 4 * hidden), minval=-s, maxval=s)
         + jax.random.uniform(k4, (1, 4 * hidden), minval=-s, maxval=s))   # b_ih + b_hh
    return (wih.astype(jnp.float32), whh.astype(jnp.float32), b.astype(jnp.float32))


def init_params(key, vocab, emb_size, hidden, att_r):
    keys = jax.random.split(key, 8)
    params = {}
    params["embedding"] = (jax.random.normal(keys[0], (vocab, emb_size)) * 0.1).astype(jnp.float32)
    params["encoder"] = [init_lstm_layer(keys[1], emb_size, hidden),
                         init_lstm_layer(keys[2], hidden, hidden)]
    params["encoder2"] = [init_lstm_layer(keys[3], hidden, hidden),
                          init_lstm_layer(keys[4], hidden, hidden)]
    # GaussianOrthogonalRandomMatrix.get_2d_array(hidden, att_r) -> synthetic normal init
    params["att_proj"] = jax.random.normal(keys[5], (hidden, att_r)).astype(jnp.float32)
    params["se_w"] = (jax.random.normal(keys[6], (2, hidden)) * 0.1).astype(jnp.float32)
    params["se_b"] = jnp.zeros((2, 1), jnp.float32)
    return params


if __name__ == "__main__":
    VOCAB, EMB, HID, ATT_R = 50, 32, 32, 60
    B, TC, TQ = 2, 16, 8

    root = jax.random.PRNGKey(0)
    kp, k1, k2, k3, k4 = jax.random.split(root, 5)

    params = init_params(kp, VOCAB, EMB, HID, ATT_R)
    context_ids = jax.random.randint(k1, (B, TC), 0, VOCAB)
    question_ids = jax.random.randint(k2, (B, TQ), 0, VOCAB)
    start_positions = jax.random.randint(k3, (B,), 0, TC)
    end_positions = jax.random.randint(k4, (B,), 0, TC)

    fwd = jax.jit(model_forward)
    loss, start_logits, end_logits = fwd(params, context_ids, question_ids,
                                         start_positions, end_positions)
    jax.block_until_ready((loss, start_logits, end_logits))

    assert loss.shape == ()
    assert start_logits.shape == (B, TC) and end_logits.shape == (B, TC)
    assert bool(jnp.isfinite(loss))
    assert bool(jnp.all(jnp.isfinite(start_logits))) and bool(jnp.all(jnp.isfinite(end_logits)))
    print("KERNEL_OK")
</pallas_src>

<mosaic_0001>
module attributes {stable_mosaic.version = 11 : i64} {
  func.func @_fused_forward_kernel(%arg0: memref<64x32xf32, #tpu.memory_space<vmem>>, %arg1: memref<32x128xf32, #tpu.memory_space<vmem>>, %arg2: memref<32x128xf32, #tpu.memory_space<vmem>>, %arg3: memref<1x128xf32, #tpu.memory_space<vmem>>, %arg4: memref<32x128xf32, #tpu.memory_space<vmem>>, %arg5: memref<32x128xf32, #tpu.memory_space<vmem>>, %arg6: memref<1x128xf32, #tpu.memory_space<vmem>>, %arg7: memref<32x128xf32, #tpu.memory_space<vmem>>, %arg8: memref<32x128xf32, #tpu.memory_space<vmem>>, %arg9: memref<1x128xf32, #tpu.memory_space<vmem>>, %arg10: memref<32x128xf32, #tpu.memory_space<vmem>>, %arg11: memref<32x128xf32, #tpu.memory_space<vmem>>, %arg12: memref<1x128xf32, #tpu.memory_space<vmem>>, %arg13: memref<32x64xf32, #tpu.memory_space<vmem>>, %arg14: memref<64x64xf32, #tpu.memory_space<vmem>>, %arg15: memref<2x32xf32, #tpu.memory_space<vmem>>, %arg16: memref<2x1xf32, #tpu.memory_space<vmem>>, %arg17: memref<2xi32, #tpu.memory_space<smem>>, %arg18: memref<2xi32, #tpu.memory_space<smem>>, %arg19: memref<1x1xf32, #tpu.memory_space<smem>>, %arg20: memref<2x32xf32, #tpu.memory_space<vmem>>, %arg21: memref<64x32xf32, #tpu.memory_space<vmem>>, %arg22: memref<64x32xf32, #tpu.memory_space<vmem>>, %arg23: memref<32x32xf32, #tpu.memory_space<vmem>>, %arg24: memref<32x32xf32, #tpu.memory_space<vmem>>) attributes {dimension_semantics = [], scalar_prefetch = 0 : i64, scratch_operands = 4 : i64, tpu.core_type = #tpu.core_type<tc>} {
    %c0 = arith.constant 0 : index
    %c0_0 = arith.constant 0 : index
    %0 = vector.load %arg0[%c0, %c0_0] : memref<64x32xf32, #tpu.memory_space<vmem>>, vector<64x32xf32>
    %c0_1 = arith.constant 0 : index
    %c0_2 = arith.constant 0 : index
    %1 = vector.load %arg1[%c0_1, %c0_2] : memref<32x128xf32, #tpu.memory_space<vmem>>, vector<32x128xf32>
    %cst = arith.constant dense<0.000000e+00> : vector<64x128xf32>
    %2 = tpu.matmul %0, %1, %cst {dimension_numbers = #tpu.dot_dimension_numbers<[1], [0], [0], [1], [0, 0, 1, 1], [], []>} : vector<64x32xf32>, vector<32x128xf32>, vector<64x128xf32> -> vector<64x128xf32>
    %c0_3 = arith.constant 0 : index
    %c0_4 = arith.constant 0 : index
    %3 = vector.load %arg3[%c0_3, %c0_4] : memref<1x128xf32, #tpu.memory_space<vmem>>, vector<1x128xf32>
    %4 = vector.broadcast %3 : vector<1x128xf32> to vector<64x128xf32>
    %5 = arith.addf %2, %4 : vector<64x128xf32>
    %c0_5 = arith.constant 0 : index
    %c0_6 = arith.constant 0 : index
    %6 = vector.load %arg2[%c0_5, %c0_6] : memref<32x128xf32, #tpu.memory_space<vmem>>, vector<32x128xf32>
    %cst_7 = arith.constant 0.000000e+00 : f32
    %7 = vector.broadcast %cst_7 : f32 to vector<4x32xf32>
    %cst_8 = arith.constant 0.000000e+00 : f32
    %8 = vector.broadcast %cst_8 : f32 to vector<4x32xf32>
    %9 = vector.extract_strided_slice %5 {offsets = [0, 0], sizes = [4, 128], strides = [1, 1]} : vector<64x128xf32> to vector<4x128xf32>
    %cst_9 = arith.constant dense<0.000000e+00> : vector<4x128xf32>
    %10 = tpu.matmul %7, %6, %cst_9 {dimension_numbers = #tpu.dot_dimension_numbers<[1], [0], [0], [1], [0, 0, 1, 1], [], []>} : vector<4x32xf32>, vector<32x128xf32>, vector<4x128xf32> -> vector<4x128xf32>
    %11 = arith.addf %9, %10 : vector<4x128xf32>
    %12 = arith.negf %11 : vector<4x128xf32>
    %13 = math.exp %12 : vector<4x128xf32>
    %cst_10 = arith.constant 1.000000e+00 : f32
    %14 = vector.broadcast %cst_10 : f32 to vector<4x128xf32>
    %15 = arith.addf %14, %13 : vector<4x128xf32>
    %16 = arith.divf %14, %15 : vector<4x128xf32>
    %17 = vector.extract_strided_slice %16 {offsets = [0, 0], sizes = [4, 32], strides = [1, 1]} : vector<4x128xf32> to vector<4x32xf32>
    %18 = vector.extract_strided_slice %16 {offsets = [0, 32], sizes = [4, 32], strides = [1, 1]} : vector<4x128xf32> to vector<4x32xf32>
    %19 = vector.extract_strided_slice %16 {offsets = [0, 96], sizes = [4, 32], strides = [1, 1]} : vector<4x128xf32> to vector<4x32xf32>
    %20 = vector.extract_strided_slice %11 {offsets = [0, 64], sizes = [4, 32], strides = [1, 1]} : vector<4x128xf32> to vector<4x32xf32>
    %21 = math.tanh %20 : vector<4x32xf32>
    %22 = arith.mulf %18, %8 : vector<4x32xf32>
    %23 = arith.mulf %17, %21 : vector<4x32xf32>
    %24 = arith.addf %22, %23 : vector<4x32xf32>
    %25 = math.tanh %24 : vector<4x32xf32>
    %26 = arith.mulf %19, %25 : vector<4x32xf32>
    %c0_11 = arith.constant 0 : index
    %c0_12 = arith.constant 0 : index
    %27 = vector.load %arg21[%c0_11, %c0_12] : memref<64x32xf32, #tpu.memory_space<vmem>>, vector<4x32xf32>
    tpu.vector_store %arg21[%c0_11, %c0_12], %26 {strides = array<i32>} : memref<64x32xf32, #tpu.memory_space<vmem>>, vector<4x32xf32>,
    %28 = vector.extract_strided_slice %5 {offsets = [4, 0], sizes = [4, 128], strides = [1, 1]} : vector<64x128xf32> to vector<4x128xf32>
    %cst_13 = arith.constant dense<0.000000e+00> : vector<4x128xf32>
    %29 = tpu.matmul %26, %6, %cst_13 {dimension_numbers = #tpu.dot_dimension_numbers<[1], [0], [0], [1], [0, 0, 1, 1], [], []>} : vector<4x32xf32>, vector<32x128xf32>, vector<4x128xf32> -> vector<4x128xf32>
    %30 = arith.addf %28, %29 : vector<4x128xf32>
    %31 = arith.negf %30 : vector<4x128xf32>
    %32 = math.exp %31 : vector<4x128xf32>
    %cst_14 = arith.constant 1.000000e+00 : f32
    %33 = vector.broadcast %cst_14 : f32 to vector<4x128xf32>
    %34 = arith.addf %33, %32 : vector<4x128xf32>
    %35 = arith.divf %33, %34 : vector<4x128xf32>
    %36 = vector.extract_strided_slice %35 {offsets = [0, 0], sizes = [4, 32], strides = [1, 1]} : vector<4x128xf32> to vector<4x32xf32>
    %37 = vector.extract_strided_slice %35 {offsets = [0, 32], sizes = [4, 32], strides = [1, 1]} : vector<4x128xf32> to vector<4x32xf32>
    %38 = vector.extract_strided_slice %35 {offsets = [0, 96], sizes = [4, 32], strides = [1, 1]} : vector<4x128xf32> to vector<4x32xf32>
    %39 = vector.extract_strided_slice %30 {offsets = [0, 64], sizes = [4, 32], strides = [1, 1]} : vector<4x128xf32> to vector<4x32xf32>
    %40 = math.tanh %39 : vector<4x32xf32>
    %41 = arith.mulf %37, %24 : vector<4x32xf32>
    %42 = arith.mulf %36, %40 : vector<4x32xf32>
    %43 = arith.addf %41, %42 : vector<4x32xf32>
    %44 = math.tanh %43 : vector<4x32xf32>
    %45 = arith.mulf %38, %44 : vector<4x32xf32>
    %c4 = arith.constant 4 : index
    %c0_15 = arith.constant 0 : index
    %46 = vector.load %arg21[%c4, %c0_15] : memref<64x32xf32, #tpu.memory_space<vmem>>, vector<4x32xf32>
    tpu.vector_store %arg21[%c4, %c0_15], %45 {strides = array<i32>} : memref<64x32xf32, #tpu.memory_space<vmem>>, vector<4x32xf32>,
    %47 = vector.extract_strided_slice %5 {offsets = [8, 0], sizes = [4, 128], strides = [1, 1]} : vector<64x128xf32> to vector<4x128xf32>
    %cst_16 = arith.constant dense<0.000000e+00> : vector<4x128xf32>
    %48 = tpu.matmul %45, %6, %cst_16 {dimension_numbers = #tpu.dot_dimension_numbers<[1], [0], [0], [1], [0, 0, 1, 1], [], []>} : vector<4x32xf32>, vector<32x128xf32>, vector<4x128xf32> -> vector<4x128xf32>
    %49 = arith.addf %47, %48 : vector<4x128xf32>
    %50 = arith.negf %49 : vector<4x128xf32>
    %51 = math.exp %50 : vector<4x128xf32>
    %cst_17 = arith.constant 1.000000e+00 : f32
    %52 = vector.broadcast %cst_17 : f32 to vector<4x128xf32>
    %53 = arith.addf %52, %51 : vector<4x128xf32>
    %54 = arith.divf %52, %53 : vector<4x128xf32>
    %55 = vector.extract_strided_slice %54 {offsets = [0, 0], sizes = [4, 32], strides = [1, 1]} : vector<4x128xf32> to vector<4x32xf32>
    %56 = vector.extract_strided_slice %54 {offsets = [0, 32], sizes = [4, 32], strides = [1, 1]} : vector<4x128xf32> to vector<4x32xf32>
    %57 = vector.extract_strided_slice %54 {offsets = [0, 96], sizes = [4, 32], strides = [1, 1]} : vector<4x128xf32> to vector<4x32xf32>
    %58 = vector.extract_strided_slice %49 {offsets = [0, 64], sizes = [4, 32], strides = [1, 1]} : vector<4x128xf32> to vector<4x32xf32>
    %59 = math.tanh %58 : vector<4x32xf32>
    %60 = arith.mulf %56, %43 : vector<4x32xf32>
    %61 = arith.mulf %55, %59 : vector<4x32xf32>
    %62 = arith.addf %60, %61 : vector<4x32xf32>
    %63 = math.tanh %62 : vector<4x32xf32>
    %64 = arith.mulf %57, %63 : vector<4x32xf32>
    %c8 = arith.constant 8 : index
    %c0_18 = arith.constant 0 : index
    %65 = vector.load %arg21[%c8, %c0_18] : memref<64x32xf32, #tpu.memory_space<vmem>>, vector<4x32xf32>
    tpu.vector_store %arg21[%c8, %c0_18], %64 {strides = array<i32>} : memref<64x32xf32, #tpu.memory_space<vmem>>, vector<4x32xf32>,
    %66 = vector.extract_strided_slice %5 {offsets = [12, 0], sizes = [4, 128], strides = [1, 1]} : vector<64x128xf32> to vector<4x128xf32>
    %cst_19 = arith.constant dense<0.000000e+00> : vector<4x128xf32>
    %67 = tpu.matmul %64, %6, %cst_19 {dimension_numbers = #tpu.dot_dimension_numbers<[1], [0], [0], [1], [0, 0, 1, 1], [], []>} : vector<4x32xf32>, vector<32x128xf32>, vector<4x128xf32> -> vector<4x128xf32>
    %68 = arith.addf %66, %67 : vector<4x128xf32>
    %69 = arith.negf %68 : vector<4x128xf32>
    %70 = math.exp %69 : vector<4x128xf32>
    %cst_20 = arith.constant 1.000000e+00 : f32
    %71 = vector.broadcast %cst_20 : f32 to vector<4x128xf32>
    %72 = arith.addf %71, %70 : vector<4x128xf32>
    %73 = arith.divf %71, %72 : vector<4x128xf32>
    %74 = vector.extract_strided_slice %73 {offsets = [0, 0], sizes = [4, 32], strides = [1, 1]} : vector<4x128xf32> to vector<4x32xf32>
    %75 = vector.extract_strided_slice %73 {offsets = [0, 32], sizes = [4, 32], strides = [1, 1]} : vector<4x128xf32> to vector<4x32xf32>
    %76 = vector.extract_strided_slice %73 {offsets = [0, 96], sizes = [4, 32], strides = [1, 1]} : vector<4x128xf32> to vector<4x32xf32>
    %77 = vector.extract_strided_slice %68 {offsets = [0, 64], sizes = [4, 32], strides = [1, 1]} : vector<4x128xf32> to vector<4x32xf32>
    %78 = math.tanh %77 : vector<4x32xf32>
    %79 = arith.mulf %75, %62 : vector<4x32xf32>
    %80 = arith.mulf %74, %78 : vector<4x32xf32>
    %81 = arith.addf %79, %80 : vector<4x32xf32>
    %82 = math.tanh %81 : vector<4x32xf32>
    %83 = arith.mulf %76, %82 : vector<4x32xf32>
    %c12 = arith.constant 12 : index
    %c0_21 = arith.constant 0 : index
    %84 = vector.load %arg21[%c12, %c0_21] : memref<64x32xf32, #tpu.memory_space<vmem>>, vector<4x32xf32>
    tpu.vector_store %arg21[%c12, %c0_21], %83 {strides = array<i32>} : memref<64x32xf32, #tpu.memory_space<vmem>>, vector<4x32xf32>,
    %85 = vector.extract_strided_slice %5 {offsets = [16, 0], sizes = [4, 128], strides = [1, 1]} : vector<64x128xf32> to vector<4x128xf32>
    %cst_22 = arith.constant dense<0.000000e+00> : vector<4x128xf32>
    %86 = tpu.matmul %83, %6, %cst_22 {dimension_numbers = #tpu.dot_dimension_numbers<[1], [0], [0], [1], [0, 0, 1, 1], [], []>} : vector<4x32xf32>, vector<32x128xf32>, vector<4x128xf32> -> vector<4x128xf32>
    %87 = arith.addf %85, %86 : vector<4x128xf32>
    %88 = arith.negf %87 : vector<4x128xf32>
    %89 = math.exp %88 : vector<4x128xf32>
    %cst_23 = arith.constant 1.000000e+00 : f32
    %90 = vector.broadcast %cst_23 : f32 to vector<4x128xf32>
    %91 = arith.addf %90, %89 : vector<4x128xf32>
    %92 = arith.divf %90, %91 : vector<4x128xf32>
    %93 = vector.extract_strided_slice %92 {offsets = [0, 0], sizes = [4, 32], strides = [1, 1]} : vector<4x128xf32> to vector<4x32xf32>
    %94 = vector.extract_strided_slice %92 {offsets = [0, 32], sizes = [4, 32], strides = [1, 1]} : vector<4x128xf32> to vector<4x32xf32>
    %95 = vector.extract_strided_slice %92 {offsets = [0, 96], sizes = [4, 32], strides = [1, 1]} : vector<4x128xf32> to vector<4x32xf32>
    %96 = vector.extract_strided_slice %87 {offsets = [0, 64], sizes = [4, 32], strides = [1, 1]} : vector<4x128xf32> to vector<4x32xf32>
    %97 = math.tanh %96 : vector<4x32xf32>
    %98 = arith.mulf %94, %81 : vector<4x32xf32>
    %99 = arith.mulf %93, %97 : vector<4x32xf32>
    %100 = arith.addf %98, %99 : vector<4x32xf32>
    %101 = math.tanh %100 : vector<4x32xf32>
    %102 = arith.mulf %95, %101 : vector<4x32xf32>
    %c16 = arith.constant 16 : index
    %c0_24 = arith.constant 0 : index
    %103 = vector.load %arg21[%c16, %c0_24] : memref<64x32xf32, #tpu.memory_space<vmem>>, vector<4x32xf32>
    tpu.vector_store %arg21[%c16, %c0_24], %102 {strides = array<i32>} : memref<64x32xf32, #tpu.memory_space<vmem>>, vector<4x32xf32>,
    %104 = vector.extract_strided_slice %5 {offsets = [20, 0], sizes = [4, 128], strides = [1, 1]} : vector<64x128xf32> to vector<4x128xf32>
    %cst_25 = arith.constant dense<0.000000e+00> : vector<4x128xf32>
    %105 = tpu.matmul %102, %6, %cst_25 {dimension_numbers = #tpu.dot_dimension_numbers<[1], [0], [0], [1], [0, 0, 1, 1], [], []>} : vector<4x32xf32>, vector<32x128xf32>, vector<4x128xf32> -> vector<4x128xf32>
    %106 = arith.addf %104, %105 : vector<4x128xf32>
    %107 = arith.negf %106 : vector<4x128xf32>
    %108 = math.exp %107 : vector<4x128xf32>
    %cst_26 = arith.constant 1.000000e+00 : f32
    %109 = vector.broadcast %cst_26 : f32 to vector<4x128xf32>
    %110 = arith.addf %109, %108 : vector<4x128xf32>
    %111 = arith.divf %109, %110 : vector<4x128xf32>
    %112 = vector.extract_strided_slice %111 {offsets = [0, 0], sizes = [4, 32], strides = [1, 1]} : vector<4x128xf32> to vector<4x32xf32>
    %113 = vector.extract_strided_slice %111 {offsets = [0, 32], sizes = [4, 32], strides = [1, 1]} : vector<4x128xf32> to vector<4x32xf32>
    %114 = vector.extract_strided_slice %111 {offsets = [0, 96], sizes = [4, 32], strides = [1, 1]} : vector<4x128xf32> to vector<4x32xf32>
    %115 = vector.extract_strided_slice %106 {offsets = [0, 64], sizes = [4, 32], strides = [1, 1]} : vector<4x128xf32> to vector<4x32xf32>
    %116 = math.tanh %115 : vector<4x32xf32>
    %117 = arith.mulf %113, %100 : vector<4x32xf32>
    %118 = arith.mulf %112, %116 : vector<4x32xf32>
    %119 = arith.addf %117, %118 : vector<4x32xf32>
    %120 = math.tanh %119 : vector<4x32xf32>
    %121 = arith.mulf %114, %120 : vector<4x32xf32>
    %c20 = arith.constant 20 : index
    %c0_27 = arith.constant 0 : index
    %122 = vector.load %arg21[%c20, %c0_27] : memref<64x32xf32, #tpu.memory_space<vmem>>, vector<4x32xf32>
    tpu.vector_store %arg21[%c20, %c0_27], %121 {strides = array<i32>} : memref<64x32xf32, #tpu.memory_space<vmem>>, vector<4x32xf32>,
    %123 = vector.extract_strided_slice %5 {offsets = [24, 0], sizes = [4, 128], strides = [1, 1]} : vector<64x128xf32> to vector<4x128xf32>
    %cst_28 = arith.constant dense<0.000000e+00> : vector<4x128xf32>
    %124 = tpu.matmul %121, %6, %cst_28 {dimension_numbers = #tpu.dot_dimension_numbers<[1], [0], [0], [1], [0, 0, 1, 1], [], []>} : vector<4x32xf32>, vector<32x128xf32>, vector<4x128xf32> -> vector<4x128xf32>
    %125 = arith.addf %123, %124 : vector<4x128xf32>
    %126 = arith.negf %125 : vector<4x128xf32>
    %127 = math.exp %126 : vector<4x128xf32>
    %cst_29 = arith.constant 1.000000e+00 : f32
    %128 = vector.broadcast %cst_29 : f32 to vector<4x128xf32>
    %129 = arith.addf %128, %127 : vector<4x128xf32>
    %130 = arith.divf %128, %129 : vector<4x128xf32>
    %131 = vector.extract_strided_slice %130 {offsets = [0, 0], sizes = [4, 32], strides = [1, 1]} : vector<4x128xf32> to vector<4x32xf32>
    %132 = vector.extract_strided_slice %130 {offsets = [0, 32], sizes = [4, 32], strides = [1, 1]} : vector<4x128xf32> to vector<4x32xf32>
    %133 = vector.extract_strided_slice %130 {offsets = [0, 96], sizes = [4, 32], strides = [1, 1]} : vector<4x128xf32> to vector<4x32xf32>
    %134 = vector.extract_strided_slice %125 {offsets = [0, 64], sizes = [4, 32], strides = [1, 1]} : vector<4x128xf32> to vector<4x32xf32>
    %135 = math.tanh %134 : vector<4x32xf32>
    %136 = arith.mulf %132, %119 : vector<4x32xf32>
    %137 = arith.mulf %131, %135 : vector<4x32xf32>
    %138 = arith.addf %136, %137 : vector<4x32xf32>
    %139 = math.tanh %138 : vector<4x32xf32>
    %140 = arith.mulf %133, %139 : vector<4x32xf32>
    %c24 = arith.constant 24 : index
    %c0_30 = arith.constant 0 : index
    %141 = vector.load %arg21[%c24, %c0_30] : memref<64x32xf32, #tpu.memory_space<vmem>>, vector<4x32xf32>
    tpu.vector_store %arg21[%c24, %c0_30], %140 {strides = array<i32>} : memref<64x32xf32, #tpu.memory_space<vmem>>, vector<4x32xf32>,
    %142 = vector.extract_strided_slice %5 {offsets = [28, 0], sizes = [4, 128], strides = [1, 1]} : vector<64x128xf32> to vector<4x128xf32>
    %cst_31 = arith.constant dense<0.000000e+00> : vector<4x128xf32>
    %143 = tpu.matmul %140, %6, %cst_31 {dimension_numbers = #tpu.dot_dimension_numbers<[1], [0], [0], [1], [0, 0, 1, 1], [], []>} : vector<4x32xf32>, vector<32x128xf32>, vector<4x128xf32> -> vector<4x128xf32>
    %144 = arith.addf %142, %143 : vector<4x128xf32>
    %145 = arith.negf %144 : vector<4x128xf32>
    %146 = math.exp %145 : vector<4x128xf32>
    %cst_32 = arith.constant 1.000000e+00 : f32
    %147 = vector.broadcast %cst_32 : f32 to vector<4x128xf32>
    %148 = arith.addf %147, %146 : vector<4x128xf32>
    %149 = arith.divf %147, %148 : vector<4x128xf32>
    %150 = vector.extract_strided_slice %149 {offsets = [0, 0], sizes = [4, 32], strides = [1, 1]} : vector<4x128xf32> to vector<4x32xf32>
    %151 = vector.extract_strided_slice %149 {offsets = [0, 32], sizes = [4, 32], strides = [1, 1]} : vector<4x128xf32> to vector<4x32xf32>
    %152 = vector.extract_strided_slice %149 {offsets = [0, 96], sizes = [4, 32], strides = [1, 1]} : vector<4x128xf32> to vector<4x32xf32>
    %153 = vector.extract_strided_slice %144 {offsets = [0, 64], sizes = [4, 32], strides = [1, 1]} : vector<4x128xf32> to vector<4x32xf32>
    %154 = math.tanh %153 : vector<4x32xf32>
    %155 = arith.mulf %151, %138 : vector<4x32xf32>
    %156 = arith.mulf %150, %154 : vector<4x32xf32>
    %157 = arith.addf %155, %156 : vector<4x32xf32>
    %158 = math.tanh %157 : vector<4x32xf32>
    %159 = arith.mulf %152, %158 : vector<4x32xf32>
    %c28 = arith.constant 28 : index
    %c0_33 = arith.constant 0 : index
    %160 = vector.load %arg21[%c28, %c0_33] : memref<64x32xf32, #tpu.memory_space<vmem>>, vector<4x32xf32>
    tpu.vector_store %arg21[%c28, %c0_33], %159 {strides = array<i32>} : memref<64x32xf32, #tpu.memory_space<vmem>>, vector<4x32xf32>,
    %161 = vector.extract_strided_slice %5 {offsets = [32, 0], sizes = [4, 128], strides = [1, 1]} : vector<64x128xf32> to vector<4x128xf32>
    %cst_34 = arith.constant dense<0.000000e+00> : vector<4x128xf32>
    %162 = tpu.matmul %159, %6, %cst_34 {dimension_numbers = #tpu.dot_dimension_numbers<[1], [0], [0], [1], [0, 0, 1, 1], [], []>} : vector<4x32xf32>, vector<32x128xf32>, vector<4x128xf32> -> vector<4x128xf32>
    %163 = arith.addf %161, %162 : vector<4x128xf32>
    %164 = arith.negf %163 : vector<4x128xf32>
    %165 = math.exp %164 : vector<4x128xf32>
    %cst_35 = arith.constant 1.000000e+00 : f32
    %166 = vector.broadcast %cst_35 : f32 to vector<4x128xf32>
    %167 = arith.addf %166, %165 : vector<4x128xf32>
    %168 = arith.divf %166, %167 : vector<4x128xf32>
    %169 = vector.extract_strided_slice %168 {offsets = [0, 0], sizes = [4, 32], strides = [1, 1]} : vector<4x128xf32> to vector<4x32xf32>
    %170 = vector.extract_strided_slice %168 {offsets = [0, 32], sizes = [4, 32], strides = [1, 1]} : vector<4x128xf32> to vector<4x32xf32>
    %171 = vector.extract_strided_slice %168 {offsets = [0, 96], sizes = [4, 32], strides = [1, 1]} : vector<4x128xf32> to vector<4x32xf32>
    %172 = vector.extract_strided_slice %163 {offsets = [0, 64], sizes = [4, 32], strides = [1, 1]} : vector<4x128xf32> to vector<4x32xf32>
    %173 = math.tanh %172 : vector<4x32xf32>
    %174 = arith.mulf %170, %157 : vector<4x32xf32>
    %175 = arith.mulf %169, %173 : vector<4x32xf32>
    %176 = arith.addf %174, %175 : vector<4x32xf32>
    %177 = math.tanh %176 : vector<4x32xf32>
    %178 = arith.mulf %171, %177 : vector<4x32xf32>
    %c32 = arith.constant 32 : index
    %c0_36 = arith.constant 0 : index
    %179 = vector.load %arg21[%c32, %c0_36] : memref<64x32xf32, #tpu.memory_space<vmem>>, vector<4x32xf32>
    tpu.vector_store %arg21[%c32, %c0_36], %178 {strides = array<i32>} : memref<64x32xf32, #tpu.memory_space<vmem>>, vector<4x32xf32>,
    %180 = vector.extract_strided_slice %5 {offsets = [36, 0], sizes = [4, 128], strides = [1, 1]} : vector<64x128xf32> to vector<4x128xf32>
    %cst_37 = arith.constant dense<0.000000e+00> : vector<4x128xf32>
    %181 = tpu.matmul %178, %6, %cst_37 {dimension_numbers = #tpu.dot_dimension_numbers<[1], [0], [0], [1], [0, 0, 1, 1], [], []>} : vector<4x32xf32>, vector<32x128xf32>, vector<4x128xf32> -> vector<4x128xf32>
    %182 = arith.addf %180, %181 : vector<4x128xf32>
    %183 = arith.negf %182 : vector<4x128xf32>
    %184 = math.exp %183 : vector<4x128xf32>
    %cst_38 = arith.constant 1.000000e+00 : f32
    %185 = vector.broadcast %cst_38 : f32 to vector<4x128xf32>
    %186 = arith.addf %185, %184 : vector<4x128xf32>
    %187 = arith.divf %185, %186 : vector<4x128xf32>
    %188 = vector.extract_strided_slice %187 {offsets = [0, 0], sizes = [4, 32], strides = [1, 1]} : vector<4x128xf32> to vector<4x32xf32>
    %189 = vector.extract_strided_slice %187 {offsets = [0, 32], sizes = [4, 32], strides = [1, 1]} : vector<4x128xf32> to vector<4x32xf32>
    %190 = vector.extract_strided_slice %187 {offsets = [0, 96], sizes = [4, 32], strides = [1, 1]} : vector<4x128xf32> to vector<4x32xf32>
    %191 = vector.extract_strided_slice %182 {offsets = [0, 64], sizes = [4, 32], strides = [1, 1]} : vector<4x128xf32> to vector<4x32xf32>
    %192 = math.tanh %191 : vector<4x32xf32>
    %193 = arith.mulf %189, %176 : vector<4x32xf32>
    %194 = arith.mulf %188, %192 : vector<4x32xf32>
    %195 = arith.addf %193, %194 : vector<4x32xf32>
    %196 = math.tanh %195 : vector<4x32xf32>
    %197 = arith.mulf %190, %196 : vector<4x32xf32>
    %c36 = arith.constant 36 : index
    %c0_39 = arith.constant 0 : index
    %198 = vector.load %arg21[%c36, %c0_39] : memref<64x32xf32, #tpu.memory_space<vmem>>, vector<4x32xf32>
    tpu.vector_store %arg21[%c36, %c0_39], %197 {strides = array<i32>} : memref<64x32xf32, #tpu.memory_space<vmem>>, vector<4x32xf32>,
    %199 = vector.extract_strided_slice %5 {offsets = [40, 0], sizes = [4, 128], strides = [1, 1]} : vector<64x128xf32> to vector<4x128xf32>
    %cst_40 = arith.constant dense<0.000000e+00> : vector<4x128xf32>
    %200 = tpu.matmul %197, %6, %cst_40 {dimension_numbers = #tpu.dot_dimension_numbers<[1], [0], [0], [1], [0, 0, 1, 1], [], []>} : vector<4x32xf32>, vector<32x128xf32>, vector<4x128xf32> -> vector<4x128xf32>
    %201 = arith.addf %199, %200 : vector<4x128xf32>
    %202 = arith.negf %201 : vector<4x128xf32>
    %203 = math.exp %202 : vector<4x128xf32>
    %cst_41 = arith.constant 1.000000e+00 : f32
    %204 = vector.broadcast %cst_41 : f32 to vector<4x128xf32>
    %205 = arith.addf %204, %203 : vector<4x128xf32>
    %206 = arith.divf %204, %205 : vector<4x128xf32>
    %207 = vector.extract_strided_slice %206 {offsets = [0, 0], sizes = [4, 32], strides = [1, 1]} : vector<4x128xf32> to vector<4x32xf32>
    %208 = vector.extract_strided_slice %206 {offsets = [0, 32], sizes = [4, 32], strides = [1, 1]} : vector<4x128xf32> to vector<4x32xf32>
    %209 = vector.extract_strided_slice %206 {offsets = [0, 96], sizes = [4, 32], strides = [1, 1]} : vector<4x128xf32> to vector<4x32xf32>
    %210 = vector.extract_strided_slice %201 {offsets = [0, 64], sizes = [4, 32], strides = [1, 1]} : vector<4x128xf32> to vector<4x32xf32>
    %211 = math.tanh %210 : vector<4x32xf32>
    %212 = arith.mulf %208, %195 : vector<4x32xf32>
    %213 = arith.mulf %207, %211 : vector<4x32xf32>
    %214 = arith.addf %212, %213 : vector<4x32xf32>
    %215 = math.tanh %214 : vector<4x32xf32>
    %216 = arith.mulf %209, %215 : vector<4x32xf32>
    %c40 = arith.constant 40 : index
    %c0_42 = arith.constant 0 : index
    %217 = vector.load %arg21[%c40, %c0_42] : memref<64x32xf32, #tpu.memory_space<vmem>>, vector<4x32xf32>
    tpu.vector_store %arg21[%c40, %c0_42], %216 {strides = array<i32>} : memref<64x32xf32, #tpu.memory_space<vmem>>, vector<4x32xf32>,
    %218 = vector.extract_strided_slice %5 {offsets = [44, 0], sizes = [4, 128], strides = [1, 1]} : vector<64x128xf32> to vector<4x128xf32>
    %cst_43 = arith.constant dense<0.000000e+00> : vector<4x128xf32>
    %219 = tpu.matmul %216, %6, %cst_43 {dimension_numbers = #tpu.dot_dimension_numbers<[1], [0], [0], [1], [0, 0, 1, 1], [], []>} : vector<4x32xf32>, vector<32x128xf32>, vector<4x128xf32> -> vector<4x128xf32>
    %220 = arith.addf %218, %219 : vector<4x128xf32>
    %221 = arith.negf %220 : vector<4x128xf32>
    %222 = math.exp %221 : vector<4x128xf32>
    %cst_44 = arith.constant 1.000000e+00 : f32
    %223 = vector.broadcast %cst_44 : f32 to vector<4x128xf32>
    %224 = arith.addf %223, %222 : vector<4x128xf32>
    %225 = arith.divf %223, %224 : vector<4x128xf32>
    %226 = vector.extract_strided_slice %225 {offsets = [0, 0], sizes = [4, 32], strides = [1, 1]} : vector<4x128xf32> to vector<4x32xf32>
    %227 = vector.extract_strided_slice %225 {offsets = [0, 32], sizes = [4, 32], strides = [1, 1]} : vector<4x128xf32> to vector<4x32xf32>
    %228 = vector.extract_strided_slice %225 {offsets = [0, 96], sizes = [4, 32], strides = [1, 1]} : vector<4x128xf32> to vector<4x32xf32>
    %229 = vector.extract_strided_slice %220 {offsets = [0, 64], sizes = [4, 32], strides = [1, 1]} : vector<4x128xf32> to vector<4x32xf32>
    %230 = math.tanh %229 : vector<4x32xf32>
    %231 = arith.mulf %227, %214 : vector<4x32xf32>
    %232 = arith.mulf %226, %230 : vector<4x32xf32>
    %233 = arith.addf %231, %232 : vector<4x32xf32>
    %234 = math.tanh %233 : vector<4x32xf32>
    %235 = arith.mulf %228, %234 : vector<4x32xf32>
    %c44 = arith.constant 44 : index
    %c0_45 = arith.constant 0 : index
    %236 = vector.load %arg21[%c44, %c0_45] : memref<64x32xf32, #tpu.memory_space<vmem>>, vector<4x32xf32>
    tpu.vector_store %arg21[%c44, %c0_45], %235 {strides = array<i32>} : memref<64x32xf32, #tpu.memory_space<vmem>>, vector<4x32xf32>,
    %237 = vector.extract_strided_slice %5 {offsets = [48, 0], sizes = [4, 128], strides = [1, 1]} : vector<64x128xf32> to vector<4x128xf32>
    %cst_46 = arith.constant dense<0.000000e+00> : vector<4x128xf32>
    %238 = tpu.matmul %235, %6, %cst_46 {dimension_numbers = #tpu.dot_dimension_numbers<[1], [0], [0], [1], [0, 0, 1, 1], [], []>} : vector<4x32xf32>, vector<32x128xf32>, vector<4x128xf32> -> vector<4x128xf32>
    %239 = arith.addf %237, %238 : vector<4x128xf32>
    %240 = arith.negf %239 : vector<4x128xf32>
    %241 = math.exp %240 : vector<4x128xf32>
    %cst_47 = arith.constant 1.000000e+00 : f32
    %242 = vector.broadcast %cst_47 : f32 to vector<4x128xf32>
    %243 = arith.addf %242, %241 : vector<4x128xf32>
    %244 = arith.divf %242, %243 : vector<4x128xf32>
    %245 = vector.extract_strided_slice %244 {offsets = [0, 0], sizes = [4, 32], strides = [1, 1]} : vector<4x128xf32> to vector<4x32xf32>
    %246 = vector.extract_strided_slice %244 {offsets = [0, 32], sizes = [4, 32], strides = [1, 1]} : vector<4x128xf32> to vector<4x32xf32>
    %247 = vector.extract_strided_slice %244 {offsets = [0, 96], sizes = [4, 32], strides = [1, 1]} : vector<4x128xf32> to vector<4x32xf32>
    %248 = vector.extract_strided_slice %239 {offsets = [0, 64], sizes = [4, 32], strides = [1, 1]} : vector<4x128xf32> to vector<4x32xf32>
    %249 = math.tanh %248 : vector<4x32xf32>
    %250 = arith.mulf %246, %233 : vector<4x32xf32>
    %251 = arith.mulf %245, %249 : vector<4x32xf32>
    %252 = arith.addf %250, %251 : vector<4x32xf32>
    %253 = math.tanh %252 : vector<4x32xf32>
    %254 = arith.mulf %247, %253 : vector<4x32xf32>
    %c48 = arith.constant 48 : index
    %c0_48 = arith.constant 0 : index
    %255 = vector.load %arg21[%c48, %c0_48] : memref<64x32xf32, #tpu.memory_space<vmem>>, vector<4x32xf32>
    tpu.vector_store %arg21[%c48, %c0_48], %254 {strides = array<i32>} : memref<64x32xf32, #tpu.memory_space<vmem>>, vector<4x32xf32>,
    %256 = vector.extract_strided_slice %5 {offsets = [52, 0], sizes = [4, 128], strides = [1, 1]} : vector<64x128xf32> to vector<4x128xf32>
    %cst_49 = arith.constant dense<0.000000e+00> : vector<4x128xf32>
    %257 = tpu.matmul %254, %6, %cst_49 {dimension_numbers = #tpu.dot_dimension_numbers<[1], [0], [0], [1], [0, 0, 1, 1], [], []>} : vector<4x32xf32>, vector<32x128xf32>, vector<4x128xf32> -> vector<4x128xf32>
    %258 = arith.addf %256, %257 : vector<4x128xf32>
    %259 = arith.negf %258 : vector<4x128xf32>
    %260 = math.exp %259 : vector<4x128xf32>
    %cst_50 = arith.constant 1.000000e+00 : f32
    %261 = vector.broadcast %cst_50 : f32 to vector<4x128xf32>
    %262 = arith.addf %261, %260 : vector<4x128xf32>
    %263 = arith.divf %261, %262 : vector<4x128xf32>
    %264 = vector.extract_strided_slice %263 {offsets = [0, 0], sizes = [4, 32], strides = [1, 1]} : vector<4x128xf32> to vector<4x32xf32>
    %265 = vector.extract_strided_slice %263 {offsets = [0, 32], sizes = [4, 32], strides = [1, 1]} : vector<4x128xf32> to vector<4x32xf32>
    %266 = vector.extract_strided_slice %263 {offsets = [0, 96], sizes = [4, 32], strides = [1, 1]} : vector<4x128xf32> to vector<4x32xf32>
    %267 = vector.extract_strided_slice %258 {offsets = [0, 64], sizes = [4, 32], strides = [1, 1]} : vector<4x128xf32> to vector<4x32xf32>
    %268 = math.tanh %267 : vector<4x32xf32>
    %269 = arith.mulf %265, %252 : vector<4x32xf32>
    %270 = arith.mulf %264, %268 : vector<4x32xf32>
    %271 = arith.addf %269, %270 : vector<4x32xf32>
    %272 = math.tanh %271 : vector<4x32xf32>
    %273 = arith.mulf %266, %272 : vector<4x32xf32>
    %c52 = arith.constant 52 : index
    %c0_51 = arith.constant 0 : index
    %274 = vector.load %arg21[%c52, %c0_51] : memref<64x32xf32, #tpu.memory_space<vmem>>, vector<4x32xf32>
    tpu.vector_store %arg21[%c52, %c0_51], %273 {strides = array<i32>} : memref<64x32xf32, #tpu.memory_space<vmem>>, vector<4x32xf32>,
    %275 = vector.extract_strided_slice %5 {offsets = [56, 0], sizes = [4, 128], strides = [1, 1]} : vector<64x128xf32> to vector<4x128xf32>
    %cst_52 = arith.constant dense<0.000000e+00> : vector<4x128xf32>
    %276 = tpu.matmul %273, %6, %cst_52 {dimension_numbers = #tpu.dot_dimension_numbers<[1], [0], [0], [1], [0, 0, 1, 1], [], []>} : vector<4x32xf32>, vector<32x128xf32>, vector<4x128xf32> -> vector<4x128xf32>
    %277 = arith.addf %275, %276 : vector<4x128xf32>
    %278 = arith.negf %277 : vector<4x128xf32>
    %279 = math.exp %278 : vector<4x128xf32>
    %cst_53 = arith.constant 1.000000e+00 : f32
    %280 = vector.broadcast %cst_53 : f32 to vector<4x128xf32>
    %281 = arith.addf %280, %279 : vector<4x128xf32>
    %282 = arith.divf %280, %281 : vector<4x128xf32>
    %283 = vector.extract_strided_slice %282 {offsets = [0, 0], sizes = [4, 32], strides = [1, 1]} : vector<4x128xf32> to vector<4x32xf32>
    %284 = vector.extract_strided_slice %282 {offsets = [0, 32], sizes = [4, 32], strides = [1, 1]} : vector<4x128xf32> to vector<4x32xf32>
    %285 = vector.extract_strided_slice %282 {offsets = [0, 96], sizes = [4, 32], strides = [1, 1]} : vector<4x128xf32> to vector<4x32xf32>
    %286 = vector.extract_strided_slice %277 {offsets = [0, 64], sizes = [4, 32], strides = [1, 1]} : vector<4x128xf32> to vector<4x32xf32>
    %287 = math.tanh %286 : vector<4x32xf32>
    %288 = arith.mulf %284, %271 : vector<4x32xf32>
    %289 = arith.mulf %283, %287 : vector<4x32xf32>
    %290 = arith.addf %288, %289 : vector<4x32xf32>
    %291 = math.tanh %290 : vector<4x32xf32>
    %292 = arith.mulf %285, %291 : vector<4x32xf32>
    %c56 = arith.constant 56 : index
    %c0_54 = arith.constant 0 : index
    %293 = vector.load %arg21[%c56, %c0_54] : memref<64x32xf32, #tpu.memory_space<vmem>>, vector<4x32xf32>
    tpu.vector_store %arg21[%c56, %c0_54], %292 {strides = array<i32>} : memref<64x32xf32, #tpu.memory_space<vmem>>, vector<4x32xf32>,
    %294 = vector.extract_strided_slice %5 {offsets = [60, 0], sizes = [4, 128], strides = [1, 1]} : vector<64x128xf32> to vector<4x128xf32>
    %cst_55 = arith.constant dense<0.000000e+00> : vector<4x128xf32>
    %295 = tpu.matmul %292, %6, %cst_55 {dimension_numbers = #tpu.dot_dimension_numbers<[1], [0], [0], [1], [0, 0, 1, 1], [], []>} : vector<4x32xf32>, vector<32x128xf32>, vector<4x128xf32> -> vector<4x128xf32>
    %296 = arith.addf %294, %295 : vector<4x128xf32>
    %297 = arith.negf %296 : vector<4x128xf32>
    %298 = math.exp %297 : vector<4x128xf32>
    %cst_56 = arith.constant 1.000000e+00 : f32
    %299 = vector.broadcast %cst_56 : f32 to vector<4x128xf32>
    %300 = arith.addf %299, %298 : vector<4x128xf32>
    %301 = arith.divf %299, %300 : vector<4x128xf32>
    %302 = vector.extract_strided_slice %301 {offsets = [0, 0], sizes = [4, 32], strides = [1, 1]} : vector<4x128xf32> to vector<4x32xf32>
    %303 = vector.extract_strided_slice %301 {offsets = [0, 32], sizes = [4, 32], strides = [1, 1]} : vector<4x128xf32> to vector<4x32xf32>
    %304 = vector.extract_strided_slice %301 {offsets = [0, 96], sizes = [4, 32], strides = [1, 1]} : vector<4x128xf32> to vector<4x32xf32>
    %305 = vector.extract_strided_slice %296 {offsets = [0, 64], sizes = [4, 32], strides = [1, 1]} : vector<4x128xf32> to vector<4x32xf32>
    %306 = math.tanh %305 : vector<4x32xf32>
    %307 = arith.mulf %303, %290 : vector<4x32xf32>
    %308 = arith.mulf %302, %306 : vector<4x32xf32>
    %309 = arith.addf %307, %308 : vector<4x32xf32>
    %310 = math.tanh %309 : vector<4x32xf32>
    %311 = arith.mulf %304, %310 : vector<4x32xf32>
    %c60 = arith.constant 60 : index
    %c0_57 = arith.constant 0 : index
    %312 = vector.load %arg21[%c60, %c0_57] : memref<64x32xf32, #tpu.memory_space<vmem>>, vector<4x32xf32>
    tpu.vector_store %arg21[%c60, %c0_57], %311 {strides = array<i32>} : memref<64x32xf32, #tpu.memory_space<vmem>>, vector<4x32xf32>,
    %c0_58 = arith.constant 0 : index
    %c0_59 = arith.constant 0 : index
    %313 = vector.load %arg21[%c0_58, %c0_59] : memref<64x32xf32, #tpu.memory_space<vmem>>, vector<64x32xf32>
    %c0_60 = arith.constant 0 : index
    %c0_61 = arith.constant 0 : index
    %314 = vector.load %arg4[%c0_60, %c0_61] : memref<32x128xf32, #tpu.memory_space<vmem>>, vector<32x128xf32>
    %cst_62 = arith.constant dense<0.000000e+00> : vector<64x128xf32>
    %315 = tpu.matmul %313, %314, %cst_62 {dimension_numbers = #tpu.dot_dimension_numbers<[1], [0], [0], [1], [0, 0, 1, 1], [], []>} : vector<64x32xf32>, vector<32x128xf32>, vector<64x128xf32> -> vector<64x128xf32>
    %c0_63 = arith.constant 0 : index
    %c0_64 = arith.constant 0 : index
    %316 = vector.load %arg6[%c0_63, %c0_64] : memref<1x128xf32, #tpu.memory_space<vmem>>, vector<1x128xf32>
    %317 = vector.broadcast %316 : vector<1x128xf32> to vector<64x128xf32>
    %318 = arith.addf %315, %317 : vector<64x128xf32>
    %c0_65 = arith.constant 0 : index
    %c0_66 = arith.constant 0 : index
    %319 = vector.load %arg5[%c0_65, %c0_66] : memref<32x128xf32, #tpu.memory_space<vmem>>, vector<32x128xf32>
    %cst_67 = arith.constant 0.000000e+00 : f32
    %320 = vector.broadcast %cst_67 : f32 to vector<4x32xf32>
    %cst_68 = arith.constant 0.000000e+00 : f32
    %321 = vector.broadcast %cst_68 : f32 to vector<4x32xf32>
    %322 = vector.extract_strided_slice %318 {offsets = [0, 0], sizes = [4, 128], strides = [1, 1]} : vector<64x128xf32> to vector<4x128xf32>
    %cst_69 = arith.constant dense<0.000000e+00> : vector<4x128xf32>
    %323 = tpu.matmul %320, %319, %cst_69 {dimension_numbers = #tpu.dot_dimension_numbers<[1], [0], [0], [1], [0, 0, 1, 1], [], []>} : vector<4x32xf32>, vector<32x128xf32>, vector<4x128xf32> -> vector<4x128xf32>
    %324 = arith.addf %322, %323 : vector<4x128xf32>
    %325 = arith.negf %324 : vector<4x128xf32>
    %326 = math.exp %325 : vector<4x128xf32>
    %cst_70 = arith.constant 1.000000e+00 : f32
    %327 = vector.broadcast %cst_70 : f32 to vector<4x128xf32>
    %328 = arith.addf %327, %326 : vector<4x128xf32>
    %329 = arith.divf %327, %328 : vector<4x128xf32>
    %330 = vector.extract_strided_slice %329 {offsets = [0, 0], sizes = [4, 32], strides = [1, 1]} : vector<4x128xf32> to vector<4x32xf32>
    %331 = vector.extract_strided_slice %329 {offsets = [0, 32], sizes = [4, 32], strides = [1, 1]} : vector<4x128xf32> to vector<4x32xf32>
    %332 = vector.extract_strided_slice %329 {offsets = [0, 96], sizes = [4, 32], strides = [1, 1]} : vector<4x128xf32> to vector<4x32xf32>
    %333 = vector.extract_strided_slice %324 {offsets = [0, 64], sizes = [4, 32], strides = [1, 1]} : vector<4x128xf32> to vector<4x32xf32>
    %334 = math.tanh %333 : vector<4x32xf32>
    %335 = arith.mulf %331, %321 : vector<4x32xf32>
    %336 = arith.mulf %330, %334 : vector<4x32xf32>
    %337 = arith.addf %335, %336 : vector<4x32xf32>
    %338 = math.tanh %337 : vector<4x32xf32>
    %339 = arith.mulf %332, %338 : vector<4x32xf32>
    %c0_71 = arith.constant 0 : index
    %c0_72 = arith.constant 0 : index
    %340 = vector.load %arg22[%c0_71, %c0_72] : memref<64x32xf32, #tpu.memory_space<vmem>>, vector<4x32xf32>
    tpu.vector_store %arg22[%c0_71, %c0_72], %339 {strides = array<i32>} : memref<64x32xf32, #tpu.memory_space<vmem>>, vector<4x32xf32>,
    %341 = vector.extract_strided_slice %318 {offsets = [4, 0], sizes = [4, 128], strides = [1, 1]} : vector<64x128xf32> to vector<4x128xf32>
    %cst_73 = arith.constant dense<0.000000e+00> : vector<4x128xf32>
    %342 = tpu.matmul %339, %319, %cst_73 {dimension_numbers = #tpu.dot_dimension_numbers<[1], [0], [0], [1], [0, 0, 1, 1], [], []>} : vector<4x32xf32>, vector<32x128xf32>, vector<4x128xf32> -> vector<4x128xf32>
    %343 = arith.addf %341, %342 : vector<4x128xf32>
    %344 = arith.negf %343 : vector<4x128xf32>
    %345 = math.exp %344 : vector<4x128xf32>
    %cst_74 = arith.constant 1.000000e+00 : f32
    %346 = vector.broadcast %cst_74 : f32 to vector<4x128xf32>
    %347 = arith.addf %346, %345 : vector<4x128xf32>
    %348 = arith.divf %346, %347 : vector<4x128xf32>
    %349 = vector.extract_strided_slice %348 {offsets = [0, 0], sizes = [4, 32], strides = [1, 1]} : vector<4x128xf32> to vector<4x32xf32>
    %350 = vector.extract_strided_slice %348 {offsets = [0, 32], sizes = [4, 32], strides = [1, 1]} : vector<4x128xf32> to vector<4x32xf32>
    %351 = vector.extract_strided_slice %348 {offsets = [0, 96], sizes = [4, 32], strides = [1, 1]} : vector<4x128xf32> to vector<4x32xf32>
    %352 = vector.extract_strided_slice %343 {offsets = [0, 64], sizes = [4, 32], strides = [1, 1]} : vector<4x128xf32> to vector<4x32xf32>
    %353 = math.tanh %352 : vector<4x32xf32>
    %354 = arith.mulf %350, %337 : vector<4x32xf32>
    %355 = arith.mulf %349, %353 : vector<4x32xf32>
    %356 = arith.addf %354, %355 : vector<4x32xf32>
    %357 = math.tanh %356 : vector<4x32xf32>
    %358 = arith.mulf %351, %357 : vector<4x32xf32>
    %c4_75 = arith.constant 4 : index
    %c0_76 = arith.constant 0 : index
    %359 = vector.load %arg22[%c4_75, %c0_76] : memref<64x32xf32, #tpu.memory_space<vmem>>, vector<4x32xf32>
    tpu.vector_store %arg22[%c4_75, %c0_76], %358 {strides = array<i32>} : memref<64x32xf32, #tpu.memory_space<vmem>>, vector<4x32xf32>,
    %360 = vector.extract_strided_slice %318 {offsets = [8, 0], sizes = [4, 128], strides = [1, 1]} : vector<64x128xf32> to vector<4x128xf32>
    %cst_77 = arith.constant dense<0.000000e+00> : vector<4x128xf32>
    %361 = tpu.matmul %358, %319, %cst_77 {dimension_numbers = #tpu.dot_dimension_numbers<[1], [0], [0], [1], [0, 0, 1, 1], [], []>} : vector<4x32xf32>, vector<32x128xf32>, vector<4x128xf32> -> vector<4x128xf32>
    %362 = arith.addf %360, %361 : vector<4x128xf32>
    %363 = arith.negf %362 : vector<4x128xf32>
    %364 = math.exp %363 : vector<4x128xf32>
    %cst_78 = arith.constant 1.000000e+00 : f32
    %365 = vector.broadcast %cst_78 : f32 to vector<4x128xf32>
    %366 = arith.addf %365, %364 : vector<4x128xf32>
    %367 = arith.divf %365, %366 : vector<4x128xf32>
    %368 = vector.extract_strided_slice %367 {offsets = [0, 0], sizes = [4, 32], strides = [1, 1]} : vector<4x128xf32> to vector<4x32xf32>
    %369 = vector.extract_strided_slice %367 {offsets = [0, 32], sizes = [4, 32], strides = [1, 1]} : vector<4x128xf32> to vector<4x32xf32>
    %370 = vector.extract_strided_slice %367 {offsets = [0, 96], sizes = [4, 32], strides = [1, 1]} : vector<4x128xf32> to vector<4x32xf32>
    %371 = vector.extract_strided_slice %362 {offsets = [0, 64], sizes = [4, 32], strides = [1, 1]} : vector<4x128xf32> to vector<4x32xf32>
    %372 = math.tanh %371 : vector<4x32xf32>
    %373 = arith.mulf %369, %356 : vector<4x32xf32>
    %374 = arith.mulf %368, %372 : vector<4x32xf32>
    %375 = arith.addf %373, %374 : vector<4x32xf32>
    %376 = math.tanh %375 : vector<4x32xf32>
    %377 = arith.mulf %370, %376 : vector<4x32xf32>
    %c8_79 = arith.constant 8 : index
    %c0_80 = arith.constant 0 : index
    %378 = vector.load %arg22[%c8_79, %c0_80] : memref<64x32xf32, #tpu.memory_space<vmem>>, vector<4x32xf32>
    tpu.vector_store %arg22[%c8_79, %c0_80], %377 {strides = array<i32>} : memref<64x32xf32, #tpu.memory_space<vmem>>, vector<4x32xf32>,
    %379 = vector.extract_strided_slice %318 {offsets = [12, 0], sizes = [4, 128], strides = [1, 1]} : vector<64x128xf32> to vector<4x128xf32>
    %cst_81 = arith.constant dense<0.000000e+00> : vector<4x128xf32>
    %380 = tpu.matmul %377, %319, %cst_81 {dimension_numbers = #tpu.dot_dimension_numbers<[1], [0], [0], [1], [0, 0, 1, 1], [], []>} : vector<4x32xf32>, vector<32x128xf32>, vector<4x128xf32> -> vector<4x128xf32>
    %381 = arith.addf %379, %380 : vector<4x128xf32>
    %382 = arith.negf %381 : vector<4x128xf32>
    %383 = math.exp %382 : vector<4x128xf32>
    %cst_82 = arith.constant 1.000000e+00 : f32
    %384 = vector.broadcast %cst_82 : f32 to vector<4x128xf32>
    %385 = arith.addf %384, %383 : vector<4x128xf32>
    %386 = arith.divf %384, %385 : vector<4x128xf32>
    %387 = vector.extract_strided_slice %386 {offsets = [0, 0], sizes = [4, 32], strides = [1, 1]} : vector<4x128xf32> to vector<4x32xf32>
    %388 = vector.extract_strided_slice %386 {offsets = [0, 32], sizes = [4, 32], strides = [1, 1]} : vector<4x128xf32> to vector<4x32xf32>
    %389 = vector.extract_strided_slice %386 {offsets = [0, 96], sizes = [4, 32], strides = [1, 1]} : vector<4x128xf32> to vector<4x32xf32>
    %390 = vector.extract_strided_slice %381 {offsets = [0, 64], sizes = [4, 32], strides = [1, 1]} : vector<4x128xf32> to vector<4x32xf32>
    %391 = math.tanh %390 : vector<4x32xf32>
    %392 = arith.mulf %388, %375 : vector<4x32xf32>
    %393 = arith.mulf %387, %391 : vector<4x32xf32>
    %394 = arith.addf %392, %393 : vector<4x32xf32>
    %395 = math.tanh %394 : vector<4x32xf32>
    %396 = arith.mulf %389, %395 : vector<4x32xf32>
    %c12_83 = arith.constant 12 : index
    %c0_84 = arith.constant 0 : index
    %397 = vector.load %arg22[%c12_83, %c0_84] : memref<64x32xf32, #tpu.memory_space<vmem>>, vector<4x32xf32>
    tpu.vector_store %arg22[%c12_83, %c0_84], %396 {strides = array<i32>} : memref<64x32xf32, #tpu.memory_space<vmem>>, vector<4x32xf32>,
    %398 = vector.extract_strided_slice %318 {offsets = [16, 0], sizes = [4, 128], strides = [1, 1]} : vector<64x128xf32> to vector<4x128xf32>
    %cst_85 = arith.constant dense<0.000000e+00> : vector<4x128xf32>
    %399 = tpu.matmul %396, %319, %cst_85 {dimension_numbers = #tpu.dot_dimension_numbers<[1], [0], [0], [1], [0, 0, 1, 1], [], []>} : vector<4x32xf32>, vector<32x128xf32>, vector<4x128xf32> -> vector<4x128xf32>
    %400 = arith.addf %398, %399 : vector<4x128xf32>
    %401 = arith.negf %400 : vector<4x128xf32>
    %402 = math.exp %401 : vector<4x128xf32>
    %cst_86 = arith.constant 1.000000e+00 : f32
    %403 = vector.broadcast %cst_86 : f32 to vector<4x128xf32>
    %404 = arith.addf %403, %402 : vector<4x128xf32>
    %405 = arith.divf %403, %404 : vector<4x128xf32>
    %406 = vector.extract_strided_slice %405 {offsets = [0, 0], sizes = [4, 32], strides = [1, 1]} : vector<4x128xf32> to vector<4x32xf32>
    %407 = vector.extract_strided_slice %405 {offsets = [0, 32], sizes = [4, 32], strides = [1, 1]} : vector<4x128xf32> to vector<4x32xf32>
    %408 = vector.extract_strided_slice %405 {offsets = [0, 96], sizes = [4, 32], strides = [1, 1]} : vector<4x128xf32> to vector<4x32xf32>
    %409 = vector.extract_strided_slice %400 {offsets = [0, 64], sizes = [4, 32], strides = [1, 1]} : vector<4x128xf32> to vector<4x32xf32>
    %410 = math.tanh %409 : vector<4x32xf32>
    %411 = arith.mulf %407, %394 : vector<4x32xf32>
    %412 = arith.mulf %406, %410 : vector<4x32xf32>
    %413 = arith.addf %411, %412 : vector<4x32xf32>
    %414 = math.tanh %413 : vector<4x32xf32>
    %415 = arith.mulf %408, %414 : vector<4x32xf32>
    %c16_87 = arith.constant 16 : index
    %c0_88 = arith.constant 0 : index
    %416 = vector.load %arg22[%c16_87, %c0_88] : memref<64x32xf32, #tpu.memory_space<vmem>>, vector<4x32xf32>
    tpu.vector_store %arg22[%c16_87, %c0_88], %415 {strides = array<i32>} : memref<64x32xf32, #tpu.memory_space<vmem>>, vector<4x32xf32>,
    %417 = vector.extract_strided_slice %318 {offsets = [20, 0], sizes = [4, 128], strides = [1, 1]} : vector<64x128xf32> to vector<4x128xf32>
    %cst_89 = arith.constant dense<0.000000e+00> : vector<4x128xf32>
    %418 = tpu.matmul %415, %319, %cst_89 {dimension_numbers = #tpu.dot_dimension_numbers<[1], [0], [0], [1], [0, 0, 1, 1], [], []>} : vector<4x32xf32>, vector<32x128xf32>, vector<4x128xf32> -> vector<4x128xf32>
    %419 = arith.addf %417, %418 : vector<4x128xf32>
    %420 = arith.negf %419 : vector<4x128xf32>
    %421 = math.exp %420 : vector<4x128xf32>
    %cst_90 = arith.constant 1.000000e+00 : f32
    %422 = vector.broadcast %cst_90 : f32 to vector<4x128xf32>
    %423 = arith.addf %422, %421 : vector<4x128xf32>
    %424 = arith.divf %422, %423 : vector<4x128xf32>
    %425 = vector.extract_strided_slice %424 {offsets = [0, 0], sizes = [4, 32], strides = [1, 1]} : vector<4x128xf32> to vector<4x32xf32>
    %426 = vector.extract_strided_slice %424 {offsets = [0, 32], sizes = [4, 32], strides = [1, 1]} : vector<4x128xf32> to vector<4x32xf32>
    %427 = vector.extract_strided_slice %424 {offsets = [0, 96], sizes = [4, 32], strides = [1, 1]} : vector<4x128xf32> to vector<4x32xf32>
    %428 = vector.extract_strided_slice %419 {offsets = [0, 64], sizes = [4, 32], strides = [1, 1]} : vector<4x128xf32> to vector<4x32xf32>
    %429 = math.tanh %428 : vector<4x32xf32>
    %430 = arith.mulf %426, %413 : vector<4x32xf32>
    %431 = arith.mulf %425, %429 : vector<4x32xf32>
    %432 = arith.addf %430, %431 : vector<4x32xf32>
    %433 = math.tanh %432 : vector<4x32xf32>
    %434 = arith.mulf %427, %433 : vector<4x32xf32>
    %c20_91 = arith.constant 20 : index
    %c0_92 = arith.constant 0 : index
    %435 = vector.load %arg22[%c20_91, %c0_92] : memref<64x32xf32, #tpu.memory_space<vmem>>, vector<4x32xf32>
    tpu.vector_store %arg22[%c20_91, %c0_92], %434 {strides = array<i32>} : memref<64x32xf32, #tpu.memory_space<vmem>>, vector<4x32xf32>,
    %436 = vector.extract_strided_slice %318 {offsets = [24, 0], sizes = [4, 128], strides = [1, 1]} : vector<64x128xf32> to vector<4x128xf32>
    %cst_93 = arith.constant dense<0.000000e+00> : vector<4x128xf32>
    %437 = tpu.matmul %434, %319, %cst_93 {dimension_numbers = #tpu.dot_dimension_numbers<[1], [0], [0], [1], [0, 0, 1, 1], [], []>} : vector<4x32xf32>, vector<32x128xf32>, vector<4x128xf32> -> vector<4x128xf32>
    %438 = arith.addf %436, %437 : vector<4x128xf32>
    %439 = arith.negf %438 : vector<4x128xf32>
    %440 = math.exp %439 : vector<4x128xf32>
    %cst_94 = arith.constant 1.000000e+00 : f32
    %441 = vector.broadcast %cst_94 : f32 to vector<4x128xf32>
    %442 = arith.addf %441, %440 : vector<4x128xf32>
    %443 = arith.divf %441, %442 : vector<4x128xf32>
    %444 = vector.extract_strided_slice %443 {offsets = [0, 0], sizes = [4, 32], strides = [1, 1]} : vector<4x128xf32> to vector<4x32xf32>
    %445 = vector.extract_strided_slice %443 {offsets = [0, 32], sizes = [4, 32], strides = [1, 1]} : vector<4x128xf32> to vector<4x32xf32>
    %446 = vector.extract_strided_slice %443 {offsets = [0, 96], sizes = [4, 32], strides = [1, 1]} : vector<4x128xf32> to vector<4x32xf32>
    %447 = vector.extract_strided_slice %438 {offsets = [0, 64], sizes = [4, 32], strides = [1, 1]} : vector<4x128xf32> to vector<4x32xf32>
    %448 = math.tanh %447 : vector<4x32xf32>
    %449 = arith.mulf %445, %432 : vector<4x32xf32>
    %450 = arith.mulf %444, %448 : vector<4x32xf32>
    %451 = arith.addf %449, %450 : vector<4x32xf32>
    %452 = math.tanh %451 : vector<4x32xf32>
    %453 = arith.mulf %446, %452 : vector<4x32xf32>
    %c24_95 = arith.constant 24 : index
    %c0_96 = arith.constant 0 : index
    %454 = vector.load %arg22[%c24_95, %c0_96] : memref<64x32xf32, #tpu.memory_space<vmem>>, vector<4x32xf32>
    tpu.vector_store %arg22[%c24_95, %c0_96], %453 {strides = array<i32>} : memref<64x32xf32, #tpu.memory_space<vmem>>, vector<4x32xf32>,
    %455 = vector.extract_strided_slice %318 {offsets = [28, 0], sizes = [4, 128], strides = [1, 1]} : vector<64x128xf32> to vector<4x128xf32>
    %cst_97 = arith.constant dense<0.000000e+00> : vector<4x128xf32>
    %456 = tpu.matmul %453, %319, %cst_97 {dimension_numbers = #tpu.dot_dimension_numbers<[1], [0], [0], [1], [0, 0, 1, 1], [], []>} : vector<4x32xf32>, vector<32x128xf32>, vector<4x128xf32> -> vector<4x128xf32>
    %457 = arith.addf %455, %456 : vector<4x128xf32>
    %458 = arith.negf %457 : vector<4x128xf32>
    %459 = math.exp %458 : vector<4x128xf32>
    %cst_98 = arith.constant 1.000000e+00 : f32
    %460 = vector.broadcast %cst_98 : f32 to vector<4x128xf32>
    %461 = arith.addf %460, %459 : vector<4x128xf32>
    %462 = arith.divf %460, %461 : vector<4x128xf32>
    %463 = vector.extract_strided_slice %462 {offsets = [0, 0], sizes = [4, 32], strides = [1, 1]} : vector<4x128xf32> to vector<4x32xf32>
    %464 = vector.extract_strided_slice %462 {offsets = [0, 32], sizes = [4, 32], strides = [1, 1]} : vector<4x128xf32> to vector<4x32xf32>
    %465 = vector.extract_strided_slice %462 {offsets = [0, 96], sizes = [4, 32], strides = [1, 1]} : vector<4x128xf32> to vector<4x32xf32>
    %466 = vector.extract_strided_slice %457 {offsets = [0, 64], sizes = [4, 32], strides = [1, 1]} : vector<4x128xf32> to vector<4x32xf32>
    %467 = math.tanh %466 : vector<4x32xf32>
    %468 = arith.mulf %464, %451 : vector<4x32xf32>
    %469 = arith.mulf %463, %467 : vector<4x32xf32>
    %470 = arith.addf %468, %469 : vector<4x32xf32>
    %471 = math.tanh %470 : vector<4x32xf32>
    %472 = arith.mulf %465, %471 : vector<4x32xf32>
    %c28_99 = arith.constant 28 : index
    %c0_100 = arith.constant 0 : index
    %473 = vector.load %arg22[%c28_99, %c0_100] : memref<64x32xf32, #tpu.memory_space<vmem>>, vector<4x32xf32>
    tpu.vector_store %arg22[%c28_99, %c0_100], %472 {strides = array<i32>} : memref<64x32xf32, #tpu.memory_space<vmem>>, vector<4x32xf32>,
    %474 = vector.extract_strided_slice %318 {offsets = [32, 0], sizes = [4, 128], strides = [1, 1]} : vector<64x128xf32> to vector<4x128xf32>
    %cst_101 = arith.constant dense<0.000000e+00> : vector<4x128xf32>
    %475 = tpu.matmul %472, %319, %cst_101 {dimension_numbers = #tpu.dot_dimension_numbers<[1], [0], [0], [1], [0, 0, 1, 1], [], []>} : vector<4x32xf32>, vector<32x128xf32>, vector<4x128xf32> -> vector<4x128xf32>
    %476 = arith.addf %474, %475 : vector<4x128xf32>
    %477 = arith.negf %476 : vector<4x128xf32>
    %478 = math.exp %477 : vector<4x128xf32>
    %cst_102 = arith.constant 1.000000e+00 : f32
    %479 = vector.broadcast %cst_102 : f32 to vector<4x128xf32>
    %480 = arith.addf %479, %478 : vector<4x128xf32>
    %481 = arith.divf %479, %480 : vector<4x128xf32>
    %482 = vector.extract_strided_slice %481 {offsets = [0, 0], sizes = [4, 32], strides = [1, 1]} : vector<4x128xf32> to vector<4x32xf32>
    %483 = vector.extract_strided_slice %481 {offsets = [0, 32], sizes = [4, 32], strides = [1, 1]} : vector<4x128xf32> to vector<4x32xf32>
    %484 = vector.extract_strided_slice %481 {offsets = [0, 96], sizes = [4, 32], strides = [1, 1]} : vector<4x128xf32> to vector<4x32xf32>
    %485 = vector.extract_strided_slice %476 {offsets = [0, 64], sizes = [4, 32], strides = [1, 1]} : vector<4x128xf32> to vector<4x32xf32>
    %486 = math.tanh %485 : vector<4x32xf32>
    %487 = arith.mulf %483, %470 : vector<4x32xf32>
    %488 = arith.mulf %482, %486 : vector<4x32xf32>
    %489 = arith.addf %487, %488 : vector<4x32xf32>
    %490 = math.tanh %489 : vector<4x32xf32>
    %491 = arith.mulf %484, %490 : vector<4x32xf32>
    %c32_103 = arith.constant 32 : index
    %c0_104 = arith.constant 0 : index
    %492 = vector.load %arg22[%c32_103, %c0_104] : memref<64x32xf32, #tpu.memory_space<vmem>>, vector<4x32xf32>
    tpu.vector_store %arg22[%c32_103, %c0_104], %491 {strides = array<i32>} : memref<64x32xf32, #tpu.memory_space<vmem>>, vector<4x32xf32>,
    %493 = vector.extract_strided_slice %318 {offsets = [36, 0], sizes = [4, 128], strides = [1, 1]} : vector<64x128xf32> to vector<4x128xf32>
    %cst_105 = arith.constant dense<0.000000e+00> : vector<4x128xf32>
    %494 = tpu.matmul %491, %319, %cst_105 {dimension_numbers = #tpu.dot_dimension_numbers<[1], [0], [0], [1], [0, 0, 1, 1], [], []>} : vector<4x32xf32>, vector<32x128xf32>, vector<4x128xf32> -> vector<4x128xf32>
    %495 = arith.addf %493, %494 : vector<4x128xf32>
    %496 = arith.negf %495 : vector<4x128xf32>
    %497 = math.exp %496 : vector<4x128xf32>
    %cst_106 = arith.constant 1.000000e+00 : f32
    %498 = vector.broadcast %cst_106 : f32 to vector<4x128xf32>
    %499 = arith.addf %498, %497 : vector<4x128xf32>
    %500 = arith.divf %498, %499 : vector<4x128xf32>
    %501 = vector.extract_strided_slice %500 {offsets = [0, 0], sizes = [4, 32], strides = [1, 1]} : vector<4x128xf32> to vector<4x32xf32>
    %502 = vector.extract_strided_slice %500 {offsets = [0, 32], sizes = [4, 32], strides = [1, 1]} : vector<4x128xf32> to vector<4x32xf32>
    %503 = vector.extract_strided_slice %500 {offsets = [0, 96], sizes = [4, 32], strides = [1, 1]} : vector<4x128xf32> to vector<4x32xf32>
    %504 = vector.extract_strided_slice %495 {offsets = [0, 64], sizes = [4, 32], strides = [1, 1]} : vector<4x128xf32> to vector<4x32xf32>
    %505 = math.tanh %504 : vector<4x32xf32>
    %506 = arith.mulf %502, %489 : vector<4x32xf32>
    %507 = arith.mulf %501, %505 : vector<4x32xf32>
    %508 = arith.addf %506, %507 : vector<4x32xf32>
    %509 = math.tanh %508 : vector<4x32xf32>
    %510 = arith.mulf %503, %509 : vector<4x32xf32>
    %c36_107 = arith.constant 36 : index
    %c0_108 = arith.constant 0 : index
    %511 = vector.load %arg22[%c36_107, %c0_108] : memref<64x32xf32, #tpu.memory_space<vmem>>, vector<4x32xf32>
    tpu.vector_store %arg22[%c36_107, %c0_108], %510 {strides = array<i32>} : memref<64x32xf32, #tpu.memory_space<vmem>>, vector<4x32xf32>,
    %512 = vector.extract_strided_slice %318 {offsets = [40, 0], sizes = [4, 128], strides = [1, 1]} : vector<64x128xf32> to vector<4x128xf32>
    %cst_109 = arith.constant dense<0.000000e+00> : vector<4x128xf32>
    %513 = tpu.matmul %510, %319, %cst_109 {dimension_numbers = #tpu.dot_dimension_numbers<[1], [0], [0], [1], [0, 0, 1, 1], [], []>} : vector<4x32xf32>, vector<32x128xf32>, vector<4x128xf32> -> vector<4x128xf32>
    %514 = arith.addf %512, %513 : vector<4x128xf32>
    %515 = arith.negf %514 : vector<4x128xf32>
    %516 = math.exp %515 : vector<4x128xf32>
    %cst_110 = arith.constant 1.000000e+00 : f32
    %517 = vector.broadcast %cst_110 : f32 to vector<4x128xf32>
    %518 = arith.addf %517, %516 : vector<4x128xf32>
    %519 = arith.divf %517, %518 : vector<4x128xf32>
    %520 = vector.extract_strided_slice %519 {offsets = [0, 0], sizes = [4, 32], strides = [1, 1]} : vector<4x128xf32> to vector<4x32xf32>
    %521 = vector.extract_strided_slice %519 {offsets = [0, 32], sizes = [4, 32], strides = [1, 1]} : vector<4x128xf32> to vector<4x32xf32>
    %522 = vector.extract_strided_slice %519 {offsets = [0, 96], sizes = [4, 32], strides = [1, 1]} : vector<4x128xf32> to vector<4x32xf32>
    %523 = vector.extract_strided_slice %514 {offsets = [0, 64], sizes = [4, 32], strides = [1, 1]} : vector<4x128xf32> to vector<4x32xf32>
    %524 = math.tanh %523 : vector<4x32xf32>
    %525 = arith.mulf %521, %508 : vector<4x32xf32>
    %526 = arith.mulf %520, %524 : vector<4x32xf32>
    %527 = arith.addf %525, %526 : vector<4x32xf32>
    %528 = math.tanh %527 : vector<4x32xf32>
    %529 = arith.mulf %522, %528 : vector<4x32xf32>
    %c40_111 = arith.constant 40 : index
    %c0_112 = arith.constant 0 : index
    %530 = vector.load %arg22[%c40_111, %c0_112] : memref<64x32xf32, #tpu.memory_space<vmem>>, vector<4x32xf32>
    tpu.vector_store %arg22[%c40_111, %c0_112], %529 {strides = array<i32>} : memref<64x32xf32, #tpu.memory_space<vmem>>, vector<4x32xf32>,
    %531 = vector.extract_strided_slice %318 {offsets = [44, 0], sizes = [4, 128], strides = [1, 1]} : vector<64x128xf32> to vector<4x128xf32>
    %cst_113 = arith.constant dense<0.000000e+00> : vector<4x128xf32>
    %532 = tpu.matmul %529, %319, %cst_113 {dimension_numbers = #tpu.dot_dimension_numbers<[1], [0], [0], [1], [0, 0, 1, 1], [], []>} : vector<4x32xf32>, vector<32x128xf32>, vector<4x128xf32> -> vector<4x128xf32>
    %533 = arith.addf %531, %532 : vector<4x128xf32>
    %534 = arith.negf %533 : vector<4x128xf32>
    %535 = math.exp %534 : vector<4x128xf32>
    %cst_114 = arith.constant 1.000000e+00 : f32
    %536 = vector.broadcast %cst_114 : f32 to vector<4x128xf32>
    %537 = arith.addf %536, %535 : vector<4x128xf32>
    %538 = arith.divf %536, %537 : vector<4x128xf32>
    %539 = vector.extract_strided_slice %538 {offsets = [0, 0], sizes = [4, 32], strides = [1, 1]} : vector<4x128xf32> to vector<4x32xf32>
    %540 = vector.extract_strided_slice %538 {offsets = [0, 32], sizes = [4, 32], strides = [1, 1]} : vector<4x128xf32> to vector<4x32xf32>
    %541 = vector.extract_strided_slice %538 {offsets = [0, 96], sizes = [4, 32], strides = [1, 1]} : vector<4x128xf32> to vector<4x32xf32>
    %542 = vector.extract_strided_slice %533 {offsets = [0, 64], sizes = [4, 32], strides = [1, 1]} : vector<4x128xf32> to vector<4x32xf32>
    %543 = math.tanh %542 : vector<4x32xf32>
    %544 = arith.mulf %540, %527 : vector<4x32xf32>
    %545 = arith.mulf %539, %543 : vector<4x32xf32>
    %546 = arith.addf %544, %545 : vector<4x32xf32>
    %547 = math.tanh %546 : vector<4x32xf32>
    %548 = arith.mulf %541, %547 : vector<4x32xf32>
    %c44_115 = arith.constant 44 : index
    %c0_116 = arith.constant 0 : index
    %549 = vector.load %arg22[%c44_115, %c0_116] : memref<64x32xf32, #tpu.memory_space<vmem>>, vector<4x32xf32>
    tpu.vector_store %arg22[%c44_115, %c0_116], %548 {strides = array<i32>} : memref<64x32xf32, #tpu.memory_space<vmem>>, vector<4x32xf32>,
    %550 = vector.extract_strided_slice %318 {offsets = [48, 0], sizes = [4, 128], strides = [1, 1]} : vector<64x128xf32> to vector<4x128xf32>
    %cst_117 = arith.constant dense<0.000000e+00> : vector<4x128xf32>
    %551 = tpu.matmul %548, %319, %cst_117 {dimension_numbers = #tpu.dot_dimension_numbers<[1], [0], [0], [1], [0, 0, 1, 1], [], []>} : vector<4x32xf32>, vector<32x128xf32>, vector<4x128xf32> -> vector<4x128xf32>
    %552 = arith.addf %550, %551 : vector<4x128xf32>
    %553 = arith.negf %552 : vector<4x128xf32>
    %554 = math.exp %553 : vector<4x128xf32>
    %cst_118 = arith.constant 1.000000e+00 : f32
    %555 = vector.broadcast %cst_118 : f32 to vector<4x128xf32>
    %556 = arith.addf %555, %554 : vector<4x128xf32>
    %557 = arith.divf %555, %556 : vector<4x128xf32>
    %558 = vector.extract_strided_slice %557 {offsets = [0, 0], sizes = [4, 32], strides = [1, 1]} : vector<4x128xf32> to vector<4x32xf32>
    %559 = vector.extract_strided_slice %557 {offsets = [0, 32], sizes = [4, 32], strides = [1, 1]} : vector<4x128xf32> to vector<4x32xf32>
    %560 = vector.extract_strided_slice %557 {offsets = [0, 96], sizes = [4, 32], strides = [1, 1]} : vector<4x128xf32> to vector<4x32xf32>
    %561 = vector.extract_strided_slice %552 {offsets = [0, 64], sizes = [4, 32], strides = [1, 1]} : vector<4x128xf32> to vector<4x32xf32>
    %562 = math.tanh %561 : vector<4x32xf32>
    %563 = arith.mulf %559, %546 : vector<4x32xf32>
    %564 = arith.mulf %558, %562 : vector<4x32xf32>
    %565 = arith.addf %563, %564 : vector<4x32xf32>
    %566 = math.tanh %565 : vector<4x32xf32>
    %567 = arith.mulf %560, %566 : vector<4x32xf32>
    %c48_119 = arith.constant 48 : index
    %c0_120 = arith.constant 0 : index
    %568 = vector.load %arg22[%c48_119, %c0_120] : memref<64x32xf32, #tpu.memory_space<vmem>>, vector<4x32xf32>
    tpu.vector_store %arg22[%c48_119, %c0_120], %567 {strides = array<i32>} : memref<64x32xf32, #tpu.memory_space<vmem>>, vector<4x32xf32>,
    %569 = vector.extract_strided_slice %318 {offsets = [52, 0], sizes = [4, 128], strides = [1, 1]} : vector<64x128xf32> to vector<4x128xf32>
    %cst_121 = arith.constant dense<0.000000e+00> : vector<4x128xf32>
    %570 = tpu.matmul %567, %319, %cst_121 {dimension_numbers = #tpu.dot_dimension_numbers<[1], [0], [0], [1], [0, 0, 1, 1], [], []>} : vector<4x32xf32>, vector<32x128xf32>, vector<4x128xf32> -> vector<4x128xf32>
    %571 = arith.addf %569, %570 : vector<4x128xf32>
    %572 = arith.negf %571 : vector<4x128xf32>
    %573 = math.exp %572 : vector<4x128xf32>
    %cst_122 = arith.constant 1.000000e+00 : f32
    %574 = vector.broadcast %cst_122 : f32 to vector<4x128xf32>
    %575 = arith.addf %574, %573 : vector<4x128xf32>
    %576 = arith.divf %574, %575 : vector<4x128xf32>
    %577 = vector.extract_strided_slice %576 {offsets = [0, 0], sizes = [4, 32], strides = [1, 1]} : vector<4x128xf32> to vector<4x32xf32>
    %578 = vector.extract_strided_slice %576 {offsets = [0, 32], sizes = [4, 32], strides = [1, 1]} : vector<4x128xf32> to vector<4x32xf32>
    %579 = vector.extract_strided_slice %576 {offsets = [0, 96], sizes = [4, 32], strides = [1, 1]} : vector<4x128xf32> to vector<4x32xf32>
    %580 = vector.extract_strided_slice %571 {offsets = [0, 64], sizes = [4, 32], strides = [1, 1]} : vector<4x128xf32> to vector<4x32xf32>
    %581 = math.tanh %580 : vector<4x32xf32>
    %582 = arith.mulf %578, %565 : vector<4x32xf32>
    %583 = arith.mulf %577, %581 : vector<4x32xf32>
    %584 = arith.addf %582, %583 : vector<4x32xf32>
    %585 = math.tanh %584 : vector<4x32xf32>
    %586 = arith.mulf %579, %585 : vector<4x32xf32>
    %c52_123 = arith.constant 52 : index
    %c0_124 = arith.constant 0 : index
    %587 = vector.load %arg22[%c52_123, %c0_124] : memref<64x32xf32, #tpu.memory_space<vmem>>, vector<4x32xf32>
    tpu.vector_store %arg22[%c52_123, %c0_124], %586 {strides = array<i32>} : memref<64x32xf32, #tpu.memory_space<vmem>>, vector<4x32xf32>,
    %588 = vector.extract_strided_slice %318 {offsets = [56, 0], sizes = [4, 128], strides = [1, 1]} : vector<64x128xf32> to vector<4x128xf32>
    %cst_125 = arith.constant dense<0.000000e+00> : vector<4x128xf32>
    %589 = tpu.matmul %586, %319, %cst_125 {dimension_numbers = #tpu.dot_dimension_numbers<[1], [0], [0], [1], [0, 0, 1, 1], [], []>} : vector<4x32xf32>, vector<32x128xf32>, vector<4x128xf32> -> vector<4x128xf32>
    %590 = arith.addf %588, %589 : vector<4x128xf32>
    %591 = arith.negf %590 : vector<4x128xf32>
    %592 = math.exp %591 : vector<4x128xf32>
    %cst_126 = arith.constant 1.000000e+00 : f32
    %593 = vector.broadcast %cst_126 : f32 to vector<4x128xf32>
    %594 = arith.addf %593, %592 : vector<4x128xf32>
    %595 = arith.divf %593, %594 : vector<4x128xf32>
    %596 = vector.extract_strided_slice %595 {offsets = [0, 0], sizes = [4, 32], strides = [1, 1]} : vector<4x128xf32> to vector<4x32xf32>
    %597 = vector.extract_strided_slice %595 {offsets = [0, 32], sizes = [4, 32], strides = [1, 1]} : vector<4x128xf32> to vector<4x32xf32>
    %598 = vector.extract_strided_slice %595 {offsets = [0, 96], sizes = [4, 32], strides = [1, 1]} : vector<4x128xf32> to vector<4x32xf32>
    %599 = vector.extract_strided_slice %590 {offsets = [0, 64], sizes = [4, 32], strides = [1, 1]} : vector<4x128xf32> to vector<4x32xf32>
    %600 = math.tanh %599 : vector<4x32xf32>
    %601 = arith.mulf %597, %584 : vector<4x32xf32>
    %602 = arith.mulf %596, %600 : vector<4x32xf32>
    %603 = arith.addf %601, %602 : vector<4x32xf32>
    %604 = math.tanh %603 : vector<4x32xf32>
    %605 = arith.mulf %598, %604 : vector<4x32xf32>
    %c56_127 = arith.constant 56 : index
    %c0_128 = arith.constant 0 : index
    %606 = vector.load %arg22[%c56_127, %c0_128] : memref<64x32xf32, #tpu.memory_space<vmem>>, vector<4x32xf32>
    tpu.vector_store %arg22[%c56_127, %c0_128], %605 {strides = array<i32>} : memref<64x32xf32, #tpu.memory_space<vmem>>, vector<4x32xf32>,
    %607 = vector.extract_strided_slice %318 {offsets = [60, 0], sizes = [4, 128], strides = [1, 1]} : vector<64x128xf32> to vector<4x128xf32>
    %cst_129 = arith.constant dense<0.000000e+00> : vector<4x128xf32>
    %608 = tpu.matmul %605, %319, %cst_129 {dimension_numbers = #tpu.dot_dimension_numbers<[1], [0], [0], [1], [0, 0, 1, 1], [], []>} : vector<4x32xf32>, vector<32x128xf32>, vector<4x128xf32> -> vector<4x128xf32>
    %609 = arith.addf %607, %608 : vector<4x128xf32>
    %610 = arith.negf %609 : vector<4x128xf32>
    %611 = math.exp %610 : vector<4x128xf32>
    %cst_130 = arith.constant 1.000000e+00 : f32
    %612 = vector.broadcast %cst_130 : f32 to vector<4x128xf32>
    %613 = arith.addf %612, %611 : vector<4x128xf32>
    %614 = arith.divf %612, %613 : vector<4x128xf32>
    %615 = vector.extract_strided_slice %614 {offsets = [0, 0], sizes = [4, 32], strides = [1, 1]} : vector<4x128xf32> to vector<4x32xf32>
    %616 = vector.extract_strided_slice %614 {offsets = [0, 32], sizes = [4, 32], strides = [1, 1]} : vector<4x128xf32> to vector<4x32xf32>
    %617 = vector.extract_strided_slice %614 {offsets = [0, 96], sizes = [4, 32], strides = [1, 1]} : vector<4x128xf32> to vector<4x32xf32>
    %618 = vector.extract_strided_slice %609 {offsets = [0, 64], sizes = [4, 32], strides = [1, 1]} : vector<4x128xf32> to vector<4x32xf32>
    %619 = math.tanh %618 : vector<4x32xf32>
    %620 = arith.mulf %616, %603 : vector<4x32xf32>
    %621 = arith.mulf %615, %619 : vector<4x32xf32>
    %622 = arith.addf %620, %621 : vector<4x32xf32>
    %623 = math.tanh %622 : vector<4x32xf32>
    %624 = arith.mulf %617, %623 : vector<4x32xf32>
    %c60_131 = arith.constant 60 : index
    %c0_132 = arith.constant 0 : index
    %625 = vector.load %arg22[%c60_131, %c0_132] : memref<64x32xf32, #tpu.memory_space<vmem>>, vector<4x32xf32>
    tpu.vector_store %arg22[%c60_131, %c0_132], %624 {strides = array<i32>} : memref<64x32xf32, #tpu.memory_space<vmem>>, vector<4x32xf32>,
    %c0_133 = arith.constant 0 : index
    %c0_134 = arith.constant 0 : index
    %626 = vector.load %arg22[%c0_133, %c0_134] : memref<64x32xf32, #tpu.memory_space<vmem>>, vector<64x32xf32>
    %c0_135 = arith.constant 0 : index
    %c0_136 = arith.constant 0 : index
    %627 = vector.load %arg13[%c0_135, %c0_136] : memref<32x64xf32, #tpu.memory_space<vmem>>, vector<32x64xf32>
    %cst_137 = arith.constant dense<0.000000e+00> : vector<64x64xf32>
    %628 = tpu.matmul %626, %627, %cst_137 {dimension_numbers = #tpu.dot_dimension_numbers<[1], [0], [0], [1], [0, 0, 1, 1], [], []>} : vector<64x32xf32>, vector<32x64xf32>, vector<64x64xf32> -> vector<64x64xf32>
    %cst_138 = arith.constant 0.420448214 : f32
    %629 = vector.broadcast %cst_138 : f32 to vector<64x64xf32>
    %630 = arith.mulf %629, %628 : vector<64x64xf32>
    %631 = arith.mulf %626, %626 : vector<64x32xf32>
    %cst_139 = arith.constant dense<0.000000e+00> : vector<64xf32>
    %632 = vector.multi_reduction <add>, %631, %cst_139 [1] : vector<64x32xf32> to vector<64xf32>
    %633 = vector.shape_cast %632 : vector<64xf32> to vector<64x1xf32>
    %cst_140 = arith.constant 0.0883883461 : f32
    %634 = vector.broadcast %cst_140 : f32 to vector<64x1xf32>
    %635 = arith.mulf %634, %633 : vector<64x1xf32>
    %636 = vector.broadcast %635 : vector<64x1xf32> to vector<64x64xf32>
    %637 = arith.subf %630, %636 : vector<64x64xf32>
    %cst_141 = arith.constant dense<0xFF800000> : vector<64xf32>
    %638 = vector.multi_reduction <maximumf>, %630, %cst_141 [1] : vector<64x64xf32> to vector<64xf32>
    %639 = vector.shape_cast %638 : vector<64xf32> to vector<64x1xf32>
    %640 = vector.broadcast %639 : vector<64x1xf32> to vector<64x64xf32>
    %641 = arith.subf %637, %640 : vector<64x64xf32>
    %642 = math.exp %641 : vector<64x64xf32>
    %cst_142 = arith.constant 9.99999997E-7 : f32
    %643 = vector.broadcast %cst_142 : f32 to vector<64x64xf32>
    %644 = arith.addf %642, %643 : vector<64x64xf32>
    %cst_143 = arith.constant 0.129099444 : f32
    %645 = vector.broadcast %cst_143 : f32 to vector<64x64xf32>
    %646 = arith.mulf %645, %644 : vector<64x64xf32>
    %647 = vector.broadcast %635 : vector<64x1xf32> to vector<64x64xf32>
    %648 = arith.subf %630, %647 : vector<64x64xf32>
    %649 = vector.shape_cast %630 : vector<64x64xf32> to vector<1x64x64xf32>
    %cst_144 = arith.constant dense<0xFF800000> : vector<1xf32>
    %650 = vector.multi_reduction <maximumf>, %649, %cst_144 [1, 2] : vector<1x64x64xf32> to vector<1xf32>
    %651 = vector.shape_cast %650 : vector<1xf32> to vector<1x1x1xf32>
    %652 = vector.extract %651[0, 0, 0] : f32 from vector<1x1x1xf32>
    %653 = vector.broadcast %652 : f32 to vector<64x64xf32>
    %654 = arith.subf %648, %653 : vector<64x64xf32>
    %655 = math.exp %654 : vector<64x64xf32>
    %cst_145 = arith.constant 9.99999997E-7 : f32
    %656 = vector.broadcast %cst_145 : f32 to vector<64x64xf32>
    %657 = arith.addf %655, %656 : vector<64x64xf32>
    %cst_146 = arith.constant 0.129099444 : f32
    %658 = vector.broadcast %cst_146 : f32 to vector<64x64xf32>
    %659 = arith.mulf %658, %657 : vector<64x64xf32>
    %660 = tpu.iota {dimensions = array<i32: 1>} : vector<1x64xi32>
    %c60_i32 = arith.constant 60 : i32
    %661 = vector.broadcast %c60_i32 : i32 to vector<1x64xi32>
    %662 = arith.cmpi slt, %660, %661 : vector<1x64xi32>
    %663 = arith.extui %662 : vector<1x64xi1> to vector<1x64xi32>
    %664 = arith.sitofp %663 : vector<1x64xi32> to vector<1x64xf32>
    %665 = vector.broadcast %664 : vector<1x64xf32> to vector<64x64xf32>
    %666 = arith.mulf %659, %665 : vector<64x64xf32>
    %cst_147 = arith.constant dense<0.000000e+00> : vector<64x64xf32>
    %667 = tpu.matmul %646, %666, %cst_147 {dimension_numbers = #tpu.dot_dimension_numbers<[1], [1], [0], [0], [0, 0, 1, 0], [], []>} : vector<64x64xf32>, vector<64x64xf32>, vector<64x64xf32> -> vector<64x64xf32>
    %c0_148 = arith.constant 0 : index
    %c0_149 = arith.constant 0 : index
    %668 = vector.load %arg14[%c0_148, %c0_149] : memref<64x64xf32, #tpu.memory_space<vmem>>, vector<64x64xf32>
    %669 = arith.mulf %667, %668 : vector<64x64xf32>
    %cst_150 = arith.constant dense<0.000000e+00> : vector<64x32xf32>
    %670 = tpu.matmul %669, %626, %cst_150 {dimension_numbers = #tpu.dot_dimension_numbers<[1], [0], [0], [1], [0, 0, 1, 1], [], []>} : vector<64x64xf32>, vector<64x32xf32>, vector<64x32xf32> -> vector<64x32xf32>
    %cst_151 = arith.constant dense<0.000000e+00> : vector<64xf32>
    %671 = vector.multi_reduction <add>, %669, %cst_151 [1] : vector<64x64xf32> to vector<64xf32>
    %672 = vector.shape_cast %671 : vector<64xf32> to vector<64x1xf32>
    %cst_152 = arith.constant 1.000000e-30 : f32
    %673 = vector.broadcast %cst_152 : f32 to vector<64x1xf32>
    %674 = arith.maximumf %672, %673 : vector<64x1xf32>
    %675 = vector.broadcast %674 : vector<64x1xf32> to vector<64x32xf32>
    %676 = arith.divf %670, %675 : vector<64x32xf32>
    %c0_153 = arith.constant 0 : index
    %c0_154 = arith.constant 0 : index
    %677 = vector.load %arg7[%c0_153, %c0_154] : memref<32x128xf32, #tpu.memory_space<vmem>>, vector<32x128xf32>
    %cst_155 = arith.constant dense<0.000000e+00> : vector<64x128xf32>
    %678 = tpu.matmul %676, %677, %cst_155 {dimension_numbers = #tpu.dot_dimension_numbers<[1], [0], [0], [1], [0, 0, 1, 1], [], []>} : vector<64x32xf32>, vector<32x128xf32>, vector<64x128xf32> -> vector<64x128xf32>
    %c0_156 = arith.constant 0 : index
    %c0_157 = arith.constant 0 : index
    %679 = vector.load %arg9[%c0_156, %c0_157] : memref<1x128xf32, #tpu.memory_space<vmem>>, vector<1x128xf32>
    %680 = vector.broadcast %679 : vector<1x128xf32> to vector<64x128xf32>
    %681 = arith.addf %678, %680 : vector<64x128xf32>
    %c0_158 = arith.constant 0 : index
    %c0_159 = arith.constant 0 : index
    %682 = vector.load %arg8[%c0_158, %c0_159] : memref<32x128xf32, #tpu.memory_space<vmem>>, vector<32x128xf32>
    %cst_160 = arith.constant 0.000000e+00 : f32
    %683 = vector.broadcast %cst_160 : f32 to vector<2x32xf32>
    %cst_161 = arith.constant 0.000000e+00 : f32
    %684 = vector.broadcast %cst_161 : f32 to vector<2x32xf32>
    %685 = vector.extract_strided_slice %681 {offsets = [0, 0], sizes = [2, 128], strides = [1, 1]} : vector<64x128xf32> to vector<2x128xf32>
    %cst_162 = arith.constant dense<0.000000e+00> : vector<2x128xf32>
    %686 = tpu.matmul %683, %682, %cst_162 {dimension_numbers = #tpu.dot_dimension_numbers<[1], [0], [0], [1], [0, 0, 1, 1], [], []>} : vector<2x32xf32>, vector<32x128xf32>, vector<2x128xf32> -> vector<2x128xf32>
    %687 = arith.addf %685, %686 : vector<2x128xf32>
    %688 = arith.negf %687 : vector<2x128xf32>
    %689 = math.exp %688 : vector<2x128xf32>
    %cst_163 = arith.constant 1.000000e+00 : f32
    %690 = vector.broadcast %cst_163 : f32 to vector<2x128xf32>
    %691 = arith.addf %690, %689 : vector<2x128xf32>
    %692 = arith.divf %690, %691 : vector<2x128xf32>
    %693 = vector.extract_strided_slice %692 {offsets = [0, 0], sizes = [2, 32], strides = [1, 1]} : vector<2x128xf32> to vector<2x32xf32>
    %694 = vector.extract_strided_slice %692 {offsets = [0, 32], sizes = [2, 32], strides = [1, 1]} : vector<2x128xf32> to vector<2x32xf32>
    %695 = vector.extract_strided_slice %692 {offsets = [0, 96], sizes = [2, 32], strides = [1, 1]} : vector<2x128xf32> to vector<2x32xf32>
    %696 = vector.extract_strided_slice %687 {offsets = [0, 64], sizes = [2, 32], strides = [1, 1]} : vector<2x128xf32> to vector<2x32xf32>
    %697 = math.tanh %696 : vector<2x32xf32>
    %698 = arith.mulf %694, %684 : vector<2x32xf32>
    %699 = arith.mulf %693, %697 : vector<2x32xf32>
    %700 = arith.addf %698, %699 : vector<2x32xf32>
    %701 = math.tanh %700 : vector<2x32xf32>
    %702 = arith.mulf %695, %701 : vector<2x32xf32>
    %c0_164 = arith.constant 0 : index
    %c0_165 = arith.constant 0 : index
    %703 = vector.load %arg23[%c0_164, %c0_165] : memref<32x32xf32, #tpu.memory_space<vmem>>, vector<2x32xf32>
    tpu.vector_store %arg23[%c0_164, %c0_165], %702 {strides = array<i32>} : memref<32x32xf32, #tpu.memory_space<vmem>>, vector<2x32xf32>,
    %704 = vector.extract_strided_slice %681 {offsets = [4, 0], sizes = [2, 128], strides = [1, 1]} : vector<64x128xf32> to vector<2x128xf32>
    %cst_166 = arith.constant dense<0.000000e+00> : vector<2x128xf32>
    %705 = tpu.matmul %702, %682, %cst_166 {dimension_numbers = #tpu.dot_dimension_numbers<[1], [0], [0], [1], [0, 0, 1, 1], [], []>} : vector<2x32xf32>, vector<32x128xf32>, vector<2x128xf32> -> vector<2x128xf32>
    %706 = arith.addf %704, %705 : vector<2x128xf32>
    %707 = arith.negf %706 : vector<2x128xf32>
    %708 = math.exp %707 : vector<2x128xf32>
    %cst_167 = arith.constant 1.000000e+00 : f32
    %709 = vector.broadcast %cst_167 : f32 to vector<2x128xf32>
    %710 = arith.addf %709, %708 : vector<2x128xf32>
    %711 = arith.divf %709, %710 : vector<2x128xf32>
    %712 = vector.extract_strided_slice %711 {offsets = [0, 0], sizes = [2, 32], strides = [1, 1]} : vector<2x128xf32> to vector<2x32xf32>
    %713 = vector.extract_strided_slice %711 {offsets = [0, 32], sizes = [2, 32], strides = [1, 1]} : vector<2x128xf32> to vector<2x32xf32>
    %714 = vector.extract_strided_slice %711 {offsets = [0, 96], sizes = [2, 32], strides = [1, 1]} : vector<2x128xf32> to vector<2x32xf32>
    %715 = vector.extract_strided_slice %706 {offsets = [0, 64], sizes = [2, 32], strides = [1, 1]} : vector<2x128xf32> to vector<2x32xf32>
    %716 = math.tanh %715 : vector<2x32xf32>
    %717 = arith.mulf %713, %700 : vector<2x32xf32>
    %718 = arith.mulf %712, %716 : vector<2x32xf32>
    %719 = arith.addf %717, %718 : vector<2x32xf32>
    %720 = math.tanh %719 : vector<2x32xf32>
    %721 = arith.mulf %714, %720 : vector<2x32xf32>
    %c2 = arith.constant 2 : index
    %c0_168 = arith.constant 0 : index
    %722 = vector.load %arg23[%c2, %c0_168] : memref<32x32xf32, #tpu.memory_space<vmem>>, vector<2x32xf32>
    tpu.vector_store %arg23[%c2, %c0_168], %721 {strides = array<i32>} : memref<32x32xf32, #tpu.memory_space<vmem>>, vector<2x32xf32>,
    %723 = vector.extract_strided_slice %681 {offsets = [8, 0], sizes = [2, 128], strides = [1, 1]} : vector<64x128xf32> to vector<2x128xf32>
    %cst_169 = arith.constant dense<0.000000e+00> : vector<2x128xf32>
    %724 = tpu.matmul %721, %682, %cst_169 {dimension_numbers = #tpu.dot_dimension_numbers<[1], [0], [0], [1], [0, 0, 1, 1], [], []>} : vector<2x32xf32>, vector<32x128xf32>, vector<2x128xf32> -> vector<2x128xf32>
    %725 = arith.addf %723, %724 : vector<2x128xf32>
    %726 = arith.negf %725 : vector<2x128xf32>
    %727 = math.exp %726 : vector<2x128xf32>
    %cst_170 = arith.constant 1.000000e+00 : f32
    %728 = vector.broadcast %cst_170 : f32 to vector<2x128xf32>
    %729 = arith.addf %728, %727 : vector<2x128xf32>
    %730 = arith.divf %728, %729 : vector<2x128xf32>
    %731 = vector.extract_strided_slice %730 {offsets = [0, 0], sizes = [2, 32], strides = [1, 1]} : vector<2x128xf32> to vector<2x32xf32>
    %732 = vector.extract_strided_slice %730 {offsets = [0, 32], sizes = [2, 32], strides = [1, 1]} : vector<2x128xf32> to vector<2x32xf32>
    %733 = vector.extract_strided_slice %730 {offsets = [0, 96], sizes = [2, 32], strides = [1, 1]} : vector<2x128xf32> to vector<2x32xf32>
    %734 = vector.extract_strided_slice %725 {offsets = [0, 64], sizes = [2, 32], strides = [1, 1]} : vector<2x128xf32> to vector<2x32xf32>
    %735 = math.tanh %734 : vector<2x32xf32>
    %736 = arith.mulf %732, %719 : vector<2x32xf32>
    %737 = arith.mulf %731, %735 : vector<2x32xf32>
    %738 = arith.addf %736, %737 : vector<2x32xf32>
    %739 = math.tanh %738 : vector<2x32xf32>
    %740 = arith.mulf %733, %739 : vector<2x32xf32>
    %c4_171 = arith.constant 4 : index
    %c0_172 = arith.constant 0 : index
    %741 = vector.load %arg23[%c4_171, %c0_172] : memref<32x32xf32, #tpu.memory_space<vmem>>, vector<2x32xf32>
    tpu.vector_store %arg23[%c4_171, %c0_172], %740 {strides = array<i32>} : memref<32x32xf32, #tpu.memory_space<vmem>>, vector<2x32xf32>,
    %742 = vector.extract_strided_slice %681 {offsets = [12, 0], sizes = [2, 128], strides = [1, 1]} : vector<64x128xf32> to vector<2x128xf32>
    %cst_173 = arith.constant dense<0.000000e+00> : vector<2x128xf32>
    %743 = tpu.matmul %740, %682, %cst_173 {dimension_numbers = #tpu.dot_dimension_numbers<[1], [0], [0], [1], [0, 0, 1, 1], [], []>} : vector<2x32xf32>, vector<32x128xf32>, vector<2x128xf32> -> vector<2x128xf32>
    %744 = arith.addf %742, %743 : vector<2x128xf32>
    %745 = arith.negf %744 : vector<2x128xf32>
    %746 = math.exp %745 : vector<2x128xf32>
    %cst_174 = arith.constant 1.000000e+00 : f32
    %747 = vector.broadcast %cst_174 : f32 to vector<2x128xf32>
    %748 = arith.addf %747, %746 : vector<2x128xf32>
    %749 = arith.divf %747, %748 : vector<2x128xf32>
    %750 = vector.extract_strided_slice %749 {offsets = [0, 0], sizes = [2, 32], strides = [1, 1]} : vector<2x128xf32> to vector<2x32xf32>
    %751 = vector.extract_strided_slice %749 {offsets = [0, 32], sizes = [2, 32], strides = [1, 1]} : vector<2x128xf32> to vector<2x32xf32>
    %752 = vector.extract_strided_slice %749 {offsets = [0, 96], sizes = [2, 32], strides = [1, 1]} : vector<2x128xf32> to vector<2x32xf32>
    %753 = vector.extract_strided_slice %744 {offsets = [0, 64], sizes = [2, 32], strides = [1, 1]} : vector<2x128xf32> to vector<2x32xf32>
    %754 = math.tanh %753 : vector<2x32xf32>
    %755 = arith.mulf %751, %738 : vector<2x32xf32>
    %756 = arith.mulf %750, %754 : vector<2x32xf32>
    %757 = arith.addf %755, %756 : vector<2x32xf32>
    %758 = math.tanh %757 : vector<2x32xf32>
    %759 = arith.mulf %752, %758 : vector<2x32xf32>
    %c6 = arith.constant 6 : index
    %c0_175 = arith.constant 0 : index
    %760 = vector.load %arg23[%c6, %c0_175] : memref<32x32xf32, #tpu.memory_space<vmem>>, vector<2x32xf32>
    tpu.vector_store %arg23[%c6, %c0_175], %759 {strides = array<i32>} : memref<32x32xf32, #tpu.memory_space<vmem>>, vector<2x32xf32>,
    %761 = vector.extract_strided_slice %681 {offsets = [16, 0], sizes = [2, 128], strides = [1, 1]} : vector<64x128xf32> to vector<2x128xf32>
    %cst_176 = arith.constant dense<0.000000e+00> : vector<2x128xf32>
    %762 = tpu.matmul %759, %682, %cst_176 {dimension_numbers = #tpu.dot_dimension_numbers<[1], [0], [0], [1], [0, 0, 1, 1], [], []>} : vector<2x32xf32>, vector<32x128xf32>, vector<2x128xf32> -> vector<2x128xf32>
    %763 = arith.addf %761, %762 : vector<2x128xf32>
    %764 = arith.negf %763 : vector<2x128xf32>
    %765 = math.exp %764 : vector<2x128xf32>
    %cst_177 = arith.constant 1.000000e+00 : f32
    %766 = vector.broadcast %cst_177 : f32 to vector<2x128xf32>
    %767 = arith.addf %766, %765 : vector<2x128xf32>
    %768 = arith.divf %766, %767 : vector<2x128xf32>
    %769 = vector.extract_strided_slice %768 {offsets = [0, 0], sizes = [2, 32], strides = [1, 1]} : vector<2x128xf32> to vector<2x32xf32>
    %770 = vector.extract_strided_slice %768 {offsets = [0, 32], sizes = [2, 32], strides = [1, 1]} : vector<2x128xf32> to vector<2x32xf32>
    %771 = vector.extract_strided_slice %768 {offsets = [0, 96], sizes = [2, 32], strides = [1, 1]} : vector<2x128xf32> to vector<2x32xf32>
    %772 = vector.extract_strided_slice %763 {offsets = [0, 64], sizes = [2, 32], strides = [1, 1]} : vector<2x128xf32> to vector<2x32xf32>
    %773 = math.tanh %772 : vector<2x32xf32>
    %774 = arith.mulf %770, %757 : vector<2x32xf32>
    %775 = arith.mulf %769, %773 : vector<2x32xf32>
    %776 = arith.addf %774, %775 : vector<2x32xf32>
    %777 = math.tanh %776 : vector<2x32xf32>
    %778 = arith.mulf %771, %777 : vector<2x32xf32>
    %c8_178 = arith.constant 8 : index
    %c0_179 = arith.constant 0 : index
    %779 = vector.load %arg23[%c8_178, %c0_179] : memref<32x32xf32, #tpu.memory_space<vmem>>, vector<2x32xf32>
    tpu.vector_store %arg23[%c8_178, %c0_179], %778 {strides = array<i32>} : memref<32x32xf32, #tpu.memory_space<vmem>>, vector<2x32xf32>,
    %780 = vector.extract_strided_slice %681 {offsets = [20, 0], sizes = [2, 128], strides = [1, 1]} : vector<64x128xf32> to vector<2x128xf32>
    %cst_180 = arith.constant dense<0.000000e+00> : vector<2x128xf32>
    %781 = tpu.matmul %778, %682, %cst_180 {dimension_numbers = #tpu.dot_dimension_numbers<[1], [0], [0], [1], [0, 0, 1, 1], [], []>} : vector<2x32xf32>, vector<32x128xf32>, vector<2x128xf32> -> vector<2x128xf32>
    %782 = arith.addf %780, %781 : vector<2x128xf32>
    %783 = arith.negf %782 : vector<2x128xf32>
    %784 = math.exp %783 : vector<2x128xf32>
    %cst_181 = arith.constant 1.000000e+00 : f32
    %785 = vector.broadcast %cst_181 : f32 to vector<2x128xf32>
    %786 = arith.addf %785, %784 : vector<2x128xf32>
    %787 = arith.divf %785, %786 : vector<2x128xf32>
    %788 = vector.extract_strided_slice %787 {offsets = [0, 0], sizes = [2, 32], strides = [1, 1]} : vector<2x128xf32> to vector<2x32xf32>
    %789 = vector.extract_strided_slice %787 {offsets = [0, 32], sizes = [2, 32], strides = [1, 1]} : vector<2x128xf32> to vector<2x32xf32>
    %790 = vector.extract_strided_slice %787 {offsets = [0, 96], sizes = [2, 32], strides = [1, 1]} : vector<2x128xf32> to vector<2x32xf32>
    %791 = vector.extract_strided_slice %782 {offsets = [0, 64], sizes = [2, 32], strides = [1, 1]} : vector<2x128xf32> to vector<2x32xf32>
    %792 = math.tanh %791 : vector<2x32xf32>
    %793 = arith.mulf %789, %776 : vector<2x32xf32>
    %794 = arith.mulf %788, %792 : vector<2x32xf32>
    %795 = arith.addf %793, %794 : vector<2x32xf32>
    %796 = math.tanh %795 : vector<2x32xf32>
    %797 = arith.mulf %790, %796 : vector<2x32xf32>
    %c10 = arith.constant 10 : index
    %c0_182 = arith.constant 0 : index
    %798 = vector.load %arg23[%c10, %c0_182] : memref<32x32xf32, #tpu.memory_space<vmem>>, vector<2x32xf32>
    tpu.vector_store %arg23[%c10, %c0_182], %797 {strides = array<i32>} : memref<32x32xf32, #tpu.memory_space<vmem>>, vector<2x32xf32>,
    %799 = vector.extract_strided_slice %681 {offsets = [24, 0], sizes = [2, 128], strides = [1, 1]} : vector<64x128xf32> to vector<2x128xf32>
    %cst_183 = arith.constant dense<0.000000e+00> : vector<2x128xf32>
    %800 = tpu.matmul %797, %682, %cst_183 {dimension_numbers = #tpu.dot_dimension_numbers<[1], [0], [0], [1], [0, 0, 1, 1], [], []>} : vector<2x32xf32>, vector<32x128xf32>, vector<2x128xf32> -> vector<2x128xf32>
    %801 = arith.addf %799, %800 : vector<2x128xf32>
    %802 = arith.negf %801 : vector<2x128xf32>
    %803 = math.exp %802 : vector<2x128xf32>
    %cst_184 = arith.constant 1.000000e+00 : f32
    %804 = vector.broadcast %cst_184 : f32 to vector<2x128xf32>
    %805 = arith.addf %804, %803 : vector<2x128xf32>
    %806 = arith.divf %804, %805 : vector<2x128xf32>
    %807 = vector.extract_strided_slice %806 {offsets = [0, 0], sizes = [2, 32], strides = [1, 1]} : vector<2x128xf32> to vector<2x32xf32>
    %808 = vector.extract_strided_slice %806 {offsets = [0, 32], sizes = [2, 32], strides = [1, 1]} : vector<2x128xf32> to vector<2x32xf32>
    %809 = vector.extract_strided_slice %806 {offsets = [0, 96], sizes = [2, 32], strides = [1, 1]} : vector<2x128xf32> to vector<2x32xf32>
    %810 = vector.extract_strided_slice %801 {offsets = [0, 64], sizes = [2, 32], strides = [1, 1]} : vector<2x128xf32> to vector<2x32xf32>
    %811 = math.tanh %810 : vector<2x32xf32>
    %812 = arith.mulf %808, %795 : vector<2x32xf32>
    %813 = arith.mulf %807, %811 : vector<2x32xf32>
    %814 = arith.addf %812, %813 : vector<2x32xf32>
    %815 = math.tanh %814 : vector<2x32xf32>
    %816 = arith.mulf %809, %815 : vector<2x32xf32>
    %c12_185 = arith.constant 12 : index
    %c0_186 = arith.constant 0 : index
    %817 = vector.load %arg23[%c12_185, %c0_186] : memref<32x32xf32, #tpu.memory_space<vmem>>, vector<2x32xf32>
    tpu.vector_store %arg23[%c12_185, %c0_186], %816 {strides = array<i32>} : memref<32x32xf32, #tpu.memory_space<vmem>>, vector<2x32xf32>,
    %818 = vector.extract_strided_slice %681 {offsets = [28, 0], sizes = [2, 128], strides = [1, 1]} : vector<64x128xf32> to vector<2x128xf32>
    %cst_187 = arith.constant dense<0.000000e+00> : vector<2x128xf32>
    %819 = tpu.matmul %816, %682, %cst_187 {dimension_numbers = #tpu.dot_dimension_numbers<[1], [0], [0], [1], [0, 0, 1, 1], [], []>} : vector<2x32xf32>, vector<32x128xf32>, vector<2x128xf32> -> vector<2x128xf32>
    %820 = arith.addf %818, %819 : vector<2x128xf32>
    %821 = arith.negf %820 : vector<2x128xf32>
    %822 = math.exp %821 : vector<2x128xf32>
    %cst_188 = arith.constant 1.000000e+00 : f32
    %823 = vector.broadcast %cst_188 : f32 to vector<2x128xf32>
    %824 = arith.addf %823, %822 : vector<2x128xf32>
    %825 = arith.divf %823, %824 : vector<2x128xf32>
    %826 = vector.extract_strided_slice %825 {offsets = [0, 0], sizes = [2, 32], strides = [1, 1]} : vector<2x128xf32> to vector<2x32xf32>
    %827 = vector.extract_strided_slice %825 {offsets = [0, 32], sizes = [2, 32], strides = [1, 1]} : vector<2x128xf32> to vector<2x32xf32>
    %828 = vector.extract_strided_slice %825 {offsets = [0, 96], sizes = [2, 32], strides = [1, 1]} : vector<2x128xf32> to vector<2x32xf32>
    %829 = vector.extract_strided_slice %820 {offsets = [0, 64], sizes = [2, 32], strides = [1, 1]} : vector<2x128xf32> to vector<2x32xf32>
    %830 = math.tanh %829 : vector<2x32xf32>
    %831 = arith.mulf %827, %814 : vector<2x32xf32>
    %832 = arith.mulf %826, %830 : vector<2x32xf32>
    %833 = arith.addf %831, %832 : vector<2x32xf32>
    %834 = math.tanh %833 : vector<2x32xf32>
    %835 = arith.mulf %828, %834 : vector<2x32xf32>
    %c14 = arith.constant 14 : index
    %c0_189 = arith.constant 0 : index
    %836 = vector.load %arg23[%c14, %c0_189] : memref<32x32xf32, #tpu.memory_space<vmem>>, vector<2x32xf32>
    tpu.vector_store %arg23[%c14, %c0_189], %835 {strides = array<i32>} : memref<32x32xf32, #tpu.memory_space<vmem>>, vector<2x32xf32>,
    %837 = vector.extract_strided_slice %681 {offsets = [32, 0], sizes = [2, 128], strides = [1, 1]} : vector<64x128xf32> to vector<2x128xf32>
    %cst_190 = arith.constant dense<0.000000e+00> : vector<2x128xf32>
    %838 = tpu.matmul %835, %682, %cst_190 {dimension_numbers = #tpu.dot_dimension_numbers<[1], [0], [0], [1], [0, 0, 1, 1], [], []>} : vector<2x32xf32>, vector<32x128xf32>, vector<2x128xf32> -> vector<2x128xf32>
    %839 = arith.addf %837, %838 : vector<2x128xf32>
    %840 = arith.negf %839 : vector<2x128xf32>
    %841 = math.exp %840 : vector<2x128xf32>
    %cst_191 = arith.constant 1.000000e+00 : f32
    %842 = vector.broadcast %cst_191 : f32 to vector<2x128xf32>
    %843 = arith.addf %842, %841 : vector<2x128xf32>
    %844 = arith.divf %842, %843 : vector<2x128xf32>
    %845 = vector.extract_strided_slice %844 {offsets = [0, 0], sizes = [2, 32], strides = [1, 1]} : vector<2x128xf32> to vector<2x32xf32>
    %846 = vector.extract_strided_slice %844 {offsets = [0, 32], sizes = [2, 32], strides = [1, 1]} : vector<2x128xf32> to vector<2x32xf32>
    %847 = vector.extract_strided_slice %844 {offsets = [0, 96], sizes = [2, 32], strides = [1, 1]} : vector<2x128xf32> to vector<2x32xf32>
    %848 = vector.extract_strided_slice %839 {offsets = [0, 64], sizes = [2, 32], strides = [1, 1]} : vector<2x128xf32> to vector<2x32xf32>
    %849 = math.tanh %848 : vector<2x32xf32>
    %850 = arith.mulf %846, %833 : vector<2x32xf32>
    %851 = arith.mulf %845, %849 : vector<2x32xf32>
    %852 = arith.addf %850, %851 : vector<2x32xf32>
    %853 = math.tanh %852 : vector<2x32xf32>
    %854 = arith.mulf %847, %853 : vector<2x32xf32>
    %c16_192 = arith.constant 16 : index
    %c0_193 = arith.constant 0 : index
    %855 = vector.load %arg23[%c16_192, %c0_193] : memref<32x32xf32, #tpu.memory_space<vmem>>, vector<2x32xf32>
    tpu.vector_store %arg23[%c16_192, %c0_193], %854 {strides = array<i32>} : memref<32x32xf32, #tpu.memory_space<vmem>>, vector<2x32xf32>,
    %856 = vector.extract_strided_slice %681 {offsets = [36, 0], sizes = [2, 128], strides = [1, 1]} : vector<64x128xf32> to vector<2x128xf32>
    %cst_194 = arith.constant dense<0.000000e+00> : vector<2x128xf32>
    %857 = tpu.matmul %854, %682, %cst_194 {dimension_numbers = #tpu.dot_dimension_numbers<[1], [0], [0], [1], [0, 0, 1, 1], [], []>} : vector<2x32xf32>, vector<32x128xf32>, vector<2x128xf32> -> vector<2x128xf32>
    %858 = arith.addf %856, %857 : vector<2x128xf32>
    %859 = arith.negf %858 : vector<2x128xf32>
    %860 = math.exp %859 : vector<2x128xf32>
    %cst_195 = arith.constant 1.000000e+00 : f32
    %861 = vector.broadcast %cst_195 : f32 to vector<2x128xf32>
    %862 = arith.addf %861, %860 : vector<2x128xf32>
    %863 = arith.divf %861, %862 : vector<2x128xf32>
    %864 = vector.extract_strided_slice %863 {offsets = [0, 0], sizes = [2, 32], strides = [1, 1]} : vector<2x128xf32> to vector<2x32xf32>
    %865 = vector.extract_strided_slice %863 {offsets = [0, 32], sizes = [2, 32], strides = [1, 1]} : vector<2x128xf32> to vector<2x32xf32>
    %866 = vector.extract_strided_slice %863 {offsets = [0, 96], sizes = [2, 32], strides = [1, 1]} : vector<2x128xf32> to vector<2x32xf32>
    %867 = vector.extract_strided_slice %858 {offsets = [0, 64], sizes = [2, 32], strides = [1, 1]} : vector<2x128xf32> to vector<2x32xf32>
    %868 = math.tanh %867 : vector<2x32xf32>
    %869 = arith.mulf %865, %852 : vector<2x32xf32>
    %870 = arith.mulf %864, %868 : vector<2x32xf32>
    %871 = arith.addf %869, %870 : vector<2x32xf32>
    %872 = math.tanh %871 : vector<2x32xf32>
    %873 = arith.mulf %866, %872 : vector<2x32xf32>
    %c18 = arith.constant 18 : index
    %c0_196 = arith.constant 0 : index
    %874 = vector.load %arg23[%c18, %c0_196] : memref<32x32xf32, #tpu.memory_space<vmem>>, vector<2x32xf32>
    tpu.vector_store %arg23[%c18, %c0_196], %873 {strides = array<i32>} : memref<32x32xf32, #tpu.memory_space<vmem>>, vector<2x32xf32>,
    %875 = vector.extract_strided_slice %681 {offsets = [40, 0], sizes = [2, 128], strides = [1, 1]} : vector<64x128xf32> to vector<2x128xf32>
    %cst_197 = arith.constant dense<0.000000e+00> : vector<2x128xf32>
    %876 = tpu.matmul %873, %682, %cst_197 {dimension_numbers = #tpu.dot_dimension_numbers<[1], [0], [0], [1], [0, 0, 1, 1], [], []>} : vector<2x32xf32>, vector<32x128xf32>, vector<2x128xf32> -> vector<2x128xf32>
    %877 = arith.addf %875, %876 : vector<2x128xf32>
    %878 = arith.negf %877 : vector<2x128xf32>
    %879 = math.exp %878 : vector<2x128xf32>
    %cst_198 = arith.constant 1.000000e+00 : f32
    %880 = vector.broadcast %cst_198 : f32 to vector<2x128xf32>
    %881 = arith.addf %880, %879 : vector<2x128xf32>
    %882 = arith.divf %880, %881 : vector<2x128xf32>
    %883 = vector.extract_strided_slice %882 {offsets = [0, 0], sizes = [2, 32], strides = [1, 1]} : vector<2x128xf32> to vector<2x32xf32>
    %884 = vector.extract_strided_slice %882 {offsets = [0, 32], sizes = [2, 32], strides = [1, 1]} : vector<2x128xf32> to vector<2x32xf32>
    %885 = vector.extract_strided_slice %882 {offsets = [0, 96], sizes = [2, 32], strides = [1, 1]} : vector<2x128xf32> to vector<2x32xf32>
    %886 = vector.extract_strided_slice %877 {offsets = [0, 64], sizes = [2, 32], strides = [1, 1]} : vector<2x128xf32> to vector<2x32xf32>
    %887 = math.tanh %886 : vector<2x32xf32>
    %888 = arith.mulf %884, %871 : vector<2x32xf32>
    %889 = arith.mulf %883, %887 : vector<2x32xf32>
    %890 = arith.addf %888, %889 : vector<2x32xf32>
    %891 = math.tanh %890 : vector<2x32xf32>
    %892 = arith.mulf %885, %891 : vector<2x32xf32>
    %c20_199 = arith.constant 20 : index
    %c0_200 = arith.constant 0 : index
    %893 = vector.load %arg23[%c20_199, %c0_200] : memref<32x32xf32, #tpu.memory_space<vmem>>, vector<2x32xf32>
    tpu.vector_store %arg23[%c20_199, %c0_200], %892 {strides = array<i32>} : memref<32x32xf32, #tpu.memory_space<vmem>>, vector<2x32xf32>,
    %894 = vector.extract_strided_slice %681 {offsets = [44, 0], sizes = [2, 128], strides = [1, 1]} : vector<64x128xf32> to vector<2x128xf32>
    %cst_201 = arith.constant dense<0.000000e+00> : vector<2x128xf32>
    %895 = tpu.matmul %892, %682, %cst_201 {dimension_numbers = #tpu.dot_dimension_numbers<[1], [0], [0], [1], [0, 0, 1, 1], [], []>} : vector<2x32xf32>, vector<32x128xf32>, vector<2x128xf32> -> vector<2x128xf32>
    %896 = arith.addf %894, %895 : vector<2x128xf32>
    %897 = arith.negf %896 : vector<2x128xf32>
    %898 = math.exp %897 : vector<2x128xf32>
    %cst_202 = arith.constant 1.000000e+00 : f32
    %899 = vector.broadcast %cst_202 : f32 to vector<2x128xf32>
    %900 = arith.addf %899, %898 : vector<2x128xf32>
    %901 = arith.divf %899, %900 : vector<2x128xf32>
    %902 = vector.extract_strided_slice %901 {offsets = [0, 0], sizes = [2, 32], strides = [1, 1]} : vector<2x128xf32> to vector<2x32xf32>
    %903 = vector.extract_strided_slice %901 {offsets = [0, 32], sizes = [2, 32], strides = [1, 1]} : vector<2x128xf32> to vector<2x32xf32>
    %904 = vector.extract_strided_slice %901 {offsets = [0, 96], sizes = [2, 32], strides = [1, 1]} : vector<2x128xf32> to vector<2x32xf32>
    %905 = vector.extract_strided_slice %896 {offsets = [0, 64], sizes = [2, 32], strides = [1, 1]} : vector<2x128xf32> to vector<2x32xf32>
    %906 = math.tanh %905 : vector<2x32xf32>
    %907 = arith.mulf %903, %890 : vector<2x32xf32>
    %908 = arith.mulf %902, %906 : vector<2x32xf32>
    %909 = arith.addf %907, %908 : vector<2x32xf32>
    %910 = math.tanh %909 : vector<2x32xf32>
    %911 = arith.mulf %904, %910 : vector<2x32xf32>
    %c22 = arith.constant 22 : index
    %c0_203 = arith.constant 0 : index
    %912 = vector.load %arg23[%c22, %c0_203] : memref<32x32xf32, #tpu.memory_space<vmem>>, vector<2x32xf32>
    tpu.vector_store %arg23[%c22, %c0_203], %911 {strides = array<i32>} : memref<32x32xf32, #tpu.memory_space<vmem>>, vector<2x32xf32>,
    %913 = vector.extract_strided_slice %681 {offsets = [48, 0], sizes = [2, 128], strides = [1, 1]} : vector<64x128xf32> to vector<2x128xf32>
    %cst_204 = arith.constant dense<0.000000e+00> : vector<2x128xf32>
    %914 = tpu.matmul %911, %682, %cst_204 {dimension_numbers = #tpu.dot_dimension_numbers<[1], [0], [0], [1], [0, 0, 1, 1], [], []>} : vector<2x32xf32>, vector<32x128xf32>, vector<2x128xf32> -> vector<2x128xf32>
    %915 = arith.addf %913, %914 : vector<2x128xf32>
    %916 = arith.negf %915 : vector<2x128xf32>
    %917 = math.exp %916 : vector<2x128xf32>
    %cst_205 = arith.constant 1.000000e+00 : f32
    %918 = vector.broadcast %cst_205 : f32 to vector<2x128xf32>
    %919 = arith.addf %918, %917 : vector<2x128xf32>
    %920 = arith.divf %918, %919 : vector<2x128xf32>
    %921 = vector.extract_strided_slice %920 {offsets = [0, 0], sizes = [2, 32], strides = [1, 1]} : vector<2x128xf32> to vector<2x32xf32>
    %922 = vector.extract_strided_slice %920 {offsets = [0, 32], sizes = [2, 32], strides = [1, 1]} : vector<2x128xf32> to vector<2x32xf32>
    %923 = vector.extract_strided_slice %920 {offsets = [0, 96], sizes = [2, 32], strides = [1, 1]} : vector<2x128xf32> to vector<2x32xf32>
    %924 = vector.extract_strided_slice %915 {offsets = [0, 64], sizes = [2, 32], strides = [1, 1]} : vector<2x128xf32> to vector<2x32xf32>
    %925 = math.tanh %924 : vector<2x32xf32>
    %926 = arith.mulf %922, %909 : vector<2x32xf32>
    %927 = arith.mulf %921, %925 : vector<2x32xf32>
    %928 = arith.addf %926, %927 : vector<2x32xf32>
    %929 = math.tanh %928 : vector<2x32xf32>
    %930 = arith.mulf %923, %929 : vector<2x32xf32>
    %c24_206 = arith.constant 24 : index
    %c0_207 = arith.constant 0 : index
    %931 = vector.load %arg23[%c24_206, %c0_207] : memref<32x32xf32, #tpu.memory_space<vmem>>, vector<2x32xf32>
    tpu.vector_store %arg23[%c24_206, %c0_207], %930 {strides = array<i32>} : memref<32x32xf32, #tpu.memory_space<vmem>>, vector<2x32xf32>,
    %932 = vector.extract_strided_slice %681 {offsets = [52, 0], sizes = [2, 128], strides = [1, 1]} : vector<64x128xf32> to vector<2x128xf32>
    %cst_208 = arith.constant dense<0.000000e+00> : vector<2x128xf32>
    %933 = tpu.matmul %930, %682, %cst_208 {dimension_numbers = #tpu.dot_dimension_numbers<[1], [0], [0], [1], [0, 0, 1, 1], [], []>} : vector<2x32xf32>, vector<32x128xf32>, vector<2x128xf32> -> vector<2x128xf32>
    %934 = arith.addf %932, %933 : vector<2x128xf32>
    %935 = arith.negf %934 : vector<2x128xf32>
    %936 = math.exp %935 : vector<2x128xf32>
    %cst_209 = arith.constant 1.000000e+00 : f32
    %937 = vector.broadcast %cst_209 : f32 to vector<2x128xf32>
    %938 = arith.addf %937, %936 : vector<2x128xf32>
    %939 = arith.divf %937, %938 : vector<2x128xf32>
    %940 = vector.extract_strided_slice %939 {offsets = [0, 0], sizes = [2, 32], strides = [1, 1]} : vector<2x128xf32> to vector<2x32xf32>
    %941 = vector.extract_strided_slice %939 {offsets = [0, 32], sizes = [2, 32], strides = [1, 1]} : vector<2x128xf32> to vector<2x32xf32>
    %942 = vector.extract_strided_slice %939 {offsets = [0, 96], sizes = [2, 32], strides = [1, 1]} : vector<2x128xf32> to vector<2x32xf32>
    %943 = vector.extract_strided_slice %934 {offsets = [0, 64], sizes = [2, 32], strides = [1, 1]} : vector<2x128xf32> to vector<2x32xf32>
    %944 = math.tanh %943 : vector<2x32xf32>
    %945 = arith.mulf %941, %928 : vector<2x32xf32>
    %946 = arith.mulf %940, %944 : vector<2x32xf32>
    %947 = arith.addf %945, %946 : vector<2x32xf32>
    %948 = math.tanh %947 : vector<2x32xf32>
    %949 = arith.mulf %942, %948 : vector<2x32xf32>
    %c26 = arith.constant 26 : index
    %c0_210 = arith.constant 0 : index
    %950 = vector.load %arg23[%c26, %c0_210] : memref<32x32xf32, #tpu.memory_space<vmem>>, vector<2x32xf32>
    tpu.vector_store %arg23[%c26, %c0_210], %949 {strides = array<i32>} : memref<32x32xf32, #tpu.memory_space<vmem>>, vector<2x32xf32>,
    %951 = vector.extract_strided_slice %681 {offsets = [56, 0], sizes = [2, 128], strides = [1, 1]} : vector<64x128xf32> to vector<2x128xf32>
    %cst_211 = arith.constant dense<0.000000e+00> : vector<2x128xf32>
    %952 = tpu.matmul %949, %682, %cst_211 {dimension_numbers = #tpu.dot_dimension_numbers<[1], [0], [0], [1], [0, 0, 1, 1], [], []>} : vector<2x32xf32>, vector<32x128xf32>, vector<2x128xf32> -> vector<2x128xf32>
    %953 = arith.addf %951, %952 : vector<2x128xf32>
    %954 = arith.negf %953 : vector<2x128xf32>
    %955 = math.exp %954 : vector<2x128xf32>
    %cst_212 = arith.constant 1.000000e+00 : f32
    %956 = vector.broadcast %cst_212 : f32 to vector<2x128xf32>
    %957 = arith.addf %956, %955 : vector<2x128xf32>
    %958 = arith.divf %956, %957 : vector<2x128xf32>
    %959 = vector.extract_strided_slice %958 {offsets = [0, 0], sizes = [2, 32], strides = [1, 1]} : vector<2x128xf32> to vector<2x32xf32>
    %960 = vector.extract_strided_slice %958 {offsets = [0, 32], sizes = [2, 32], strides = [1, 1]} : vector<2x128xf32> to vector<2x32xf32>
    %961 = vector.extract_strided_slice %958 {offsets = [0, 96], sizes = [2, 32], strides = [1, 1]} : vector<2x128xf32> to vector<2x32xf32>
    %962 = vector.extract_strided_slice %953 {offsets = [0, 64], sizes = [2, 32], strides = [1, 1]} : vector<2x128xf32> to vector<2x32xf32>
    %963 = math.tanh %962 : vector<2x32xf32>
    %964 = arith.mulf %960, %947 : vector<2x32xf32>
    %965 = arith.mulf %959, %963 : vector<2x32xf32>
    %966 = arith.addf %964, %965 : vector<2x32xf32>
    %967 = math.tanh %966 : vector<2x32xf32>
    %968 = arith.mulf %961, %967 : vector<2x32xf32>
    %c28_213 = arith.constant 28 : index
    %c0_214 = arith.constant 0 : index
    %969 = vector.load %arg23[%c28_213, %c0_214] : memref<32x32xf32, #tpu.memory_space<vmem>>, vector<2x32xf32>
    tpu.vector_store %arg23[%c28_213, %c0_214], %968 {strides = array<i32>} : memref<32x32xf32, #tpu.memory_space<vmem>>, vector<2x32xf32>,
    %970 = vector.extract_strided_slice %681 {offsets = [60, 0], sizes = [2, 128], strides = [1, 1]} : vector<64x128xf32> to vector<2x128xf32>
    %cst_215 = arith.constant dense<0.000000e+00> : vector<2x128xf32>
    %971 = tpu.matmul %968, %682, %cst_215 {dimension_numbers = #tpu.dot_dimension_numbers<[1], [0], [0], [1], [0, 0, 1, 1], [], []>} : vector<2x32xf32>, vector<32x128xf32>, vector<2x128xf32> -> vector<2x128xf32>
    %972 = arith.addf %970, %971 : vector<2x128xf32>
    %973 = arith.negf %972 : vector<2x128xf32>
    %974 = math.exp %973 : vector<2x128xf32>
    %cst_216 = arith.constant 1.000000e+00 : f32
    %975 = vector.broadcast %cst_216 : f32 to vector<2x128xf32>
    %976 = arith.addf %975, %974 : vector<2x128xf32>
    %977 = arith.divf %975, %976 : vector<2x128xf32>
    %978 = vector.extract_strided_slice %977 {offsets = [0, 0], sizes = [2, 32], strides = [1, 1]} : vector<2x128xf32> to vector<2x32xf32>
    %979 = vector.extract_strided_slice %977 {offsets = [0, 32], sizes = [2, 32], strides = [1, 1]} : vector<2x128xf32> to vector<2x32xf32>
    %980 = vector.extract_strided_slice %977 {offsets = [0, 96], sizes = [2, 32], strides = [1, 1]} : vector<2x128xf32> to vector<2x32xf32>
    %981 = vector.extract_strided_slice %972 {offsets = [0, 64], sizes = [2, 32], strides = [1, 1]} : vector<2x128xf32> to vector<2x32xf32>
    %982 = math.tanh %981 : vector<2x32xf32>
    %983 = arith.mulf %979, %966 : vector<2x32xf32>
    %984 = arith.mulf %978, %982 : vector<2x32xf32>
    %985 = arith.addf %983, %984 : vector<2x32xf32>
    %986 = math.tanh %985 : vector<2x32xf32>
    %987 = arith.mulf %980, %986 : vector<2x32xf32>
    %c30 = arith.constant 30 : index
    %c0_217 = arith.constant 0 : index
    %988 = vector.load %arg23[%c30, %c0_217] : memref<32x32xf32, #tpu.memory_space<vmem>>, vector<2x32xf32>
    tpu.vector_store %arg23[%c30, %c0_217], %987 {strides = array<i32>} : memref<32x32xf32, #tpu.memory_space<vmem>>, vector<2x32xf32>,
    %c0_218 = arith.constant 0 : index
    %c0_219 = arith.constant 0 : index
    %989 = vector.load %arg23[%c0_218, %c0_219] : memref<32x32xf32, #tpu.memory_space<vmem>>, vector<32x32xf32>
    %c0_220 = arith.constant 0 : index
    %c0_221 = arith.constant 0 : index
    %990 = vector.load %arg10[%c0_220, %c0_221] : memref<32x128xf32, #tpu.memory_space<vmem>>, vector<32x128xf32>
    %cst_222 = arith.constant dense<0.000000e+00> : vector<32x128xf32>
    %991 = tpu.matmul %989, %990, %cst_222 {dimension_numbers = #tpu.dot_dimension_numbers<[1], [0], [0], [1], [0, 0, 1, 1], [], []>} : vector<32x32xf32>, vector<32x128xf32>, vector<32x128xf32> -> vector<32x128xf32>
    %c0_223 = arith.constant 0 : index
    %c0_224 = arith.constant 0 : index
    %992 = vector.load %arg12[%c0_223, %c0_224] : memref<1x128xf32, #tpu.memory_space<vmem>>, vector<1x128xf32>
    %993 = vector.broadcast %992 : vector<1x128xf32> to vector<32x128xf32>
    %994 = arith.addf %991, %993 : vector<32x128xf32>
    %c0_225 = arith.constant 0 : index
    %c0_226 = arith.constant 0 : index
    %995 = vector.load %arg11[%c0_225, %c0_226] : memref<32x128xf32, #tpu.memory_space<vmem>>, vector<32x128xf32>
    %cst_227 = arith.constant 0.000000e+00 : f32
    %996 = vector.broadcast %cst_227 : f32 to vector<2x32xf32>
    %cst_228 = arith.constant 0.000000e+00 : f32
    %997 = vector.broadcast %cst_228 : f32 to vector<2x32xf32>
    %998 = vector.extract_strided_slice %994 {offsets = [0, 0], sizes = [2, 128], strides = [1, 1]} : vector<32x128xf32> to vector<2x128xf32>
    %cst_229 = arith.constant dense<0.000000e+00> : vector<2x128xf32>
    %999 = tpu.matmul %996, %995, %cst_229 {dimension_numbers = #tpu.dot_dimension_numbers<[1], [0], [0], [1], [0, 0, 1, 1], [], []>} : vector<2x32xf32>, vector<32x128xf32>, vector<2x128xf32> -> vector<2x128xf32>
    %1000 = arith.addf %998, %999 : vector<2x128xf32>
    %1001 = arith.negf %1000 : vector<2x128xf32>
    %1002 = math.exp %1001 : vector<2x128xf32>
    %cst_230 = arith.constant 1.000000e+00 : f32
    %1003 = vector.broadcast %cst_230 : f32 to vector<2x128xf32>
    %1004 = arith.addf %1003, %1002 : vector<2x128xf32>
    %1005 = arith.divf %1003, %1004 : vector<2x128xf32>
    %1006 = vector.extract_strided_slice %1005 {offsets = [0, 0], sizes = [2, 32], strides = [1, 1]} : vector<2x128xf32> to vector<2x32xf32>
    %1007 = vector.extract_strided_slice %1005 {offsets = [0, 32], sizes = [2, 32], strides = [1, 1]} : vector<2x128xf32> to vector<2x32xf32>
    %1008 = vector.extract_strided_slice %1005 {offsets = [0, 96], sizes = [2, 32], strides = [1, 1]} : vector<2x128xf32> to vector<2x32xf32>
    %1009 = vector.extract_strided_slice %1000 {offsets = [0, 64], sizes = [2, 32], strides = [1, 1]} : vector<2x128xf32> to vector<2x32xf32>
    %1010 = math.tanh %1009 : vector<2x32xf32>
    %1011 = arith.mulf %1007, %997 : vector<2x32xf32>
    %1012 = arith.mulf %1006, %1010 : vector<2x32xf32>
    %1013 = arith.addf %1011, %1012 : vector<2x32xf32>
    %1014 = math.tanh %1013 : vector<2x32xf32>
    %1015 = arith.mulf %1008, %1014 : vector<2x32xf32>
    %1016 = vector.extract_strided_slice %1015 {offsets = [0, 0], sizes = [1, 32], strides = [1, 1]} : vector<2x32xf32> to vector<1x32xf32>
    %c0_231 = arith.constant 0 : index
    %c0_232 = arith.constant 0 : index
    %1017 = vector.load %arg24[%c0_231, %c0_232] : memref<32x32xf32, #tpu.memory_space<vmem>>, vector<1x32xf32>
    tpu.vector_store %arg24[%c0_231, %c0_232], %1016 {strides = array<i32>} : memref<32x32xf32, #tpu.memory_space<vmem>>, vector<1x32xf32>,
    %1018 = vector.extract_strided_slice %1015 {offsets = [1, 0], sizes = [1, 32], strides = [1, 1]} : vector<2x32xf32> to vector<1x32xf32>
    %c16_233 = arith.constant 16 : index
    %c0_234 = arith.constant 0 : index
    %1019 = vector.load %arg24[%c16_233, %c0_234] : memref<32x32xf32, #tpu.memory_space<vmem>>, vector<1x32xf32>
    tpu.vector_store %arg24[%c16_233, %c0_234], %1018 {strides = array<i32>} : memref<32x32xf32, #tpu.memory_space<vmem>>, vector<1x32xf32>,
    %1020 = vector.extract_strided_slice %994 {offsets = [2, 0], sizes = [2, 128], strides = [1, 1]} : vector<32x128xf32> to vector<2x128xf32>
    %cst_235 = arith.constant dense<0.000000e+00> : vector<2x128xf32>
    %1021 = tpu.matmul %1015, %995, %cst_235 {dimension_numbers = #tpu.dot_dimension_numbers<[1], [0], [0], [1], [0, 0, 1, 1], [], []>} : vector<2x32xf32>, vector<32x128xf32>, vector<2x128xf32> -> vector<2x128xf32>
    %1022 = arith.addf %1020, %1021 : vector<2x128xf32>
    %1023 = arith.negf %1022 : vector<2x128xf32>
    %1024 = math.exp %1023 : vector<2x128xf32>
    %cst_236 = arith.constant 1.000000e+00 : f32
    %1025 = vector.broadcast %cst_236 : f32 to vector<2x128xf32>
    %1026 = arith.addf %1025, %1024 : vector<2x128xf32>
    %1027 = arith.divf %1025, %1026 : vector<2x128xf32>
    %1028 = vector.extract_strided_slice %1027 {offsets = [0, 0], sizes = [2, 32], strides = [1, 1]} : vector<2x128xf32> to vector<2x32xf32>
    %1029 = vector.extract_strided_slice %1027 {offsets = [0, 32], sizes = [2, 32], strides = [1, 1]} : vector<2x128xf32> to vector<2x32xf32>
    %1030 = vector.extract_strided_slice %1027 {offsets = [0, 96], sizes = [2, 32], strides = [1, 1]} : vector<2x128xf32> to vector<2x32xf32>
    %1031 = vector.extract_strided_slice %1022 {offsets = [0, 64], sizes = [2, 32], strides = [1, 1]} : vector<2x128xf32> to vector<2x32xf32>
    %1032 = math.tanh %1031 : vector<2x32xf32>
    %1033 = arith.mulf %1029, %1013 : vector<2x32xf32>
    %1034 = arith.mulf %1028, %1032 : vector<2x32xf32>
    %1035 = arith.addf %1033, %1034 : vector<2x32xf32>
    %1036 = math.tanh %1035 : vector<2x32xf32>
    %1037 = arith.mulf %1030, %1036 : vector<2x32xf32>
    %1038 = vector.extract_strided_slice %1037 {offsets = [0, 0], sizes = [1, 32], strides = [1, 1]} : vector<2x32xf32> to vector<1x32xf32>
    %c1 = arith.constant 1 : index
    %c0_237 = arith.constant 0 : index
    %1039 = vector.load %arg24[%c1, %c0_237] : memref<32x32xf32, #tpu.memory_space<vmem>>, vector<1x32xf32>
    tpu.vector_store %arg24[%c1, %c0_237], %1038 {strides = array<i32>} : memref<32x32xf32, #tpu.memory_space<vmem>>, vector<1x32xf32>,
    %1040 = vector.extract_strided_slice %1037 {offsets = [1, 0], sizes = [1, 32], strides = [1, 1]} : vector<2x32xf32> to vector<1x32xf32>
    %c17 = arith.constant 17 : index
    %c0_238 = arith.constant 0 : index
    %1041 = vector.load %arg24[%c17, %c0_238] : memref<32x32xf32, #tpu.memory_space<vmem>>, vector<1x32xf32>
    tpu.vector_store %arg24[%c17, %c0_238], %1040 {strides = array<i32>} : memref<32x32xf32, #tpu.memory_space<vmem>>, vector<1x32xf32>,
    %1042 = vector.extract_strided_slice %994 {offsets = [4, 0], sizes = [2, 128], strides = [1, 1]} : vector<32x128xf32> to vector<2x128xf32>
    %cst_239 = arith.constant dense<0.000000e+00> : vector<2x128xf32>
    %1043 = tpu.matmul %1037, %995, %cst_239 {dimension_numbers = #tpu.dot_dimension_numbers<[1], [0], [0], [1], [0, 0, 1, 1], [], []>} : vector<2x32xf32>, vector<32x128xf32>, vector<2x128xf32> -> vector<2x128xf32>
    %1044 = arith.addf %1042, %1043 : vector<2x128xf32>
    %1045 = arith.negf %1044 : vector<2x128xf32>
    %1046 = math.exp %1045 : vector<2x128xf32>
    %cst_240 = arith.constant 1.000000e+00 : f32
    %1047 = vector.broadcast %cst_240 : f32 to vector<2x128xf32>
    %1048 = arith.addf %1047, %1046 : vector<2x128xf32>
    %1049 = arith.divf %1047, %1048 : vector<2x128xf32>
    %1050 = vector.extract_strided_slice %1049 {offsets = [0, 0], sizes = [2, 32], strides = [1, 1]} : vector<2x128xf32> to vector<2x32xf32>
    %1051 = vector.extract_strided_slice %1049 {offsets = [0, 32], sizes = [2, 32], strides = [1, 1]} : vector<2x128xf32> to vector<2x32xf32>
    %1052 = vector.extract_strided_slice %1049 {offsets = [0, 96], sizes = [2, 32], strides = [1, 1]} : vector<2x128xf32> to vector<2x32xf32>
    %1053 = vector.extract_strided_slice %1044 {offsets = [0, 64], sizes = [2, 32], strides = [1, 1]} : vector<2x128xf32> to vector<2x32xf32>
    %1054 = math.tanh %1053 : vector<2x32xf32>
    %1055 = arith.mulf %1051, %1035 : vector<2x32xf32>
    %1056 = arith.mulf %1050, %1054 : vector<2x32xf32>
    %1057 = arith.addf %1055, %1056 : vector<2x32xf32>
    %1058 = math.tanh %1057 : vector<2x32xf32>
    %1059 = arith.mulf %1052, %1058 : vector<2x32xf32>
    %1060 = vector.extract_strided_slice %1059 {offsets = [0, 0], sizes = [1, 32], strides = [1, 1]} : vector<2x32xf32> to vector<1x32xf32>
    %c2_241 = arith.constant 2 : index
    %c0_242 = arith.constant 0 : index
    %1061 = vector.load %arg24[%c2_241, %c0_242] : memref<32x32xf32, #tpu.memory_space<vmem>>, vector<1x32xf32>
    tpu.vector_store %arg24[%c2_241, %c0_242], %1060 {strides = array<i32>} : memref<32x32xf32, #tpu.memory_space<vmem>>, vector<1x32xf32>,
    %1062 = vector.extract_strided_slice %1059 {offsets = [1, 0], sizes = [1, 32], strides = [1, 1]} : vector<2x32xf32> to vector<1x32xf32>
    %c18_243 = arith.constant 18 : index
    %c0_244 = arith.constant 0 : index
    %1063 = vector.load %arg24[%c18_243, %c0_244] : memref<32x32xf32, #tpu.memory_space<vmem>>, vector<1x32xf32>
    tpu.vector_store %arg24[%c18_243, %c0_244], %1062 {strides = array<i32>} : memref<32x32xf32, #tpu.memory_space<vmem>>, vector<1x32xf32>,
    %1064 = vector.extract_strided_slice %994 {offsets = [6, 0], sizes = [2, 128], strides = [1, 1]} : vector<32x128xf32> to vector<2x128xf32>
    %cst_245 = arith.constant dense<0.000000e+00> : vector<2x128xf32>
    %1065 = tpu.matmul %1059, %995, %cst_245 {dimension_numbers = #tpu.dot_dimension_numbers<[1], [0], [0], [1], [0, 0, 1, 1], [], []>} : vector<2x32xf32>, vector<32x128xf32>, vector<2x128xf32> -> vector<2x128xf32>
    %1066 = arith.addf %1064, %1065 : vector<2x128xf32>
    %1067 = arith.negf %1066 : vector<2x128xf32>
    %1068 = math.exp %1067 : vector<2x128xf32>
    %cst_246 = arith.constant 1.000000e+00 : f32
    %1069 = vector.broadcast %cst_246 : f32 to vector<2x128xf32>
    %1070 = arith.addf %1069, %1068 : vector<2x128xf32>
    %1071 = arith.divf %1069, %1070 : vector<2x128xf32>
    %1072 = vector.extract_strided_slice %1071 {offsets = [0, 0], sizes = [2, 32], strides = [1, 1]} : vector<2x128xf32> to vector<2x32xf32>
    %1073 = vector.extract_strided_slice %1071 {offsets = [0, 32], sizes = [2, 32], strides = [1, 1]} : vector<2x128xf32> to vector<2x32xf32>
    %1074 = vector.extract_strided_slice %1071 {offsets = [0, 96], sizes = [2, 32], strides = [1, 1]} : vector<2x128xf32> to vector<2x32xf32>
    %1075 = vector.extract_strided_slice %1066 {offsets = [0, 64], sizes = [2, 32], strides = [1, 1]} : vector<2x128xf32> to vector<2x32xf32>
    %1076 = math.tanh %1075 : vector<2x32xf32>
    %1077 = arith.mulf %1073, %1057 : vector<2x32xf32>
    %1078 = arith.mulf %1072, %1076 : vector<2x32xf32>
    %1079 = arith.addf %1077, %1078 : vector<2x32xf32>
    %1080 = math.tanh %1079 : vector<2x32xf32>
    %1081 = arith.mulf %1074, %1080 : vector<2x32xf32>
    %1082 = vector.extract_strided_slice %1081 {offsets = [0, 0], sizes = [1, 32], strides = [1, 1]} : vector<2x32xf32> to vector<1x32xf32>
    %c3 = arith.constant 3 : index
    %c0_247 = arith.constant 0 : index
    %1083 = vector.load %arg24[%c3, %c0_247] : memref<32x32xf32, #tpu.memory_space<vmem>>, vector<1x32xf32>
    tpu.vector_store %arg24[%c3, %c0_247], %1082 {strides = array<i32>} : memref<32x32xf32, #tpu.memory_space<vmem>>, vector<1x32xf32>,
    %1084 = vector.extract_strided_slice %1081 {offsets = [1, 0], sizes = [1, 32], strides = [1, 1]} : vector<2x32xf32> to vector<1x32xf32>
    %c19 = arith.constant 19 : index
    %c0_248 = arith.constant 0 : index
    %1085 = vector.load %arg24[%c19, %c0_248] : memref<32x32xf32, #tpu.memory_space<vmem>>, vector<1x32xf32>
    tpu.vector_store %arg24[%c19, %c0_248], %1084 {strides = array<i32>} : memref<32x32xf32, #tpu.memory_space<vmem>>, vector<1x32xf32>,
    %1086 = vector.extract_strided_slice %994 {offsets = [8, 0], sizes = [2, 128], strides = [1, 1]} : vector<32x128xf32> to vector<2x128xf32>
    %cst_249 = arith.constant dense<0.000000e+00> : vector<2x128xf32>
    %1087 = tpu.matmul %1081, %995, %cst_249 {dimension_numbers = #tpu.dot_dimension_numbers<[1], [0], [0], [1], [0, 0, 1, 1], [], []>} : vector<2x32xf32>, vector<32x128xf32>, vector<2x128xf32> -> vector<2x128xf32>
    %1088 = arith.addf %1086, %1087 : vector<2x128xf32>
    %1089 = arith.negf %1088 : vector<2x128xf32>
    %1090 = math.exp %1089 : vector<2x128xf32>
    %cst_250 = arith.constant 1.000000e+00 : f32
    %1091 = vector.broadcast %cst_250 : f32 to vector<2x128xf32>
    %1092 = arith.addf %1091, %1090 : vector<2x128xf32>
    %1093 = arith.divf %1091, %1092 : vector<2x128xf32>
    %1094 = vector.extract_strided_slice %1093 {offsets = [0, 0], sizes = [2, 32], strides = [1, 1]} : vector<2x128xf32> to vector<2x32xf32>
    %1095 = vector.extract_strided_slice %1093 {offsets = [0, 32], sizes = [2, 32], strides = [1, 1]} : vector<2x128xf32> to vector<2x32xf32>
    %1096 = vector.extract_strided_slice %1093 {offsets = [0, 96], sizes = [2, 32], strides = [1, 1]} : vector<2x128xf32> to vector<2x32xf32>
    %1097 = vector.extract_strided_slice %1088 {offsets = [0, 64], sizes = [2, 32], strides = [1, 1]} : vector<2x128xf32> to vector<2x32xf32>
    %1098 = math.tanh %1097 : vector<2x32xf32>
    %1099 = arith.mulf %1095, %1079 : vector<2x32xf32>
    %1100 = arith.mulf %1094, %1098 : vector<2x32xf32>
    %1101 = arith.addf %1099, %1100 : vector<2x32xf32>
    %1102 = math.tanh %1101 : vector<2x32xf32>
    %1103 = arith.mulf %1096, %1102 : vector<2x32xf32>
    %1104 = vector.extract_strided_slice %1103 {offsets = [0, 0], sizes = [1, 32], strides = [1, 1]} : vector<2x32xf32> to vector<1x32xf32>
    %c4_251 = arith.constant 4 : index
    %c0_252 = arith.constant 0 : index
    %1105 = vector.load %arg24[%c4_251, %c0_252] : memref<32x32xf32, #tpu.memory_space<vmem>>, vector<1x32xf32>
    tpu.vector_store %arg24[%c4_251, %c0_252], %1104 {strides = array<i32>} : memref<32x32xf32, #tpu.memory_space<vmem>>, vector<1x32xf32>,
    %1106 = vector.extract_strided_slice %1103 {offsets = [1, 0], sizes = [1, 32], strides = [1, 1]} : vector<2x32xf32> to vector<1x32xf32>
    %c20_253 = arith.constant 20 : index
    %c0_254 = arith.constant 0 : index
    %1107 = vector.load %arg24[%c20_253, %c0_254] : memref<32x32xf32, #tpu.memory_space<vmem>>, vector<1x32xf32>
    tpu.vector_store %arg24[%c20_253, %c0_254], %1106 {strides = array<i32>} : memref<32x32xf32, #tpu.memory_space<vmem>>, vector<1x32xf32>,
    %1108 = vector.extract_strided_slice %994 {offsets = [10, 0], sizes = [2, 128], strides = [1, 1]} : vector<32x128xf32> to vector<2x128xf32>
    %cst_255 = arith.constant dense<0.000000e+00> : vector<2x128xf32>
    %1109 = tpu.matmul %1103, %995, %cst_255 {dimension_numbers = #tpu.dot_dimension_numbers<[1], [0], [0], [1], [0, 0, 1, 1], [], []>} : vector<2x32xf32>, vector<32x128xf32>, vector<2x128xf32> -> vector<2x128xf32>
    %1110 = arith.addf %1108, %1109 : vector<2x128xf32>
    %1111 = arith.negf %1110 : vector<2x128xf32>
    %1112 = math.exp %1111 : vector<2x128xf32>
    %cst_256 = arith.constant 1.000000e+00 : f32
    %1113 = vector.broadcast %cst_256 : f32 to vector<2x128xf32>
    %1114 = arith.addf %1113, %1112 : vector<2x128xf32>
    %1115 = arith.divf %1113, %1114 : vector<2x128xf32>
    %1116 = vector.extract_strided_slice %1115 {offsets = [0, 0], sizes = [2, 32], strides = [1, 1]} : vector<2x128xf32> to vector<2x32xf32>
    %1117 = vector.extract_strided_slice %1115 {offsets = [0, 32], sizes = [2, 32], strides = [1, 1]} : vector<2x128xf32> to vector<2x32xf32>
    %1118 = vector.extract_strided_slice %1115 {offsets = [0, 96], sizes = [2, 32], strides = [1, 1]} : vector<2x128xf32> to vector<2x32xf32>
    %1119 = vector.extract_strided_slice %1110 {offsets = [0, 64], sizes = [2, 32], strides = [1, 1]} : vector<2x128xf32> to vector<2x32xf32>
    %1120 = math.tanh %1119 : vector<2x32xf32>
    %1121 = arith.mulf %1117, %1101 : vector<2x32xf32>
    %1122 = arith.mulf %1116, %1120 : vector<2x32xf32>
    %1123 = arith.addf %1121, %1122 : vector<2x32xf32>
    %1124 = math.tanh %1123 : vector<2x32xf32>
    %1125 = arith.mulf %1118, %1124 : vector<2x32xf32>
    %1126 = vector.extract_strided_slice %1125 {offsets = [0, 0], sizes = [1, 32], strides = [1, 1]} : vector<2x32xf32> to vector<1x32xf32>
    %c5 = arith.constant 5 : index
    %c0_257 = arith.constant 0 : index
    %1127 = vector.load %arg24[%c5, %c0_257] : memref<32x32xf32, #tpu.memory_space<vmem>>, vector<1x32xf32>
    tpu.vector_store %arg24[%c5, %c0_257], %1126 {strides = array<i32>} : memref<32x32xf32, #tpu.memory_space<vmem>>, vector<1x32xf32>,
    %1128 = vector.extract_strided_slice %1125 {offsets = [1, 0], sizes = [1, 32], strides = [1, 1]} : vector<2x32xf32> to vector<1x32xf32>
    %c21 = arith.constant 21 : index
    %c0_258 = arith.constant 0 : index
    %1129 = vector.load %arg24[%c21, %c0_258] : memref<32x32xf32, #tpu.memory_space<vmem>>, vector<1x32xf32>
    tpu.vector_store %arg24[%c21, %c0_258], %1128 {strides = array<i32>} : memref<32x32xf32, #tpu.memory_space<vmem>>, vector<1x32xf32>,
    %1130 = vector.extract_strided_slice %994 {offsets = [12, 0], sizes = [2, 128], strides = [1, 1]} : vector<32x128xf32> to vector<2x128xf32>
    %cst_259 = arith.constant dense<0.000000e+00> : vector<2x128xf32>
    %1131 = tpu.matmul %1125, %995, %cst_259 {dimension_numbers = #tpu.dot_dimension_numbers<[1], [0], [0], [1], [0, 0, 1, 1], [], []>} : vector<2x32xf32>, vector<32x128xf32>, vector<2x128xf32> -> vector<2x128xf32>
    %1132 = arith.addf %1130, %1131 : vector<2x128xf32>
    %1133 = arith.negf %1132 : vector<2x128xf32>
    %1134 = math.exp %1133 : vector<2x128xf32>
    %cst_260 = arith.constant 1.000000e+00 : f32
    %1135 = vector.broadcast %cst_260 : f32 to vector<2x128xf32>
    %1136 = arith.addf %1135, %1134 : vector<2x128xf32>
    %1137 = arith.divf %1135, %1136 : vector<2x128xf32>
    %1138 = vector.extract_strided_slice %1137 {offsets = [0, 0], sizes = [2, 32], strides = [1, 1]} : vector<2x128xf32> to vector<2x32xf32>
    %1139 = vector.extract_strided_slice %1137 {offsets = [0, 32], sizes = [2, 32], strides = [1, 1]} : vector<2x128xf32> to vector<2x32xf32>
    %1140 = vector.extract_strided_slice %1137 {offsets = [0, 96], sizes = [2, 32], strides = [1, 1]} : vector<2x128xf32> to vector<2x32xf32>
    %1141 = vector.extract_strided_slice %1132 {offsets = [0, 64], sizes = [2, 32], strides = [1, 1]} : vector<2x128xf32> to vector<2x32xf32>
    %1142 = math.tanh %1141 : vector<2x32xf32>
    %1143 = arith.mulf %1139, %1123 : vector<2x32xf32>
    %1144 = arith.mulf %1138, %1142 : vector<2x32xf32>
    %1145 = arith.addf %1143, %1144 : vector<2x32xf32>
    %1146 = math.tanh %1145 : vector<2x32xf32>
    %1147 = arith.mulf %1140, %1146 : vector<2x32xf32>
    %1148 = vector.extract_strided_slice %1147 {offsets = [0, 0], sizes = [1, 32], strides = [1, 1]} : vector<2x32xf32> to vector<1x32xf32>
    %c6_261 = arith.constant 6 : index
    %c0_262 = arith.constant 0 : index
    %1149 = vector.load %arg24[%c6_261, %c0_262] : memref<32x32xf32, #tpu.memory_space<vmem>>, vector<1x32xf32>
    tpu.vector_store %arg24[%c6_261, %c0_262], %1148 {strides = array<i32>} : memref<32x32xf32, #tpu.memory_space<vmem>>, vector<1x32xf32>,
    %1150 = vector.extract_strided_slice %1147 {offsets = [1, 0], sizes = [1, 32], strides = [1, 1]} : vector<2x32xf32> to vector<1x32xf32>
    %c22_263 = arith.constant 22 : index
    %c0_264 = arith.constant 0 : index
    %1151 = vector.load %arg24[%c22_263, %c0_264] : memref<32x32xf32, #tpu.memory_space<vmem>>, vector<1x32xf32>
    tpu.vector_store %arg24[%c22_263, %c0_264], %1150 {strides = array<i32>} : memref<32x32xf32, #tpu.memory_space<vmem>>, vector<1x32xf32>,
    %1152 = vector.extract_strided_slice %994 {offsets = [14, 0], sizes = [2, 128], strides = [1, 1]} : vector<32x128xf32> to vector<2x128xf32>
    %cst_265 = arith.constant dense<0.000000e+00> : vector<2x128xf32>
    %1153 = tpu.matmul %1147, %995, %cst_265 {dimension_numbers = #tpu.dot_dimension_numbers<[1], [0], [0], [1], [0, 0, 1, 1], [], []>} : vector<2x32xf32>, vector<32x128xf32>, vector<2x128xf32> -> vector<2x128xf32>
    %1154 = arith.addf %1152, %1153 : vector<2x128xf32>
    %1155 = arith.negf %1154 : vector<2x128xf32>
    %1156 = math.exp %1155 : vector<2x128xf32>
    %cst_266 = arith.constant 1.000000e+00 : f32
    %1157 = vector.broadcast %cst_266 : f32 to vector<2x128xf32>
    %1158 = arith.addf %1157, %1156 : vector<2x128xf32>
    %1159 = arith.divf %1157, %1158 : vector<2x128xf32>
    %1160 = vector.extract_strided_slice %1159 {offsets = [0, 0], sizes = [2, 32], strides = [1, 1]} : vector<2x128xf32> to vector<2x32xf32>
    %1161 = vector.extract_strided_slice %1159 {offsets = [0, 32], sizes = [2, 32], strides = [1, 1]} : vector<2x128xf32> to vector<2x32xf32>
    %1162 = vector.extract_strided_slice %1159 {offsets = [0, 96], sizes = [2, 32], strides = [1, 1]} : vector<2x128xf32> to vector<2x32xf32>
    %1163 = vector.extract_strided_slice %1154 {offsets = [0, 64], sizes = [2, 32], strides = [1, 1]} : vector<2x128xf32> to vector<2x32xf32>
    %1164 = math.tanh %1163 : vector<2x32xf32>
    %1165 = arith.mulf %1161, %1145 : vector<2x32xf32>
    %1166 = arith.mulf %1160, %1164 : vector<2x32xf32>
    %1167 = arith.addf %1165, %1166 : vector<2x32xf32>
    %1168 = math.tanh %1167 : vector<2x32xf32>
    %1169 = arith.mulf %1162, %1168 : vector<2x32xf32>
    %1170 = vector.extract_strided_slice %1169 {offsets = [0, 0], sizes = [1, 32], strides = [1, 1]} : vector<2x32xf32> to vector<1x32xf32>
    %c7 = arith.constant 7 : index
    %c0_267 = arith.constant 0 : index
    %1171 = vector.load %arg24[%c7, %c0_267] : memref<32x32xf32, #tpu.memory_space<vmem>>, vector<1x32xf32>
    tpu.vector_store %arg24[%c7, %c0_267], %1170 {strides = array<i32>} : memref<32x32xf32, #tpu.memory_space<vmem>>, vector<1x32xf32>,
    %1172 = vector.extract_strided_slice %1169 {offsets = [1, 0], sizes = [1, 32], strides = [1, 1]} : vector<2x32xf32> to vector<1x32xf32>
    %c23 = arith.constant 23 : index
    %c0_268 = arith.constant 0 : index
    %1173 = vector.load %arg24[%c23, %c0_268] : memref<32x32xf32, #tpu.memory_space<vmem>>, vector<1x32xf32>
    tpu.vector_store %arg24[%c23, %c0_268], %1172 {strides = array<i32>} : memref<32x32xf32, #tpu.memory_space<vmem>>, vector<1x32xf32>,
    %1174 = vector.extract_strided_slice %994 {offsets = [16, 0], sizes = [2, 128], strides = [1, 1]} : vector<32x128xf32> to vector<2x128xf32>
    %cst_269 = arith.constant dense<0.000000e+00> : vector<2x128xf32>
    %1175 = tpu.matmul %1169, %995, %cst_269 {dimension_numbers = #tpu.dot_dimension_numbers<[1], [0], [0], [1], [0, 0, 1, 1], [], []>} : vector<2x32xf32>, vector<32x128xf32>, vector<2x128xf32> -> vector<2x128xf32>
    %1176 = arith.addf %1174, %1175 : vector<2x128xf32>
    %1177 = arith.negf %1176 : vector<2x128xf32>
    %1178 = math.exp %1177 : vector<2x128xf32>
    %cst_270 = arith.constant 1.000000e+00 : f32
    %1179 = vector.broadcast %cst_270 : f32 to vector<2x128xf32>
    %1180 = arith.addf %1179, %1178 : vector<2x128xf32>
    %1181 = arith.divf %1179, %1180 : vector<2x128xf32>
    %1182 = vector.extract_strided_slice %1181 {offsets = [0, 0], sizes = [2, 32], strides = [1, 1]} : vector<2x128xf32> to vector<2x32xf32>
    %1183 = vector.extract_strided_slice %1181 {offsets = [0, 32], sizes = [2, 32], strides = [1, 1]} : vector<2x128xf32> to vector<2x32xf32>
    %1184 = vector.extract_strided_slice %1181 {offsets = [0, 96], sizes = [2, 32], strides = [1, 1]} : vector<2x128xf32> to vector<2x32xf32>
    %1185 = vector.extract_strided_slice %1176 {offsets = [0, 64], sizes = [2, 32], strides = [1, 1]} : vector<2x128xf32> to vector<2x32xf32>
    %1186 = math.tanh %1185 : vector<2x32xf32>
    %1187 = arith.mulf %1183, %1167 : vector<2x32xf32>
    %1188 = arith.mulf %1182, %1186 : vector<2x32xf32>
    %1189 = arith.addf %1187, %1188 : vector<2x32xf32>
    %1190 = math.tanh %1189 : vector<2x32xf32>
    %1191 = arith.mulf %1184, %1190 : vector<2x32xf32>
    %1192 = vector.extract_strided_slice %1191 {offsets = [0, 0], sizes = [1, 32], strides = [1, 1]} : vector<2x32xf32> to vector<1x32xf32>
    %c8_271 = arith.constant 8 : index
    %c0_272 = arith.constant 0 : index
    %1193 = vector.load %arg24[%c8_271, %c0_272] : memref<32x32xf32, #tpu.memory_space<vmem>>, vector<1x32xf32>
    tpu.vector_store %arg24[%c8_271, %c0_272], %1192 {strides = array<i32>} : memref<32x32xf32, #tpu.memory_space<vmem>>, vector<1x32xf32>,
    %1194 = vector.extract_strided_slice %1191 {offsets = [1, 0], sizes = [1, 32], strides = [1, 1]} : vector<2x32xf32> to vector<1x32xf32>
    %c24_273 = arith.constant 24 : index
    %c0_274 = arith.constant 0 : index
    %1195 = vector.load %arg24[%c24_273, %c0_274] : memref<32x32xf32, #tpu.memory_space<vmem>>, vector<1x32xf32>
    tpu.vector_store %arg24[%c24_273, %c0_274], %1194 {strides = array<i32>} : memref<32x32xf32, #tpu.memory_space<vmem>>, vector<1x32xf32>,
    %1196 = vector.extract_strided_slice %994 {offsets = [18, 0], sizes = [2, 128], strides = [1, 1]} : vector<32x128xf32> to vector<2x128xf32>
    %cst_275 = arith.constant dense<0.000000e+00> : vector<2x128xf32>
    %1197 = tpu.matmul %1191, %995, %cst_275 {dimension_numbers = #tpu.dot_dimension_numbers<[1], [0], [0], [1], [0, 0, 1, 1], [], []>} : vector<2x32xf32>, vector<32x128xf32>, vector<2x128xf32> -> vector<2x128xf32>
    %1198 = arith.addf %1196, %1197 : vector<2x128xf32>
    %1199 = arith.negf %1198 : vector<2x128xf32>
    %1200 = math.exp %1199 : vector<2x128xf32>
    %cst_276 = arith.constant 1.000000e+00 : f32
    %1201 = vector.broadcast %cst_276 : f32 to vector<2x128xf32>
    %1202 = arith.addf %1201, %1200 : vector<2x128xf32>
    %1203 = arith.divf %1201, %1202 : vector<2x128xf32>
    %1204 = vector.extract_strided_slice %1203 {offsets = [0, 0], sizes = [2, 32], strides = [1, 1]} : vector<2x128xf32> to vector<2x32xf32>
    %1205 = vector.extract_strided_slice %1203 {offsets = [0, 32], sizes = [2, 32], strides = [1, 1]} : vector<2x128xf32> to vector<2x32xf32>
    %1206 = vector.extract_strided_slice %1203 {offsets = [0, 96], sizes = [2, 32], strides = [1, 1]} : vector<2x128xf32> to vector<2x32xf32>
    %1207 = vector.extract_strided_slice %1198 {offsets = [0, 64], sizes = [2, 32], strides = [1, 1]} : vector<2x128xf32> to vector<2x32xf32>
    %1208 = math.tanh %1207 : vector<2x32xf32>
    %1209 = arith.mulf %1205, %1189 : vector<2x32xf32>
    %1210 = arith.mulf %1204, %1208 : vector<2x32xf32>
    %1211 = arith.addf %1209, %1210 : vector<2x32xf32>
    %1212 = math.tanh %1211 : vector<2x32xf32>
    %1213 = arith.mulf %1206, %1212 : vector<2x32xf32>
    %1214 = vector.extract_strided_slice %1213 {offsets = [0, 0], sizes = [1, 32], strides = [1, 1]} : vector<2x32xf32> to vector<1x32xf32>
    %c9 = arith.constant 9 : index
    %c0_277 = arith.constant 0 : index
    %1215 = vector.load %arg24[%c9, %c0_277] : memref<32x32xf32, #tpu.memory_space<vmem>>, vector<1x32xf32>
    tpu.vector_store %arg24[%c9, %c0_277], %1214 {strides = array<i32>} : memref<32x32xf32, #tpu.memory_space<vmem>>, vector<1x32xf32>,
    %1216 = vector.extract_strided_slice %1213 {offsets = [1, 0], sizes = [1, 32], strides = [1, 1]} : vector<2x32xf32> to vector<1x32xf32>
    %c25 = arith.constant 25 : index
    %c0_278 = arith.constant 0 : index
    %1217 = vector.load %arg24[%c25, %c0_278] : memref<32x32xf32, #tpu.memory_space<vmem>>, vector<1x32xf32>
    tpu.vector_store %arg24[%c25, %c0_278], %1216 {strides = array<i32>} : memref<32x32xf32, #tpu.memory_space<vmem>>, vector<1x32xf32>,
    %1218 = vector.extract_strided_slice %994 {offsets = [20, 0], sizes = [2, 128], strides = [1, 1]} : vector<32x128xf32> to vector<2x128xf32>
    %cst_279 = arith.constant dense<0.000000e+00> : vector<2x128xf32>
    %1219 = tpu.matmul %1213, %995, %cst_279 {dimension_numbers = #tpu.dot_dimension_numbers<[1], [0], [0], [1], [0, 0, 1, 1], [], []>} : vector<2x32xf32>, vector<32x128xf32>, vector<2x128xf32> -> vector<2x128xf32>
    %1220 = arith.addf %1218, %1219 : vector<2x128xf32>
    %1221 = arith.negf %1220 : vector<2x128xf32>
    %1222 = math.exp %1221 : vector<2x128xf32>
    %cst_280 = arith.constant 1.000000e+00 : f32
    %1223 = vector.broadcast %cst_280 : f32 to vector<2x128xf32>
    %1224 = arith.addf %1223, %1222 : vector<2x128xf32>
    %1225 = arith.divf %1223, %1224 : vector<2x128xf32>
    %1226 = vector.extract_strided_slice %1225 {offsets = [0, 0], sizes = [2, 32], strides = [1, 1]} : vector<2x128xf32> to vector<2x32xf32>
    %1227 = vector.extract_strided_slice %1225 {offsets = [0, 32], sizes = [2, 32], strides = [1, 1]} : vector<2x128xf32> to vector<2x32xf32>
    %1228 = vector.extract_strided_slice %1225 {offsets = [0, 96], sizes = [2, 32], strides = [1, 1]} : vector<2x128xf32> to vector<2x32xf32>
    %1229 = vector.extract_strided_slice %1220 {offsets = [0, 64], sizes = [2, 32], strides = [1, 1]} : vector<2x128xf32> to vector<2x32xf32>
    %1230 = math.tanh %1229 : vector<2x32xf32>
    %1231 = arith.mulf %1227, %1211 : vector<2x32xf32>
    %1232 = arith.mulf %1226, %1230 : vector<2x32xf32>
    %1233 = arith.addf %1231, %1232 : vector<2x32xf32>
    %1234 = math.tanh %1233 : vector<2x32xf32>
    %1235 = arith.mulf %1228, %1234 : vector<2x32xf32>
    %1236 = vector.extract_strided_slice %1235 {offsets = [0, 0], sizes = [1, 32], strides = [1, 1]} : vector<2x32xf32> to vector<1x32xf32>
    %c10_281 = arith.constant 10 : index
    %c0_282 = arith.constant 0 : index
    %1237 = vector.load %arg24[%c10_281, %c0_282] : memref<32x32xf32, #tpu.memory_space<vmem>>, vector<1x32xf32>
    tpu.vector_store %arg24[%c10_281, %c0_282], %1236 {strides = array<i32>} : memref<32x32xf32, #tpu.memory_space<vmem>>, vector<1x32xf32>,
    %1238 = vector.extract_strided_slice %1235 {offsets = [1, 0], sizes = [1, 32], strides = [1, 1]} : vector<2x32xf32> to vector<1x32xf32>
    %c26_283 = arith.constant 26 : index
    %c0_284 = arith.constant 0 : index
    %1239 = vector.load %arg24[%c26_283, %c0_284] : memref<32x32xf32, #tpu.memory_space<vmem>>, vector<1x32xf32>
    tpu.vector_store %arg24[%c26_283, %c0_284], %1238 {strides = array<i32>} : memref<32x32xf32, #tpu.memory_space<vmem>>, vector<1x32xf32>,
    %1240 = vector.extract_strided_slice %994 {offsets = [22, 0], sizes = [2, 128], strides = [1, 1]} : vector<32x128xf32> to vector<2x128xf32>
    %cst_285 = arith.constant dense<0.000000e+00> : vector<2x128xf32>
    %1241 = tpu.matmul %1235, %995, %cst_285 {dimension_numbers = #tpu.dot_dimension_numbers<[1], [0], [0], [1], [0, 0, 1, 1], [], []>} : vector<2x32xf32>, vector<32x128xf32>, vector<2x128xf32> -> vector<2x128xf32>
    %1242 = arith.addf %1240, %1241 : vector<2x128xf32>
    %1243 = arith.negf %1242 : vector<2x128xf32>
    %1244 = math.exp %1243 : vector<2x128xf32>
    %cst_286 = arith.constant 1.000000e+00 : f32
    %1245 = vector.broadcast %cst_286 : f32 to vector<2x128xf32>
    %1246 = arith.addf %1245, %1244 : vector<2x128xf32>
    %1247 = arith.divf %1245, %1246 : vector<2x128xf32>
    %1248 = vector.extract_strided_slice %1247 {offsets = [0, 0], sizes = [2, 32], strides = [1, 1]} : vector<2x128xf32> to vector<2x32xf32>
    %1249 = vector.extract_strided_slice %1247 {offsets = [0, 32], sizes = [2, 32], strides = [1, 1]} : vector<2x128xf32> to vector<2x32xf32>
    %1250 = vector.extract_strided_slice %1247 {offsets = [0, 96], sizes = [2, 32], strides = [1, 1]} : vector<2x128xf32> to vector<2x32xf32>
    %1251 = vector.extract_strided_slice %1242 {offsets = [0, 64], sizes = [2, 32], strides = [1, 1]} : vector<2x128xf32> to vector<2x32xf32>
    %1252 = math.tanh %1251 : vector<2x32xf32>
    %1253 = arith.mulf %1249, %1233 : vector<2x32xf32>
    %1254 = arith.mulf %1248, %1252 : vector<2x32xf32>
    %1255 = arith.addf %1253, %1254 : vector<2x32xf32>
    %1256 = math.tanh %1255 : vector<2x32xf32>
    %1257 = arith.mulf %1250, %1256 : vector<2x32xf32>
    %1258 = vector.extract_strided_slice %1257 {offsets = [0, 0], sizes = [1, 32], strides = [1, 1]} : vector<2x32xf32> to vector<1x32xf32>
    %c11 = arith.constant 11 : index
    %c0_287 = arith.constant 0 : index
    %1259 = vector.load %arg24[%c11, %c0_287] : memref<32x32xf32, #tpu.memory_space<vmem>>, vector<1x32xf32>
    tpu.vector_store %arg24[%c11, %c0_287], %1258 {strides = array<i32>} : memref<32x32xf32, #tpu.memory_space<vmem>>, vector<1x32xf32>,
    %1260 = vector.extract_strided_slice %1257 {offsets = [1, 0], sizes = [1, 32], strides = [1, 1]} : vector<2x32xf32> to vector<1x32xf32>
    %c27 = arith.constant 27 : index
    %c0_288 = arith.constant 0 : index
    %1261 = vector.load %arg24[%c27, %c0_288] : memref<32x32xf32, #tpu.memory_space<vmem>>, vector<1x32xf32>
    tpu.vector_store %arg24[%c27, %c0_288], %1260 {strides = array<i32>} : memref<32x32xf32, #tpu.memory_space<vmem>>, vector<1x32xf32>,
    %1262 = vector.extract_strided_slice %994 {offsets = [24, 0], sizes = [2, 128], strides = [1, 1]} : vector<32x128xf32> to vector<2x128xf32>
    %cst_289 = arith.constant dense<0.000000e+00> : vector<2x128xf32>
    %1263 = tpu.matmul %1257, %995, %cst_289 {dimension_numbers = #tpu.dot_dimension_numbers<[1], [0], [0], [1], [0, 0, 1, 1], [], []>} : vector<2x32xf32>, vector<32x128xf32>, vector<2x128xf32> -> vector<2x128xf32>
    %1264 = arith.addf %1262, %1263 : vector<2x128xf32>
    %1265 = arith.negf %1264 : vector<2x128xf32>
    %1266 = math.exp %1265 : vector<2x128xf32>
    %cst_290 = arith.constant 1.000000e+00 : f32
    %1267 = vector.broadcast %cst_290 : f32 to vector<2x128xf32>
    %1268 = arith.addf %1267, %1266 : vector<2x128xf32>
    %1269 = arith.divf %1267, %1268 : vector<2x128xf32>
    %1270 = vector.extract_strided_slice %1269 {offsets = [0, 0], sizes = [2, 32], strides = [1, 1]} : vector<2x128xf32> to vector<2x32xf32>
    %1271 = vector.extract_strided_slice %1269 {offsets = [0, 32], sizes = [2, 32], strides = [1, 1]} : vector<2x128xf32> to vector<2x32xf32>
    %1272 = vector.extract_strided_slice %1269 {offsets = [0, 96], sizes = [2, 32], strides = [1, 1]} : vector<2x128xf32> to vector<2x32xf32>
    %1273 = vector.extract_strided_slice %1264 {offsets = [0, 64], sizes = [2, 32], strides = [1, 1]} : vector<2x128xf32> to vector<2x32xf32>
    %1274 = math.tanh %1273 : vector<2x32xf32>
    %1275 = arith.mulf %1271, %1255 : vector<2x32xf32>
    %1276 = arith.mulf %1270, %1274 : vector<2x32xf32>
    %1277 = arith.addf %1275, %1276 : vector<2x32xf32>
    %1278 = math.tanh %1277 : vector<2x32xf32>
    %1279 = arith.mulf %1272, %1278 : vector<2x32xf32>
    %1280 = vector.extract_strided_slice %1279 {offsets = [0, 0], sizes = [1, 32], strides = [1, 1]} : vector<2x32xf32> to vector<1x32xf32>
    %c12_291 = arith.constant 12 : index
    %c0_292 = arith.constant 0 : index
    %1281 = vector.load %arg24[%c12_291, %c0_292] : memref<32x32xf32, #tpu.memory_space<vmem>>, vector<1x32xf32>
    tpu.vector_store %arg24[%c12_291, %c0_292], %1280 {strides = array<i32>} : memref<32x32xf32, #tpu.memory_space<vmem>>, vector<1x32xf32>,
    %1282 = vector.extract_strided_slice %1279 {offsets = [1, 0], sizes = [1, 32], strides = [1, 1]} : vector<2x32xf32> to vector<1x32xf32>
    %c28_293 = arith.constant 28 : index
    %c0_294 = arith.constant 0 : index
    %1283 = vector.load %arg24[%c28_293, %c0_294] : memref<32x32xf32, #tpu.memory_space<vmem>>, vector<1x32xf32>
    tpu.vector_store %arg24[%c28_293, %c0_294], %1282 {strides = array<i32>} : memref<32x32xf32, #tpu.memory_space<vmem>>, vector<1x32xf32>,
    %1284 = vector.extract_strided_slice %994 {offsets = [26, 0], sizes = [2, 128], strides = [1, 1]} : vector<32x128xf32> to vector<2x128xf32>
    %cst_295 = arith.constant dense<0.000000e+00> : vector<2x128xf32>
    %1285 = tpu.matmul %1279, %995, %cst_295 {dimension_numbers = #tpu.dot_dimension_numbers<[1], [0], [0], [1], [0, 0, 1, 1], [], []>} : vector<2x32xf32>, vector<32x128xf32>, vector<2x128xf32> -> vector<2x128xf32>
    %1286 = arith.addf %1284, %1285 : vector<2x128xf32>
    %1287 = arith.negf %1286 : vector<2x128xf32>
    %1288 = math.exp %1287 : vector<2x128xf32>
    %cst_296 = arith.constant 1.000000e+00 : f32
    %1289 = vector.broadcast %cst_296 : f32 to vector<2x128xf32>
    %1290 = arith.addf %1289, %1288 : vector<2x128xf32>
    %1291 = arith.divf %1289, %1290 : vector<2x128xf32>
    %1292 = vector.extract_strided_slice %1291 {offsets = [0, 0], sizes = [2, 32], strides = [1, 1]} : vector<2x128xf32> to vector<2x32xf32>
    %1293 = vector.extract_strided_slice %1291 {offsets = [0, 32], sizes = [2, 32], strides = [1, 1]} : vector<2x128xf32> to vector<2x32xf32>
    %1294 = vector.extract_strided_slice %1291 {offsets = [0, 96], sizes = [2, 32], strides = [1, 1]} : vector<2x128xf32> to vector<2x32xf32>
    %1295 = vector.extract_strided_slice %1286 {offsets = [0, 64], sizes = [2, 32], strides = [1, 1]} : vector<2x128xf32> to vector<2x32xf32>
    %1296 = math.tanh %1295 : vector<2x32xf32>
    %1297 = arith.mulf %1293, %1277 : vector<2x32xf32>
    %1298 = arith.mulf %1292, %1296 : vector<2x32xf32>
    %1299 = arith.addf %1297, %1298 : vector<2x32xf32>
    %1300 = math.tanh %1299 : vector<2x32xf32>
    %1301 = arith.mulf %1294, %1300 : vector<2x32xf32>
    %1302 = vector.extract_strided_slice %1301 {offsets = [0, 0], sizes = [1, 32], strides = [1, 1]} : vector<2x32xf32> to vector<1x32xf32>
    %c13 = arith.constant 13 : index
    %c0_297 = arith.constant 0 : index
    %1303 = vector.load %arg24[%c13, %c0_297] : memref<32x32xf32, #tpu.memory_space<vmem>>, vector<1x32xf32>
    tpu.vector_store %arg24[%c13, %c0_297], %1302 {strides = array<i32>} : memref<32x32xf32, #tpu.memory_space<vmem>>, vector<1x32xf32>,
    %1304 = vector.extract_strided_slice %1301 {offsets = [1, 0], sizes = [1, 32], strides = [1, 1]} : vector<2x32xf32> to vector<1x32xf32>
    %c29 = arith.constant 29 : index
    %c0_298 = arith.constant 0 : index
    %1305 = vector.load %arg24[%c29, %c0_298] : memref<32x32xf32, #tpu.memory_space<vmem>>, vector<1x32xf32>
    tpu.vector_store %arg24[%c29, %c0_298], %1304 {strides = array<i32>} : memref<32x32xf32, #tpu.memory_space<vmem>>, vector<1x32xf32>,
    %1306 = vector.extract_strided_slice %994 {offsets = [28, 0], sizes = [2, 128], strides = [1, 1]} : vector<32x128xf32> to vector<2x128xf32>
    %cst_299 = arith.constant dense<0.000000e+00> : vector<2x128xf32>
    %1307 = tpu.matmul %1301, %995, %cst_299 {dimension_numbers = #tpu.dot_dimension_numbers<[1], [0], [0], [1], [0, 0, 1, 1], [], []>} : vector<2x32xf32>, vector<32x128xf32>, vector<2x128xf32> -> vector<2x128xf32>
    %1308 = arith.addf %1306, %1307 : vector<2x128xf32>
    %1309 = arith.negf %1308 : vector<2x128xf32>
    %1310 = math.exp %1309 : vector<2x128xf32>
    %cst_300 = arith.constant 1.000000e+00 : f32
    %1311 = vector.broadcast %cst_300 : f32 to vector<2x128xf32>
    %1312 = arith.addf %1311, %1310 : vector<2x128xf32>
    %1313 = arith.divf %1311, %1312 : vector<2x128xf32>
    %1314 = vector.extract_strided_slice %1313 {offsets = [0, 0], sizes = [2, 32], strides = [1, 1]} : vector<2x128xf32> to vector<2x32xf32>
    %1315 = vector.extract_strided_slice %1313 {offsets = [0, 32], sizes = [2, 32], strides = [1, 1]} : vector<2x128xf32> to vector<2x32xf32>
    %1316 = vector.extract_strided_slice %1313 {offsets = [0, 96], sizes = [2, 32], strides = [1, 1]} : vector<2x128xf32> to vector<2x32xf32>
    %1317 = vector.extract_strided_slice %1308 {offsets = [0, 64], sizes = [2, 32], strides = [1, 1]} : vector<2x128xf32> to vector<2x32xf32>
    %1318 = math.tanh %1317 : vector<2x32xf32>
    %1319 = arith.mulf %1315, %1299 : vector<2x32xf32>
    %1320 = arith.mulf %1314, %1318 : vector<2x32xf32>
    %1321 = arith.addf %1319, %1320 : vector<2x32xf32>
    %1322 = math.tanh %1321 : vector<2x32xf32>
    %1323 = arith.mulf %1316, %1322 : vector<2x32xf32>
    %1324 = vector.extract_strided_slice %1323 {offsets = [0, 0], sizes = [1, 32], strides = [1, 1]} : vector<2x32xf32> to vector<1x32xf32>
    %c14_301 = arith.constant 14 : index
    %c0_302 = arith.constant 0 : index
    %1325 = vector.load %arg24[%c14_301, %c0_302] : memref<32x32xf32, #tpu.memory_space<vmem>>, vector<1x32xf32>
    tpu.vector_store %arg24[%c14_301, %c0_302], %1324 {strides = array<i32>} : memref<32x32xf32, #tpu.memory_space<vmem>>, vector<1x32xf32>,
    %1326 = vector.extract_strided_slice %1323 {offsets = [1, 0], sizes = [1, 32], strides = [1, 1]} : vector<2x32xf32> to vector<1x32xf32>
    %c30_303 = arith.constant 30 : index
    %c0_304 = arith.constant 0 : index
    %1327 = vector.load %arg24[%c30_303, %c0_304] : memref<32x32xf32, #tpu.memory_space<vmem>>, vector<1x32xf32>
    tpu.vector_store %arg24[%c30_303, %c0_304], %1326 {strides = array<i32>} : memref<32x32xf32, #tpu.memory_space<vmem>>, vector<1x32xf32>,
    %1328 = vector.extract_strided_slice %994 {offsets = [30, 0], sizes = [2, 128], strides = [1, 1]} : vector<32x128xf32> to vector<2x128xf32>
    %cst_305 = arith.constant dense<0.000000e+00> : vector<2x128xf32>
    %1329 = tpu.matmul %1323, %995, %cst_305 {dimension_numbers = #tpu.dot_dimension_numbers<[1], [0], [0], [1], [0, 0, 1, 1], [], []>} : vector<2x32xf32>, vector<32x128xf32>, vector<2x128xf32> -> vector<2x128xf32>
    %1330 = arith.addf %1328, %1329 : vector<2x128xf32>
    %1331 = arith.negf %1330 : vector<2x128xf32>
    %1332 = math.exp %1331 : vector<2x128xf32>
    %cst_306 = arith.constant 1.000000e+00 : f32
    %1333 = vector.broadcast %cst_306 : f32 to vector<2x128xf32>
    %1334 = arith.addf %1333, %1332 : vector<2x128xf32>
    %1335 = arith.divf %1333, %1334 : vector<2x128xf32>
    %1336 = vector.extract_strided_slice %1335 {offsets = [0, 0], sizes = [2, 32], strides = [1, 1]} : vector<2x128xf32> to vector<2x32xf32>
    %1337 = vector.extract_strided_slice %1335 {offsets = [0, 32], sizes = [2, 32], strides = [1, 1]} : vector<2x128xf32> to vector<2x32xf32>
    %1338 = vector.extract_strided_slice %1335 {offsets = [0, 96], sizes = [2, 32], strides = [1, 1]} : vector<2x128xf32> to vector<2x32xf32>
    %1339 = vector.extract_strided_slice %1330 {offsets = [0, 64], sizes = [2, 32], strides = [1, 1]} : vector<2x128xf32> to vector<2x32xf32>
    %1340 = math.tanh %1339 : vector<2x32xf32>
    %1341 = arith.mulf %1337, %1321 : vector<2x32xf32>
    %1342 = arith.mulf %1336, %1340 : vector<2x32xf32>
    %1343 = arith.addf %1341, %1342 : vector<2x32xf32>
    %1344 = math.tanh %1343 : vector<2x32xf32>
    %1345 = arith.mulf %1338, %1344 : vector<2x32xf32>
    %1346 = vector.extract_strided_slice %1345 {offsets = [0, 0], sizes = [1, 32], strides = [1, 1]} : vector<2x32xf32> to vector<1x32xf32>
    %c15 = arith.constant 15 : index
    %c0_307 = arith.constant 0 : index
    %1347 = vector.load %arg24[%c15, %c0_307] : memref<32x32xf32, #tpu.memory_space<vmem>>, vector<1x32xf32>
    tpu.vector_store %arg24[%c15, %c0_307], %1346 {strides = array<i32>} : memref<32x32xf32, #tpu.memory_space<vmem>>, vector<1x32xf32>,
    %1348 = vector.extract_strided_slice %1345 {offsets = [1, 0], sizes = [1, 32], strides = [1, 1]} : vector<2x32xf32> to vector<1x32xf32>
    %c31 = arith.constant 31 : index
    %c0_308 = arith.constant 0 : index
    %1349 = vector.load %arg24[%c31, %c0_308] : memref<32x32xf32, #tpu.memory_space<vmem>>, vector<1x32xf32>
    tpu.vector_store %arg24[%c31, %c0_308], %1348 {strides = array<i32>} : memref<32x32xf32, #tpu.memory_space<vmem>>, vector<1x32xf32>,
    %c0_309 = arith.constant 0 : index
    %c0_310 = arith.constant 0 : index
    %1350 = vector.load %arg15[%c0_309, %c0_310] : memref<2x32xf32, #tpu.memory_space<vmem>>, vector<2x32xf32>
    %c0_311 = arith.constant 0 : index
    %c0_312 = arith.constant 0 : index
    %1351 = vector.load %arg16[%c0_311, %c0_312] : memref<2x1xf32, #tpu.memory_space<vmem>>, vector<2x1xf32>
    %c0_313 = arith.constant 0 : index
    %c0_314 = arith.constant 0 : index
    %1352 = vector.load %arg24[%c0_313, %c0_314] : memref<32x32xf32, #tpu.memory_space<vmem>>, vector<32x32xf32>
    %cst_315 = arith.constant dense<0.000000e+00> : vector<2x32xf32>
    %1353 = tpu.matmul %1350, %1352, %cst_315 {dimension_numbers = #tpu.dot_dimension_numbers<[1], [1], [0], [0], [0, 0, 1, 0], [], []>} : vector<2x32xf32>, vector<32x32xf32>, vector<2x32xf32> -> vector<2x32xf32>
    %1354 = vector.broadcast %1351 : vector<2x1xf32> to vector<2x32xf32>
    %1355 = arith.addf %1353, %1354 : vector<2x32xf32>
    %1356 = arith.negf %1355 : vector<2x32xf32>
    %1357 = math.exp %1356 : vector<2x32xf32>
    %cst_316 = arith.constant 1.000000e+00 : f32
    %1358 = vector.broadcast %cst_316 : f32 to vector<2x32xf32>
    %1359 = arith.addf %1358, %1357 : vector<2x32xf32>
    %1360 = arith.divf %1358, %1359 : vector<2x32xf32>
    %c0_317 = arith.constant 0 : index
    %c0_318 = arith.constant 0 : index
    %1361 = vector.load %arg20[%c0_317, %c0_318] : memref<2x32xf32, #tpu.memory_space<vmem>>, vector<2x32xf32>
    tpu.vector_store %arg20[%c0_317, %c0_318], %1360 {strides = array<i32>} : memref<2x32xf32, #tpu.memory_space<vmem>>, vector<2x32xf32>,
    %1362 = tpu.iota {dimensions = array<i32: 1>} : vector<1x16xi32>
    %1363 = vector.extract_strided_slice %1360 {offsets = [0, 0], sizes = [1, 16], strides = [1, 1]} : vector<2x32xf32> to vector<1x16xf32>
    %1364 = vector.extract_strided_slice %1360 {offsets = [1, 0], sizes = [1, 16], strides = [1, 1]} : vector<2x32xf32> to vector<1x16xf32>
    %c0_319 = arith.constant 0 : index
    %1365 = memref.load %arg17[%c0_319] : memref<2xi32, #tpu.memory_space<smem>>
    %c0_i32 = arith.constant 0 : i32
    %c16_i32 = arith.constant 16 : i32
    %1366 = arith.maxsi %c0_i32, %1365 : i32
    %1367 = arith.minsi %c16_i32, %1366 : i32
    %1368 = vector.shape_cast %1363 : vector<1x16xf32> to vector<1x1x16xf32>
    %cst_320 = arith.constant dense<0xFF800000> : vector<1xf32>
    %1369 = vector.multi_reduction <maximumf>, %1368, %cst_320 [1, 2] : vector<1x1x16xf32> to vector<1xf32>
    %1370 = vector.shape_cast %1369 : vector<1xf32> to vector<1x1x1xf32>
    %1371 = vector.extract %1370[0, 0, 0] : f32 from vector<1x1x1xf32>
    %1372 = vector.broadcast %1371 : f32 to vector<1x16xf32>
    %1373 = arith.subf %1363, %1372 : vector<1x16xf32>
    %1374 = math.exp %1373 : vector<1x16xf32>
    %1375 = vector.shape_cast %1374 : vector<1x16xf32> to vector<1x1x16xf32>
    %cst_321 = arith.constant dense<0.000000e+00> : vector<1xf32>
    %1376 = vector.multi_reduction <add>, %1375, %cst_321 [1, 2] : vector<1x1x16xf32> to vector<1xf32>
    %1377 = vector.shape_cast %1376 : vector<1xf32> to vector<1x1x1xf32>
    %1378 = vector.extract %1377[0, 0, 0] : f32 from vector<1x1x1xf32>
    %1379 = math.log %1378 : f32
    %1380 = arith.addf %1371, %1379 : f32
    %1381 = vector.broadcast %1367 : i32 to vector<1x16xi32>
    %1382 = arith.cmpi eq, %1362, %1381 : vector<1x16xi32>
    %cst_322 = arith.constant 0.000000e+00 : f32
    %1383 = vector.broadcast %cst_322 : f32 to vector<1x16xf32>
    %1384 = arith.select %1382, %1363, %1383 : vector<1x16xi1>, vector<1x16xf32>
    %1385 = vector.shape_cast %1384 : vector<1x16xf32> to vector<1x1x16xf32>
    %cst_323 = arith.constant dense<0.000000e+00> : vector<1xf32>
    %1386 = vector.multi_reduction <add>, %1385, %cst_323 [1, 2] : vector<1x1x16xf32> to vector<1xf32>
    %1387 = vector.shape_cast %1386 : vector<1xf32> to vector<1x1x1xf32>
    %1388 = vector.extract %1387[0, 0, 0] : f32 from vector<1x1x1xf32>
    %c16_i32_324 = arith.constant 16 : i32
    %1389 = arith.cmpi slt, %1367, %c16_i32_324 : i32
    %1390 = arith.extui %1389 : i1 to i32
    %1391 = arith.sitofp %1390 : i32 to f32
    %1392 = arith.subf %1380, %1388 : f32
    %1393 = arith.mulf %1392, %1391 : f32
    %c0_325 = arith.constant 0 : index
    %1394 = memref.load %arg18[%c0_325] : memref<2xi32, #tpu.memory_space<smem>>
    %c0_i32_326 = arith.constant 0 : i32
    %c16_i32_327 = arith.constant 16 : i32
    %1395 = arith.maxsi %c0_i32_326, %1394 : i32
    %1396 = arith.minsi %c16_i32_327, %1395 : i32
    %1397 = vector.shape_cast %1364 : vector<1x16xf32> to vector<1x1x16xf32>
    %cst_328 = arith.constant dense<0xFF800000> : vector<1xf32>
    %1398 = vector.multi_reduction <maximumf>, %1397, %cst_328 [1, 2] : vector<1x1x16xf32> to vector<1xf32>
    %1399 = vector.shape_cast %1398 : vector<1xf32> to vector<1x1x1xf32>
    %1400 = vector.extract %1399[0, 0, 0] : f32 from vector<1x1x1xf32>
    %1401 = vector.broadcast %1400 : f32 to vector<1x16xf32>
    %1402 = arith.subf %1364, %1401 : vector<1x16xf32>
    %1403 = math.exp %1402 : vector<1x16xf32>
    %1404 = vector.shape_cast %1403 : vector<1x16xf32> to vector<1x1x16xf32>
    %cst_329 = arith.constant dense<0.000000e+00> : vector<1xf32>
    %1405 = vector.multi_reduction <add>, %1404, %cst_329 [1, 2] : vector<1x1x16xf32> to vector<1xf32>
    %1406 = vector.shape_cast %1405 : vector<1xf32> to vector<1x1x1xf32>
    %1407 = vector.extract %1406[0, 0, 0] : f32 from vector<1x1x1xf32>
    %1408 = math.log %1407 : f32
    %1409 = arith.addf %1400, %1408 : f32
    %1410 = vector.broadcast %1396 : i32 to vector<1x16xi32>
    %1411 = arith.cmpi eq, %1362, %1410 : vector<1x16xi32>
    %cst_330 = arith.constant 0.000000e+00 : f32
    %1412 = vector.broadcast %cst_330 : f32 to vector<1x16xf32>
    %1413 = arith.select %1411, %1364, %1412 : vector<1x16xi1>, vector<1x16xf32>
    %1414 = vector.shape_cast %1413 : vector<1x16xf32> to vector<1x1x16xf32>
    %cst_331 = arith.constant dense<0.000000e+00> : vector<1xf32>
    %1415 = vector.multi_reduction <add>, %1414, %cst_331 [1, 2] : vector<1x1x16xf32> to vector<1xf32>
    %1416 = vector.shape_cast %1415 : vector<1xf32> to vector<1x1x1xf32>
    %1417 = vector.extract %1416[0, 0, 0] : f32 from vector<1x1x1xf32>
    %c16_i32_332 = arith.constant 16 : i32
    %1418 = arith.cmpi slt, %1396, %c16_i32_332 : i32
    %1419 = arith.extui %1418 : i1 to i32
    %1420 = arith.sitofp %1419 : i32 to f32
    %1421 = arith.subf %1409, %1417 : f32
    %1422 = arith.mulf %1421, %1420 : f32
    %cst_333 = arith.constant 0.000000e+00 : f32
    %1423 = arith.addf %cst_333, %1393 : f32
    %cst_334 = arith.constant 0.000000e+00 : f32
    %1424 = arith.addf %cst_334, %1391 : f32
    %cst_335 = arith.constant 0.000000e+00 : f32
    %1425 = arith.addf %cst_335, %1422 : f32
    %cst_336 = arith.constant 0.000000e+00 : f32
    %1426 = arith.addf %cst_336, %1420 : f32
    %1427 = vector.extract_strided_slice %1360 {offsets = [0, 16], sizes = [1, 16], strides = [1, 1]} : vector<2x32xf32> to vector<1x16xf32>
    %1428 = vector.extract_strided_slice %1360 {offsets = [1, 16], sizes = [1, 16], strides = [1, 1]} : vector<2x32xf32> to vector<1x16xf32>
    %c1_337 = arith.constant 1 : index
    %1429 = memref.load %arg17[%c1_337] : memref<2xi32, #tpu.memory_space<smem>>
    %c0_i32_338 = arith.constant 0 : i32
    %c16_i32_339 = arith.constant 16 : i32
    %1430 = arith.maxsi %c0_i32_338, %1429 : i32
    %1431 = arith.minsi %c16_i32_339, %1430 : i32
    %1432 = vector.shape_cast %1427 : vector<1x16xf32> to vector<1x1x16xf32>
    %cst_340 = arith.constant dense<0xFF800000> : vector<1xf32>
    %1433 = vector.multi_reduction <maximumf>, %1432, %cst_340 [1, 2] : vector<1x1x16xf32> to vector<1xf32>
    %1434 = vector.shape_cast %1433 : vector<1xf32> to vector<1x1x1xf32>
    %1435 = vector.extract %1434[0, 0, 0] : f32 from vector<1x1x1xf32>
    %1436 = vector.broadcast %1435 : f32 to vector<1x16xf32>
    %1437 = arith.subf %1427, %1436 : vector<1x16xf32>
    %1438 = math.exp %1437 : vector<1x16xf32>
    %1439 = vector.shape_cast %1438 : vector<1x16xf32> to vector<1x1x16xf32>
    %cst_341 = arith.constant dense<0.000000e+00> : vector<1xf32>
    %1440 = vector.multi_reduction <add>, %1439, %cst_341 [1, 2] : vector<1x1x16xf32> to vector<1xf32>
    %1441 = vector.shape_cast %1440 : vector<1xf32> to vector<1x1x1xf32>
    %1442 = vector.extract %1441[0, 0, 0] : f32 from vector<1x1x1xf32>
    %1443 = math.log %1442 : f32
    %1444 = arith.addf %1435, %1443 : f32
    %1445 = vector.broadcast %1431 : i32 to vector<1x16xi32>
    %1446 = arith.cmpi eq, %1362, %1445 : vector<1x16xi32>
    %cst_342 = arith.constant 0.000000e+00 : f32
    %1447 = vector.broadcast %cst_342 : f32 to vector<1x16xf32>
    %1448 = arith.select %1446, %1427, %1447 : vector<1x16xi1>, vector<1x16xf32>
    %1449 = vector.shape_cast %1448 : vector<1x16xf32> to vector<1x1x16xf32>
    %cst_343 = arith.constant dense<0.000000e+00> : vector<1xf32>
    %1450 = vector.multi_reduction <add>, %1449, %cst_343 [1, 2] : vector<1x1x16xf32> to vector<1xf32>
    %1451 = vector.shape_cast %1450 : vector<1xf32> to vector<1x1x1xf32>
    %1452 = vector.extract %1451[0, 0, 0] : f32 from vector<1x1x1xf32>
    %c16_i32_344 = arith.constant 16 : i32
    %1453 = arith.cmpi slt, %1431, %c16_i32_344 : i32
    %1454 = arith.extui %1453 : i1 to i32
    %1455 = arith.sitofp %1454 : i32 to f32
    %1456 = arith.subf %1444, %1452 : f32
    %1457 = arith.mulf %1456, %1455 : f32
    %c1_345 = arith.constant 1 : index
    %1458 = memref.load %arg18[%c1_345] : memref<2xi32, #tpu.memory_space<smem>>
    %c0_i32_346 = arith.constant 0 : i32
    %c16_i32_347 = arith.constant 16 : i32
    %1459 = arith.maxsi %c0_i32_346, %1458 : i32
    %1460 = arith.minsi %c16_i32_347, %1459 : i32
    %1461 = vector.shape_cast %1428 : vector<1x16xf32> to vector<1x1x16xf32>
    %cst_348 = arith.constant dense<0xFF800000> : vector<1xf32>
    %1462 = vector.multi_reduction <maximumf>, %1461, %cst_348 [1, 2] : vector<1x1x16xf32> to vector<1xf32>
    %1463 = vector.shape_cast %1462 : vector<1xf32> to vector<1x1x1xf32>
    %1464 = vector.extract %1463[0, 0, 0] : f32 from vector<1x1x1xf32>
    %1465 = vector.broadcast %1464 : f32 to vector<1x16xf32>
    %1466 = arith.subf %1428, %1465 : vector<1x16xf32>
    %1467 = math.exp %1466 : vector<1x16xf32>
    %1468 = vector.shape_cast %1467 : vector<1x16xf32> to vector<1x1x16xf32>
    %cst_349 = arith.constant dense<0.000000e+00> : vector<1xf32>
    %1469 = vector.multi_reduction <add>, %1468, %cst_349 [1, 2] : vector<1x1x16xf32> to vector<1xf32>
    %1470 = vector.shape_cast %1469 : vector<1xf32> to vector<1x1x1xf32>
    %1471 = vector.extract %1470[0, 0, 0] : f32 from vector<1x1x1xf32>
    %1472 = math.log %1471 : f32
    %1473 = arith.addf %1464, %1472 : f32
    %1474 = vector.broadcast %1460 : i32 to vector<1x16xi32>
    %1475 = arith.cmpi eq, %1362, %1474 : vector<1x16xi32>
    %cst_350 = arith.constant 0.000000e+00 : f32
    %1476 = vector.broadcast %cst_350 : f32 to vector<1x16xf32>
    %1477 = arith.select %1475, %1428, %1476 : vector<1x16xi1>, vector<1x16xf32>
    %1478 = vector.shape_cast %1477 : vector<1x16xf32> to vector<1x1x16xf32>
    %cst_351 = arith.constant dense<0.000000e+00> : vector<1xf32>
    %1479 = vector.multi_reduction <add>, %1478, %cst_351 [1, 2] : vector<1x1x16xf32> to vector<1xf32>
    %1480 = vector.shape_cast %1479 : vector<1xf32> to vector<1x1x1xf32>
    %1481 = vector.extract %1480[0, 0, 0] : f32 from vector<1x1x1xf32>
    %c16_i32_352 = arith.constant 16 : i32
    %1482 = arith.cmpi slt, %1460, %c16_i32_352 : i32
    %1483 = arith.extui %1482 : i1 to i32
    %1484 = arith.sitofp %1483 : i32 to f32
    %1485 = arith.subf %1473, %1481 : f32
    %1486 = arith.mulf %1485, %1484 : f32
    %1487 = arith.addf %1423, %1457 : f32
    %1488 = arith.addf %1424, %1455 : f32
    %1489 = arith.addf %1425, %1486 : f32
    %1490 = arith.addf %1426, %1484 : f32
    %cst_353 = arith.constant 1.000000e+00 : f32
    %1491 = arith.maximumf %1488, %cst_353 : f32
    %1492 = arith.divf %1487, %1491 : f32
    %cst_354 = arith.constant 1.000000e+00 : f32
    %1493 = arith.maximumf %1490, %cst_354 : f32
    %1494 = arith.divf %1489, %1493 : f32
    %1495 = arith.addf %1492, %1494 : f32
    %cst_355 = arith.constant 5.000000e-01 : f32
    %1496 = arith.mulf %cst_355, %1495 : f32
    %c0_356 = arith.constant 0 : index
    %c0_357 = arith.constant 0 : index
    %1497 = memref.load %arg19[%c0_356, %c0_357] : memref<1x1xf32, #tpu.memory_space<smem>>
    memref.store %1496, %arg19[%c0_356, %c0_357] : memref<1x1xf32, #tpu.memory_space<smem>>
    return
  }
}

</mosaic_0001>

<bundles_post_ra>
// kernel: squeeze.3
= control target key start
LH: loop header
LB: loop body
LE: loop exit
PB: predicated region body
PF: predicated region fallthrough
CT: control target
= control target key end

     0   :  { %s85_s0 = inlined_call_operand.vmem [shape: f32[32], index: 0, kind: input, shape index: {}]   ;;  %s86_s1 = inlined_call_operand.hbm [shape: f32[2,16], index: 1, kind: output, shape index: {}]  }
   0x1   :  { %v5_v0 = vld [vmem:[%s85_s0] sm:$0x1] }
   0x2   :  { %2 = vsyncpa [#allocation1], 0  ;;  %6 = vst [vmem:[#allocation3] sm:$0x1] %v5_v0  ;;  %vm8_vm0 = vcmask 130048   ;;  %s58_s0 = smov 112  }
   0x3   :  { %s59_s8 = smov [#allocation0]  }
   0x4   :  { %s26_s9 = sshll.u32 %s59_s8, 4  ;;  %s27_s9 = int_to_ptr.vmem [resolvable:$true] %s26_s9 }
   0x5   :  { %s34_s10 = scalar_lea.vmem %s27_s9, 32  ;;  %p39_p1 = scmp.lt.s32.totalorder %s27_s9, %s27_s9 }
   0x6   :  { %p35_p0 = scmp.ne.s32.totalorder %s27_s9, %s34_s10  ;;  %p40_p2 = scmp.lt.s32.totalorder %s34_s10, %s34_s10 }
   0x8   :  { %p41_p3 = por %p40_p2, %p39_p1 }
   0x9   :  { %v10_v1 = vld [vmem:[#allocation3] sm:$0x1]  }
   0xa   :  { %v7_v2 = vld [vmem:[#allocation3] sm:$0x1]   ;;  %11 = vrot.lane.b32.xlu0 %v10_v1, %s58_s0  ;;  %p42_p4 = pnand %p41_p3, %p35_p0 }
   0xb   :  { %9 = vst.msk [vmem:[#allocation2] sm:$0x1] %vm8_vm0, %v7_v2  }
  0x7c   :  { %v12_v3 = vpop.permute.xlu0 %11  }
  0x7d   :  { %15 = vst.msk [vmem:[#allocation2 + $0x1] sm:$0x1] %vm8_vm0, %v12_v3  }
  0x84   :  { %v19_v4 = vld [vmem:[#allocation2] sm:$0x3] }
  0x85   :  { %21 = vst [vmem:[#allocation0] sm:$0x3] %v19_v4 }
  0x86   :  { %45 = shalt.err (!%p42_p4)
}
  0x87   :  { %s46_s13 = scalar_lea.hbm %s86_s1, 32 }
  0x88   :  { %p47_p5 = scmp.ne.s32.totalorder %s86_s1, %s46_s13  ;;  %p50_p6 = scmp.lt.u32.totalorder %s46_s13, %s86_s1 }
  0x8a   :  { %p52_p7 = pnand %p50_p6, %p47_p5 }
  0x8c   :  { %55 = shalt.err (!%p52_p7)
}
  0x8d   :  { %29 = dma.vmem_to_hbm [thread:$0]  %s27_s9, 32, %s86_s1, [#allocation1]  }
  0x8e   :  { %56 = dma.done.wait [#allocation1], 32  }
  0x8f   :  { %57 = vsyncadd [#allocation1], 4294967264 }
  0x90   :  { %31 = vsyncpa [#allocation1], 1 }

// kernel: model_forward.1
= control target key start
LH: loop header
LB: loop body
LE: loop exit
PB: predicated region body
PF: predicated region fallthrough
CT: control target
= control target key end

     0   :  { %s13054_s0 = inlined_call_operand.vmem [shape: f32[64,32], index: 0, kind: input, shape index: {}]   ;;  %s13055_s1 = inlined_call_operand.vmem [shape: f32[32,128], index: 1, kind: input, shape index: {}]   ;;  %s13056_s2 = inlined_call_operand.vmem [shape: f32[32,128], index: 2, kind: input, shape index: {}]   ;;  %s13057_s3 = inlined_call_operand.vmem [shape: f32[1,128], index: 3, kind: input, shape index: {}]   ;;  %s13058_s4 = inlined_call_operand.vmem [shape: f32[32,128], index: 4, kind: input, shape index: {}]   ;;  %s13059_s5 = inlined_call_operand.vmem [shape: f32[32,128], index: 5, kind: input, shape index: {}]   ;;  %s13060_s6 = inlined_call_operand.vmem [shape: f32[1,128], index: 6, kind: input, shape index: {}]   ;;  %s13061_s7 = inlined_call_operand.vmem [shape: f32[32,128], index: 7, kind: input, shape index: {}]   ;;  %s13062_s8 = inlined_call_operand.vmem [shape: f32[32,128], index: 8, kind: input, shape index: {}]   ;;  %s13063_s9 = inlined_call_operand.vmem [shape: f32[1,128], index: 9, kind: input, shape index: {}]   ;;  %s13064_s10 = inlined_call_operand.vmem [shape: f32[32,128], index: 10, kind: input, shape index: {}]   ;;  %s13065_s11 = inlined_call_operand.vmem [shape: f32[32,128], index: 11, kind: input, shape index: {}]   ;;  %s13066_s12 = inlined_call_operand.vmem [shape: f32[1,128], index: 12, kind: input, shape index: {}]   ;;  %s13067_s13 = inlined_call_operand.vmem [shape: f32[32,64], index: 13, kind: input, shape index: {}]   ;;  %s13068_s14 = inlined_call_operand.vmem [shape: f32[64,64], index: 14, kind: input, shape index: {}]   ;;  %s13069_s15 = inlined_call_operand.vmem [shape: f32[2,32], index: 15, kind: input, shape index: {}]   ;;  %s13070_s16 = inlined_call_operand.vmem [shape: f32[2,1], index: 16, kind: input, shape index: {}]   ;;  %s13071_s17 = inlined_call_operand.vmem [shape: s32[2], index: 17, kind: input, shape index: {}]   ;;  %s13072_s18 = inlined_call_operand.vmem [shape: s32[2], index: 18, kind: input, shape index: {}]   ;;  %s13073_s19 = inlined_call_operand.hbm [shape: f32[1,1], index: 19, kind: output, shape index: {0}]   ;;  %s13074_s20 = inlined_call_operand.vmem [shape: f32[2,32], index: 20, kind: output, shape index: {1}]  }
   0x1   :  { %13079 = sst [smem:[#allocation15_spill]] %s13054_s0 }
   0x2   :  { %13080 = sst [smem:[#allocation16_spill]] %s13055_s1 }
   0x3   :  { %13081 = sst [smem:[#allocation17_spill]] %s13056_s2 }
   0x4   :  { %13082 = sst [smem:[#allocation18_spill]] %s13057_s3 }
   0x5   :  { %13083 = sst [smem:[#allocation19_spill]] %s13058_s4 }
   0x6   :  { %26 = vsyncpa [#allocation8], 0 }
   0x7   :  { %27 = vsyncpa [#allocation10], 0 }
   0x8   :  { %28 = vsyncpa [#allocation7], 0  ;;  %s69_s23 = sshll.u32 %s13071_s17, 4  ;;  %s79_s25 = sshll.u32 %s13072_s18, 4  ;;  %s70_s23 = int_to_ptr.vmem [resolvable:$true] %s69_s23  ;;  %s80_s25 = int_to_ptr.vmem [resolvable:$true] %s79_s25 }
   0x9   :  { %s11263_s3 = scalar_lea.vmem %s70_s23, 16  ;;  %p11268_p1 = scmp.lt.s32.totalorder %s70_s23, %s70_s23 }
   0xa   :  { %p11264_p0 = scmp.ne.s32.totalorder %s70_s23, %s11263_s3  ;;  %p11269_p2 = scmp.lt.s32.totalorder %s11263_s3, %s11263_s3 }
   0xc   :  { %p11270_p3 = por %p11269_p2, %p11268_p1 }
   0xe   :  { %p11271_p4 = pnand %p11270_p3, %p11264_p0 }
  0x10   :  { %11274 = shalt.err (!%p11271_p4)
}
  0x11   :  { %s11303_s26 = smov [#allocation6]   ;;  %s11275_s27 = scalar_lea.vmem %s80_s25, 16 }
  0x12   :  { %72 = dma.vmem_to_smem %s70_s23, 16, %s11303_s26, [#allocation8]  }
  0x13   :  { %p11276_p5 = scmp.ne.s32.totalorder %s80_s25, %s11275_s27  ;;  %p11280_p6 = scmp.lt.s32.totalorder %s80_s25, %s80_s25 }
  0x14   :  { %p11281_p7 = scmp.lt.s32.totalorder %s11275_s27, %s11275_s27 }
  0x16   :  { %p11282_p8 = por %p11281_p7, %p11280_p6 }
  0x18   :  { %p11283_p9 = pnand %p11282_p8, %p11276_p5 }
  0x1a   :  { %11286 = shalt.err (!%p11283_p9)
}
  0x1b   :  { %s11304_s17 = smov [#allocation9]  }
  0x1c   :  { %82 = dma.vmem_to_smem %s80_s25, 16, %s11304_s17, [#allocation10]  }
  0x1d   :  { %11297 = dma.done.wait [#allocation8], 16  }
  0x1e   :  { %11298 = vsyncadd [#allocation8], 4294967280 }
  0x1f   :  { %11299 = dma.done.wait [#allocation10], 16  }
  0x20   :  { %11300 = vsyncadd [#allocation10], 4294967280 }
  0x21   :  { %89 = sfence }
  0x22   :  { %s13084_s4 = sld [smem:[#allocation16_spill]]  ;;  %vm109_vm0 = vcmask 261120   ;;  %s13085_s2 = sld [smem:[#allocation15_spill]]  ;;  %v11305_v13 = vmov 0.0|0.0   ;;  %vm11306_vm1 = vmmov 0   ;;  %v11307_v19 = vmov 0.0  }
  0x23   :  { %s13086_s17 = sld [smem:[#allocation17_spill]]  ;;  %s13087_s18 = sld [smem:[#allocation18_spill]]  ;;  %vm345_vm2 = vcmask 257024   ;;  %vm454_vm3 = vcmask 261124   ;;  %vm4037_vm4 = vcmask 523264   ;;  %vm4761_vm7 = vcmask 254976  }
  0x24   :  { %s11308_s28 = smov 64   ;;  %s13088_s22 = sld [smem:[#allocation19_spill]]  ;;  %vm12169_vm6 = vmpackc.low %vm4037_vm4, %vm4037_vm4  ;;  %vm4870_vm8 = vcmask 259076   ;;  %vm6599_vm9 = vcmask 253952   ;;  %vm6601_vm10 = vcmask 254977   ;;  %vm6710_vm11 = vcmask 256002  }
  0x25   :  { %vm6712_vm12 = vcmask 257027   ;;  %vm6938_vm13 = vcmask 260102   ;;  %vm6940_vm14 = vcmask 261127   ;;  %vm6824_vm15 = vcmask 258052   ;;  %s8371_s3 = sld [smem:[#allocation6]]  ;;  %s11311_s1 = smov 112  }
  0x26   :  { %s8424_s26 = sld [smem:[#allocation9]] }
  0x28   :  { %v98_v0 = vld [vmem:[%s13084_s4] sm:$0xff]  ;;  %v99_v1 = vld [vmem:[%s13084_s4 + $0x8] sm:$0xff]  ;;  %v100_v2 = vld [vmem:[%s13084_s4 + $0x10] sm:$0xff] }
  0x29   :  { %v10150_v3 = vpack.c.bf16 %v99_v1, %v98_v0  ;;  %v101_v4 = vld [vmem:[%s13084_s4 + $0x18] sm:$0xff]  ;;  %v94_v5 = vld [vmem:[%s13085_s2 + $0x20] sm:$0xff]  ;;  %v240_v9 = vld [vmem:[%s13086_s17 + $0x8] sm:$0xff]  ;;  %s11309_s4 = smov 32  }
  0x2a   :  { %v10154_v6 = vpack.c.bf16 %v101_v4, %v100_v2  ;;  %9299 = vmatprep.mubr.msk.f32.mxu1 %vm109_vm0, %v94_v5  ;;  %v90_v7 = vld [vmem:[%s13085_s2] sm:$0xff]  ;;  %v95_v10 = vld [vmem:[%s13085_s2 + $0x28] sm:$0xff]  ;;  %v96_v14 = vld [vmem:[%s13085_s2 + $0x30] sm:$0xff] }
  0x2b   :  { %10622 = vmatprep.subr.bf16.mxu1 %v10150_v3  ;;  %10151 = vmatprep.subr.bf16.mxu0 %v10150_v3  ;;  %v239_v8 = vld [vmem:[%s13086_s17] sm:$0xff]  ;;  %v91_v12 = vld [vmem:[%s13085_s2 + $0x8] sm:$0xff]  ;;  %v241_v15 = vld [vmem:[%s13086_s17 + $0x10] sm:$0xff]  ;;  %p8372_p10 = scmp.gt.s32.totalorder %s8371_s3, 0  ;;  %p8842_p12 = scmp.lt.s32.totalorder %s8371_s3, 16 }
  0x2c   :  { %10624 = vmatpush3.bf16.msra.mxu1 %v10150_v3  ;;  %10153 = vmatpush3.bf16.msra.mxu0 %v10150_v3  ;;  %v11454_v11 = vpack.c.bf16 %v240_v9, %v239_v8  ;;  %v242_v16 = vld [vmem:[%s13086_s17 + $0x18] sm:$0xff]  ;;  %v11505_v24 = vld [vmem:[%s13087_s18] ss:$0 sm:$0xff]  ;;  %v92_v60 = vld [vmem:[%s13085_s2 + $0x10] sm:$0xff]  ;;  %p8425_p11 = scmp.gt.s32.totalorder %s8424_s26, 0  ;;  %p8847_p13 = scmp.lt.s32.totalorder %s8424_s26, 16 }
  0x2d   :  { %10623 = vmatprep.subr.bf16.mxu1 %v10154_v6  ;;  %10155 = vmatprep.subr.bf16.mxu0 %v10154_v6  ;;  %v97_v17 = vld [vmem:[%s13085_s2 + $0x38] sm:$0xff]  ;;  %v11477_v18 = vpack.c.bf16 %v242_v16, %v241_v15 }
  0x2e   :  { %9293 = vmatprep.mubr.msk.f32.mxu0 %vm109_vm0, %v90_v7  ;;  %v93_v61 = vld [vmem:[%s13085_s2 + $0x18] sm:$0xff]  ;;  %s13092_s26 = smov (!%p8425_p11, %s8424_s26), 0 }
  0x2f   :  { %s13096_s26 = smov (!%p8847_p13, %s13092_s26), 16 }
  0x30   :  { %10625 = vmatpush3.bf16.msra.mxu1 %v10154_v6  ;;  %10157 = vmatpush3.bf16.msra.mxu0 %v10154_v6  ;;  %p8478_p7 = scmp.lt.s32.totalorder %s13096_s26, 16 }
  0x31   :  { %10158 = vmatprep.subr.bf16.mxu1 %v11305_v13  ;;  %10170 = vmatprep.subr.bf16.mxu0 %v11305_v13 }
  0x33   :  { %9300 = vmatmul.mubr.msk.f32.vlgmr.msra.gmra.mrb[0].mxu1 %vm109_vm0, %v95_v10  ;;  %9294 = vmatmul.mubr.msk.f32.vlgmr.msra.gmra.mrb[0].mxu0 %vm109_vm0, %v91_v12 }
  0x34   :  { %10160 = vmatpush3.bf16.msra.mxu1 %v11454_v11  ;;  %9302 = vmatprep.mubr.msk.f32.mxu1 %vm109_vm0, %v96_v14 }
  0x35   :  { %10161 = vmatprep.subr.bf16.mxu1 %v11305_v13  ;;  %10172 = vmatpush3.bf16.msra.mxu0 %v11454_v11 }
  0x36   :  { %10173 = vmatprep.subr.bf16.mxu0 %v11305_v13  ;;  %9296 = vmatprep.mubr.msk.f32.mxu0 %vm109_vm0, %v92_v60 }
  0x37   :  { %9303 = vmatmul.mubr.msk.f32.gmra.mrb[2].mxu1 %vm109_vm0, %v97_v17  ;;  %9297 = vmatmul.mubr.msk.f32.gmra.mrb[2].mxu0 %vm109_vm0, %v93_v61 }
  0x38   :  { %10163 = vmatpush3.bf16.msra.mxu1 %v11477_v18  ;;  %9313 = vmatprep.mubr.msk.f32.mxu1 %vm11306_vm1, %v11307_v19 }
  0x39   :  { %10164 = vmatprep.subr.bf16.mxu1 %v11305_v13  ;;  %10175 = vmatpush3.bf16.msra.mxu0 %v11477_v18 }
  0x3a   :  { %10182 = vmatprep.subr.bf16.mxu0 %v11305_v13  ;;  %9335 = vmatprep.mubr.msk.f32.mxu0 %vm11306_vm1, %v11307_v19 }
  0x3b   :  { %9314 = vmatmul.mubr.f32.vlgmr.msra.gmra.mrb[4].mxu1 %v11307_v19 }
  0x3c   :  { %10166 = vmatpush3.bf16.msra.mxu1 %v11454_v11  ;;  %9324 = vmatprep.mubr.msk.f32.mxu1 %vm11306_vm1, %v11307_v19 }
  0x3d   :  { %10167 = vmatprep.subr.bf16.mxu1 %v11305_v13 }
  0x40   :  { %10169 = vmatpush3.bf16.msra.mxu1 %v11477_v18 }
  0x41   :  { %10176 = vmatprep.subr.bf16.mxu1 %v11305_v13 }
 0x106   :  { %v11496_v20 = vpop.f32.mrb[0].mxu1  ;;  %v11498_v21 = vpop.f32.mrb[0].mxu0 }
 0x107   :  { %v11500_v22 = vpop.f32.mrb[1].mxu1  ;;  %v200_v23 = vpop.f32.mrb[1].mxu0  ;;  %v206_v5 = vadd.f32 %v11498_v21, %v11505_v24 }
 0x108   :  { %v201_v27 = vadd.f32 %v11505_v24, %v200_v23 }
 0x10a   :  { %v11507_v25 = vpop.f32.mrb[2].mxu1  ;;  %v11541_v2 = vpop.f32.mrb[2].mxu0 }
 0x10b   :  { %v11509_v26 = vpop.f32.mrb[3].mxu1  ;;  %v11543_v3 = vpop.f32.mrb[3].mxu0 }
 0x10e   :  { %v312_v28 = vpop.f32.mrb[4].mxu1 }
 0x10f   :  { %v316_v29 = vadd.f32 %v312_v28, %v201_v27  ;;  %v9315_v30 = vpop.f32.mrb[5].mxu1 }
 0x111   :  { %10677 = vtanh.f32 %v316_v29  ;;  %v8656_v32 = vmul.f32 -1.442695, %v316_v29 }
 0x113   :  { %10679 = vpow2.f32 %v8656_v32 }
 0x11b   :  { %v10678_v31 = vpop.eup %10677 }
 0x11c   :  { %326 = vrot.lane.b32.xlu0 %v10678_v31, %s11308_s28 }
 0x11d   :  { %v10680_v33 = vpop.eup %10679 }
 0x11e   :  { %v320_v34 = vadd.f32 1.0, %v10680_v33 }
 0x120   :  { %10681 = vrcp.f32 %v320_v34 }
 0x12a   :  { %v10682_v35 = vpop.eup %10681 }
 0x12b   :  { %v324_v38 = vmul.f32 0.0, %v10682_v35 }
 0x18e   :  { %v327_v36 = vpop.permute.xlu0 %326 }
 0x18f   :  { %v329_v37 = vmul.f32 %v10682_v35, %v327_v36 }
 0x191   :  { %331 = vrot.lane.b32.xlu0 %v329_v37, %s11309_s4 }
 0x203   :  { %v332_v39 = vpop.permute.xlu0 %331 }
 0x204   :  { %v334_v40 = vadd.f32 %v332_v39, %v324_v38 }
 0x206   :  { %10683 = vtanh.f32 %v334_v40  ;;  %v431_v56 = vrot.slane %v334_v40, 4 }
 0x210   :  { %v10684_v41 = vpop.eup %10683 }
 0x211   :  { %337 = vrot.lane.b32.xlu1 %v10684_v41, %s11308_s28 }
 0x283   :  { %v338_v42 = vpop.permute.xlu1 %337 }
 0x284   :  { %v340_v43 = vmul.f32 %v10682_v35, %v338_v42 }
 0x286   :  { %342 = vrot.lane.b32.xlu1 %v340_v43, %s11309_s4 }
 0x2f8   :  { %v343_v44 = vpop.permute.xlu1 %342 }
 0x2f9   :  { %346 = vst.msk [vmem:[#allocation2] sm:$0xf] %vm345_vm2, %v343_v44  ;;  %9325 = vmatmul.mubr.msk.f32.vlgmr.msra.gmra.mrb[6].mxu1 %vm109_vm0, %v343_v44 }
 0x2fa   :  { %10178 = vmatpush3.bf16.msra.mxu1 %v11454_v11  ;;  %9346 = vmatprep.mubr.msk.f32.mxu1 %vm11306_vm1, %v11307_v19 }
 0x2fb   :  { %10179 = vmatprep.subr.bf16.mxu1 %v11305_v13 }
 0x2fe   :  { %10181 = vmatpush3.bf16.msra.mxu1 %v11477_v18 }
 0x2ff   :  { %10188 = vmatprep.subr.bf16.mxu1 %v11305_v13 }
 0x3cc   :  { %v415_v45 = vpop.f32.mrb[6].mxu1 }
 0x3cd   :  { %v420_v46 = vrot.slane %v415_v45, 4  ;;  %v9326_v47 = vpop.f32.mrb[7].mxu1 }
 0x3cf   :  { %v422_v48 = vadd.f32 %v420_v46, %v201_v27 }
 0x3d1   :  { %10685 = vtanh.f32 %v422_v48  ;;  %v8658_v50 = vmul.f32 -1.442695, %v422_v48 }
 0x3d3   :  { %10687 = vpow2.f32 %v8658_v50 }
 0x3db   :  { %v10686_v49 = vpop.eup %10685 }
 0x3dc   :  { %435 = vrot.lane.b32.xlu0 %v10686_v49, %s11308_s28 }
 0x3dd   :  { %v10688_v51 = vpop.eup %10687 }
 0x3de   :  { %v426_v52 = vadd.f32 1.0, %v10688_v51 }
 0x3e0   :  { %10689 = vrcp.f32 %v426_v52 }
 0x3ea   :  { %v10690_v53 = vpop.eup %10689 }
 0x3eb   :  { %v433_v57 = vmul.f32 %v10690_v53, %v431_v56 }
 0x44e   :  { %v436_v54 = vpop.permute.xlu0 %435 }
 0x44f   :  { %v438_v55 = vmul.f32 %v10690_v53, %v436_v54 }
 0x451   :  { %440 = vrot.lane.b32.xlu1 %v438_v55, %s11309_s4 }
 0x4c3   :  { %v441_v58 = vpop.permute.xlu1 %440 }
 0x4c4   :  { %v443_v59 = vadd.f32 %v441_v58, %v433_v57 }
 0x4c6   :  { %10691 = vtanh.f32 %v443_v59  ;;  %v540_v23 = vrot.slane %v443_v59, 4 }
 0x4d0   :  { %v10692_v62 = vpop.eup %10691 }
 0x4d1   :  { %446 = vrot.lane.b32.xlu0 %v10692_v62, %s11308_s28 }
 0x543   :  { %v447_v63 = vpop.permute.xlu0 %446 }
 0x544   :  { %v11537_v0 = vmul.f32 %v10690_v53, %v447_v63  ;;  %v211_v53 = vadd.f32 %v11505_v24, %v11543_v3 }
 0x546   :  { %v456_v1 = vrot.slane %v11537_v0, 4 }
 0x548   :  { %457 = vrot.lane.b32.xlu1 %v456_v1, %s11309_s4 }
 0x5ba   :  { %v458_v4 = vpop.permute.xlu1 %457 }
 0x5bb   :  { %9336 = vmatmul.mubr.msk.f32.vlgmr.msra.gmra.mrb[4].mxu0 %vm109_vm0, %v458_v4 }
 0x5bc   :  { %10184 = vmatpush3.bf16.msra.mxu0 %v11454_v11  ;;  %9357 = vmatprep.mubr.msk.f32.mxu0 %vm11306_vm1, %v11307_v19 }
 0x5bd   :  { %10185 = vmatprep.subr.bf16.mxu0 %v11305_v13 }
 0x5c0   :  { %10187 = vmatpush3.bf16.msra.mxu0 %v11477_v18 }
 0x5c1   :  { %10194 = vmatprep.subr.bf16.mxu0 %v11305_v13 }
 0x68e   :  { %v527_v6 = vpop.f32.mrb[4].mxu0 }
 0x68f   :  { %v531_v7 = vadd.f32 %v527_v6, %v206_v5  ;;  %v9337_v8 = vpop.f32.mrb[5].mxu0 }
 0x691   :  { %10693 = vtanh.f32 %v531_v7  ;;  %v8660_v10 = vmul.f32 -1.442695, %v531_v7 }
 0x693   :  { %10695 = vpow2.f32 %v8660_v10 }
 0x69b   :  { %v10694_v9 = vpop.eup %10693 }
 0x69c   :  { %544 = vrot.lane.b32.xlu0 %v10694_v9, %s11308_s28 }
 0x69d   :  { %v10696_v12 = vpop.eup %10695 }
 0x69e   :  { %v535_v14 = vadd.f32 1.0, %v10696_v12 }
 0x6a0   :  { %10697 = vrcp.f32 %v535_v14 }
 0x6aa   :  { %v10698_v15 = vpop.eup %10697 }
 0x6ab   :  { %v542_v27 = vmul.f32 %v10698_v15, %v540_v23 }
 0x70e   :  { %v545_v16 = vpop.permute.xlu0 %544 }
 0x70f   :  { %v547_v17 = vmul.f32 %v10698_v15, %v545_v16 }
 0x711   :  { %549 = vrot.lane.b32.xlu1 %v547_v17, %s11309_s4 }
 0x783   :  { %v550_v21 = vpop.permute.xlu1 %549 }
 0x784   :  { %v552_v28 = vadd.f32 %v550_v21, %v542_v27 }
 0x786   :  { %10699 = vtanh.f32 %v552_v28  ;;  %v648_v44 = vrot.slane %v552_v28, 4 }
 0x790   :  { %v10700_v29 = vpop.eup %10699 }
 0x791   :  { %555 = vrot.lane.b32.xlu0 %v10700_v29, %s11308_s28 }
 0x803   :  { %v556_v30 = vpop.permute.xlu0 %555 }
 0x804   :  { %v558_v31 = vmul.f32 %v10698_v15, %v556_v30 }
 0x806   :  { %560 = vrot.lane.b32.xlu1 %v558_v31, %s11309_s4 }
 0x878   :  { %v561_v32 = vpop.permute.xlu1 %560 }
 0x879   :  { %563 = vst.msk [vmem:[#allocation2 + $0x8] sm:$0xf] %vm345_vm2, %v561_v32  ;;  %9347 = vmatmul.mubr.msk.f32.vlgmr.msra.gmra.mrb[8].mxu1 %vm109_vm0, %v561_v32 }
 0x87a   :  { %10190 = vmatpush3.bf16.msra.mxu1 %v11454_v11  ;;  %9368 = vmatprep.mubr.msk.f32.mxu1 %vm11306_vm1, %v11307_v19 }
 0x87b   :  { %10191 = vmatprep.subr.bf16.mxu1 %v11305_v13 }
 0x87e   :  { %10193 = vmatpush3.bf16.msra.mxu1 %v11477_v18 }
 0x87f   :  { %10200 = vmatprep.subr.bf16.mxu1 %v11305_v13 }
 0x94c   :  { %v632_v33 = vpop.f32.mrb[8].mxu1 }
 0x94d   :  { %v637_v34 = vrot.slane %v632_v33, 4  ;;  %v9348_v35 = vpop.f32.mrb[9].mxu1 }
 0x94f   :  { %v639_v36 = vadd.f32 %v637_v34, %v206_v5 }
 0x951   :  { %10701 = vtanh.f32 %v639_v36  ;;  %v8662_v38 = vmul.f32 -1.442695, %v639_v36 }
 0x953   :  { %10703 = vpow2.f32 %v8662_v38 }
 0x95b   :  { %v10702_v37 = vpop.eup %10701 }
 0x95c   :  { %652 = vrot.lane.b32.xlu0 %v10702_v37, %s11308_s28 }
 0x95d   :  { %v10704_v39 = vpop.eup %10703 }
 0x95e   :  { %v643_v40 = vadd.f32 1.0, %v10704_v39  ;;  %v216_v39 = vadd.f32 %v11541_v2, %v11505_v24 }
 0x960   :  { %10705 = vrcp.f32 %v643_v40 }
 0x96a   :  { %v10706_v41 = vpop.eup %10705 }
 0x96b   :  { %v650_v45 = vmul.f32 %v10706_v41, %v648_v44 }
 0x9ce   :  { %v653_v42 = vpop.permute.xlu0 %652 }
 0x9cf   :  { %v655_v43 = vmul.f32 %v10706_v41, %v653_v42 }
 0x9d1   :  { %657 = vrot.lane.b32.xlu1 %v655_v43, %s11309_s4 }
 0xa43   :  { %v658_v46 = vpop.permute.xlu1 %657 }
 0xa44   :  { %v660_v47 = vadd.f32 %v658_v46, %v650_v45 }
 0xa46   :  { %10707 = vtanh.f32 %v660_v47  ;;  %v756_v1 = vrot.slane %v660_v47, 4 }
 0xa50   :  { %v10708_v48 = vpop.eup %10707 }
 0xa51   :  { %663 = vrot.lane.b32.xlu0 %v10708_v48, %s11308_s28 }
 0xac3   :  { %v664_v49 = vpop.permute.xlu0 %663 }
 0xac4   :  { %v11569_v50 = vmul.f32 %v10706_v41, %v664_v49 }
 0xac6   :  { %v672_v51 = vrot.slane %v11569_v50, 4 }
 0xac8   :  { %673 = vrot.lane.b32.xlu1 %v672_v51, %s11309_s4 }
 0xb3a   :  { %v674_v52 = vpop.permute.xlu1 %673 }
 0xb3b   :  { %9358 = vmatmul.mubr.msk.f32.vlgmr.msra.gmra.mrb[6].mxu0 %vm109_vm0, %v674_v52 }
 0xb3c   :  { %10196 = vmatpush3.bf16.msra.mxu0 %v11454_v11  ;;  %9379 = vmatprep.mubr.msk.f32.mxu0 %vm11306_vm1, %v11307_v19 }
 0xb3d   :  { %10197 = vmatprep.subr.bf16.mxu0 %v11305_v13 }
 0xb40   :  { %10199 = vmatpush3.bf16.msra.mxu0 %v11477_v18 }
 0xb41   :  { %10206 = vmatprep.subr.bf16.mxu0 %v11305_v13 }
 0xc0e   :  { %v743_v54 = vpop.f32.mrb[6].mxu0 }
 0xc0f   :  { %v747_v55 = vadd.f32 %v743_v54, %v211_v53  ;;  %v9359_v56 = vpop.f32.mrb[7].mxu0 }
 0xc11   :  { %10709 = vtanh.f32 %v747_v55  ;;  %v8664_v58 = vmul.f32 -1.442695, %v747_v55 }
 0xc13   :  { %10711 = vpow2.f32 %v8664_v58 }
 0xc1b   :  { %v10710_v57 = vpop.eup %10709 }
 0xc1c   :  { %760 = vrot.lane.b32.xlu0 %v10710_v57, %s11308_s28 }
 0xc1d   :  { %v10712_v59 = vpop.eup %10711 }
 0xc1e   :  { %v751_v60 = vadd.f32 1.0, %v10712_v59 }
 0xc20   :  { %10713 = vrcp.f32 %v751_v60 }
 0xc2a   :  { %v10714_v61 = vpop.eup %10713 }
 0xc2b   :  { %v758_v4 = vmul.f32 %v10714_v61, %v756_v1 }
 0xc8e   :  { %v761_v62 = vpop.permute.xlu0 %760 }
 0xc8f   :  { %v763_v63 = vmul.f32 %v10714_v61, %v761_v62 }
 0xc91   :  { %765 = vrot.lane.b32.xlu1 %v763_v63, %s11309_s4 }
 0xd03   :  { %v766_v3 = vpop.permute.xlu1 %765 }
 0xd04   :  { %v768_v5 = vadd.f32 %v766_v3, %v758_v4 }
 0xd06   :  { %10715 = vtanh.f32 %v768_v5  ;;  %v864_v30 = vrot.slane %v768_v5, 4 }
 0xd10   :  { %v10716_v6 = vpop.eup %10715 }
 0xd11   :  { %771 = vrot.lane.b32.xlu0 %v10716_v6, %s11308_s28 }
 0xd83   :  { %v772_v7 = vpop.permute.xlu0 %771 }
 0xd84   :  { %v774_v8 = vmul.f32 %v10714_v61, %v772_v7 }
 0xd86   :  { %776 = vrot.lane.b32.xlu1 %v774_v8, %s11309_s4 }
 0xdf8   :  { %v777_v9 = vpop.permute.xlu1 %776 }
 0xdf9   :  { %779 = vst.msk [vmem:[#allocation2 + $0x10] sm:$0xf] %vm345_vm2, %v777_v9  ;;  %9369 = vmatmul.mubr.msk.f32.vlgmr.msra.gmra.mrb[10].mxu1 %vm109_vm0, %v777_v9 }
 0xdfa   :  { %10202 = vmatpush3.bf16.msra.mxu1 %v11454_v11  ;;  %9390 = vmatprep.mubr.msk.f32.mxu1 %vm11306_vm1, %v11307_v19 }
 0xdfb   :  { %10203 = vmatprep.subr.bf16.mxu1 %v11305_v13 }
 0xdfe   :  { %10205 = vmatpush3.bf16.msra.mxu1 %v11477_v18 }
 0xdff   :  { %10212 = vmatprep.subr.bf16.mxu1 %v11305_v13 }
 0xecc   :  { %v848_v10 = vpop.f32.mrb[10].mxu1 }
 0xecd   :  { %v853_v12 = vrot.slane %v848_v10, 4  ;;  %v9370_v14 = vpop.f32.mrb[11].mxu1 }
 0xecf   :  { %v855_v15 = vadd.f32 %v853_v12, %v211_v53 }
 0xed1   :  { %10717 = vtanh.f32 %v855_v15  ;;  %v8666_v17 = vmul.f32 -1.442695, %v855_v15 }
 0xed3   :  { %10719 = vpow2.f32 %v8666_v17 }
 0xedb   :  { %v10718_v16 = vpop.eup %10717 }
 0xedc   :  { %868 = vrot.lane.b32.xlu0 %v10718_v16, %s11308_s28 }
 0xedd   :  { %v10720_v23 = vpop.eup %10719 }
 0xede   :  { %v859_v27 = vadd.f32 1.0, %v10720_v23  ;;  %v221_v23 = vadd.f32 %v11505_v24, %v11500_v22 }
 0xee0   :  { %10721 = vrcp.f32 %v859_v27 }
 0xeea   :  { %v10722_v21 = vpop.eup %10721 }
 0xeeb   :  { %v866_v31 = vmul.f32 %v10722_v21, %v864_v30 }
 0xf4e   :  { %v869_v28 = vpop.permute.xlu0 %868 }
 0xf4f   :  { %v871_v29 = vmul.f32 %v10722_v21, %v869_v28 }
 0xf51   :  { %873 = vrot.lane.b32.xlu1 %v871_v29, %s11309_s4 }
 0xfc3   :  { %v874_v32 = vpop.permute.xlu1 %873 }
 0xfc4   :  { %v876_v33 = vadd.f32 %v874_v32, %v866_v31 }
 0xfc6   :  { %10723 = vtanh.f32 %v876_v33  ;;  %v972_v51 = vrot.slane %v876_v33, 4 }
 0xfd0   :  { %v10724_v34 = vpop.eup %10723 }
 0xfd1   :  { %879 = vrot.lane.b32.xlu0 %v10724_v34, %s11308_s28 }
0x1043   :  { %v880_v35 = vpop.permute.xlu0 %879 }
0x1044   :  { %v11597_v36 = vmul.f32 %v10722_v21, %v880_v35 }
0x1046   :  { %v888_v37 = vrot.slane %v11597_v36, 4 }
0x1048   :  { %889 = vrot.lane.b32.xlu1 %v888_v37, %s11309_s4 }
0x10ba   :  { %v890_v38 = vpop.permute.xlu1 %889 }
0x10bb   :  { %9380 = vmatmul.mubr.msk.f32.vlgmr.msra.gmra.mrb[8].mxu0 %vm109_vm0, %v890_v38 }
0x10bc   :  { %10208 = vmatpush3.bf16.msra.mxu0 %v11454_v11  ;;  %9401 = vmatprep.mubr.msk.f32.mxu0 %vm11306_vm1, %v11307_v19 }
0x10bd   :  { %10209 = vmatprep.subr.bf16.mxu0 %v11305_v13 }
0x10c0   :  { %10211 = vmatpush3.bf16.msra.mxu0 %v11477_v18 }
0x10c1   :  { %10218 = vmatprep.subr.bf16.mxu0 %v11305_v13 }
0x118e   :  { %v959_v40 = vpop.f32.mrb[8].mxu0 }
0x118f   :  { %v963_v41 = vadd.f32 %v959_v40, %v216_v39  ;;  %v9381_v42 = vpop.f32.mrb[9].mxu0 }
0x1191   :  { %10725 = vtanh.f32 %v963_v41  ;;  %v8668_v44 = vmul.f32 -1.442695, %v963_v41 }
0x1193   :  { %10727 = vpow2.f32 %v8668_v44 }
0x119b   :  { %v10726_v43 = vpop.eup %10725 }
0x119c   :  { %976 = vrot.lane.b32.xlu0 %v10726_v43, %s11308_s28 }
0x119d   :  { %v10728_v45 = vpop.eup %10727 }
0x119e   :  { %v967_v46 = vadd.f32 1.0, %v10728_v45 }
0x11a0   :  { %10729 = vrcp.f32 %v967_v46 }
0x11aa   :  { %v10730_v47 = vpop.eup %10729 }
0x11ab   :  { %v974_v52 = vmul.f32 %v10730_v47, %v972_v51 }
0x120e   :  { %v977_v48 = vpop.permute.xlu0 %976 }
0x120f   :  { %v979_v49 = vmul.f32 %v10730_v47, %v977_v48 }
0x1211   :  { %981 = vrot.lane.b32.xlu1 %v979_v49, %s11309_s4 }
0x1283   :  { %v982_v2 = vpop.permute.xlu1 %981 }
0x1284   :  { %v984_v53 = vadd.f32 %v982_v2, %v974_v52 }
0x1286   :  { %10731 = vtanh.f32 %v984_v53  ;;  %v1080_v7 = vrot.slane %v984_v53, 4 }
0x1290   :  { %v10732_v54 = vpop.eup %10731 }
0x1291   :  { %987 = vrot.lane.b32.xlu0 %v10732_v54, %s11308_s28 }
0x1303   :  { %v988_v55 = vpop.permute.xlu0 %987 }
0x1304   :  { %v990_v56 = vmul.f32 %v10730_v47, %v988_v55 }
0x1306   :  { %992 = vrot.lane.b32.xlu1 %v990_v56, %s11309_s4 }
0x1378   :  { %v993_v57 = vpop.permute.xlu1 %992 }
0x1379   :  { %995 = vst.msk [vmem:[#allocation2 + $0x18] sm:$0xf] %vm345_vm2, %v993_v57  ;;  %9391 = vmatmul.mubr.msk.f32.vlgmr.msra.gmra.mrb[12].mxu1 %vm109_vm0, %v993_v57 }
0x137a   :  { %10214 = vmatpush3.bf16.msra.mxu1 %v11454_v11  ;;  %9412 = vmatprep.mubr.msk.f32.mxu1 %vm11306_vm1, %v11307_v19 }
0x137b   :  { %10215 = vmatprep.subr.bf16.mxu1 %v11305_v13 }
0x137e   :  { %10217 = vmatpush3.bf16.msra.mxu1 %v11477_v18 }
0x137f   :  { %10224 = vmatprep.subr.bf16.mxu1 %v11305_v13 }
0x144c   :  { %v1064_v58 = vpop.f32.mrb[12].mxu1 }
0x144d   :  { %v1069_v59 = vrot.slane %v1064_v58, 4  ;;  %v9392_v60 = vpop.f32.mrb[13].mxu1 }
0x144f   :  { %v1071_v61 = vadd.f32 %v1069_v59, %v216_v39 }
0x1451   :  { %10733 = vtanh.f32 %v1071_v61  ;;  %v8670_v63 = vmul.f32 -1.442695, %v1071_v61 }
0x1453   :  { %10735 = vpow2.f32 %v8670_v63 }
0x145b   :  { %v10734_v62 = vpop.eup %10733 }
0x145c   :  { %1084 = vrot.lane.b32.xlu0 %v10734_v62, %s11308_s28 }
0x145d   :  { %v10736_v1 = vpop.eup %10735 }
0x145e   :  { %v1075_v4 = vadd.f32 1.0, %v10736_v1  ;;  %v226_v1 = vadd.f32 %v11496_v20, %v11505_v24 }
0x1460   :  { %10737 = vrcp.f32 %v1075_v4 }
0x146a   :  { %v10738_v3 = vpop.eup %10737 }
0x146b   :  { %v1082_v8 = vmul.f32 %v10738_v3, %v1080_v7 }
0x14ce   :  { %v1085_v5 = vpop.permute.xlu0 %1084 }
0x14cf   :  { %v1087_v6 = vmul.f32 %v10738_v3, %v1085_v5 }
0x14d1   :  { %1089 = vrot.lane.b32.xlu1 %v1087_v6, %s11309_s4 }
0x1543   :  { %v1090_v9 = vpop.permute.xlu1 %1089 }
0x1544   :  { %v1092_v10 = vadd.f32 %v1090_v9, %v1082_v8 }
0x1546   :  { %10739 = vtanh.f32 %v1092_v10  ;;  %v1188_v37 = vrot.slane %v1092_v10, 4 }
0x1550   :  { %v10740_v12 = vpop.eup %10739 }
0x1551   :  { %1095 = vrot.lane.b32.xlu0 %v10740_v12, %s11308_s28 }
0x15c3   :  { %v1096_v14 = vpop.permute.xlu0 %1095 }
0x15c4   :  { %v11625_v15 = vmul.f32 %v10738_v3, %v1096_v14 }
0x15c6   :  { %v1104_v16 = vrot.slane %v11625_v15, 4 }
0x15c8   :  { %1105 = vrot.lane.b32.xlu1 %v1104_v16, %s11309_s4 }
0x163a   :  { %v1106_v17 = vpop.permute.xlu1 %1105 }
0x163b   :  { %9402 = vmatmul.mubr.msk.f32.vlgmr.msra.gmra.mrb[10].mxu0 %vm109_vm0, %v1106_v17 }
0x163c   :  { %10220 = vmatpush3.bf16.msra.mxu0 %v11454_v11  ;;  %9423 = vmatprep.mubr.msk.f32.mxu0 %vm11306_vm1, %v11307_v19 }
0x163d   :  { %10221 = vmatprep.subr.bf16.mxu0 %v11305_v13 }
0x1640   :  { %10223 = vmatpush3.bf16.msra.mxu0 %v11477_v18 }
0x1641   :  { %10230 = vmatprep.subr.bf16.mxu0 %v11305_v13 }
0x170e   :  { %v1175_v27 = vpop.f32.mrb[10].mxu0 }
0x170f   :  { %v1179_v21 = vadd.f32 %v1175_v27, %v221_v23  ;;  %v9403_v28 = vpop.f32.mrb[11].mxu0 }
0x1711   :  { %10741 = vtanh.f32 %v1179_v21  ;;  %v8672_v30 = vmul.f32 -1.442695, %v1179_v21 }
0x1713   :  { %10743 = vpow2.f32 %v8672_v30 }
0x171b   :  { %v10742_v29 = vpop.eup %10741 }
0x171c   :  { %1192 = vrot.lane.b32.xlu0 %v10742_v29, %s11308_s28 }
0x171d   :  { %v10744_v31 = vpop.eup %10743 }
0x171e   :  { %v1183_v32 = vadd.f32 1.0, %v10744_v31 }
0x1720   :  { %10745 = vrcp.f32 %v1183_v32 }
0x172a   :  { %v10746_v33 = vpop.eup %10745 }
0x172b   :  { %v1190_v38 = vmul.f32 %v10746_v33, %v1188_v37 }
0x178e   :  { %v1193_v34 = vpop.permute.xlu0 %1192 }
0x178f   :  { %v1195_v35 = vmul.f32 %v10746_v33, %v1193_v34 }
0x1791   :  { %1197 = vrot.lane.b32.xlu1 %v1195_v35, %s11309_s4 }
0x1803   :  { %v1198_v22 = vpop.permute.xlu1 %1197 }
0x1804   :  { %v1200_v39 = vadd.f32 %v1198_v22, %v1190_v38 }
0x1806   :  { %10747 = vtanh.f32 %v1200_v39  ;;  %v1296_v55 = vrot.slane %v1200_v39, 4 }
0x1810   :  { %v10748_v40 = vpop.eup %10747 }
0x1811   :  { %1203 = vrot.lane.b32.xlu0 %v10748_v40, %s11308_s28 }
0x1883   :  { %v1204_v41 = vpop.permute.xlu0 %1203 }
0x1884   :  { %v1206_v42 = vmul.f32 %v10746_v33, %v1204_v41 }
0x1886   :  { %1208 = vrot.lane.b32.xlu1 %v1206_v42, %s11309_s4 }
0x18f8   :  { %v1209_v43 = vpop.permute.xlu1 %1208 }
0x18f9   :  { %1211 = vst.msk [vmem:[#allocation2 + $0x20] sm:$0xf] %vm345_vm2, %v1209_v43  ;;  %9413 = vmatmul.mubr.msk.f32.vlgmr.msra.gmra.mrb[14].mxu1 %vm109_vm0, %v1209_v43 }
0x18fa   :  { %10226 = vmatpush3.bf16.msra.mxu1 %v11454_v11  ;;  %9434 = vmatprep.mubr.msk.f32.mxu1 %vm11306_vm1, %v11307_v19 }
0x18fb   :  { %10227 = vmatprep.subr.bf16.mxu1 %v11305_v13 }
0x18fe   :  { %10229 = vmatpush3.bf16.msra.mxu1 %v11477_v18 }
0x18ff   :  { %10236 = vmatprep.subr.bf16.mxu1 %v11305_v13 }
0x19cc   :  { %v1280_v44 = vpop.f32.mrb[14].mxu1 }
0x19cd   :  { %v1285_v45 = vrot.slane %v1280_v44, 4  ;;  %v9414_v46 = vpop.f32.mrb[15].mxu1 }
0x19cf   :  { %v1287_v47 = vadd.f32 %v1285_v45, %v221_v23 }
0x19d1   :  { %10749 = vtanh.f32 %v1287_v47  ;;  %v8674_v49 = vmul.f32 -1.442695, %v1287_v47 }
0x19d3   :  { %10751 = vpow2.f32 %v8674_v49 }
0x19db   :  { %v10750_v48 = vpop.eup %10749 }
0x19dc   :  { %1300 = vrot.lane.b32.xlu0 %v10750_v48, %s11308_s28 }
0x19dd   :  { %v10752_v51 = vpop.eup %10751 }
0x19de   :  { %v1291_v52 = vadd.f32 1.0, %v10752_v51  ;;  %v231_v51 = vadd.f32 %v11505_v24, %v11509_v26 }
0x19e0   :  { %10753 = vrcp.f32 %v1291_v52 }
0x19ea   :  { %v10754_v2 = vpop.eup %10753 }
0x19eb   :  { %v1298_v56 = vmul.f32 %v10754_v2, %v1296_v55 }
0x1a4e   :  { %v1301_v53 = vpop.permute.xlu0 %1300 }
0x1a4f   :  { %v1303_v54 = vmul.f32 %v10754_v2, %v1301_v53 }
0x1a51   :  { %1305 = vrot.lane.b32.xlu1 %v1303_v54, %s11309_s4 }
0x1ac3   :  { %v1306_v57 = vpop.permute.xlu1 %1305 }
0x1ac4   :  { %v1308_v58 = vadd.f32 %v1306_v57, %v1298_v56 }
0x1ac6   :  { %10755 = vtanh.f32 %v1308_v58  ;;  %v1404_v16 = vrot.slane %v1308_v58, 4 }
0x1ad0   :  { %v10756_v59 = vpop.eup %10755 }
0x1ad1   :  { %1311 = vrot.lane.b32.xlu0 %v10756_v59, %s11308_s28 }
0x1b43   :  { %v1312_v60 = vpop.permute.xlu0 %1311 }
0x1b44   :  { %v11653_v61 = vmul.f32 %v10754_v2, %v1312_v60 }
0x1b46   :  { %v1320_v62 = vrot.slane %v11653_v61, 4 }
0x1b48   :  { %1321 = vrot.lane.b32.xlu1 %v1320_v62, %s11309_s4 }
0x1bba   :  { %v1322_v63 = vpop.permute.xlu1 %1321 }
0x1bbb   :  { %9424 = vmatmul.mubr.msk.f32.vlgmr.msra.gmra.mrb[12].mxu0 %vm109_vm0, %v1322_v63 }
0x1bbc   :  { %10232 = vmatpush3.bf16.msra.mxu0 %v11454_v11  ;;  %9445 = vmatprep.mubr.msk.f32.mxu0 %vm11306_vm1, %v11307_v19 }
0x1bbd   :  { %10233 = vmatprep.subr.bf16.mxu0 %v11305_v13 }
0x1bc0   :  { %10235 = vmatpush3.bf16.msra.mxu0 %v11477_v18 }
0x1bc1   :  { %10242 = vmatprep.subr.bf16.mxu0 %v11305_v13 }
0x1c8e   :  { %v1391_v4 = vpop.f32.mrb[12].mxu0 }
0x1c8f   :  { %v1395_v3 = vadd.f32 %v1391_v4, %v226_v1  ;;  %v9425_v5 = vpop.f32.mrb[13].mxu0 }
0x1c91   :  { %10757 = vtanh.f32 %v1395_v3  ;;  %v8676_v7 = vmul.f32 -1.442695, %v1395_v3 }
0x1c93   :  { %10759 = vpow2.f32 %v8676_v7 }
0x1c9b   :  { %v10758_v6 = vpop.eup %10757 }
0x1c9c   :  { %1408 = vrot.lane.b32.xlu0 %v10758_v6, %s11308_s28 }
0x1c9d   :  { %v10760_v8 = vpop.eup %10759 }
0x1c9e   :  { %v1399_v9 = vadd.f32 1.0, %v10760_v8 }
0x1ca0   :  { %10761 = vrcp.f32 %v1399_v9 }
0x1caa   :  { %v10762_v10 = vpop.eup %10761 }
0x1cab   :  { %v1406_v17 = vmul.f32 %v10762_v10, %v1404_v16 }
0x1d0e   :  { %v1409_v12 = vpop.permute.xlu0 %1408 }
0x1d0f   :  { %v1411_v14 = vmul.f32 %v10762_v10, %v1409_v12 }
0x1d11   :  { %1413 = vrot.lane.b32.xlu1 %v1411_v14, %s11309_s4 }
0x1d83   :  { %v1414_v20 = vpop.permute.xlu1 %1413 }
0x1d84   :  { %v1416_v23 = vadd.f32 %v1414_v20, %v1406_v17 }
0x1d86   :  { %10763 = vtanh.f32 %v1416_v23  ;;  %v1512_v41 = vrot.slane %v1416_v23, 4 }
0x1d90   :  { %v10764_v27 = vpop.eup %10763 }
0x1d91   :  { %1419 = vrot.lane.b32.xlu0 %v10764_v27, %s11308_s28 }
0x1e03   :  { %v1420_v21 = vpop.permute.xlu0 %1419 }
0x1e04   :  { %v1422_v28 = vmul.f32 %v10762_v10, %v1420_v21 }
0x1e06   :  { %1424 = vrot.lane.b32.xlu1 %v1422_v28, %s11309_s4 }
0x1e78   :  { %v1425_v29 = vpop.permute.xlu1 %1424 }
0x1e79   :  { %1427 = vst.msk [vmem:[#allocation2 + $0x28] sm:$0xf] %vm345_vm2, %v1425_v29  ;;  %9435 = vmatmul.mubr.msk.f32.vlgmr.msra.gmra.mrb[16].mxu1 %vm109_vm0, %v1425_v29 }
0x1e7a   :  { %10238 = vmatpush3.bf16.msra.mxu1 %v11454_v11  ;;  %9456 = vmatprep.mubr.msk.f32.mxu1 %vm11306_vm1, %v11307_v19 }
0x1e7b   :  { %10239 = vmatprep.subr.bf16.mxu1 %v11305_v13 }
0x1e7e   :  { %10241 = vmatpush3.bf16.msra.mxu1 %v11477_v18 }
0x1e7f   :  { %10248 = vmatprep.subr.bf16.mxu1 %v11305_v13 }
0x1f4c   :  { %v1496_v30 = vpop.f32.mrb[16].mxu1 }
0x1f4d   :  { %v1501_v31 = vrot.slane %v1496_v30, 4  ;;  %v9436_v32 = vpop.f32.mrb[17].mxu1 }
0x1f4f   :  { %v1503_v33 = vadd.f32 %v1501_v31, %v226_v1 }
0x1f51   :  { %10765 = vtanh.f32 %v1503_v33  ;;  %v8678_v35 = vmul.f32 -1.442695, %v1503_v33 }
0x1f53   :  { %10767 = vpow2.f32 %v8678_v35 }
0x1f5b   :  { %v10766_v34 = vpop.eup %10765 }
0x1f5c   :  { %1516 = vrot.lane.b32.xlu0 %v10766_v34, %s11308_s28  ;;  %v11715_v34 = vadd.f32 %v11507_v25, %v11505_v24 }
0x1f5d   :  { %v10768_v37 = vpop.eup %10767 }
0x1f5e   :  { %v1507_v38 = vadd.f32 1.0, %v10768_v37 }
0x1f60   :  { %10769 = vrcp.f32 %v1507_v38 }
0x1f6a   :  { %v10770_v22 = vpop.eup %10769 }
0x1f6b   :  { %v1514_v42 = vmul.f32 %v10770_v22, %v1512_v41 }
0x1fce   :  { %v1517_v39 = vpop.permute.xlu0 %1516 }
0x1fcf   :  { %v1519_v40 = vmul.f32 %v10770_v22, %v1517_v39 }
0x1fd1   :  { %1521 = vrot.lane.b32.xlu1 %v1519_v40, %s11309_s4 }
0x2043   :  { %v1522_v43 = vpop.permute.xlu1 %1521 }
0x2044   :  { %v1524_v44 = vadd.f32 %v1522_v43, %v1514_v42 }
0x2046   :  { %10771 = vtanh.f32 %v1524_v44  ;;  %v1620_v62 = vrot.slane %v1524_v44, 4 }
0x2050   :  { %v10772_v45 = vpop.eup %10771 }
0x2051   :  { %1527 = vrot.lane.b32.xlu0 %v10772_v45, %s11308_s28 }
0x20c3   :  { %v1528_v46 = vpop.permute.xlu0 %1527 }
0x20c4   :  { %v11681_v47 = vmul.f32 %v10770_v22, %v1528_v46 }
0x20c6   :  { %v1536_v48 = vrot.slane %v11681_v47, 4 }
0x20c8   :  { %1537 = vrot.lane.b32.xlu1 %v1536_v48, %s11309_s4  ;;  %v1976_v48 = vld [vmem:[%s13088_s22] sm:$0xff] }
0x213a   :  { %v1538_v49 = vpop.permute.xlu1 %1537 }
0x213b   :  { %9446 = vmatmul.mubr.msk.f32.vlgmr.msra.gmra.mrb[14].mxu0 %vm109_vm0, %v1538_v49  ;;  %v1977_v49 = vld [vmem:[%s13088_s22 + $0x8] sm:$0xff] }
0x213c   :  { %10244 = vmatpush3.bf16.msra.mxu0 %v11454_v11  ;;  %9467 = vmatprep.mubr.msk.f32.mxu0 %vm11306_vm1, %v11307_v19 }
0x213d   :  { %10245 = vmatprep.subr.bf16.mxu0 %v11305_v13 }
0x2140   :  { %10247 = vmatpush3.bf16.msra.mxu0 %v11477_v18 }
0x220e   :  { %v1607_v52 = vpop.f32.mrb[14].mxu0 }
0x220f   :  { %v1611_v2 = vadd.f32 %v1607_v52, %v231_v51  ;;  %v9447_v53 = vpop.f32.mrb[15].mxu0 }
0x2211   :  { %10773 = vtanh.f32 %v1611_v2  ;;  %v8680_v55 = vmul.f32 -1.442695, %v1611_v2  ;;  %v1979_v2 = vld [vmem:[%s13088_s22 + $0x18] sm:$0xff] }
0x2213   :  { %10775 = vpow2.f32 %v8680_v55 }
0x221b   :  { %v10774_v54 = vpop.eup %10773 }
0x221c   :  { %1624 = vrot.lane.b32.xlu0 %v10774_v54, %s11308_s28 }
0x221d   :  { %v10776_v56 = vpop.eup %10775 }
0x221e   :  { %v1615_v57 = vadd.f32 1.0, %v10776_v56 }
0x2220   :  { %10777 = vrcp.f32 %v1615_v57 }
0x222a   :  { %v10778_v58 = vpop.eup %10777 }
0x222b   :  { %v1622_v63 = vmul.f32 %v10778_v58, %v1620_v62 }
0x228e   :  { %v1625_v59 = vpop.permute.xlu0 %1624 }
0x228f   :  { %v1627_v60 = vmul.f32 %v10778_v58, %v1625_v59  ;;  %v2116_v59 = vld [vmem:[%s13059_s5] sm:$0xff] }
0x2291   :  { %1629 = vrot.lane.b32.xlu1 %v1627_v60, %s11309_s4  ;;  %v2117_v60 = vld [vmem:[%s13059_s5 + $0x8] sm:$0xff] }
0x2303   :  { %v1630_v26 = vpop.permute.xlu1 %1629 }
0x2304   :  { %v1632_v1 = vadd.f32 %v1630_v26, %v1622_v63  ;;  %v11751_v63 = vpack.c.bf16 %v2117_v60, %v2116_v59  ;;  %v2119_v26 = vld [vmem:[%s13059_s5 + $0x18] sm:$0xff] }
0x2306   :  { %10779 = vtanh.f32 %v1632_v1 }
0x2310   :  { %v10780_v4 = vpop.eup %10779 }
0x2311   :  { %1635 = vrot.lane.b32.xlu0 %v10780_v4, %s11308_s28 }
0x2383   :  { %v1636_v3 = vpop.permute.xlu0 %1635 }
0x2384   :  { %v1638_v5 = vmul.f32 %v10778_v58, %v1636_v3 }
0x2386   :  { %1640 = vrot.lane.b32.xlu1 %v1638_v5, %s11309_s4 }
0x23f8   :  { %v1641_v6 = vpop.permute.xlu1 %1640 }
0x23f9   :  { %1643 = vst.msk [vmem:[#allocation2 + $0x30] sm:$0xf] %vm345_vm2, %v1641_v6  ;;  %9457 = vmatmul.mubr.msk.f32.vlgmr.msra.gmra.mrb[18].mxu1 %vm109_vm0, %v1641_v6 }
0x23fa   :  { %10250 = vmatpush3.bf16.msra.mxu1 %v11454_v11  ;;  %9478 = vmatprep.mubr.msk.f32.mxu1 %vm11306_vm1, %v11307_v19 }
0x23fb   :  { %10251 = vmatprep.subr.bf16.mxu1 %v11305_v13 }
0x23fe   :  { %10253 = vmatpush3.bf16.msra.mxu1 %v11477_v18  ;;  %v1728_v18 = vrot.slane %v1632_v1, 4 }
0x23ff   :  { %10262 = vmatprep.subr.bf16.mxu1 %v11305_v13 }
0x24cc   :  { %v1712_v7 = vpop.f32.mrb[18].mxu1 }
0x24cd   :  { %v1717_v8 = vrot.slane %v1712_v7, 4  ;;  %v9458_v9 = vpop.f32.mrb[19].mxu1 }
0x24cf   :  { %v1719_v10 = vadd.f32 %v1717_v8, %v231_v51  ;;  %v10254_v51 = vpack.c.bf16 %v1977_v49, %v1976_v48  ;;  %v11786_v8 = vld [vmem:[%s13060_s6] ss:$0 sm:$0xff] }
0x24d1   :  { %10781 = vtanh.f32 %v1719_v10  ;;  %v8682_v14 = vmul.f32 -1.442695, %v1719_v10  ;;  %10255 = vmatprep.subr.bf16.mxu0 %v10254_v51 }
0x24d3   :  { %10783 = vpow2.f32 %v8682_v14 }
0x24db   :  { %v10782_v12 = vpop.eup %10781 }
0x24dc   :  { %1732 = vrot.lane.b32.xlu0 %v10782_v12, %s11308_s28 }
0x24dd   :  { %v10784_v11 = vpop.eup %10783 }
0x24de   :  { %v1723_v16 = vadd.f32 1.0, %v10784_v11 }
0x24e0   :  { %10785 = vrcp.f32 %v1723_v16 }
0x24ea   :  { %v10786_v17 = vpop.eup %10785 }
0x24eb   :  { %v1730_v27 = vmul.f32 %v10786_v17, %v1728_v18 }
0x254e   :  { %v1733_v20 = vpop.permute.xlu0 %1732 }
0x254f   :  { %v1735_v23 = vmul.f32 %v10786_v17, %v1733_v20 }
0x2551   :  { %1737 = vrot.lane.b32.xlu1 %v1735_v23, %s11309_s4 }
0x25c3   :  { %v1738_v21 = vpop.permute.xlu1 %1737 }
0x25c4   :  { %v1740_v28 = vadd.f32 %v1738_v21, %v1730_v27 }
0x25c6   :  { %10787 = vtanh.f32 %v1740_v28  ;;  %v1836_v24 = vrot.slane %v1740_v28, 4 }
0x25d0   :  { %v10788_v29 = vpop.eup %10787 }
0x25d1   :  { %1743 = vrot.lane.b32.xlu0 %v10788_v29, %s11308_s28 }
0x2643   :  { %v1744_v30 = vpop.permute.xlu0 %1743 }
0x2644   :  { %v11708_v31 = vmul.f32 %v10786_v17, %v1744_v30 }
0x2646   :  { %v1752_v32 = vrot.slane %v11708_v31, 4 }
0x2648   :  { %1753 = vrot.lane.b32.xlu1 %v1752_v32, %s11309_s4 }
0x26ba   :  { %v1754_v33 = vpop.permute.xlu1 %1753 }
0x26bb   :  { %9468 = vmatmul.mubr.msk.f32.vlgmr.msra.gmra.mrb[16].mxu0 %vm109_vm0, %v1754_v33 }
0x26bc   :  { %10257 = vmatpush3.bf16.msra.mxu0 %v10254_v51 }
0x278e   :  { %v1823_v35 = vpop.f32.mrb[16].mxu0 }
0x278f   :  { %v1827_v37 = vadd.f32 %v1823_v35, %v11715_v34  ;;  %v9469_v38 = vpop.f32.mrb[17].mxu0 }
0x2791   :  { %10789 = vtanh.f32 %v1827_v37  ;;  %v8684_v39 = vmul.f32 -1.442695, %v1827_v37 }
0x2793   :  { %10791 = vpow2.f32 %v8684_v39 }
0x279b   :  { %v10790_v22 = vpop.eup %10789 }
0x279c   :  { %1840 = vrot.lane.b32.xlu0 %v10790_v22, %s11308_s28 }
0x279d   :  { %v10792_v40 = vpop.eup %10791 }
0x279e   :  { %v1831_v41 = vadd.f32 1.0, %v10792_v40 }
0x27a0   :  { %10793 = vrcp.f32 %v1831_v41 }
0x27aa   :  { %v10794_v42 = vpop.eup %10793 }
0x27ab   :  { %v1838_v25 = vmul.f32 %v10794_v42, %v1836_v24 }
0x280e   :  { %v1841_v43 = vpop.permute.xlu0 %1840 }
0x280f   :  { %v1843_v44 = vmul.f32 %v10794_v42, %v1841_v43 }
0x2811   :  { %1845 = vrot.lane.b32.xlu1 %v1843_v44, %s11309_s4 }
0x2815   :  { %451 = vrot.lane.b32.xlu1 %v11537_v0, %s11309_s4  ;;  %v1978_v0 = vld [vmem:[%s13088_s22 + $0x10] sm:$0xff] }
0x2816   :  { %v10258_v53 = vpack.c.bf16 %v1979_v2, %v1978_v0 }
0x2818   :  { %10259 = vmatprep.subr.bf16.mxu0 %v10258_v53 }
0x2819   :  { %10261 = vmatpush3.bf16.msra.mxu0 %v10258_v53 }
0x281a   :  { %10274 = vmatprep.subr.bf16.mxu0 %v11305_v13 }
0x2883   :  { %v1846_v45 = vpop.permute.xlu1 %1845 }
0x2884   :  { %v11722_v46 = vadd.f32 %v1846_v45, %v1838_v25 }
0x2886   :  { %10795 = vtanh.f32 %v11722_v46  ;;  %v1944_v44 = vrot.slane %v11722_v46, 4 }
0x2887   :  { %v452_v52 = vpop.permute.xlu1 %451 }
0x2888   :  { %455 = vst.msk [vmem:[#allocation2] sm:$0xf0] %vm454_vm3, %v452_v52 }
0x288f   :  { %v1968_v54 = vld [vmem:[#allocation2] sm:$0xff] }
0x2890   :  { %v10796_v55 = vpop.eup %10795  ;;  %9489 = vmatprep.mubr.msk.f32.mxu0 %vm109_vm0, %v1968_v54 }
0x2891   :  { %1851 = vrot.lane.b32.xlu0 %v10796_v55, %s11308_s28 }
0x2895   :  { %668 = vrot.lane.b32.xlu0 %v11569_v50, %s11309_s4  ;;  %v2118_v50 = vld [vmem:[%s13059_s5 + $0x10] sm:$0xff]  ;;  %s8852_s5 = sld [smem:[#allocation6 + $0x1]] }
0x2896   :  { %v11762_v1 = vpack.c.bf16 %v2119_v26, %v2118_v50 }
0x289b   :  { %p8488_p0 = scmp.gt.s32.totalorder %s8852_s5, 0  ;;  %p8853_p1 = scmp.lt.s32.totalorder %s8852_s5, 16 }
0x289d   :  { %s8489_s22 = scalar_select %p8488_p0, %s8852_s5, 0 }
0x289f   :  { %s13098_s22 = smov (!%p8853_p1, %s8489_s22), 16 }
0x28a0   :  { %p8543_p3 = scmp.lt.s32.totalorder %s13098_s22, 16 }
0x2903   :  { %v1852_v56 = vpop.permute.xlu0 %1851 }
0x2904   :  { %v1854_v57 = vmul.f32 %v10794_v42, %v1852_v56 }
0x2906   :  { %1856 = vrot.lane.b32.xlu1 %v1854_v57, %s11309_s4 }
0x2907   :  { %v669_v58 = vpop.permute.xlu0 %668 }
0x2908   :  { %671 = vst.msk [vmem:[#allocation2 + $0x8] sm:$0xf0] %vm454_vm3, %v669_v58 }
0x290f   :  { %v1969_v62 = vld [vmem:[#allocation2 + $0x8] sm:$0xff] }
0x2910   :  { %9490 = vmatmul.mubr.msk.f32.vlgmr.msra.gmra.mrb[18].mxu0 %vm109_vm0, %v1969_v62 }
0x2911   :  { %10276 = vmatpush3.bf16.msra.mxu0 %v11751_v63 }
0x2912   :  { %10277 = vmatprep.subr.bf16.mxu0 %v11305_v13 }
0x2915   :  { %10279 = vmatpush3.bf16.msra.mxu0 %v11762_v1 }
0x2916   :  { %10286 = vmatprep.subr.bf16.mxu0 %v11305_v13 }
0x2978   :  { %v1857_v4 = vpop.permute.xlu1 %1856 }
0x2979   :  { %1859 = vst.msk [vmem:[#allocation2 + $0x38] sm:$0xf] %vm345_vm2, %v1857_v4  ;;  %9479 = vmatmul.mubr.msk.f32.vlgmr.msra.gmra.mrb[20].mxu1 %vm109_vm0, %v1857_v4 }
0x297a   :  { %10264 = vmatpush3.bf16.msra.mxu1 %v11751_v63  ;;  %9509 = vmatprep.mubr.msk.f32.mxu1 %vm11306_vm1, %v11307_v19 }
0x297b   :  { %10265 = vmatprep.subr.bf16.mxu1 %v11305_v13 }
0x297e   :  { %10267 = vmatpush3.bf16.msra.mxu1 %v11762_v1 }
0x297f   :  { %10268 = vmatprep.subr.bf16.mxu1 %v11305_v13 }
0x2981   :  { %9510 = vmatmul.mubr.f32.vlgmr.msra.gmra.mrb[22].mxu1 %v11307_v19 }
0x2982   :  { %10270 = vmatpush3.bf16.msra.mxu1 %v11751_v63  ;;  %9520 = vmatprep.mubr.msk.f32.mxu1 %vm11306_vm1, %v11307_v19 }
0x2983   :  { %10271 = vmatprep.subr.bf16.mxu1 %v11305_v13 }
0x2986   :  { %10273 = vmatpush3.bf16.msra.mxu1 %v11762_v1 }
0x2987   :  { %10280 = vmatprep.subr.bf16.mxu1 %v11305_v13 }
0x29e3   :  { %v11781_v3 = vpop.f32.mrb[18].mxu0 }
0x29e4   :  { %v2077_v5 = vpop.f32.mrb[19].mxu0 }
0x29e5   :  { %v11789_v9 = vadd.f32 %v11786_v8, %v2077_v5 }
0x2a4c   :  { %v1928_v6 = vpop.f32.mrb[20].mxu1 }
0x2a4d   :  { %v9480_v7 = vpop.f32.mrb[21].mxu1  ;;  %v1933_v21 = vrot.slane %v1928_v6, 4 }
0x2a4f   :  { %v1935_v32 = vadd.f32 %v1933_v21, %v11715_v34 }
0x2a51   :  { %v8686_v37 = vmul.f32 -1.442695, %v1935_v32 }
0x2a54   :  { %v2186_v10 = vpop.f32.mrb[22].mxu1 }
0x2a55   :  { %v2190_v12 = vadd.f32 %v2186_v10, %v11789_v9  ;;  %v9511_v14 = vpop.f32.mrb[23].mxu1 }
0x2a57   :  { %10797 = vtanh.f32 %v2190_v12  ;;  %v8696_v16 = vmul.f32 -1.442695, %v2190_v12 }
0x2a59   :  { %10799 = vpow2.f32 %v8696_v16 }
0x2a61   :  { %v10798_v11 = vpop.eup %10797 }
0x2a62   :  { %2200 = vrot.lane.b32.xlu0 %v10798_v11, %s11308_s28 }
0x2a63   :  { %v10800_v17 = vpop.eup %10799 }
0x2a64   :  { %v2194_v20 = vadd.f32 1.0, %v10800_v17 }
0x2a66   :  { %10801 = vrcp.f32 %v2194_v20 }
0x2a70   :  { %v10802_v23 = vpop.eup %10801 }
0x2a71   :  { %v2198_v28 = vmul.f32 0.0, %v10802_v23 }
0x2ad4   :  { %v2201_v18 = vpop.permute.xlu0 %2200 }
0x2ad5   :  { %v2203_v27 = vmul.f32 %v10802_v23, %v2201_v18 }
0x2ad7   :  { %2205 = vrot.lane.b32.xlu1 %v2203_v27, %s11309_s4 }
0x2b49   :  { %v2206_v29 = vpop.permute.xlu1 %2205 }
0x2b4a   :  { %v11794_v30 = vadd.f32 %v2206_v29, %v2198_v28 }
0x2b4c   :  { %10803 = vtanh.f32 %v11794_v30  ;;  %v2304_v60 = vrot.slane %v11794_v30, 4  ;;  %v2083_v30 = vadd.f32 %v11781_v3, %v11786_v8 }
0x2b4d   :  { %10805 = vtanh.f32 %v1935_v32 }
0x2b4e   :  { %10807 = vpow2.f32 %v8686_v37 }
0x2b56   :  { %v10804_v33 = vpop.eup %10803 }
0x2b57   :  { %2211 = vrot.lane.b32.xlu0 %v10804_v33, %s11308_s28  ;;  %v10806_v35 = vpop.eup %10805 }
0x2b58   :  { %v10808_v38 = vpop.eup %10807 }
0x2b59   :  { %v1939_v22 = vadd.f32 1.0, %v10808_v38 }
0x2b5b   :  { %1948 = vrot.lane.b32.xlu0 %v10806_v35, %s11308_s28  ;;  %10809 = vrcp.f32 %v1939_v22 }
0x2b65   :  { %v10810_v41 = vpop.eup %10809 }
0x2b66   :  { %v1946_v24 = vmul.f32 %v10810_v41, %v1944_v44 }
0x2bc9   :  { %v2212_v39 = vpop.permute.xlu0 %2211 }
0x2bca   :  { %v2214_v40 = vmul.f32 %v10802_v23, %v2212_v39 }
0x2bcc   :  { %2216 = vrot.lane.b32.xlu1 %v2214_v40, %s11309_s4 }
0x2bcd   :  { %v1949_v34 = vpop.permute.xlu0 %1948 }
0x2bce   :  { %v1951_v42 = vmul.f32 %v10810_v41, %v1949_v34 }
0x2bd0   :  { %1953 = vrot.lane.b32.xlu0 %v1951_v42, %s11309_s4 }
0x2c3e   :  { %v2217_v43 = vpop.permute.xlu1 %2216 }
0x2c3f   :  { %2219 = vst.msk [vmem:[#allocation3] sm:$0xf] %vm345_vm2, %v2217_v43  ;;  %9521 = vmatmul.mubr.msk.f32.vlgmr.msra.gmra.mrb[24].mxu1 %vm109_vm0, %v2217_v43 }
0x2c40   :  { %10282 = vmatpush3.bf16.msra.mxu1 %v11751_v63  ;;  %9542 = vmatprep.mubr.msk.f32.mxu1 %vm11306_vm1, %v11307_v19 }
0x2c41   :  { %10283 = vmatprep.subr.bf16.mxu1 %v11305_v13 }
0x2c42   :  { %v1954_v25 = vpop.permute.xlu0 %1953 }
0x2c43   :  { %v1956_v45 = vadd.f32 %v1954_v25, %v1946_v24 }
0x2c44   :  { %10285 = vmatpush3.bf16.msra.mxu1 %v11762_v1 }
0x2c45   :  { %10811 = vtanh.f32 %v1956_v45  ;;  %10292 = vmatprep.subr.bf16.mxu1 %v11305_v13 }
0x2c4f   :  { %v10812_v46 = vpop.eup %10811 }
0x2c50   :  { %1959 = vrot.lane.b32.xlu0 %v10812_v46, %s11308_s28 }
0x2c54   :  { %884 = vrot.lane.b32.xlu0 %v11597_v36, %s11309_s4 }
0x2c58   :  { %1316 = vrot.lane.b32.xlu0 %v11653_v61, %s11309_s4 }
0x2c5c   :  { %1748 = vrot.lane.b32.xlu0 %v11708_v31, %s11309_s4 }
0x2cc2   :  { %v1960_v48 = vpop.permute.xlu0 %1959 }
0x2cc3   :  { %v1962_v5 = vmul.f32 %v10810_v41, %v1960_v48 }
0x2cc6   :  { %v885_v49 = vpop.permute.xlu0 %884 }
0x2cc7   :  { %887 = vst.msk [vmem:[#allocation2 + $0x10] sm:$0xf0] %vm454_vm3, %v885_v49 }
0x2cca   :  { %v1317_v51 = vpop.permute.xlu0 %1316 }
0x2ccb   :  { %1319 = vst.msk [vmem:[#allocation2 + $0x20] sm:$0xf0] %vm454_vm3, %v1317_v51 }
0x2cce   :  { %v1749_v52 = vpop.permute.xlu0 %1748  ;;  %v1970_v0 = vld [vmem:[#allocation2 + $0x10] sm:$0xff] }
0x2ccf   :  { %1751 = vst.msk [vmem:[#allocation2 + $0x30] sm:$0xf0] %vm454_vm3, %v1749_v52  ;;  %9492 = vmatprep.mubr.msk.f32.mxu0 %vm109_vm0, %v1970_v0 }
0x2cd6   :  { %v1974_v16 = vld [vmem:[#allocation2 + $0x30] sm:$0xff] }
0x2d12   :  { %v2288_v36 = vpop.f32.mrb[24].mxu1 }
0x2d13   :  { %v2293_v2 = vrot.slane %v2288_v36, 4  ;;  %v9522_v53 = vpop.f32.mrb[25].mxu1 }
0x2d15   :  { %v2295_v61 = vadd.f32 %v2293_v2, %v11789_v9 }
0x2d17   :  { %10813 = vtanh.f32 %v2295_v61  ;;  %v8698_v54 = vmul.f32 -1.442695, %v2295_v61 }
0x2d19   :  { %10815 = vpow2.f32 %v8698_v54 }
0x2d21   :  { %v10814_v31 = vpop.eup %10813 }
0x2d22   :  { %2308 = vrot.lane.b32.xlu1 %v10814_v31, %s11308_s28 }
0x2d23   :  { %v10816_v55 = vpop.eup %10815 }
0x2d24   :  { %v2299_v56 = vadd.f32 1.0, %v10816_v55 }
0x2d26   :  { %10817 = vrcp.f32 %v2299_v56 }
0x2d30   :  { %v10818_v57 = vpop.eup %10817 }
0x2d31   :  { %v2306_v62 = vmul.f32 %v10818_v57, %v2304_v60 }
0x2d94   :  { %v2309_v58 = vpop.permute.xlu1 %2308 }
0x2d95   :  { %v2311_v59 = vmul.f32 %v10818_v57, %v2309_v58 }
0x2d97   :  { %2313 = vrot.lane.b32.xlu1 %v2311_v59, %s11309_s4 }
0x2e09   :  { %v2314_v50 = vpop.permute.xlu1 %2313 }
0x2e0a   :  { %v2316_v26 = vadd.f32 %v2314_v50, %v2306_v62 }
0x2e0c   :  { %10819 = vtanh.f32 %v2316_v26  ;;  %v2412_v42 = vrot.slane %v2316_v26, 4 }
0x2e16   :  { %v10820_v4 = vpop.eup %10819 }
0x2e17   :  { %2319 = vrot.lane.b32.xlu1 %v10820_v4, %s11308_s28 }
0x2e1b   :  { %1100 = vrot.lane.b32.xlu1 %v11625_v15, %s11309_s4 }
0x2e1f   :  { %1532 = vrot.lane.b32.xlu1 %v11681_v47, %s11309_s4  ;;  %v1972_v47 = vld [vmem:[#allocation2 + $0x20] sm:$0xff] }
0x2e23   :  { %1964 = vrot.lane.b32.xlu1 %v1962_v5, %s11309_s4 }
0x2e89   :  { %v2320_v6 = vpop.permute.xlu1 %2319 }
0x2e8a   :  { %v11832_v7 = vmul.f32 %v10818_v57, %v2320_v6 }
0x2e8c   :  { %v2328_v9 = vrot.slane %v11832_v7, 4 }
0x2e8d   :  { %v1101_v10 = vpop.permute.xlu1 %1100 }
0x2e8e   :  { %1103 = vst.msk [vmem:[#allocation2 + $0x18] sm:$0xf0] %vm454_vm3, %v1101_v10  ;;  %2329 = vrot.lane.b32.xlu0 %v2328_v9, %s11309_s4 }
0x2e91   :  { %v1533_v12 = vpop.permute.xlu1 %1532 }
0x2e92   :  { %1535 = vst.msk [vmem:[#allocation2 + $0x28] sm:$0xf0] %vm454_vm3, %v1533_v12 }
0x2e95   :  { %v1965_v15 = vpop.permute.xlu1 %1964  ;;  %v1971_v14 = vld [vmem:[#allocation2 + $0x18] sm:$0xff] }
0x2e96   :  { %1967 = vst.msk [vmem:[#allocation2 + $0x38] sm:$0xf0] %vm454_vm3, %v1965_v15  ;;  %9493 = vmatmul.mubr.msk.f32.gmra.mrb[20].mxu0 %vm109_vm0, %v1971_v14 }
0x2e97   :  { %9495 = vmatprep.mubr.msk.f32.mxu0 %vm109_vm0, %v1972_v47 }
0x2e99   :  { %v1973_v11 = vld [vmem:[#allocation2 + $0x28] sm:$0xff] }
0x2e9a   :  { %9496 = vmatmul.mubr.msk.f32.gmra.mrb[22].mxu0 %vm109_vm0, %v1973_v11 }
0x2e9b   :  { %9498 = vmatprep.mubr.msk.f32.mxu0 %vm109_vm0, %v1974_v16 }
0x2e9d   :  { %v1975_v17 = vld [vmem:[#allocation2 + $0x38] sm:$0xff] }
0x2e9e   :  { %9499 = vmatmul.mubr.msk.f32.gmra.mrb[24].mxu0 %vm109_vm0, %v1975_v17 }
0x2e9f   :  { %9531 = vmatprep.mubr.msk.f32.mxu0 %vm11306_vm1, %v11307_v19 }
0x2f00   :  { %v2330_v20 = vpop.permute.xlu0 %2329 }
0x2f01   :  { %9532 = vmatmul.mubr.msk.f32.vlgmr.msra.gmra.mrb[26].mxu0 %vm109_vm0, %v2330_v20 }
0x2f02   :  { %10288 = vmatpush3.bf16.msra.mxu0 %v11751_v63  ;;  %9553 = vmatprep.mubr.msk.f32.mxu0 %vm11306_vm1, %v11307_v19 }
0x2f03   :  { %10289 = vmatprep.subr.bf16.mxu0 %v11305_v13 }
0x2f06   :  { %10291 = vmatpush3.bf16.msra.mxu0 %v11762_v1 }
0x2f07   :  { %10298 = vmatprep.subr.bf16.mxu0 %v11305_v13 }
0x2f69   :  { %v11853_v23 = vpop.f32.mrb[20].mxu0 }
0x2f6a   :  { %v11855_v18 = vpop.f32.mrb[21].mxu0 }
0x2f6b   :  { %v2088_v4 = vadd.f32 %v11786_v8, %v11855_v18 }
0x2f6d   :  { %v11857_v27 = vpop.f32.mrb[22].mxu0 }
0x2f6e   :  { %v11859_v21 = vpop.f32.mrb[23].mxu0 }
0x2f71   :  { %v11861_v28 = vpop.f32.mrb[24].mxu0 }
0x2f72   :  { %v11863_v29 = vpop.f32.mrb[25].mxu0 }
0x2fd4   :  { %v2399_v32 = vpop.f32.mrb[26].mxu0 }
0x2fd5   :  { %v2403_v33 = vadd.f32 %v2399_v32, %v2083_v30  ;;  %v9533_v35 = vpop.f32.mrb[27].mxu0 }
0x2fd7   :  { %10821 = vtanh.f32 %v2403_v33  ;;  %v8700_v38 = vmul.f32 -1.442695, %v2403_v33 }
0x2fd9   :  { %10823 = vpow2.f32 %v8700_v38 }
0x2fe1   :  { %v10822_v37 = vpop.eup %10821 }
0x2fe2   :  { %2416 = vrot.lane.b32.xlu1 %v10822_v37, %s11308_s28 }
0x2fe3   :  { %v10824_v22 = vpop.eup %10823 }
0x2fe4   :  { %v2407_v39 = vadd.f32 1.0, %v10824_v22 }
0x2fe6   :  { %10825 = vrcp.f32 %v2407_v39 }
0x2ff0   :  { %v10826_v40 = vpop.eup %10825 }
0x2ff1   :  { %v2414_v43 = vmul.f32 %v10826_v40, %v2412_v42 }
0x3054   :  { %v2417_v41 = vpop.permute.xlu1 %2416 }
0x3055   :  { %v2419_v34 = vmul.f32 %v10826_v40, %v2417_v41 }
0x3057   :  { %2421 = vrot.lane.b32.xlu0 %v2419_v34, %s11309_s4 }
0x30c9   :  { %v2422_v3 = vpop.permute.xlu0 %2421 }
0x30ca   :  { %v2424_v44 = vadd.f32 %v2422_v3, %v2414_v43 }
0x30cc   :  { %10827 = vtanh.f32 %v2424_v44  ;;  %v2520_v55 = vrot.slane %v2424_v44, 4 }
0x30d6   :  { %v10828_v24 = vpop.eup %10827 }
0x30d7   :  { %2427 = vrot.lane.b32.xlu1 %v10828_v24, %s11308_s28 }
0x3149   :  { %v2428_v25 = vpop.permute.xlu1 %2427 }
0x314a   :  { %v2430_v45 = vmul.f32 %v10826_v40, %v2428_v25 }
0x314c   :  { %2432 = vrot.lane.b32.xlu0 %v2430_v45, %s11309_s4 }
0x31be   :  { %v2433_v46 = vpop.permute.xlu0 %2432 }
0x31bf   :  { %2435 = vst.msk [vmem:[#allocation3 + $0x8] sm:$0xf] %vm345_vm2, %v2433_v46  ;;  %9543 = vmatmul.mubr.msk.f32.vlgmr.msra.gmra.mrb[26].mxu1 %vm109_vm0, %v2433_v46 }
0x31c0   :  { %10294 = vmatpush3.bf16.msra.mxu1 %v11751_v63  ;;  %9564 = vmatprep.mubr.msk.f32.mxu1 %vm11306_vm1, %v11307_v19 }
0x31c1   :  { %10295 = vmatprep.subr.bf16.mxu1 %v11305_v13 }
0x31c4   :  { %10297 = vmatpush3.bf16.msra.mxu1 %v11762_v1 }
0x31c5   :  { %10304 = vmatprep.subr.bf16.mxu1 %v11305_v13 }
0x3292   :  { %v2504_v48 = vpop.f32.mrb[26].mxu1 }
0x3293   :  { %v2509_v49 = vrot.slane %v2504_v48, 4  ;;  %v9544_v51 = vpop.f32.mrb[27].mxu1 }
0x3295   :  { %v2511_v52 = vadd.f32 %v2509_v49, %v2083_v30 }
0x3297   :  { %10829 = vtanh.f32 %v2511_v52  ;;  %v8702_v36 = vmul.f32 -1.442695, %v2511_v52 }
0x3299   :  { %10831 = vpow2.f32 %v8702_v36 }
0x32a1   :  { %v10830_v0 = vpop.eup %10829 }
0x32a2   :  { %2524 = vrot.lane.b32.xlu1 %v10830_v0, %s11308_s28 }
0x32a3   :  { %v10832_v2 = vpop.eup %10831 }
0x32a4   :  { %v2515_v53 = vadd.f32 1.0, %v10832_v2  ;;  %v2093_v2 = vadd.f32 %v11853_v23, %v11786_v8 }
0x32a6   :  { %10833 = vrcp.f32 %v2515_v53 }
0x32b0   :  { %v10834_v61 = vpop.eup %10833 }
0x32b1   :  { %v2522_v56 = vmul.f32 %v10834_v61, %v2520_v55 }
0x3314   :  { %v2525_v31 = vpop.permute.xlu1 %2524 }
0x3315   :  { %v2527_v54 = vmul.f32 %v10834_v61, %v2525_v31 }
0x3317   :  { %2529 = vrot.lane.b32.xlu0 %v2527_v54, %s11309_s4 }
0x3389   :  { %v2530_v57 = vpop.permute.xlu0 %2529 }
0x338a   :  { %v2532_v58 = vadd.f32 %v2530_v57, %v2522_v56 }
0x338c   :  { %10835 = vtanh.f32 %v2532_v58  ;;  %v2628_v17 = vrot.slane %v2532_v58, 4 }
0x3396   :  { %v10836_v59 = vpop.eup %10835 }
0x3397   :  { %2535 = vrot.lane.b32.xlu1 %v10836_v59, %s11308_s28 }
0x3409   :  { %v2536_v60 = vpop.permute.xlu1 %2535 }
0x340a   :  { %v11882_v62 = vmul.f32 %v10834_v61, %v2536_v60 }
0x340c   :  { %v2544_v50 = vrot.slane %v11882_v62, 4 }
0x340e   :  { %2545 = vrot.lane.b32.xlu0 %v2544_v50, %s11309_s4 }
0x3480   :  { %v2546_v26 = vpop.permute.xlu0 %2545 }
0x3481   :  { %9554 = vmatmul.mubr.msk.f32.vlgmr.msra.gmra.mrb[28].mxu0 %vm109_vm0, %v2546_v26 }
0x3482   :  { %10300 = vmatpush3.bf16.msra.mxu0 %v11751_v63  ;;  %9575 = vmatprep.mubr.msk.f32.mxu0 %vm11306_vm1, %v11307_v19 }
0x3483   :  { %10301 = vmatprep.subr.bf16.mxu0 %v11305_v13 }
0x3486   :  { %10303 = vmatpush3.bf16.msra.mxu0 %v11762_v1 }
0x3487   :  { %10310 = vmatprep.subr.bf16.mxu0 %v11305_v13 }
0x3554   :  { %v2615_v5 = vpop.f32.mrb[28].mxu0 }
0x3555   :  { %v2619_v6 = vadd.f32 %v2615_v5, %v2088_v4  ;;  %v9555_v9 = vpop.f32.mrb[29].mxu0 }
0x3557   :  { %10837 = vtanh.f32 %v2619_v6  ;;  %v8704_v12 = vmul.f32 -1.442695, %v2619_v6 }
0x3559   :  { %10839 = vpow2.f32 %v8704_v12 }
0x3561   :  { %v10838_v10 = vpop.eup %10837 }
0x3562   :  { %2632 = vrot.lane.b32.xlu1 %v10838_v10, %s11308_s28 }
0x3563   :  { %v10840_v15 = vpop.eup %10839 }
0x3564   :  { %v2623_v14 = vadd.f32 1.0, %v10840_v15 }
0x3566   :  { %10841 = vrcp.f32 %v2623_v14 }
0x3570   :  { %v10842_v47 = vpop.eup %10841 }
0x3571   :  { %v2630_v20 = vmul.f32 %v10842_v47, %v2628_v17 }
0x35d4   :  { %v2633_v11 = vpop.permute.xlu1 %2632 }
0x35d5   :  { %v2635_v16 = vmul.f32 %v10842_v47, %v2633_v11 }
0x35d7   :  { %2637 = vrot.lane.b32.xlu0 %v2635_v16, %s11309_s4 }
0x3649   :  { %v2638_v18 = vpop.permute.xlu0 %2637 }
0x364a   :  { %v2640_v30 = vadd.f32 %v2638_v18, %v2630_v20 }
0x364c   :  { %10843 = vtanh.f32 %v2640_v30  ;;  %v2736_v25 = vrot.slane %v2640_v30, 4 }
0x3656   :  { %v10844_v32 = vpop.eup %10843 }
0x3657   :  { %2643 = vrot.lane.b32.xlu1 %v10844_v32, %s11308_s28 }
0x36c9   :  { %v2644_v33 = vpop.permute.xlu1 %2643 }
0x36ca   :  { %v2646_v35 = vmul.f32 %v10842_v47, %v2644_v33 }
0x36cc   :  { %2648 = vrot.lane.b32.xlu0 %v2646_v35, %s11309_s4 }
0x373e   :  { %v2649_v37 = vpop.permute.xlu0 %2648 }
0x373f   :  { %2651 = vst.msk [vmem:[#allocation3 + $0x10] sm:$0xf] %vm345_vm2, %v2649_v37  ;;  %9565 = vmatmul.mubr.msk.f32.vlgmr.msra.gmra.mrb[28].mxu1 %vm109_vm0, %v2649_v37 }
0x3740   :  { %10306 = vmatpush3.bf16.msra.mxu1 %v11751_v63  ;;  %9586 = vmatprep.mubr.msk.f32.mxu1 %vm11306_vm1, %v11307_v19 }
0x3741   :  { %10307 = vmatprep.subr.bf16.mxu1 %v11305_v13 }
0x3744   :  { %10309 = vmatpush3.bf16.msra.mxu1 %v11762_v1 }
0x3745   :  { %10316 = vmatprep.subr.bf16.mxu1 %v11305_v13 }
0x3812   :  { %v2720_v38 = vpop.f32.mrb[28].mxu1 }
0x3813   :  { %v2725_v22 = vrot.slane %v2720_v38, 4  ;;  %v9566_v39 = vpop.f32.mrb[29].mxu1 }
0x3815   :  { %v2727_v40 = vadd.f32 %v2725_v22, %v2088_v4 }
0x3817   :  { %10845 = vtanh.f32 %v2727_v40  ;;  %v8706_v34 = vmul.f32 -1.442695, %v2727_v40 }
0x3819   :  { %10847 = vpow2.f32 %v8706_v34 }
0x3821   :  { %v10846_v41 = vpop.eup %10845 }
0x3822   :  { %2740 = vrot.lane.b32.xlu1 %v10846_v41, %s11308_s28 }
0x3823   :  { %v10848_v42 = vpop.eup %10847 }
0x3824   :  { %v2731_v43 = vadd.f32 1.0, %v10848_v42  ;;  %v2098_v42 = vadd.f32 %v11786_v8, %v11859_v21 }
0x3826   :  { %10849 = vrcp.f32 %v2731_v43 }
0x3830   :  { %v10850_v3 = vpop.eup %10849 }
0x3831   :  { %v2738_v45 = vmul.f32 %v10850_v3, %v2736_v25 }
0x3894   :  { %v2741_v44 = vpop.permute.xlu1 %2740 }
0x3895   :  { %v2743_v24 = vmul.f32 %v10850_v3, %v2741_v44 }
0x3897   :  { %2745 = vrot.lane.b32.xlu0 %v2743_v24, %s11309_s4 }
0x3909   :  { %v2746_v46 = vpop.permute.xlu0 %2745 }
0x390a   :  { %v2748_v48 = vadd.f32 %v2746_v46, %v2738_v45 }
0x390c   :  { %10851 = vtanh.f32 %v2748_v48  ;;  %v2844_v50 = vrot.slane %v2748_v48, 4 }
0x3916   :  { %v10852_v49 = vpop.eup %10851 }
0x3917   :  { %2751 = vrot.lane.b32.xlu1 %v10852_v49, %s11308_s28 }
0x3989   :  { %v2752_v51 = vpop.permute.xlu1 %2751 }
0x398a   :  { %v11910_v52 = vmul.f32 %v10850_v3, %v2752_v51 }
0x398c   :  { %v2760_v0 = vrot.slane %v11910_v52, 4 }
0x398e   :  { %2761 = vrot.lane.b32.xlu0 %v2760_v0, %s11309_s4 }
0x3a00   :  { %v2762_v36 = vpop.permute.xlu0 %2761 }
0x3a01   :  { %9576 = vmatmul.mubr.msk.f32.vlgmr.msra.gmra.mrb[30].mxu0 %vm109_vm0, %v2762_v36 }
0x3a02   :  { %10312 = vmatpush3.bf16.msra.mxu0 %v11751_v63  ;;  %9597 = vmatprep.mubr.msk.f32.mxu0 %vm11306_vm1, %v11307_v19 }
0x3a03   :  { %10313 = vmatprep.subr.bf16.mxu0 %v11305_v13 }
0x3a06   :  { %10315 = vmatpush3.bf16.msra.mxu0 %v11762_v1 }
0x3a07   :  { %10322 = vmatprep.subr.bf16.mxu0 %v11305_v13 }
0x3ad4   :  { %v2831_v53 = vpop.f32.mrb[30].mxu0 }
0x3ad5   :  { %v2835_v61 = vadd.f32 %v2831_v53, %v2093_v2  ;;  %v9577_v31 = vpop.f32.mrb[31].mxu0 }
0x3ad7   :  { %10853 = vtanh.f32 %v2835_v61  ;;  %v8708_v55 = vmul.f32 -1.442695, %v2835_v61 }
0x3ad9   :  { %10855 = vpow2.f32 %v8708_v55 }
0x3ae1   :  { %v10854_v54 = vpop.eup %10853 }
0x3ae2   :  { %2848 = vrot.lane.b32.xlu1 %v10854_v54, %s11308_s28 }
0x3ae3   :  { %v10856_v56 = vpop.eup %10855 }
0x3ae4   :  { %v2839_v57 = vadd.f32 1.0, %v10856_v56 }
0x3ae6   :  { %10857 = vrcp.f32 %v2839_v57 }
0x3af0   :  { %v10858_v58 = vpop.eup %10857 }
0x3af1   :  { %v2846_v26 = vmul.f32 %v10858_v58, %v2844_v50 }
0x3b54   :  { %v2849_v59 = vpop.permute.xlu1 %2848 }
0x3b55   :  { %v2851_v60 = vmul.f32 %v10858_v58, %v2849_v59 }
0x3b57   :  { %2853 = vrot.lane.b32.xlu0 %v2851_v60, %s11309_s4 }
0x3bc9   :  { %v2854_v23 = vpop.permute.xlu0 %2853 }
0x3bca   :  { %v2856_v4 = vadd.f32 %v2854_v23, %v2846_v26 }
0x3bcc   :  { %10859 = vtanh.f32 %v2856_v4  ;;  %v2952_v33 = vrot.slane %v2856_v4, 4 }
0x3bd6   :  { %v10860_v5 = vpop.eup %10859 }
0x3bd7   :  { %2859 = vrot.lane.b32.xlu1 %v10860_v5, %s11308_s28 }
0x3c49   :  { %v2860_v6 = vpop.permute.xlu1 %2859 }
0x3c4a   :  { %v2862_v9 = vmul.f32 %v10858_v58, %v2860_v6 }
0x3c4c   :  { %2864 = vrot.lane.b32.xlu0 %v2862_v9, %s11309_s4 }
0x3cbe   :  { %v2865_v10 = vpop.permute.xlu0 %2864 }
0x3cbf   :  { %2867 = vst.msk [vmem:[#allocation3 + $0x18] sm:$0xf] %vm345_vm2, %v2865_v10  ;;  %9587 = vmatmul.mubr.msk.f32.vlgmr.msra.gmra.mrb[30].mxu1 %vm109_vm0, %v2865_v10 }
0x3cc0   :  { %10318 = vmatpush3.bf16.msra.mxu1 %v11751_v63  ;;  %9608 = vmatprep.mubr.msk.f32.mxu1 %vm11306_vm1, %v11307_v19 }
0x3cc1   :  { %10319 = vmatprep.subr.bf16.mxu1 %v11305_v13 }
0x3cc4   :  { %10321 = vmatpush3.bf16.msra.mxu1 %v11762_v1 }
0x3cc5   :  { %10328 = vmatprep.subr.bf16.mxu1 %v11305_v13 }
0x3d92   :  { %v2936_v12 = vpop.f32.mrb[30].mxu1 }
0x3d93   :  { %v2941_v15 = vrot.slane %v2936_v12, 4  ;;  %v9588_v14 = vpop.f32.mrb[31].mxu1 }
0x3d95   :  { %v2943_v47 = vadd.f32 %v2941_v15, %v2093_v2 }
0x3d97   :  { %10861 = vtanh.f32 %v2943_v47  ;;  %v8710_v16 = vmul.f32 -1.442695, %v2943_v47 }
0x3d99   :  { %10863 = vpow2.f32 %v8710_v16 }
0x3da1   :  { %v10862_v11 = vpop.eup %10861 }
0x3da2   :  { %2956 = vrot.lane.b32.xlu1 %v10862_v11, %s11308_s28 }
0x3da3   :  { %v10864_v17 = vpop.eup %10863 }
0x3da4   :  { %v2947_v20 = vadd.f32 1.0, %v10864_v17  ;;  %v2103_v17 = vadd.f32 %v11857_v27, %v11786_v8 }
0x3da6   :  { %10865 = vrcp.f32 %v2947_v20 }
0x3db0   :  { %v10866_v18 = vpop.eup %10865 }
0x3db1   :  { %v2954_v35 = vmul.f32 %v10866_v18, %v2952_v33 }
0x3e14   :  { %v2957_v30 = vpop.permute.xlu1 %2956 }
0x3e15   :  { %v2959_v32 = vmul.f32 %v10866_v18, %v2957_v30 }
0x3e17   :  { %2961 = vrot.lane.b32.xlu0 %v2959_v32, %s11309_s4 }
0x3e89   :  { %v2962_v37 = vpop.permute.xlu0 %2961 }
0x3e8a   :  { %v2964_v38 = vadd.f32 %v2962_v37, %v2954_v35 }
0x3e8c   :  { %10867 = vtanh.f32 %v2964_v38  ;;  %v3060_v0 = vrot.slane %v2964_v38, 4 }
0x3e96   :  { %v10868_v22 = vpop.eup %10867 }
0x3e97   :  { %2967 = vrot.lane.b32.xlu1 %v10868_v22, %s11308_s28 }
0x3f09   :  { %v2968_v39 = vpop.permute.xlu1 %2967 }
0x3f0a   :  { %v11938_v40 = vmul.f32 %v10866_v18, %v2968_v39 }
0x3f0c   :  { %v2976_v41 = vrot.slane %v11938_v40, 4 }
0x3f0e   :  { %2977 = vrot.lane.b32.xlu0 %v2976_v41, %s11309_s4 }
0x3f80   :  { %v2978_v34 = vpop.permute.xlu0 %2977 }
0x3f81   :  { %9598 = vmatmul.mubr.msk.f32.vlgmr.msra.gmra.mrb[32].mxu0 %vm109_vm0, %v2978_v34 }
0x3f82   :  { %10324 = vmatpush3.bf16.msra.mxu0 %v11751_v63  ;;  %9619 = vmatprep.mubr.msk.f32.mxu0 %vm11306_vm1, %v11307_v19 }
0x3f83   :  { %10325 = vmatprep.subr.bf16.mxu0 %v11305_v13 }
0x3f86   :  { %10327 = vmatpush3.bf16.msra.mxu0 %v11762_v1 }
0x3f87   :  { %10334 = vmatprep.subr.bf16.mxu0 %v11305_v13 }
0x4054   :  { %v3047_v43 = vpop.f32.mrb[32].mxu0 }
0x4055   :  { %v3051_v3 = vadd.f32 %v3047_v43, %v2098_v42  ;;  %v9599_v44 = vpop.f32.mrb[33].mxu0 }
0x4057   :  { %10869 = vtanh.f32 %v3051_v3  ;;  %v8712_v25 = vmul.f32 -1.442695, %v3051_v3 }
0x4059   :  { %10871 = vpow2.f32 %v8712_v25 }
0x4061   :  { %v10870_v24 = vpop.eup %10869 }
0x4062   :  { %3064 = vrot.lane.b32.xlu1 %v10870_v24, %s11308_s28 }
0x4063   :  { %v10872_v45 = vpop.eup %10871 }
0x4064   :  { %v3055_v46 = vadd.f32 1.0, %v10872_v45 }
0x4066   :  { %10873 = vrcp.f32 %v3055_v46 }
0x4070   :  { %v10874_v48 = vpop.eup %10873 }
0x4071   :  { %v3062_v36 = vmul.f32 %v10874_v48, %v3060_v0 }
0x40d4   :  { %v3065_v49 = vpop.permute.xlu1 %3064 }
0x40d5   :  { %v3067_v51 = vmul.f32 %v10874_v48, %v3065_v49 }
0x40d7   :  { %3069 = vrot.lane.b32.xlu0 %v3067_v51, %s11309_s4 }
0x4149   :  { %v3070_v21 = vpop.permute.xlu0 %3069 }
0x414a   :  { %v3072_v2 = vadd.f32 %v3070_v21, %v3062_v36 }
0x414c   :  { %10875 = vtanh.f32 %v3072_v2  ;;  %v3168_v6 = vrot.slane %v3072_v2, 4 }
0x4156   :  { %v10876_v53 = vpop.eup %10875 }
0x4157   :  { %3075 = vrot.lane.b32.xlu1 %v10876_v53, %s11308_s28 }
0x41c9   :  { %v3076_v61 = vpop.permute.xlu1 %3075 }
0x41ca   :  { %v3078_v31 = vmul.f32 %v10874_v48, %v3076_v61 }
0x41cc   :  { %3080 = vrot.lane.b32.xlu0 %v3078_v31, %s11309_s4 }
0x423e   :  { %v3081_v54 = vpop.permute.xlu0 %3080 }
0x423f   :  { %3083 = vst.msk [vmem:[#allocation3 + $0x20] sm:$0xf] %vm345_vm2, %v3081_v54  ;;  %9609 = vmatmul.mubr.msk.f32.vlgmr.msra.gmra.mrb[32].mxu1 %vm109_vm0, %v3081_v54 }
0x4240   :  { %10330 = vmatpush3.bf16.msra.mxu1 %v11751_v63  ;;  %9630 = vmatprep.mubr.msk.f32.mxu1 %vm11306_vm1, %v11307_v19 }
0x4241   :  { %10331 = vmatprep.subr.bf16.mxu1 %v11305_v13 }
0x4244   :  { %10333 = vmatpush3.bf16.msra.mxu1 %v11762_v1 }
0x4245   :  { %10340 = vmatprep.subr.bf16.mxu1 %v11305_v13 }
0x4312   :  { %v3152_v55 = vpop.f32.mrb[32].mxu1 }
0x4313   :  { %v3157_v56 = vrot.slane %v3152_v55, 4  ;;  %v9610_v57 = vpop.f32.mrb[33].mxu1 }
0x4315   :  { %v3159_v58 = vadd.f32 %v3157_v56, %v2098_v42 }
0x4317   :  { %10877 = vtanh.f32 %v3159_v58  ;;  %v8714_v60 = vmul.f32 -1.442695, %v3159_v58 }
0x4319   :  { %10879 = vpow2.f32 %v8714_v60 }
0x4321   :  { %v10878_v59 = vpop.eup %10877 }
0x4322   :  { %3172 = vrot.lane.b32.xlu1 %v10878_v59, %s11308_s28 }
0x4323   :  { %v10880_v50 = vpop.eup %10879 }
0x4324   :  { %v3163_v26 = vadd.f32 1.0, %v10880_v50  ;;  %v2108_v50 = vadd.f32 %v11786_v8, %v11863_v29 }
0x4326   :  { %10881 = vrcp.f32 %v3163_v26 }
0x4330   :  { %v10882_v23 = vpop.eup %10881 }
0x4331   :  { %v3170_v9 = vmul.f32 %v10882_v23, %v3168_v6 }
0x4394   :  { %v3173_v4 = vpop.permute.xlu1 %3172 }
0x4395   :  { %v3175_v5 = vmul.f32 %v10882_v23, %v3173_v4 }
0x4397   :  { %3177 = vrot.lane.b32.xlu0 %v3175_v5, %s11309_s4 }
0x4409   :  { %v3178_v10 = vpop.permute.xlu0 %3177 }
0x440a   :  { %v3180_v12 = vadd.f32 %v3178_v10, %v3170_v9 }
0x440c   :  { %10883 = vtanh.f32 %v3180_v12  ;;  %v3276_v41 = vrot.slane %v3180_v12, 4 }
0x4416   :  { %v10884_v15 = vpop.eup %10883 }
0x4417   :  { %3183 = vrot.lane.b32.xlu1 %v10884_v15, %s11308_s28 }
0x4489   :  { %v3184_v14 = vpop.permute.xlu1 %3183 }
0x448a   :  { %v11966_v47 = vmul.f32 %v10882_v23, %v3184_v14 }
0x448c   :  { %v3192_v11 = vrot.slane %v11966_v47, 4 }
0x448e   :  { %3193 = vrot.lane.b32.xlu0 %v3192_v11, %s11309_s4 }
0x4500   :  { %v3194_v16 = vpop.permute.xlu0 %3193 }
0x4501   :  { %9620 = vmatmul.mubr.msk.f32.vlgmr.msra.gmra.mrb[34].mxu0 %vm109_vm0, %v3194_v16 }
0x4502   :  { %10336 = vmatpush3.bf16.msra.mxu0 %v11751_v63  ;;  %9641 = vmatprep.mubr.msk.f32.mxu0 %vm11306_vm1, %v11307_v19 }
0x4503   :  { %10337 = vmatprep.subr.bf16.mxu0 %v11305_v13 }
0x4506   :  { %10339 = vmatpush3.bf16.msra.mxu0 %v11762_v1 }
0x4507   :  { %10346 = vmatprep.subr.bf16.mxu0 %v11305_v13 }
0x45d4   :  { %v3263_v20 = vpop.f32.mrb[34].mxu0 }
0x45d5   :  { %v3267_v18 = vadd.f32 %v3263_v20, %v2103_v17  ;;  %v9621_v30 = vpop.f32.mrb[35].mxu0 }
0x45d7   :  { %10885 = vtanh.f32 %v3267_v18  ;;  %v8716_v33 = vmul.f32 -1.442695, %v3267_v18 }
0x45d9   :  { %10887 = vpow2.f32 %v8716_v33 }
0x45e1   :  { %v10886_v32 = vpop.eup %10885 }
0x45e2   :  { %3280 = vrot.lane.b32.xlu1 %v10886_v32, %s11308_s28 }
0x45e3   :  { %v10888_v35 = vpop.eup %10887 }
0x45e4   :  { %v3271_v37 = vadd.f32 1.0, %v10888_v35 }
0x45e6   :  { %10889 = vrcp.f32 %v3271_v37 }
0x45f0   :  { %v10890_v38 = vpop.eup %10889 }
0x45f1   :  { %v3278_v34 = vmul.f32 %v10890_v38, %v3276_v41 }
0x4654   :  { %v3281_v22 = vpop.permute.xlu1 %3280 }
0x4655   :  { %v3283_v39 = vmul.f32 %v10890_v38, %v3281_v22 }
0x4657   :  { %3285 = vrot.lane.b32.xlu0 %v3283_v39, %s11309_s4 }
0x46c9   :  { %v3286_v27 = vpop.permute.xlu0 %3285 }
0x46ca   :  { %v3288_v42 = vadd.f32 %v3286_v27, %v3278_v34 }
0x46cc   :  { %10891 = vtanh.f32 %v3288_v42  ;;  %v3384_v61 = vrot.slane %v3288_v42, 4 }
0x46d6   :  { %v10892_v43 = vpop.eup %10891 }
0x46d7   :  { %3291 = vrot.lane.b32.xlu1 %v10892_v43, %s11308_s28 }
0x4749   :  { %v3292_v3 = vpop.permute.xlu1 %3291 }
0x474a   :  { %v3294_v44 = vmul.f32 %v10890_v38, %v3292_v3 }
0x474c   :  { %3296 = vrot.lane.b32.xlu0 %v3294_v44, %s11309_s4 }
0x47be   :  { %v3297_v24 = vpop.permute.xlu0 %3296 }
0x47bf   :  { %3299 = vst.msk [vmem:[#allocation3 + $0x28] sm:$0xf] %vm345_vm2, %v3297_v24  ;;  %9631 = vmatmul.mubr.msk.f32.vlgmr.msra.gmra.mrb[34].mxu1 %vm109_vm0, %v3297_v24 }
0x47c0   :  { %10342 = vmatpush3.bf16.msra.mxu1 %v11751_v63  ;;  %9652 = vmatprep.mubr.msk.f32.mxu1 %vm11306_vm1, %v11307_v19 }
0x47c1   :  { %10343 = vmatprep.subr.bf16.mxu1 %v11305_v13 }
0x47c4   :  { %10345 = vmatpush3.bf16.msra.mxu1 %v11762_v1 }
0x47c5   :  { %10352 = vmatprep.subr.bf16.mxu1 %v11305_v13 }
0x4892   :  { %v3368_v25 = vpop.f32.mrb[34].mxu1 }
0x4893   :  { %v3373_v45 = vrot.slane %v3368_v25, 4  ;;  %v9632_v46 = vpop.f32.mrb[35].mxu1 }
0x4895   :  { %v3375_v48 = vadd.f32 %v3373_v45, %v2103_v17 }
0x4897   :  { %10893 = vtanh.f32 %v3375_v48  ;;  %v8718_v51 = vmul.f32 -1.442695, %v3375_v48  ;;  %v11261_v48 = vld [vmem:[%s13060_s6] ss:$0 sm:$0xff]  ;;  %s13000_s6 = scalar_select %p8543_p3, 1, 0 }
0x4899   :  { %10895 = vpow2.f32 %v8718_v51 }
0x48a1   :  { %v10894_v49 = vpop.eup %10893 }
0x48a2   :  { %3388 = vrot.lane.b32.xlu1 %v10894_v49, %s11308_s28  ;;  %v2113_v49 = vadd.f32 %v11261_v48, %v11861_v28 }
0x48a3   :  { %v10896_v0 = vpop.eup %10895 }
0x48a4   :  { %v3379_v36 = vadd.f32 1.0, %v10896_v0 }
0x48a6   :  { %10897 = vrcp.f32 %v3379_v36 }
0x48b0   :  { %v10898_v21 = vpop.eup %10897 }
0x48b1   :  { %v3386_v31 = vmul.f32 %v10898_v21, %v3384_v61 }
0x4914   :  { %v3389_v2 = vpop.permute.xlu1 %3388 }
0x4915   :  { %v3391_v53 = vmul.f32 %v10898_v21, %v3389_v2 }
0x4917   :  { %3393 = vrot.lane.b32.xlu0 %v3391_v53, %s11309_s4 }
0x4989   :  { %v3394_v54 = vpop.permute.xlu0 %3393 }
0x498a   :  { %v3396_v55 = vadd.f32 %v3394_v54, %v3386_v31 }
0x498c   :  { %10899 = vtanh.f32 %v3396_v55  ;;  %v3492_v11 = vrot.slane %v3396_v55, 4 }
0x4996   :  { %v10900_v56 = vpop.eup %10899 }
0x4997   :  { %3399 = vrot.lane.b32.xlu1 %v10900_v56, %s11308_s28 }
0x4a09   :  { %v3400_v57 = vpop.permute.xlu1 %3399 }
0x4a0a   :  { %v11994_v58 = vmul.f32 %v10898_v21, %v3400_v57 }
0x4a0c   :  { %v3408_v59 = vrot.slane %v11994_v58, 4 }
0x4a0e   :  { %3409 = vrot.lane.b32.xlu0 %v3408_v59, %s11309_s4 }
0x4a80   :  { %v3410_v60 = vpop.permute.xlu0 %3409 }
0x4a81   :  { %9642 = vmatmul.mubr.msk.f32.vlgmr.msra.gmra.mrb[36].mxu0 %vm109_vm0, %v3410_v60 }
0x4a82   :  { %10348 = vmatpush3.bf16.msra.mxu0 %v11751_v63  ;;  %9663 = vmatprep.mubr.msk.f32.mxu0 %vm11306_vm1, %v11307_v19 }
0x4a83   :  { %10349 = vmatprep.subr.bf16.mxu0 %v11305_v13 }
0x4a86   :  { %10351 = vmatpush3.bf16.msra.mxu0 %v11762_v1 }
0x4b54   :  { %v3479_v26 = vpop.f32.mrb[36].mxu0 }
0x4b55   :  { %v3483_v23 = vadd.f32 %v3479_v26, %v2108_v50  ;;  %v9643_v4 = vpop.f32.mrb[37].mxu0 }
0x4b57   :  { %10901 = vtanh.f32 %v3483_v23  ;;  %v8720_v6 = vmul.f32 -1.442695, %v3483_v23 }
0x4b59   :  { %10903 = vpow2.f32 %v8720_v6 }
0x4b61   :  { %v10902_v5 = vpop.eup %10901 }
0x4b62   :  { %3496 = vrot.lane.b32.xlu1 %v10902_v5, %s11308_s28 }
0x4b63   :  { %v10904_v9 = vpop.eup %10903 }
0x4b64   :  { %v3487_v10 = vadd.f32 1.0, %v10904_v9 }
0x4b66   :  { %10905 = vrcp.f32 %v3487_v10 }
0x4b70   :  { %v10906_v12 = vpop.eup %10905 }
0x4b71   :  { %v3494_v16 = vmul.f32 %v10906_v12, %v3492_v11 }
0x4bd4   :  { %v3497_v15 = vpop.permute.xlu1 %3496 }
0x4bd5   :  { %v3499_v14 = vmul.f32 %v10906_v12, %v3497_v15 }
0x4bd7   :  { %3501 = vrot.lane.b32.xlu0 %v3499_v14, %s11309_s4 }
0x4c49   :  { %v3502_v8 = vpop.permute.xlu0 %3501 }
0x4c4a   :  { %v3504_v29 = vadd.f32 %v3502_v8, %v3494_v16 }
0x4c4c   :  { %10907 = vtanh.f32 %v3504_v29  ;;  %v3600_v42 = vrot.slane %v3504_v29, 4 }
0x4c56   :  { %v10908_v17 = vpop.eup %10907 }
0x4c57   :  { %3507 = vrot.lane.b32.xlu1 %v10908_v17, %s11308_s28 }
0x4cc9   :  { %v3508_v20 = vpop.permute.xlu1 %3507 }
0x4cca   :  { %v3510_v18 = vmul.f32 %v10906_v12, %v3508_v20 }
0x4ccc   :  { %3512 = vrot.lane.b32.xlu0 %v3510_v18, %s11309_s4 }
0x4d3e   :  { %v3513_v30 = vpop.permute.xlu0 %3512 }
0x4d3f   :  { %3515 = vst.msk [vmem:[#allocation3 + $0x30] sm:$0xf] %vm345_vm2, %v3513_v30  ;;  %9653 = vmatmul.mubr.msk.f32.vlgmr.msra.gmra.mrb[36].mxu1 %vm109_vm0, %v3513_v30  ;;  %v3848_v30 = vld [vmem:[%s13067_s13] sm:$0xff] }
0x4d40   :  { %10354 = vmatpush3.bf16.msra.mxu1 %v11751_v63  ;;  %9674 = vmatprep.mubr.msk.f32.mxu1 %vm11306_vm1, %v11307_v19 }
0x4d41   :  { %10355 = vmatprep.subr.bf16.mxu1 %v11305_v13 }
0x4d44   :  { %10357 = vmatpush3.bf16.msra.mxu1 %v11762_v1 }
0x4e12   :  { %v3584_v32 = vpop.f32.mrb[36].mxu1 }
0x4e13   :  { %v3589_v33 = vrot.slane %v3584_v32, 4  ;;  %v9654_v35 = vpop.f32.mrb[37].mxu1 }
0x4e15   :  { %v3591_v37 = vadd.f32 %v3589_v33, %v2108_v50  ;;  %v3851_v33 = vld [vmem:[%s13067_s13 + $0x18] sm:$0xff] }
0x4e17   :  { %10909 = vtanh.f32 %v3591_v37  ;;  %v8722_v22 = vmul.f32 -1.442695, %v3591_v37 }
0x4e19   :  { %10911 = vpow2.f32 %v8722_v22 }
0x4e21   :  { %v10910_v38 = vpop.eup %10909 }
0x4e22   :  { %3604 = vrot.lane.b32.xlu1 %v10910_v38, %s11308_s28 }
0x4e23   :  { %v10912_v39 = vpop.eup %10911 }
0x4e24   :  { %v3595_v41 = vadd.f32 1.0, %v10912_v39 }
0x4e26   :  { %10913 = vrcp.f32 %v3595_v41 }
0x4e30   :  { %v10914_v63 = vpop.eup %10913 }
0x4e31   :  { %v3602_v1 = vmul.f32 %v10914_v63, %v3600_v42 }
0x4e94   :  { %v3605_v34 = vpop.permute.xlu1 %3604 }
0x4e95   :  { %v3607_v27 = vmul.f32 %v10914_v63, %v3605_v34 }
0x4e97   :  { %3609 = vrot.lane.b32.xlu0 %v3607_v27, %s11309_s4 }
0x4f09   :  { %v3610_v43 = vpop.permute.xlu0 %3609 }
0x4f0a   :  { %v3612_v3 = vadd.f32 %v3610_v43, %v3602_v1 }
0x4f0c   :  { %10915 = vtanh.f32 %v3612_v3  ;;  %v3708_v56 = vrot.slane %v3612_v3, 4 }
0x4f16   :  { %v10916_v44 = vpop.eup %10915 }
0x4f17   :  { %3615 = vrot.lane.b32.xlu1 %v10916_v44, %s11308_s28 }
0x4f89   :  { %v3616_v24 = vpop.permute.xlu1 %3615 }
0x4f8a   :  { %v3618_v25 = vmul.f32 %v10914_v63, %v3616_v24 }
0x4f8c   :  { %v3624_v45 = vrot.slane %v3618_v25, 4 }
0x4f8e   :  { %3625 = vrot.lane.b32.xlu0 %v3624_v45, %s11309_s4 }
0x5000   :  { %v3626_v46 = vpop.permute.xlu0 %3625 }
0x5001   :  { %9664 = vmatmul.mubr.msk.f32.vlgmr.msra.gmra.mrb[38].mxu0 %vm109_vm0, %v3626_v46 }
0x50d4   :  { %v3695_v51 = vpop.f32.mrb[38].mxu0 }
0x50d5   :  { %v3699_v0 = vadd.f32 %v3695_v51, %v2113_v49  ;;  %v9665_v36 = vpop.f32.mrb[39].mxu0 }
0x50d7   :  { %10917 = vtanh.f32 %v3699_v0  ;;  %v8724_v2 = vmul.f32 -1.442695, %v3699_v0 }
0x50d9   :  { %10919 = vpow2.f32 %v8724_v2 }
0x50e1   :  { %v10918_v21 = vpop.eup %10917 }
0x50e2   :  { %3712 = vrot.lane.b32.xlu1 %v10918_v21, %s11308_s28 }
0x50e3   :  { %v10920_v53 = vpop.eup %10919 }
0x50e4   :  { %v3703_v61 = vadd.f32 1.0, %v10920_v53 }
0x50e6   :  { %10921 = vrcp.f32 %v3703_v61 }
0x50f0   :  { %v10922_v31 = vpop.eup %10921 }
0x50f1   :  { %v3710_v57 = vmul.f32 %v10922_v31, %v3708_v56 }
0x5154   :  { %v3713_v54 = vpop.permute.xlu1 %3712 }
0x5155   :  { %v3715_v55 = vmul.f32 %v10922_v31, %v3713_v54 }
0x5157   :  { %3717 = vrot.lane.b32.xlu0 %v3715_v55, %s11309_s4 }
0x51c9   :  { %v3718_v28 = vpop.permute.xlu0 %3717 }
0x51ca   :  { %v3720_v59 = vadd.f32 %v3718_v28, %v3710_v57 }
0x51cc   :  { %10923 = vtanh.f32 %v3720_v59  ;;  %v3816_v29 = vrot.slane %v3720_v59, 4 }
0x51d6   :  { %v10924_v60 = vpop.eup %10923 }
0x51d7   :  { %3723 = vrot.lane.b32.xlu1 %v10924_v60, %s11308_s28 }
0x5249   :  { %v3724_v50 = vpop.permute.xlu1 %3723 }
0x524a   :  { %v3726_v26 = vmul.f32 %v10922_v31, %v3724_v50 }
0x524c   :  { %3728 = vrot.lane.b32.xlu0 %v3726_v26, %s11309_s4 }
0x52be   :  { %v3729_v23 = vpop.permute.xlu0 %3728 }
0x52bf   :  { %3731 = vst.msk [vmem:[#allocation3 + $0x38] sm:$0xf] %vm345_vm2, %v3729_v23  ;;  %9675 = vmatmul.mubr.msk.f32.vlgmr.msra.gmra.mrb[38].mxu1 %vm109_vm0, %v3729_v23  ;;  %vm10616_vm2 = vmpackc.low %vm109_vm0, %vm109_vm0 }
0x5392   :  { %v3800_v4 = vpop.f32.mrb[38].mxu1 }
0x5393   :  { %v3805_v5 = vrot.slane %v3800_v4, 4  ;;  %v9676_v6 = vpop.f32.mrb[39].mxu1 }
0x5395   :  { %v3807_v9 = vadd.f32 %v3805_v5, %v2113_v49 }
0x5397   :  { %10925 = vtanh.f32 %v3807_v9  ;;  %v8726_v12 = vmul.f32 -1.442695, %v3807_v9 }
0x5399   :  { %10927 = vpow2.f32 %v8726_v12 }
0x53a1   :  { %v10926_v10 = vpop.eup %10925 }
0x53a2   :  { %3820 = vrot.lane.b32.xlu1 %v10926_v10, %s11308_s28 }
0x53a3   :  { %v10928_v15 = vpop.eup %10927 }
0x53a4   :  { %v3811_v14 = vadd.f32 1.0, %v10928_v15 }
0x53a6   :  { %10929 = vrcp.f32 %v3811_v14 }
0x53b0   :  { %v10930_v11 = vpop.eup %10929 }
0x53b1   :  { %v3818_v17 = vmul.f32 %v10930_v11, %v3816_v29 }
0x5414   :  { %v3821_v16 = vpop.permute.xlu1 %3820 }
0x5415   :  { %v3823_v8 = vmul.f32 %v10930_v11, %v3821_v16 }
0x5417   :  { %3825 = vrot.lane.b32.xlu0 %v3823_v8, %s11309_s4 }
0x541b   :  { %2324 = vrot.lane.b32.xlu0 %v11832_v7, %s11309_s4  ;;  %v3849_v7 = vld [vmem:[%s13067_s13 + $0x8] sm:$0xff] }
0x541c   :  { %v10358_v32 = vpack.c.bf16 %v3849_v7, %v3848_v30 }
0x541e   :  { %10359 = vmatprep.subr.bf16.mxu0 %v10358_v32 }
0x541f   :  { %2756 = vrot.lane.b32.xlu0 %v11910_v52, %s11309_s4  ;;  %10361 = vmatpush3.bf16.msra.mxu0 %v10358_v32 }
0x5423   :  { %3188 = vrot.lane.b32.xlu0 %v11966_v47, %s11309_s4  ;;  %v3850_v47 = vld [vmem:[%s13067_s13 + $0x10] sm:$0xff] }
0x5424   :  { %v10362_v35 = vpack.c.bf16 %v3851_v33, %v3850_v47 }
0x5426   :  { %10363 = vmatprep.subr.bf16.mxu0 %v10362_v35 }
0x5427   :  { %3620 = vrot.lane.b32.xlu0 %v3618_v25, %s11309_s4  ;;  %10365 = vmatpush3.bf16.msra.mxu0 %v10362_v35 }
0x5489   :  { %v3826_v20 = vpop.permute.xlu0 %3825 }
0x548a   :  { %v3828_v18 = vadd.f32 %v3826_v20, %v3818_v17 }
0x548c   :  { %10931 = vtanh.f32 %v3828_v18 }
0x548d   :  { %v2325_v52 = vpop.permute.xlu0 %2324 }
0x548e   :  { %2327 = vst.msk [vmem:[#allocation3] sm:$0xf0] %vm454_vm3, %v2325_v52 }
0x5491   :  { %v2757_v37 = vpop.permute.xlu0 %2756 }
0x5492   :  { %2759 = vst.msk [vmem:[#allocation3 + $0x10] sm:$0xf0] %vm454_vm3, %v2757_v37 }
0x5495   :  { %v3189_v38 = vpop.permute.xlu0 %3188  ;;  %v3840_v22 = vld [vmem:[#allocation3] sm:$0xff] }
0x5496   :  { %v10932_v39 = vpop.eup %10931  ;;  %3191 = vst.msk [vmem:[#allocation3 + $0x20] sm:$0xf0] %vm454_vm3, %v3189_v38  ;;  %9685 = vmatprep.mubr.msk.f32.mxu0 %vm109_vm0, %v3840_v22  ;;  %v3989_v46 = vmul.f32 %v3840_v22, %v3840_v22 }
0x5497   :  { %3831 = vrot.lane.b32.xlu1 %v10932_v39, %s11308_s28 }
0x5498   :  { %v3997_v48 = vsel %vm109_vm0, %v3989_v46, 0.0 }
0x5499   :  { %v3621_v41 = vpop.permute.xlu0 %3620 }
0x549a   :  { %3623 = vst.msk [vmem:[#allocation3 + $0x30] sm:$0xf0] %vm454_vm3, %v3621_v41 }
0x549b   :  { %2540 = vrot.lane.b32.xlu1 %v11882_v62, %s11309_s4  ;;  %v12073_v62 = vld [vmem:[#allocation3 + $0x10] sm:$0xff] }
0x549c   :  { %v3991_v38 = vmul.f32 %v12073_v62, %v12073_v62 }
0x549d   :  { %v12079_v3 = vld [vmem:[#allocation3 + $0x20] sm:$0xff] }
0x549e   :  { %v3993_v39 = vmul.f32 %v12079_v3, %v12079_v3 }
0x549f   :  { %2972 = vrot.lane.b32.xlu1 %v11938_v40, %s11309_s4 }
0x54a0   :  { %v4009_v41 = vsel %vm109_vm0, %v3993_v39, 0.0 }
0x54a1   :  { %v12085_v25 = vld [vmem:[#allocation3 + $0x30] sm:$0xff] }
0x54a3   :  { %3404 = vrot.lane.b32.xlu1 %v11994_v58, %s11309_s4 }
0x5509   :  { %v3832_v63 = vpop.permute.xlu1 %3831 }
0x550a   :  { %v3834_v34 = vmul.f32 %v10930_v11, %v3832_v63  ;;  %v3995_v63 = vmul.f32 %v12085_v25, %v12085_v25 }
0x550c   :  { %3836 = vrot.lane.b32.xlu1 %v3834_v34, %s11309_s4  ;;  %v4015_v34 = vsel %vm109_vm0, %v3995_v63, 0.0 }
0x550d   :  { %v2541_v27 = vpop.permute.xlu1 %2540 }
0x550e   :  { %2543 = vst.msk [vmem:[#allocation3 + $0x8] sm:$0xf0] %vm454_vm3, %v2541_v27 }
0x5511   :  { %v2973_v42 = vpop.permute.xlu1 %2972 }
0x5512   :  { %2975 = vst.msk [vmem:[#allocation3 + $0x18] sm:$0xf0] %vm454_vm3, %v2973_v42 }
0x5515   :  { %v3405_v1 = vpop.permute.xlu1 %3404  ;;  %v12068_v43 = vld [vmem:[#allocation3 + $0x8] sm:$0xff] }
0x5516   :  { %3407 = vst.msk [vmem:[#allocation3 + $0x28] sm:$0xf0] %vm454_vm3, %v3405_v1  ;;  %9686 = vmatmul.mubr.msk.f32.vlgmr.msra.gmra.mrb[40].mxu0 %vm109_vm0, %v12068_v43  ;;  %v10390_v40 = vpack.c.bf16 %v12068_v43, %v3840_v22  ;;  %v3990_v35 = vmul.f32 %v12068_v43, %v12068_v43  ;;  %v4003_v22 = vsel %vm109_vm0, %v3991_v38, 0.0 }
0x5517   :  { %9688 = vmatprep.mubr.msk.f32.mxu0 %vm109_vm0, %v12073_v62 }
0x5518   :  { %10391 = vmatprep.subr.bf16.mxu0 %v10390_v40  ;;  %v4000_v37 = vsel %vm109_vm0, %v3990_v35, 0.0 }
0x5519   :  { %10393 = vmatpush3.bf16.msra.mxu0 %v10390_v40  ;;  %v3843_v58 = vld [vmem:[#allocation3 + $0x18] sm:$0xff] }
0x551a   :  { %9689 = vmatmul.mubr.msk.f32.gmra.mrb[42].mxu0 %vm109_vm0, %v3843_v58  ;;  %v10394_v44 = vpack.c.bf16 %v3843_v58, %v12073_v62  ;;  %v3992_v49 = vmul.f32 %v3843_v58, %v3843_v58 }
0x551b   :  { %9691 = vmatprep.mubr.msk.f32.mxu0 %vm109_vm0, %v12079_v3 }
0x551c   :  { %10395 = vmatprep.subr.bf16.mxu0 %v10394_v44  ;;  %v4006_v51 = vsel %vm109_vm0, %v3992_v49, 0.0 }
0x551d   :  { %10397 = vmatpush3.bf16.msra.mxu0 %v10394_v44  ;;  %v3845_v24 = vld [vmem:[#allocation3 + $0x28] sm:$0xff] }
0x551e   :  { %9692 = vmatmul.mubr.msk.f32.gmra.mrb[44].mxu0 %vm109_vm0, %v3845_v24  ;;  %v10398_v45 = vpack.c.bf16 %v3845_v24, %v12079_v3  ;;  %v3994_v0 = vmul.f32 %v3845_v24, %v3845_v24 }
0x551f   :  { %9694 = vmatprep.mubr.msk.f32.mxu0 %vm109_vm0, %v12085_v25 }
0x5520   :  { %10399 = vmatprep.subr.bf16.mxu0 %v10398_v45  ;;  %v4012_v36 = vsel %vm109_vm0, %v3994_v0, 0.0 }
0x5521   :  { %10401 = vmatpush3.bf16.msra.mxu0 %v10398_v45 }
0x5530   :  { %3998 = vadd.xlane.f32.xlu1 %v3997_v48 }
0x5534   :  { %4007 = vadd.xlane.f32.xlu1 %v4006_v51 }
0x5538   :  { %4013 = vadd.xlane.f32.xlu1 %v4012_v36 }
0x557e   :  { %v3837_v21 = vpop.permute.xlu1 %3836 }
0x557f   :  { %3839 = vst.msk [vmem:[#allocation3 + $0x38] sm:$0xf0] %vm454_vm3, %v3837_v21 }
0x5586   :  { %v3847_v2 = vld [vmem:[#allocation3 + $0x38] sm:$0xff] }
0x5587   :  { %9695 = vmatmul.mubr.msk.f32.gmra.mrb[46].mxu0 %vm109_vm0, %v3847_v2  ;;  %v10402_v53 = vpack.c.bf16 %v3847_v2, %v12085_v25  ;;  %v3996_v61 = vmul.f32 %v3847_v2, %v3847_v2 }
0x5589   :  { %10403 = vmatprep.subr.bf16.mxu0 %v10402_v53  ;;  %v4018_v31 = vsel %vm109_vm0, %v3996_v61, 0.0 }
0x558a   :  { %10405 = vmatpush3.bf16.msra.mxu0 %v10402_v53  ;;  %4019 = vadd.xlane.f32.xlu1 %v4018_v31 }
0x55bd   :  { %v3999_v25 = vpop.xlane.xlu1 %3998 }
0x55be   :  { %v4021_v46 = vmul.f32 0.088388346, %v3999_v25 }
0x55c1   :  { %v4008_v53 = vpop.xlane.xlu1 %4007 }
0x55c5   :  { %v4014_v61 = vpop.xlane.xlu1 %4013 }
0x55e9   :  { %v9687_v54 = vpop.f32.mrb[40].mxu0 }
0x55ea   :  { %v12097_v55 = vmul.f32 0.4204482, %v9687_v54  ;;  %v3942_v56 = vpop.f32.mrb[41].mxu0 }
0x55eb   :  { %v3981_v26 = vmul.f32 0.4204482, %v3942_v56 }
0x55ec   :  { %v4041_v57 = vsel %vm4037_vm4, %v12097_v55, -inf }
0x55ed   :  { %4042 = vmax.xlane.f32.xlu1 %v4041_v57  ;;  %v9690_v28 = vpop.f32.mrb[42].mxu0  ;;  %v4038_v10 = vsel %vm4037_vm4, %v3981_v26, -inf  ;;  %v4029_v48 = vsub.f32 %v3981_v26, %v4021_v46 }
0x55ee   :  { %v12101_v59 = vmul.f32 0.4204482, %v9690_v28  ;;  %v3952_v60 = vpop.f32.mrb[43].mxu0  ;;  %v4026_v28 = vmul.f32 0.088388346, %v4014_v61 }
0x55ef   :  { %v3983_v16 = vmul.f32 0.4204482, %v3952_v60 }
0x55f0   :  { %v4047_v50 = vsel %vm4037_vm4, %v12101_v59, -inf }
0x55f1   :  { %4048 = vmax.xlane.f32.xlu1 %v4047_v50  ;;  %v9693_v23 = vpop.f32.mrb[44].mxu0  ;;  %v4044_v30 = vsel %vm4037_vm4, %v3983_v16, -inf }
0x55f2   :  { %v12105_v4 = vmul.f32 0.4204482, %v9693_v23  ;;  %v3962_v5 = vpop.f32.mrb[45].mxu0 }
0x55f3   :  { %v12107_v6 = vmul.f32 0.4204482, %v3962_v5 }
0x55f4   :  { %v4053_v9 = vsel %vm4037_vm4, %v12105_v4, -inf  ;;  %v12145_v23 = vsub.f32 %v12105_v4, %v4026_v28 }
0x55f5   :  { %v4050_v12 = vsel %vm4037_vm4, %v12107_v6, -inf  ;;  %4054 = vmax.xlane.f32.xlu1 %v4053_v9  ;;  %v4103_v15 = vmax.f32 %v4041_v57, %v4053_v9  ;;  %v4024_v57 = vmul.f32 0.088388346, %v4008_v53 }
0x55f6   :  { %v4102_v14 = vmax.f32 %v4038_v10, %v4050_v12 }
0x55f7   :  { %v12137_v60 = vsub.f32 %v12101_v59, %v4024_v57 }
0x55f8   :  { %v4106_v11 = vmax.f32 %v4102_v14, %v4103_v15 }
0x565a   :  { %v9696_v8 = vpop.f32.mrb[46].mxu0 }
0x565b   :  { %v12114_v29 = vmul.f32 0.4204482, %v9696_v8  ;;  %v3972_v17 = vpop.f32.mrb[47].mxu0 }
0x565c   :  { %v12116_v20 = vmul.f32 0.4204482, %v3972_v17 }
0x565d   :  { %v4059_v18 = vsel %vm4037_vm4, %v12114_v29, -inf }
0x565e   :  { %v4056_v7 = vsel %vm4037_vm4, %v12116_v20, -inf  ;;  %4060 = vmax.xlane.f32.xlu1 %v4059_v18  ;;  %v4105_v32 = vmax.f32 %v4047_v50, %v4059_v18 }
0x565f   :  { %v4104_v52 = vmax.f32 %v4044_v30, %v4056_v7 }
0x5661   :  { %v4107_v47 = vmax.f32 %v4104_v52, %v4105_v32  ;;  %v4159_v52 = vlaneseq }
0x5663   :  { %v4108_v33 = vmax.f32 %v4106_v11, %v4107_v47 }
0x5665   :  { %4109 = vmax.xlane.f32.xlu0 %v4108_v33 }
0x5669   :  { %4001 = vadd.xlane.f32.xlu0 %v4000_v37  ;;  %v12163_v37 = vand.u32 127, %v4159_v52 }
0x566b   :  { %vm4161_vm5 = vcmp.lt.s32.totalorder %v12163_v37, 60 }
0x566d   :  { %4004 = vadd.xlane.f32.xlu0 %v4003_v22 }
0x5671   :  { %4010 = vadd.xlane.f32.xlu0 %v4009_v41 }
0x5675   :  { %4016 = vadd.xlane.f32.xlu0 %v4015_v34  ;;  %v8735_v34 = vsel %vm4161_vm5, 1.0, %v11307_v19  ;;  %vm8429_vm5 = vcmask 123905  }
0x5679   :  { %4039 = vmax.xlane.f32.xlu0 %v4038_v10 }
0x567d   :  { %4045 = vmax.xlane.f32.xlu0 %v4044_v30 }
0x5681   :  { %4051 = vmax.xlane.f32.xlu0 %v4050_v12  ;;  %v4020_v12 = vpop.xlane.xlu1 %4019 }
0x5682   :  { %v4028_v18 = vmul.f32 0.088388346, %v4020_v12 }
0x5684   :  { %v12159_v32 = vsub.f32 %v12114_v29, %v4028_v18 }
0x5685   :  { %4057 = vmax.xlane.f32.xlu0 %v4056_v7 }
0x56f2   :  { %v4110_v27 = vpop.xlane.xlu0 %4109 }
0x56f3   :  { %v4111_v42 = vrot.slane %v4110_v27, 4 }
0x56f5   :  { %v4112_v1 = vmax.f32 %v4110_v27, %v4111_v42 }
0x56f6   :  { %v4002_v43 = vpop.xlane.xlu0 %4001 }
0x56f7   :  { %v4113_v62 = vrot.slane %v4112_v1, 2  ;;  %v4022_v31 = vmul.f32 0.088388346, %v4002_v43 }
0x56f9   :  { %v4114_v40 = vmax.f32 %v4112_v1, %v4113_v62  ;;  %v12140_v50 = vsub.f32 %v12097_v55, %v4022_v31 }
0x56fa   :  { %v4005_v58 = vpop.xlane.xlu0 %4004 }
0x56fb   :  { %v4115_v3 = vrot.slane %v4114_v40, 1  ;;  %v4023_v54 = vmul.f32 0.088388346, %v4005_v58 }
0x56fd   :  { %v4116_v44 = vmax.f32 %v4114_v40, %v4115_v3  ;;  %v12142_v26 = vsub.f32 %v3983_v16, %v4023_v54 }
0x56fe   :  { %v4011_v24 = vpop.xlane.xlu0 %4010 }
0x56ff   :  { %10626 = vpush %v4116_v44  ;;  %v4025_v56 = vmul.f32 0.088388346, %v4011_v24 }
0x5701   :  { %v12148_v9 = vsub.f32 %v12107_v6, %v4025_v56 }
0x5702   :  { %v4017_v45 = vpop.xlane.xlu0 %4016 }
0x5703   :  { %v4027_v5 = vmul.f32 0.088388346, %v4017_v45 }
0x5705   :  { %v12156_v6 = vsub.f32 %v12116_v20, %v4027_v5 }
0x5706   :  { %v4040_v49 = vpop.xlane.xlu0 %4039 }
0x5707   :  { %v4062_v51 = vsub.f32 %v4029_v48, %v4040_v49 }
0x5709   :  { %v4070_v0 = vmul.f32 1.442695, %v4062_v51  ;;  %v4043_v51 = vpop.xlane.xlu1 %4042 }
0x570a   :  { %v4063_v12 = vsub.f32 %v12140_v50, %v4043_v51 }
0x570b   :  { %10933 = vpow2.f32 %v4070_v0 }
0x570d   :  { %v4049_v56 = vpop.xlane.xlu1 %4048 }
0x5715   :  { %v10934_v36 = vpop.eup %10933 }
0x5716   :  { %v4086_v21 = vadd.f32 1e-06, %v10934_v36 }
0x5718   :  { %v4094_v2 = vmul.f32 0.12909944, %v4086_v21  ;;  %v4046_v21 = vpop.xlane.xlu0 %4045 }
0x571a   :  { %9713 = vmatprep.mubr.msk.f32.mxu1 %vm4037_vm4, %v4094_v2 }
0x5730   :  { %s10627_s13 = spop %10626 }
0x5731   :  { %v4118_v10 = vstv %s10627_s13 }
0x5732   :  { %v4119_v15 = vsub.f32 %v4029_v48, %v4118_v10  ;;  %v4120_v14 = vsub.f32 %v12140_v50, %v4118_v10  ;;  %v4121_v59 = vsub.f32 %v12142_v26, %v4118_v10  ;;  %v4122_v55 = vsub.f32 %v12137_v60, %v4118_v10  ;;  %v4326_v48 = vld [vmem:[%s13068_s14 + $0x8] sm:$0xff] }
0x5733   :  { %v4123_v11 = vsub.f32 %v12148_v9, %v4118_v10  ;;  %v4124_v16 = vsub.f32 %v12145_v23, %v4118_v10  ;;  %v4125_v33 = vsub.f32 %v12156_v6, %v4118_v10  ;;  %v4126_v35 = vsub.f32 %v12159_v32, %v4118_v10 }
0x5734   :  { %v4127_v8 = vmul.f32 1.442695, %v4119_v15  ;;  %v4129_v4 = vmul.f32 1.442695, %v4120_v14  ;;  %v4131_v17 = vmul.f32 1.442695, %v4121_v59  ;;  %v4052_v15 = vpop.xlane.xlu0 %4051  ;;  %v4064_v14 = vsub.f32 %v12142_v26, %v4046_v21 }
0x5735   :  { %v4133_v30 = vmul.f32 1.442695, %v4122_v55  ;;  %v4135_v7 = vmul.f32 1.442695, %v4123_v11  ;;  %v4137_v47 = vmul.f32 1.442695, %v4124_v16  ;;  %v4065_v16 = vsub.f32 %v12137_v60, %v4049_v56 }
0x5736   :  { %10935 = vpow2.f32 %v4127_v8  ;;  %v4139_v20 = vmul.f32 1.442695, %v4125_v33  ;;  %v4141_v38 = vmul.f32 1.442695, %v4126_v35  ;;  %v4072_v8 = vmul.f32 1.442695, %v4063_v12 }
0x5737   :  { %10937 = vpow2.f32 %v4129_v4  ;;  %v4055_v4 = vpop.xlane.xlu1 %4054  ;;  %v4066_v18 = vsub.f32 %v12148_v9, %v4052_v15  ;;  %v4076_v26 = vmul.f32 1.442695, %v4065_v16  ;;  %v4330_v12 = vld [vmem:[%s13068_s14 + $0x28] sm:$0xff]  ;;  %v4332_v16 = vld [vmem:[%s13068_s14 + $0x38] sm:$0xff] }
0x5738   :  { %10939 = vpow2.f32 %v4131_v17  ;;  %v4074_v17 = vmul.f32 1.442695, %v4064_v14  ;;  %v4058_v50 = vpop.xlane.xlu0 %4057  ;;  %v4067_v52 = vsub.f32 %v12145_v23, %v4055_v4 }
0x5739   :  { %10941 = vpow2.f32 %v4133_v30  ;;  %v4078_v60 = vmul.f32 1.442695, %v4066_v18  ;;  %v4068_v33 = vsub.f32 %v12156_v6, %v4058_v50  ;;  %v4518_v18 = vld [vmem:[%s13061_s7] sm:$0xff]  ;;  %v4519_v50 = vld [vmem:[%s13061_s7 + $0x8] sm:$0xff] }
0x573a   :  { %10943 = vpow2.f32 %v4135_v7 }
0x573b   :  { %10945 = vpow2.f32 %v4137_v47  ;;  %v4061_v47 = vpop.xlane.xlu1 %4060 }
0x573c   :  { %10947 = vpow2.f32 %v4139_v20  ;;  %v4080_v20 = vmul.f32 1.442695, %v4067_v52  ;;  %v4069_v9 = vsub.f32 %v12159_v32, %v4061_v47  ;;  %v4520_v52 = vld [vmem:[%s13061_s7 + $0x10] sm:$0xff]  ;;  %v4521_v47 = vld [vmem:[%s13061_s7 + $0x18] sm:$0xff]  ;;  %s8373_s7 = scalar_select %p8372_p10, %s8371_s3, 0 }
0x573d   :  { %10949 = vpow2.f32 %v4141_v38  ;;  %v4082_v38 = vmul.f32 1.442695, %v4068_v33  ;;  %v10410_v33 = vpack.c.bf16 %v4521_v47, %v4520_v52 }
0x573e   :  { %10951 = vpow2.f32 %v4072_v8  ;;  %v4084_v23 = vmul.f32 1.442695, %v4069_v9  ;;  %s13094_s7 = smov (!%p8842_p12, %s8373_s7), 16 }
0x573f   :  { %10953 = vpow2.f32 %v4074_v17  ;;  %p8419_p2 = scmp.lt.s32.totalorder %s13094_s7, 16 }
0x5740   :  { %v10936_v22 = vpop.eup %10935  ;;  %10955 = vpow2.f32 %v4076_v26  ;;  %v4659_v26 = vld [vmem:[%s13062_s8 + $0x8] sm:$0xff] }
0x5741   :  { %v10938_v29 = vpop.eup %10937  ;;  %v4143_v39 = vadd.f32 1e-06, %v10936_v22  ;;  %10957 = vpow2.f32 %v4078_v60  ;;  %s12998_s24 = scalar_select %p8419_p2, 1, 0 }
0x5742   :  { %v10940_v41 = vpop.eup %10939  ;;  %v4144_v63 = vadd.f32 1e-06, %v10938_v29  ;;  %10959 = vpow2.f32 %v4080_v20  ;;  %v4661_v20 = vld [vmem:[%s13062_s8 + $0x18] sm:$0xff] }
0x5743   :  { %v10942_v27 = vpop.eup %10941  ;;  %v4151_v42 = vmul.f32 0.12909944, %v4143_v39  ;;  %v4145_v1 = vadd.f32 1e-06, %v10940_v41  ;;  %10961 = vpow2.f32 %v4082_v38  ;;  %s8421_s25 = scvt.s32.f32 %s12998_s24 }
0x5744   :  { %v10944_v43 = vpop.eup %10943  ;;  %v4152_v62 = vmul.f32 0.12909944, %v4144_v63  ;;  %v4146_v40 = vadd.f32 1e-06, %v10942_v27  ;;  %10963 = vpow2.f32 %v4084_v23 }
0x5745   :  { %v10946_v58 = vpop.eup %10945  ;;  %v4164_v3 = vmul.f32 %v8735_v34, %v4151_v42  ;;  %v4153_v44 = vmul.f32 0.12909944, %v4145_v1  ;;  %v4147_v45 = vadd.f32 1e-06, %v10944_v43 }
0x5746   :  { %v4165_v24 = vmul.f32 %v8735_v34, %v4152_v62  ;;  %v4154_v25 = vmul.f32 0.12909944, %v4146_v40  ;;  %v4148_v46 = vadd.f32 1e-06, %v10946_v58  ;;  %v10948_v2 = vpop.eup %10947 }
0x5747   :  { %v4166_v49 = vmul.f32 %v8735_v34, %v4153_v44  ;;  %v4155_v61 = vmul.f32 0.12909944, %v4147_v45  ;;  %v10950_v54 = vpop.eup %10949  ;;  %v4149_v5 = vadd.f32 1e-06, %v10948_v2 }
0x5748   :  { %v10366_v0 = vpack.c.bf16 %v4165_v24, %v4164_v3  ;;  %v4167_v36 = vmul.f32 %v8735_v34, %v4154_v25  ;;  %v4156_v31 = vmul.f32 0.12909944, %v4148_v46  ;;  %v4150_v10 = vadd.f32 1e-06, %v10950_v54  ;;  %v10952_v22 = vpop.eup %10951 }
0x5749   :  { %v4168_v57 = vmul.f32 %v8735_v34, %v4155_v61  ;;  %v4157_v55 = vmul.f32 0.12909944, %v4149_v5  ;;  %v10954_v29 = vpop.eup %10953  ;;  %v4087_v6 = vadd.f32 1e-06, %v10952_v22  ;;  %v4329_v5 = vld [vmem:[%s13068_s14 + $0x20] sm:$0xff] }
0x574a   :  { %10368 = vmatprep.subr.msk.bf16.mxu1 %vm12169_vm6, %v10366_v0  ;;  %v10372_v53 = vpack.c.bf16 %v4167_v36, %v4166_v49  ;;  %v4169_v28 = vmul.f32 %v8735_v34, %v4156_v31  ;;  %v4158_v11 = vmul.f32 0.12909944, %v4150_v10  ;;  %v10956_v32 = vpop.eup %10955  ;;  %v4088_v39 = vadd.f32 1e-06, %v10954_v29  ;;  %v4325_v49 = vld [vmem:[%s13068_s14] sm:$0xff]  ;;  %v4328_v31 = vld [vmem:[%s13068_s14 + $0x18] sm:$0xff] }
0x574b   :  { %10371 = vmatpush3.bf16.xpose.msk.msra.mxu1 %vm12169_vm6, %v10366_v0  ;;  %v4170_v30 = vmul.f32 %v8735_v34, %v4157_v55  ;;  %v10958_v41 = vpop.eup %10957  ;;  %v4089_v63 = vadd.f32 1e-06, %v10956_v32  ;;  %v4331_v55 = vld [vmem:[%s13068_s14 + $0x30] sm:$0xff] }
0x574c   :  { %10374 = vmatprep.subr.msk.bf16.mxu1 %vm12169_vm6, %v10372_v53  ;;  %v10378_v59 = vpack.c.bf16 %v4169_v28, %v4168_v57  ;;  %v4171_v7 = vmul.f32 %v8735_v34, %v4158_v11  ;;  %v4095_v34 = vmul.f32 0.12909944, %v4087_v6  ;;  %v10960_v27 = vpop.eup %10959  ;;  %v4096_v42 = vmul.f32 0.12909944, %v4088_v39 }
0x574d   :  { %v4090_v1 = vadd.f32 1e-06, %v10958_v41  ;;  %v10962_v43 = vpop.eup %10961  ;;  %v4097_v62 = vmul.f32 0.12909944, %v4089_v63  ;;  %v4091_v40 = vadd.f32 1e-06, %v10960_v27 }
0x574e   :  { %v10384_v35 = vpack.c.bf16 %v4171_v7, %v4170_v30  ;;  %v10964_v58 = vpop.eup %10963  ;;  %v4092_v44 = vadd.f32 1e-06, %v10962_v43  ;;  %v4658_v30 = vld [vmem:[%s13062_s8] sm:$0xff]  ;;  %v10406_v7 = vpack.c.bf16 %v4519_v50, %v4518_v18 }
0x574f   :  { %v4098_v3 = vmul.f32 0.12909944, %v4090_v1  ;;  %v4099_v24 = vmul.f32 0.12909944, %v4091_v40  ;;  %v4093_v25 = vadd.f32 1e-06, %v10964_v58  ;;  %v12276_v60 = vpack.c.bf16 %v4659_v26, %v4658_v30 }
0x5750   :  { %v4100_v45 = vmul.f32 0.12909944, %v4092_v44  ;;  %10407 = vmatprep.subr.bf16.mxu0 %v10406_v7  ;;  %v12317_v44 = vld [vmem:[%s13063_s9] ss:$0 sm:$0xff] }
0x5751   :  { %v4101_v46 = vmul.f32 0.12909944, %v4093_v25 }
0x5753   :  { %10377 = vmatpush3.bf16.xpose.msk.msra.mxu1 %vm12169_vm6, %v10372_v53  ;;  %v4327_v53 = vld [vmem:[%s13068_s14 + $0x10] sm:$0xff] }
0x5754   :  { %10380 = vmatprep.subr.msk.bf16.mxu1 %vm12169_vm6, %v10378_v59 }
0x575b   :  { %10383 = vmatpush3.bf16.xpose.msk.msra.mxu1 %vm12169_vm6, %v10378_v59 }
0x575c   :  { %10386 = vmatprep.subr.msk.bf16.mxu1 %vm12169_vm6, %v10384_v35 }
0x5763   :  { %10389 = vmatpush3.bf16.xpose.msk.msra.mxu1 %vm12169_vm6, %v10384_v35  ;;  %v4660_v35 = vld [vmem:[%s13062_s8 + $0x10] sm:$0xff]  ;;  %vm8492_vm6 = vcmask 254080  }
0x5764   :  { %10414 = vmatprep.subr.bf16.mxu1 %v11305_v13  ;;  %v12287_v9 = vpack.c.bf16 %v4661_v20, %v4660_v35 }
0x576a   :  { %9714 = vmatmul.mubr.msk.f32.vlgmr.msra.gmra.mrb[40].mxu1 %vm4037_vm4, %v4095_v34 }
0x576b   :  { %9716 = vmatprep.mubr.msk.f32.mxu1 %vm4037_vm4, %v4096_v42  ;;  %10416 = vmatpush3.bf16.msra.mxu1 %v12276_v60 }
0x576c   :  { %10417 = vmatprep.subr.bf16.mxu1 %v11305_v13 }
0x576e   :  { %9717 = vmatmul.mubr.msk.f32.gmra.mrb[42].mxu1 %vm4037_vm4, %v4097_v62 }
0x576f   :  { %9719 = vmatprep.mubr.msk.f32.mxu1 %vm4037_vm4, %v4098_v3  ;;  %10419 = vmatpush3.bf16.msra.mxu1 %v12287_v9 }
0x5770   :  { %10426 = vmatprep.subr.bf16.mxu1 %v11305_v13 }
0x5772   :  { %9720 = vmatmul.mubr.msk.f32.gmra.mrb[44].mxu1 %vm4037_vm4, %v4099_v24 }
0x5773   :  { %9722 = vmatprep.mubr.msk.f32.mxu1 %vm4037_vm4, %v4100_v45 }
0x5776   :  { %9723 = vmatmul.mubr.msk.f32.gmra.mrb[46].mxu1 %vm4037_vm4, %v4101_v46 }
0x5777   :  { %9781 = vmatprep.mubr.msk.f32.mxu1 %vm11306_vm1, %v11307_v19 }
0x577a   :  { %9782 = vmatmul.mubr.f32.vlgmr.msra.gmra.mrb[48].mxu1 %v11307_v19 }
0x577b   :  { %10428 = vmatpush3.bf16.msra.mxu1 %v12276_v60  ;;  %9803 = vmatprep.mubr.msk.f32.mxu1 %vm11306_vm1, %v11307_v19 }
0x577c   :  { %10429 = vmatprep.subr.bf16.mxu1 %v11305_v13 }
0x577f   :  { %10431 = vmatpush3.bf16.msra.mxu1 %v12287_v9 }
0x5780   :  { %10438 = vmatprep.subr.bf16.mxu1 %v11305_v13 }
0x583d   :  { %v9715_v51 = vpop.f32.mrb[40].mxu1 }
0x583e   :  { %v4334_v0 = vmul.f32 %v9715_v51, %v4326_v48  ;;  %v4286_v36 = vpop.f32.mrb[41].mxu1 }
0x583f   :  { %v4333_v21 = vmul.f32 %v4325_v49, %v4286_v36 }
0x5840   :  { %v4473_v2 = vsel %vm4037_vm4, %v4334_v0, 0.0 }
0x5841   :  { %4474 = vadd.xlane.f32.xlu1 %v4473_v2  ;;  %v9718_v61 = vpop.f32.mrb[42].mxu1  ;;  %9741 = vmatprep.mubr.msk.f32.mxu0 %vm4037_vm4, %v4333_v21  ;;  %v4470_v54 = vsel %vm4037_vm4, %v4333_v21, 0.0 }
0x5842   :  { %4471 = vadd.xlane.f32.xlu0 %v4470_v54  ;;  %v4296_v56 = vpop.f32.mrb[43].mxu1  ;;  %9742 = vmatmul.mubr.msk.f32.vlgmr.msra.gmra.mrb[48].mxu0 %vm4037_vm4, %v4334_v0  ;;  %v12224_v28 = vmul.f32 %v9718_v61, %v4328_v31 }
0x5843   :  { %v12222_v57 = vmul.f32 %v4327_v53, %v4296_v56  ;;  %10409 = vmatpush3.bf16.msra.mxu0 %v10406_v7 }
0x5844   :  { %10411 = vmatprep.subr.bf16.mxu0 %v10410_v33 }
0x5845   :  { %v9721_v10 = vpop.f32.mrb[44].mxu1  ;;  %9744 = vmatprep.mubr.msk.f32.mxu0 %vm4037_vm4, %v12222_v57  ;;  %v4476_v49 = vsel %vm4037_vm4, %v12222_v57, 0.0 }
0x5846   :  { %v4306_v15 = vpop.f32.mrb[45].mxu1  ;;  %9745 = vmatmul.mubr.msk.f32.gmra.mrb[50].mxu0 %vm4037_vm4, %v12224_v28  ;;  %v12238_v59 = vmul.f32 %v9721_v10, %v4330_v12 }
0x5847   :  { %v12236_v14 = vmul.f32 %v4329_v5, %v4306_v15  ;;  %10413 = vmatpush3.bf16.msra.mxu0 %v10410_v33 }
0x5848   :  { %10420 = vmatprep.subr.bf16.mxu0 %v11305_v13  ;;  %v4485_v0 = vsel %vm4037_vm4, %v12238_v59, 0.0 }
0x5849   :  { %v9724_v11 = vpop.f32.mrb[46].mxu1  ;;  %9747 = vmatprep.mubr.msk.f32.mxu0 %vm4037_vm4, %v12236_v14  ;;  %v4482_v51 = vsel %vm4037_vm4, %v12236_v14, 0.0 }
0x584a   :  { %v4316_v8 = vpop.f32.mrb[47].mxu1  ;;  %9748 = vmatmul.mubr.msk.f32.gmra.mrb[52].mxu0 %vm4037_vm4, %v12238_v59  ;;  %v12252_v17 = vmul.f32 %v9724_v11, %v4332_v16 }
0x584b   :  { %v12250_v4 = vmul.f32 %v4331_v55, %v4316_v8  ;;  %v4479_v55 = vsel %vm4037_vm4, %v12224_v28, 0.0 }
0x584c   :  { %v4491_v36 = vsel %vm4037_vm4, %v12252_v17, 0.0 }
0x584d   :  { %9750 = vmatprep.mubr.msk.f32.mxu0 %vm4037_vm4, %v12250_v4  ;;  %v4728_v58 = vpop.f32.mrb[48].mxu1  ;;  %v4488_v11 = vsel %vm4037_vm4, %v12250_v4, 0.0 }
0x584e   :  { %9751 = vmatmul.mubr.msk.f32.gmra.mrb[54].mxu0 %vm4037_vm4, %v12252_v17  ;;  %v9783_v3 = vpop.f32.mrb[49].mxu1 }
0x58ce   :  { %v4475_v23 = vpop.xlane.xlu1 %4474 }
0x58cf   :  { %v4472_v38 = vpop.xlane.xlu0 %4471  ;;  %v4495_v29 = vmax.f32 %v4475_v23, 1e-30 }
0x58d0   :  { %v4494_v22 = vmax.f32 %v4472_v38, 1e-30 }
0x58d2   :  { %10965 = vrcp.f32 %v4494_v22 }
0x58d3   :  { %10967 = vrcp.f32 %v4495_v29 }
0x58dc   :  { %v10966_v32 = vpop.eup %10965 }
0x58dd   :  { %v10968_v41 = vpop.eup %10967 }
0x5915   :  { %v9743_v6 = vpop.f32.mrb[48].mxu0 }
0x5916   :  { %v4431_v39 = vpop.f32.mrb[49].mxu0  ;;  %v4505_v34 = vmul.f32 %v10968_v41, %v9743_v6 }
0x5917   :  { %v4503_v63 = vmul.f32 %v10966_v32, %v4431_v39 }
0x5919   :  { %v12298_v27 = vpop.f32.mrb[50].mxu0  ;;  %9761 = vmatprep.mubr.msk.f32.mxu0 %vm109_vm0, %v4503_v63 }
0x591a   :  { %v4441_v42 = vpop.f32.mrb[51].mxu0  ;;  %9762 = vmatmul.mubr.msk.f32.vlgmr.msra.gmra.mrb[56].mxu0 %vm109_vm0, %v4505_v34 }
0x591b   :  { %10422 = vmatpush3.bf16.msra.mxu0 %v12276_v60 }
0x591c   :  { %10423 = vmatprep.subr.bf16.mxu0 %v11305_v13 }
0x591d   :  { %v12304_v1 = vpop.f32.mrb[52].mxu0 }
0x591e   :  { %v12306_v43 = vpop.f32.mrb[53].mxu0 }
0x591f   :  { %10425 = vmatpush3.bf16.msra.mxu0 %v12287_v9 }
0x5920   :  { %10432 = vmatprep.subr.bf16.mxu0 %v11305_v13 }
0x5921   :  { %v12310_v62 = vpop.f32.mrb[54].mxu0 }
0x5922   :  { %v12312_v40 = vpop.f32.mrb[55].mxu0 }
0x59ed   :  { %v12319_v24 = vpop.f32.mrb[56].mxu0 }
0x59ee   :  { %v4619_v25 = vpop.f32.mrb[57].mxu0 }
0x59ef   :  { %v12322_v45 = vadd.f32 %v12317_v44, %v4619_v25 }
0x59f1   :  { %v4732_v46 = vadd.f32 %v4728_v58, %v12322_v45 }
0x59f3   :  { %10969 = vtanh.f32 %v4732_v46  ;;  %v8769_v21 = vmul.f32 -1.442695, %v4732_v46 }
0x59f5   :  { %10971 = vpow2.f32 %v8769_v21 }
0x59fd   :  { %v10970_v48 = vpop.eup %10969 }
0x59fe   :  { %4742 = vrot.lane.b32.xlu0 %v10970_v48, %s11308_s28 }
0x59ff   :  { %v10972_v2 = vpop.eup %10971 }
0x5a00   :  { %v4736_v53 = vadd.f32 1.0, %v10972_v2 }
0x5a02   :  { %10973 = vrcp.f32 %v4736_v53 }
0x5a0c   :  { %v10974_v61 = vpop.eup %10973 }
0x5a0d   :  { %v4740_v12 = vmul.f32 0.0, %v10974_v61 }
0x5a1d   :  { %4477 = vadd.xlane.f32.xlu0 %v4476_v49 }
0x5a21   :  { %4483 = vadd.xlane.f32.xlu0 %v4482_v51 }
0x5a25   :  { %4486 = vadd.xlane.f32.xlu0 %v4485_v0 }
0x5a29   :  { %4492 = vadd.xlane.f32.xlu0 %v4491_v36 }
0x5a70   :  { %v4743_v31 = vpop.permute.xlu0 %4742 }
0x5a71   :  { %v4745_v54 = vmul.f32 %v10974_v61, %v4743_v31 }
0x5a73   :  { %4747 = vrot.lane.b32.xlu1 %v4745_v54, %s11309_s4 }
0x5aaa   :  { %v4478_v56 = vpop.xlane.xlu0 %4477 }
0x5aab   :  { %v4496_v57 = vmax.f32 %v4478_v56, 1e-30 }
0x5aad   :  { %10975 = vrcp.f32 %v4496_v57 }
0x5aae   :  { %v4484_v17 = vpop.xlane.xlu0 %4483 }
0x5aaf   :  { %v4498_v50 = vmax.f32 %v4484_v17, 1e-30 }
0x5ab2   :  { %v4487_v18 = vpop.xlane.xlu0 %4486 }
0x5ab3   :  { %v4499_v7 = vmax.f32 %v4487_v18, 1e-30 }
0x5ab6   :  { %v4493_v52 = vpop.xlane.xlu0 %4492 }
0x5ab7   :  { %v10976_v5 = vpop.eup %10975  ;;  %v4501_v28 = vmax.f32 %v4493_v52, 1e-30 }
0x5ab8   :  { %v4507_v10 = vmul.f32 %v10976_v5, %v4441_v42  ;;  %v4625_v5 = vadd.f32 %v12319_v24, %v12317_v44 }
0x5aba   :  { %9764 = vmatprep.mubr.msk.f32.mxu0 %vm109_vm0, %v4507_v10 }
0x5ae5   :  { %v4748_v15 = vpop.permute.xlu1 %4747 }
0x5ae6   :  { %v12336_v14 = vadd.f32 %v4748_v15, %v4740_v12 }
0x5ae8   :  { %10977 = vtanh.f32 %v12336_v14  ;;  %v4847_v21 = vrot.slane %v12336_v14, 4 }
0x5ae9   :  { %10979 = vrcp.f32 %v4498_v50 }
0x5af2   :  { %v10978_v59 = vpop.eup %10977 }
0x5af3   :  { %4753 = vrot.lane.b32.xlu1 %v10978_v59, %s11308_s28  ;;  %v10980_v4 = vpop.eup %10979 }
0x5af4   :  { %v4511_v23 = vmul.f32 %v10980_v4, %v12306_v43 }
0x5b17   :  { %4480 = vadd.xlane.f32.xlu1 %v4479_v55 }
0x5b1b   :  { %4489 = vadd.xlane.f32.xlu1 %v4488_v11 }
0x5b65   :  { %v4754_v16 = vpop.permute.xlu1 %4753 }
0x5b66   :  { %v4756_v8 = vmul.f32 %v10974_v61, %v4754_v16 }
0x5b68   :  { %4758 = vrot.lane.b32.xlu1 %v4756_v8, %s11309_s4 }
0x5ba4   :  { %v4481_v30 = vpop.xlane.xlu1 %4480 }
0x5ba5   :  { %v4497_v26 = vmax.f32 %v4481_v30, 1e-30 }
0x5ba7   :  { %10981 = vrcp.f32 %v4497_v26 }
0x5ba8   :  { %v4490_v47 = vpop.xlane.xlu1 %4489  ;;  %10983 = vrcp.f32 %v4499_v7 }
0x5ba9   :  { %v4500_v33 = vmax.f32 %v4490_v47, 1e-30 }
0x5bab   :  { %10985 = vrcp.f32 %v4500_v33 }
0x5bac   :  { %10987 = vrcp.f32 %v4501_v28 }
0x5bb1   :  { %v10982_v35 = vpop.eup %10981 }
0x5bb2   :  { %v4509_v20 = vmul.f32 %v10982_v35, %v12298_v27  ;;  %v10984_v38 = vpop.eup %10983 }
0x5bb3   :  { %v4513_v29 = vmul.f32 %v10984_v38, %v12304_v1 }
0x5bb4   :  { %9765 = vmatmul.mubr.msk.f32.gmra.mrb[58].mxu0 %vm109_vm0, %v4509_v20 }
0x5bb5   :  { %v10986_v22 = vpop.eup %10985  ;;  %9767 = vmatprep.mubr.msk.f32.mxu0 %vm109_vm0, %v4511_v23 }
0x5bb6   :  { %v4515_v6 = vmul.f32 %v10986_v22, %v12312_v40  ;;  %v10988_v32 = vpop.eup %10987 }
0x5bb7   :  { %v4517_v39 = vmul.f32 %v10988_v32, %v12310_v62 }
0x5bb8   :  { %9768 = vmatmul.mubr.msk.f32.gmra.mrb[60].mxu0 %vm109_vm0, %v4513_v29 }
0x5bb9   :  { %9770 = vmatprep.mubr.msk.f32.mxu0 %vm109_vm0, %v4515_v6 }
0x5bbc   :  { %9771 = vmatmul.mubr.msk.f32.gmra.mrb[62].mxu0 %vm109_vm0, %v4517_v39 }
0x5bbd   :  { %9792 = vmatprep.mubr.msk.f32.mxu0 %vm11306_vm1, %v11307_v19 }
0x5bda   :  { %v4759_v41 = vpop.permute.xlu1 %4758 }
0x5bdb   :  { %4762 = vst.msk [vmem:[#allocation4] sm:$0x3] %vm4761_vm7, %v4759_v41  ;;  %9793 = vmatmul.mubr.msk.f32.vlgmr.msra.gmra.mrb[64].mxu0 %vm109_vm0, %v4759_v41 }
0x5bdc   :  { %10434 = vmatpush3.bf16.msra.mxu0 %v12276_v60  ;;  %9814 = vmatprep.mubr.msk.f32.mxu0 %vm11306_vm1, %v11307_v19 }
0x5bdd   :  { %10435 = vmatprep.subr.bf16.mxu0 %v11305_v13 }
0x5be0   :  { %10437 = vmatpush3.bf16.msra.mxu0 %v12287_v9 }
0x5be1   :  { %10444 = vmatprep.subr.bf16.mxu0 %v11305_v13 }
0x5c87   :  { %v12365_v63 = vpop.f32.mrb[58].mxu0 }
0x5c88   :  { %v12367_v34 = vpop.f32.mrb[59].mxu0 }
0x5c8b   :  { %v12369_v27 = vpop.f32.mrb[60].mxu0 }
0x5c8c   :  { %v12371_v42 = vpop.f32.mrb[61].mxu0 }
0x5c8f   :  { %v12373_v1 = vpop.f32.mrb[62].mxu0 }
0x5c90   :  { %v12375_v43 = vpop.f32.mrb[63].mxu0 }
0x5cae   :  { %v4831_v62 = vpop.f32.mrb[64].mxu0 }
0x5caf   :  { %v4836_v40 = vrot.slane %v4831_v62, 4  ;;  %v9794_v58 = vpop.f32.mrb[65].mxu0 }
0x5cb1   :  { %v4838_v3 = vadd.f32 %v4836_v40, %v12322_v45 }
0x5cb3   :  { %10989 = vtanh.f32 %v4838_v3  ;;  %v8771_v46 = vmul.f32 -1.442695, %v4838_v3 }
0x5cb5   :  { %10991 = vpow2.f32 %v8771_v46 }
0x5cbd   :  { %v10990_v25 = vpop.eup %10989 }
0x5cbe   :  { %4851 = vrot.lane.b32.xlu0 %v10990_v25, %s11308_s28 }
0x5cbf   :  { %v10992_v48 = vpop.eup %10991 }
0x5cc0   :  { %v4842_v49 = vadd.f32 1.0, %v10992_v48 }
0x5cc2   :  { %10993 = vrcp.f32 %v4842_v49  ;;  %v4630_v49 = vadd.f32 %v12317_v44, %v12367_v34 }
0x5ccc   :  { %v10994_v51 = vpop.eup %10993 }
0x5ccd   :  { %v4849_v2 = vmul.f32 %v10994_v51, %v4847_v21 }
0x5d30   :  { %v4852_v0 = vpop.permute.xlu0 %4851 }
0x5d31   :  { %v4854_v36 = vmul.f32 %v10994_v51, %v4852_v0 }
0x5d33   :  { %4856 = vrot.lane.b32.xlu1 %v4854_v36, %s11309_s4 }
0x5da5   :  { %v4857_v53 = vpop.permute.xlu1 %4856 }
0x5da6   :  { %v4859_v61 = vadd.f32 %v4857_v53, %v4849_v2 }
0x5da8   :  { %10995 = vtanh.f32 %v4859_v61  ;;  %v4956_v18 = vrot.slane %v4859_v61, 4 }
0x5db2   :  { %v10996_v45 = vpop.eup %10995 }
0x5db3   :  { %4862 = vrot.lane.b32.xlu1 %v10996_v45, %s11308_s28 }
0x5e25   :  { %v4863_v31 = vpop.permute.xlu1 %4862 }
0x5e26   :  { %v12382_v54 = vmul.f32 %v10994_v51, %v4863_v31 }
0x5e28   :  { %v4872_v56 = vrot.slane %v12382_v54, 4 }
0x5e2a   :  { %4873 = vrot.lane.b32.xlu0 %v4872_v56, %s11309_s4 }
0x5e9c   :  { %v4874_v57 = vpop.permute.xlu0 %4873 }
0x5e9d   :  { %9804 = vmatmul.mubr.msk.f32.vlgmr.msra.gmra.mrb[50].mxu1 %vm109_vm0, %v4874_v57 }
0x5e9e   :  { %10440 = vmatpush3.bf16.msra.mxu1 %v12276_v60  ;;  %9825 = vmatprep.mubr.msk.f32.mxu1 %vm11306_vm1, %v11307_v19 }
0x5e9f   :  { %10441 = vmatprep.subr.bf16.mxu1 %v11305_v13 }
0x5ea2   :  { %10443 = vmatpush3.bf16.msra.mxu1 %v12287_v9 }
0x5ea3   :  { %10450 = vmatprep.subr.bf16.mxu1 %v11305_v13 }
0x5f70   :  { %v4943_v10 = vpop.f32.mrb[50].mxu1 }
0x5f71   :  { %v4947_v12 = vadd.f32 %v4943_v10, %v4625_v5  ;;  %v9805_v15 = vpop.f32.mrb[51].mxu1 }
0x5f73   :  { %10997 = vtanh.f32 %v4947_v12  ;;  %v8773_v59 = vmul.f32 -1.442695, %v4947_v12 }
0x5f75   :  { %10999 = vpow2.f32 %v8773_v59 }
0x5f7d   :  { %v10998_v14 = vpop.eup %10997 }
0x5f7e   :  { %4960 = vrot.lane.b32.xlu1 %v10998_v14, %s11308_s28 }
0x5f7f   :  { %v11000_v55 = vpop.eup %10999 }
0x5f80   :  { %v4951_v11 = vadd.f32 1.0, %v11000_v55 }
0x5f82   :  { %11001 = vrcp.f32 %v4951_v11 }
0x5f8c   :  { %v11002_v16 = vpop.eup %11001 }
0x5f8d   :  { %v4958_v50 = vmul.f32 %v11002_v16, %v4956_v18 }
0x5ff0   :  { %v4961_v8 = vpop.permute.xlu1 %4960 }
0x5ff1   :  { %v4963_v17 = vmul.f32 %v11002_v16, %v4961_v8 }
0x5ff3   :  { %4965 = vrot.lane.b32.xlu0 %v4963_v17, %s11309_s4 }
0x6065   :  { %v4966_v24 = vpop.permute.xlu0 %4965 }
0x6066   :  { %v4968_v30 = vadd.f32 %v4966_v24, %v4958_v50 }
0x6068   :  { %11003 = vtanh.f32 %v4968_v30  ;;  %v5064_v39 = vrot.slane %v4968_v30, 4 }
0x6072   :  { %v11004_v7 = vpop.eup %11003 }
0x6073   :  { %4971 = vrot.lane.b32.xlu1 %v11004_v7, %s11308_s28 }
0x60e5   :  { %v4972_v26 = vpop.permute.xlu1 %4971 }
0x60e6   :  { %v4974_v52 = vmul.f32 %v11002_v16, %v4972_v26 }
0x60e8   :  { %4976 = vrot.lane.b32.xlu0 %v4974_v52, %s11309_s4 }
0x615a   :  { %v4977_v47 = vpop.permute.xlu0 %4976 }
0x615b   :  { %4979 = vst.msk [vmem:[#allocation4 + $0x4] sm:$0x3] %vm4761_vm7, %v4977_v47  ;;  %9815 = vmatmul.mubr.msk.f32.vlgmr.msra.gmra.mrb[66].mxu0 %vm109_vm0, %v4977_v47 }
0x615c   :  { %10446 = vmatpush3.bf16.msra.mxu0 %v12276_v60  ;;  %9836 = vmatprep.mubr.msk.f32.mxu0 %vm11306_vm1, %v11307_v19 }
0x615d   :  { %10447 = vmatprep.subr.bf16.mxu0 %v11305_v13 }
0x6160   :  { %10449 = vmatpush3.bf16.msra.mxu0 %v12287_v9 }
0x6161   :  { %10456 = vmatprep.subr.bf16.mxu0 %v11305_v13 }
0x622e   :  { %v5048_v28 = vpop.f32.mrb[66].mxu0 }
0x622f   :  { %v5053_v33 = vrot.slane %v5048_v28, 4  ;;  %v9816_v4 = vpop.f32.mrb[67].mxu0 }
0x6231   :  { %v5055_v35 = vadd.f32 %v5053_v33, %v4625_v5 }
0x6233   :  { %11005 = vtanh.f32 %v5055_v35  ;;  %v8775_v38 = vmul.f32 -1.442695, %v5055_v35 }
0x6235   :  { %11007 = vpow2.f32 %v8775_v38 }
0x623d   :  { %v11006_v20 = vpop.eup %11005 }
0x623e   :  { %5068 = vrot.lane.b32.xlu1 %v11006_v20, %s11308_s28 }
0x623f   :  { %v11008_v23 = vpop.eup %11007 }
0x6240   :  { %v5059_v22 = vadd.f32 1.0, %v11008_v23 }
0x6242   :  { %11009 = vrcp.f32 %v5059_v22  ;;  %v4635_v22 = vadd.f32 %v12365_v63, %v12317_v44 }
0x624c   :  { %v11010_v29 = vpop.eup %11009 }
0x624d   :  { %v5066_v41 = vmul.f32 %v11010_v29, %v5064_v39 }
0x62b0   :  { %v5069_v6 = vpop.permute.xlu1 %5068 }
0x62b1   :  { %v5071_v32 = vmul.f32 %v11010_v29, %v5069_v6 }
0x62b3   :  { %5073 = vrot.lane.b32.xlu0 %v5071_v32, %s11309_s4 }
0x6325   :  { %v5074_v62 = vpop.permute.xlu0 %5073 }
0x6326   :  { %v5076_v40 = vadd.f32 %v5074_v62, %v5066_v41 }
0x6328   :  { %11011 = vtanh.f32 %v5076_v40  ;;  %v5172_v57 = vrot.slane %v5076_v40, 4 }
0x6332   :  { %v11012_v58 = vpop.eup %11011 }
0x6333   :  { %5079 = vrot.lane.b32.xlu1 %v11012_v58, %s11308_s28 }
0x63a5   :  { %v5080_v3 = vpop.permute.xlu1 %5079 }
0x63a6   :  { %v12410_v25 = vmul.f32 %v11010_v29, %v5080_v3 }
0x63a8   :  { %v5088_v46 = vrot.slane %v12410_v25, 4 }
0x63aa   :  { %5089 = vrot.lane.b32.xlu0 %v5088_v46, %s11309_s4 }
0x641c   :  { %v5090_v48 = vpop.permute.xlu0 %5089 }
0x641d   :  { %9826 = vmatmul.mubr.msk.f32.vlgmr.msra.gmra.mrb[52].mxu1 %vm109_vm0, %v5090_v48 }
0x641e   :  { %10452 = vmatpush3.bf16.msra.mxu1 %v12276_v60  ;;  %9847 = vmatprep.mubr.msk.f32.mxu1 %vm11306_vm1, %v11307_v19 }
0x641f   :  { %10453 = vmatprep.subr.bf16.mxu1 %v11305_v13 }
0x6422   :  { %10455 = vmatpush3.bf16.msra.mxu1 %v12287_v9 }
0x6423   :  { %10462 = vmatprep.subr.bf16.mxu1 %v11305_v13 }
0x64f0   :  { %v5159_v51 = vpop.f32.mrb[52].mxu1 }
0x64f1   :  { %v5163_v0 = vadd.f32 %v5159_v51, %v4630_v49  ;;  %v9827_v36 = vpop.f32.mrb[53].mxu1 }
0x64f3   :  { %11013 = vtanh.f32 %v5163_v0  ;;  %v8777_v2 = vmul.f32 -1.442695, %v5163_v0 }
0x64f5   :  { %11015 = vpow2.f32 %v8777_v2 }
0x64fd   :  { %v11014_v21 = vpop.eup %11013 }
0x64fe   :  { %5176 = vrot.lane.b32.xlu1 %v11014_v21, %s11308_s28 }
0x64ff   :  { %v11016_v53 = vpop.eup %11015 }
0x6500   :  { %v5167_v61 = vadd.f32 1.0, %v11016_v53 }
0x6502   :  { %11017 = vrcp.f32 %v5167_v61 }
0x650c   :  { %v11018_v45 = vpop.eup %11017 }
0x650d   :  { %v5174_v5 = vmul.f32 %v11018_v45, %v5172_v57 }
0x6570   :  { %v5177_v31 = vpop.permute.xlu1 %5176 }
0x6571   :  { %v5179_v56 = vmul.f32 %v11018_v45, %v5177_v31 }
0x6573   :  { %5181 = vrot.lane.b32.xlu0 %v5179_v56, %s11309_s4 }
0x65e5   :  { %v5182_v34 = vpop.permute.xlu0 %5181 }
0x65e6   :  { %v5184_v10 = vadd.f32 %v5182_v34, %v5174_v5 }
0x65e8   :  { %11019 = vtanh.f32 %v5184_v10  ;;  %v5280_v52 = vrot.slane %v5184_v10, 4 }
0x65f2   :  { %v11020_v12 = vpop.eup %11019 }
0x65f3   :  { %5187 = vrot.lane.b32.xlu1 %v11020_v12, %s11308_s28 }
0x6665   :  { %v5188_v15 = vpop.permute.xlu1 %5187 }
0x6666   :  { %v5190_v14 = vmul.f32 %v11018_v45, %v5188_v15 }
0x6668   :  { %5192 = vrot.lane.b32.xlu0 %v5190_v14, %s11309_s4 }
0x66da   :  { %v5193_v59 = vpop.permute.xlu0 %5192 }
0x66db   :  { %5195 = vst.msk [vmem:[#allocation4 + $0x8] sm:$0x3] %vm4761_vm7, %v5193_v59  ;;  %9837 = vmatmul.mubr.msk.f32.vlgmr.msra.gmra.mrb[68].mxu0 %vm109_vm0, %v5193_v59 }
0x66dc   :  { %10458 = vmatpush3.bf16.msra.mxu0 %v12276_v60  ;;  %9858 = vmatprep.mubr.msk.f32.mxu0 %vm11306_vm1, %v11307_v19 }
0x66dd   :  { %10459 = vmatprep.subr.bf16.mxu0 %v11305_v13 }
0x66e0   :  { %10461 = vmatpush3.bf16.msra.mxu0 %v12287_v9 }
0x66e1   :  { %10468 = vmatprep.subr.bf16.mxu0 %v11305_v13 }
0x67ae   :  { %v5264_v55 = vpop.f32.mrb[68].mxu0 }
0x67af   :  { %v5269_v11 = vrot.slane %v5264_v55, 4  ;;  %v9838_v16 = vpop.f32.mrb[69].mxu0 }
0x67b1   :  { %v5271_v8 = vadd.f32 %v5269_v11, %v4630_v49 }
0x67b3   :  { %11021 = vtanh.f32 %v5271_v8  ;;  %v8779_v18 = vmul.f32 -1.442695, %v5271_v8 }
0x67b5   :  { %11023 = vpow2.f32 %v8779_v18 }
0x67bd   :  { %v11022_v17 = vpop.eup %11021 }
0x67be   :  { %5284 = vrot.lane.b32.xlu1 %v11022_v17, %s11308_s28 }
0x67bf   :  { %v11024_v50 = vpop.eup %11023 }
0x67c0   :  { %v5275_v24 = vadd.f32 1.0, %v11024_v50 }
0x67c2   :  { %11025 = vrcp.f32 %v5275_v24  ;;  %v4640_v24 = vadd.f32 %v12317_v44, %v12371_v42 }
0x67cc   :  { %v11026_v30 = vpop.eup %11025 }
0x67cd   :  { %v5282_v47 = vmul.f32 %v11026_v30, %v5280_v52 }
0x6830   :  { %v5285_v7 = vpop.permute.xlu1 %5284 }
0x6831   :  { %v5287_v26 = vmul.f32 %v11026_v30, %v5285_v7 }
0x6833   :  { %5289 = vrot.lane.b32.xlu0 %v5287_v26, %s11309_s4 }
0x68a5   :  { %v5290_v28 = vpop.permute.xlu0 %5289 }
0x68a6   :  { %v5292_v33 = vadd.f32 %v5290_v28, %v5282_v47 }
0x68a8   :  { %11027 = vtanh.f32 %v5292_v33  ;;  %v5388_v48 = vrot.slane %v5292_v33, 4 }
0x68b2   :  { %v11028_v4 = vpop.eup %11027 }
0x68b3   :  { %5295 = vrot.lane.b32.xlu1 %v11028_v4, %s11308_s28 }
0x6925   :  { %v5296_v35 = vpop.permute.xlu1 %5295 }
0x6926   :  { %v12438_v20 = vmul.f32 %v11026_v30, %v5296_v35 }
0x6928   :  { %v5304_v38 = vrot.slane %v12438_v20, 4 }
0x692a   :  { %5305 = vrot.lane.b32.xlu0 %v5304_v38, %s11309_s4 }
0x699c   :  { %v5306_v23 = vpop.permute.xlu0 %5305 }
0x699d   :  { %9848 = vmatmul.mubr.msk.f32.vlgmr.msra.gmra.mrb[54].mxu1 %vm109_vm0, %v5306_v23 }
0x699e   :  { %10464 = vmatpush3.bf16.msra.mxu1 %v12276_v60  ;;  %9869 = vmatprep.mubr.msk.f32.mxu1 %vm11306_vm1, %v11307_v19 }
0x699f   :  { %10465 = vmatprep.subr.bf16.mxu1 %v11305_v13 }
0x69a2   :  { %10467 = vmatpush3.bf16.msra.mxu1 %v12287_v9 }
0x69a3   :  { %10474 = vmatprep.subr.bf16.mxu1 %v11305_v13 }
0x6a70   :  { %v5375_v29 = vpop.f32.mrb[54].mxu1 }
0x6a71   :  { %v5379_v6 = vadd.f32 %v5375_v29, %v4635_v22  ;;  %v9849_v32 = vpop.f32.mrb[55].mxu1 }
0x6a73   :  { %11029 = vtanh.f32 %v5379_v6  ;;  %v8781_v41 = vmul.f32 -1.442695, %v5379_v6 }
0x6a75   :  { %11031 = vpow2.f32 %v8781_v41 }
0x6a7d   :  { %v11030_v39 = vpop.eup %11029 }
0x6a7e   :  { %5392 = vrot.lane.b32.xlu1 %v11030_v39, %s11308_s28 }
0x6a7f   :  { %v11032_v62 = vpop.eup %11031 }
0x6a80   :  { %v5383_v40 = vadd.f32 1.0, %v11032_v62 }
0x6a82   :  { %11033 = vrcp.f32 %v5383_v40 }
0x6a8c   :  { %v11034_v58 = vpop.eup %11033 }
0x6a8d   :  { %v5390_v49 = vmul.f32 %v11034_v58, %v5388_v48 }
0x6af0   :  { %v5393_v3 = vpop.permute.xlu1 %5392 }
0x6af1   :  { %v5395_v46 = vmul.f32 %v11034_v58, %v5393_v3 }
0x6af3   :  { %5397 = vrot.lane.b32.xlu0 %v5395_v46, %s11309_s4 }
0x6b65   :  { %v5398_v63 = vpop.permute.xlu0 %5397 }
0x6b66   :  { %v5400_v51 = vadd.f32 %v5398_v63, %v5390_v49 }
0x6b68   :  { %11035 = vtanh.f32 %v5400_v51  ;;  %v5496_v14 = vrot.slane %v5400_v51, 4 }
0x6b72   :  { %v11036_v0 = vpop.eup %11035 }
0x6b73   :  { %5403 = vrot.lane.b32.xlu1 %v11036_v0, %s11308_s28 }
0x6be5   :  { %v5404_v36 = vpop.permute.xlu1 %5403 }
0x6be6   :  { %v5406_v21 = vmul.f32 %v11034_v58, %v5404_v36 }
0x6be8   :  { %5408 = vrot.lane.b32.xlu0 %v5406_v21, %s11309_s4 }
0x6c5a   :  { %v5409_v2 = vpop.permute.xlu0 %5408 }
0x6c5b   :  { %5411 = vst.msk [vmem:[#allocation4 + $0xc] sm:$0x3] %vm4761_vm7, %v5409_v2  ;;  %9859 = vmatmul.mubr.msk.f32.vlgmr.msra.gmra.mrb[70].mxu0 %vm109_vm0, %v5409_v2 }
0x6c5c   :  { %10470 = vmatpush3.bf16.msra.mxu0 %v12276_v60  ;;  %9880 = vmatprep.mubr.msk.f32.mxu0 %vm11306_vm1, %v11307_v19 }
0x6c5d   :  { %10471 = vmatprep.subr.bf16.mxu0 %v11305_v13 }
0x6c60   :  { %10473 = vmatpush3.bf16.msra.mxu0 %v12287_v9 }
0x6c61   :  { %10480 = vmatprep.subr.bf16.mxu0 %v11305_v13 }
0x6d2e   :  { %v5480_v53 = vpop.f32.mrb[70].mxu0 }
0x6d2f   :  { %v5485_v61 = vrot.slane %v5480_v53, 4  ;;  %v9860_v45 = vpop.f32.mrb[71].mxu0 }
0x6d31   :  { %v5487_v31 = vadd.f32 %v5485_v61, %v4635_v22 }
0x6d33   :  { %11037 = vtanh.f32 %v5487_v31  ;;  %v8783_v57 = vmul.f32 -1.442695, %v5487_v31 }
0x6d35   :  { %11039 = vpow2.f32 %v8783_v57 }
0x6d3d   :  { %v11038_v56 = vpop.eup %11037 }
0x6d3e   :  { %5500 = vrot.lane.b32.xlu1 %v11038_v56, %s11308_s28 }
0x6d3f   :  { %v11040_v5 = vpop.eup %11039 }
0x6d40   :  { %v5491_v34 = vadd.f32 1.0, %v11040_v5 }
0x6d42   :  { %11041 = vrcp.f32 %v5491_v34  ;;  %v4645_v34 = vadd.f32 %v12369_v27, %v12317_v44 }
0x6d4c   :  { %v11042_v10 = vpop.eup %11041 }
0x6d4d   :  { %v5498_v59 = vmul.f32 %v11042_v10, %v5496_v14 }
0x6db0   :  { %v5501_v12 = vpop.permute.xlu1 %5500 }
0x6db1   :  { %v5503_v15 = vmul.f32 %v11042_v10, %v5501_v12 }
0x6db3   :  { %5505 = vrot.lane.b32.xlu0 %v5503_v15, %s11309_s4 }
0x6e25   :  { %v5506_v55 = vpop.permute.xlu0 %5505 }
0x6e26   :  { %v5508_v11 = vadd.f32 %v5506_v55, %v5498_v59 }
0x6e28   :  { %11043 = vtanh.f32 %v5508_v11  ;;  %v5604_v23 = vrot.slane %v5508_v11, 4 }
0x6e32   :  { %v11044_v16 = vpop.eup %11043 }
0x6e33   :  { %5511 = vrot.lane.b32.xlu1 %v11044_v16, %s11308_s28 }
0x6ea5   :  { %v5512_v8 = vpop.permute.xlu1 %5511 }
0x6ea6   :  { %v12466_v17 = vmul.f32 %v11042_v10, %v5512_v8 }
0x6ea8   :  { %v5520_v18 = vrot.slane %v12466_v17, 4 }
0x6eaa   :  { %5521 = vrot.lane.b32.xlu0 %v5520_v18, %s11309_s4 }
0x6f1c   :  { %v5522_v50 = vpop.permute.xlu0 %5521 }
0x6f1d   :  { %9870 = vmatmul.mubr.msk.f32.vlgmr.msra.gmra.mrb[56].mxu1 %vm109_vm0, %v5522_v50 }
0x6f1e   :  { %10476 = vmatpush3.bf16.msra.mxu1 %v12276_v60  ;;  %9891 = vmatprep.mubr.msk.f32.mxu1 %vm11306_vm1, %v11307_v19 }
0x6f1f   :  { %10477 = vmatprep.subr.bf16.mxu1 %v11305_v13 }
0x6f22   :  { %10479 = vmatpush3.bf16.msra.mxu1 %v12287_v9 }
0x6f23   :  { %10486 = vmatprep.subr.bf16.mxu1 %v11305_v13 }
0x6ff0   :  { %v5591_v30 = vpop.f32.mrb[56].mxu1 }
0x6ff1   :  { %v5595_v7 = vadd.f32 %v5591_v30, %v4640_v24  ;;  %v9871_v26 = vpop.f32.mrb[57].mxu1 }
0x6ff3   :  { %11045 = vtanh.f32 %v5595_v7  ;;  %v8785_v47 = vmul.f32 -1.442695, %v5595_v7 }
0x6ff5   :  { %11047 = vpow2.f32 %v8785_v47 }
0x6ffd   :  { %v11046_v52 = vpop.eup %11045 }
0x6ffe   :  { %5608 = vrot.lane.b32.xlu1 %v11046_v52, %s11308_s28 }
0x6fff   :  { %v11048_v28 = vpop.eup %11047 }
0x7000   :  { %v5599_v33 = vadd.f32 1.0, %v11048_v28 }
0x7002   :  { %11049 = vrcp.f32 %v5599_v33 }
0x700c   :  { %v11050_v4 = vpop.eup %11049 }
0x700d   :  { %v5606_v22 = vmul.f32 %v11050_v4, %v5604_v23 }
0x7070   :  { %v5609_v35 = vpop.permute.xlu1 %5608 }
0x7071   :  { %v5611_v38 = vmul.f32 %v11050_v4, %v5609_v35 }
0x7073   :  { %5613 = vrot.lane.b32.xlu0 %v5611_v38, %s11309_s4 }
0x70e5   :  { %v5614_v42 = vpop.permute.xlu0 %5613 }
0x70e6   :  { %v5616_v29 = vadd.f32 %v5614_v42, %v5606_v22 }
0x70e8   :  { %11051 = vtanh.f32 %v5616_v29  ;;  %v5712_v21 = vrot.slane %v5616_v29, 4 }
0x70f2   :  { %v11052_v6 = vpop.eup %11051 }
0x70f3   :  { %5619 = vrot.lane.b32.xlu1 %v11052_v6, %s11308_s28 }
0x7165   :  { %v5620_v32 = vpop.permute.xlu1 %5619 }
0x7166   :  { %v5622_v39 = vmul.f32 %v11050_v4, %v5620_v32 }
0x7168   :  { %5624 = vrot.lane.b32.xlu0 %v5622_v39, %s11309_s4 }
0x71da   :  { %v5625_v41 = vpop.permute.xlu0 %5624 }
0x71db   :  { %5627 = vst.msk [vmem:[#allocation4 + $0x10] sm:$0x3] %vm4761_vm7, %v5625_v41  ;;  %9881 = vmatmul.mubr.msk.f32.vlgmr.msra.gmra.mrb[72].mxu0 %vm109_vm0, %v5625_v41 }
0x71dc   :  { %10482 = vmatpush3.bf16.msra.mxu0 %v12276_v60  ;;  %9902 = vmatprep.mubr.msk.f32.mxu0 %vm11306_vm1, %v11307_v19 }
0x71dd   :  { %10483 = vmatprep.subr.bf16.mxu0 %v11305_v13 }
0x71e0   :  { %10485 = vmatpush3.bf16.msra.mxu0 %v12287_v9 }
0x71e1   :  { %10492 = vmatprep.subr.bf16.mxu0 %v11305_v13 }
0x72ae   :  { %v5696_v62 = vpop.f32.mrb[72].mxu0 }
0x72af   :  { %v5701_v40 = vrot.slane %v5696_v62, 4  ;;  %v9882_v58 = vpop.f32.mrb[73].mxu0 }
0x72b1   :  { %v5703_v3 = vadd.f32 %v5701_v40, %v4640_v24 }
0x72b3   :  { %11053 = vtanh.f32 %v5703_v3  ;;  %v8787_v48 = vmul.f32 -1.442695, %v5703_v3 }
0x72b5   :  { %11055 = vpow2.f32 %v8787_v48 }
0x72bd   :  { %v11054_v46 = vpop.eup %11053 }
0x72be   :  { %5716 = vrot.lane.b32.xlu1 %v11054_v46, %s11308_s28 }
0x72bf   :  { %v11056_v49 = vpop.eup %11055 }
0x72c0   :  { %v5707_v63 = vadd.f32 1.0, %v11056_v49 }
0x72c2   :  { %11057 = vrcp.f32 %v5707_v63  ;;  %v4650_v63 = vadd.f32 %v12317_v44, %v12375_v43 }
0x72cc   :  { %v11058_v51 = vpop.eup %11057 }
0x72cd   :  { %v5714_v2 = vmul.f32 %v11058_v51, %v5712_v21 }
0x7330   :  { %v5717_v0 = vpop.permute.xlu1 %5716 }
0x7331   :  { %v5719_v36 = vmul.f32 %v11058_v51, %v5717_v0 }
0x7333   :  { %5721 = vrot.lane.b32.xlu0 %v5719_v36, %s11309_s4 }
0x73a5   :  { %v5722_v53 = vpop.permute.xlu0 %5721 }
0x73a6   :  { %v5724_v61 = vadd.f32 %v5722_v53, %v5714_v2 }
0x73a8   :  { %11059 = vtanh.f32 %v5724_v61  ;;  %v5820_v50 = vrot.slane %v5724_v61, 4 }
0x73b2   :  { %v11060_v45 = vpop.eup %11059 }
0x73b3   :  { %5727 = vrot.lane.b32.xlu1 %v11060_v45, %s11308_s28 }
0x7425   :  { %v5728_v31 = vpop.permute.xlu1 %5727 }
0x7426   :  { %v12494_v56 = vmul.f32 %v11058_v51, %v5728_v31 }
0x7428   :  { %v5736_v57 = vrot.slane %v12494_v56, 4 }
0x742a   :  { %5737 = vrot.lane.b32.xlu0 %v5736_v57, %s11309_s4 }
0x749c   :  { %v5738_v5 = vpop.permute.xlu0 %5737 }
0x749d   :  { %9892 = vmatmul.mubr.msk.f32.vlgmr.msra.gmra.mrb[58].mxu1 %vm109_vm0, %v5738_v5 }
0x749e   :  { %10488 = vmatpush3.bf16.msra.mxu1 %v12276_v60  ;;  %9913 = vmatprep.mubr.msk.f32.mxu1 %vm11306_vm1, %v11307_v19 }
0x749f   :  { %10489 = vmatprep.subr.bf16.mxu1 %v11305_v13 }
0x74a2   :  { %10491 = vmatpush3.bf16.msra.mxu1 %v12287_v9 }
0x74a3   :  { %10498 = vmatprep.subr.bf16.mxu1 %v11305_v13 }
0x7570   :  { %v5807_v10 = vpop.f32.mrb[58].mxu1 }
0x7571   :  { %v5811_v12 = vadd.f32 %v5807_v10, %v4645_v34  ;;  %v9893_v15 = vpop.f32.mrb[59].mxu1 }
0x7573   :  { %11061 = vtanh.f32 %v5811_v12  ;;  %v8789_v59 = vmul.f32 -1.442695, %v5811_v12 }
0x7575   :  { %11063 = vpow2.f32 %v8789_v59 }
0x757d   :  { %v11062_v14 = vpop.eup %11061 }
0x757e   :  { %5824 = vrot.lane.b32.xlu1 %v11062_v14, %s11308_s28 }
0x757f   :  { %v11064_v55 = vpop.eup %11063 }
0x7580   :  { %v5815_v11 = vadd.f32 1.0, %v11064_v55 }
0x7582   :  { %11065 = vrcp.f32 %v5815_v11 }
0x758c   :  { %v11066_v16 = vpop.eup %11065 }
0x758d   :  { %v5822_v24 = vmul.f32 %v11066_v16, %v5820_v50 }
0x75f0   :  { %v5825_v8 = vpop.permute.xlu1 %5824 }
0x75f1   :  { %v5827_v18 = vmul.f32 %v11066_v16, %v5825_v8 }
0x75f3   :  { %5829 = vrot.lane.b32.xlu0 %v5827_v18, %s11309_s4 }
0x7665   :  { %v5830_v27 = vpop.permute.xlu0 %5829 }
0x7666   :  { %v5832_v30 = vadd.f32 %v5830_v27, %v5822_v24 }
0x7668   :  { %11067 = vtanh.f32 %v5832_v30  ;;  %v5928_v39 = vrot.slane %v5832_v30, 4 }
0x7672   :  { %v11068_v7 = vpop.eup %11067 }
0x7673   :  { %5835 = vrot.lane.b32.xlu1 %v11068_v7, %s11308_s28 }
0x76e5   :  { %v5836_v26 = vpop.permute.xlu1 %5835 }
0x76e6   :  { %v5838_v52 = vmul.f32 %v11066_v16, %v5836_v26 }
0x76e8   :  { %5840 = vrot.lane.b32.xlu0 %v5838_v52, %s11309_s4 }
0x775a   :  { %v5841_v47 = vpop.permute.xlu0 %5840 }
0x775b   :  { %5843 = vst.msk [vmem:[#allocation4 + $0x14] sm:$0x3] %vm4761_vm7, %v5841_v47  ;;  %9903 = vmatmul.mubr.msk.f32.vlgmr.msra.gmra.mrb[74].mxu0 %vm109_vm0, %v5841_v47 }
0x775c   :  { %10494 = vmatpush3.bf16.msra.mxu0 %v12276_v60  ;;  %9924 = vmatprep.mubr.msk.f32.mxu0 %vm11306_vm1, %v11307_v19 }
0x775d   :  { %10495 = vmatprep.subr.bf16.mxu0 %v11305_v13 }
0x7760   :  { %10497 = vmatpush3.bf16.msra.mxu0 %v12287_v9 }
0x7761   :  { %10504 = vmatprep.subr.bf16.mxu0 %v11305_v13 }
0x782e   :  { %v5912_v28 = vpop.f32.mrb[74].mxu0 }
0x782f   :  { %v5917_v33 = vrot.slane %v5912_v28, 4  ;;  %v9904_v4 = vpop.f32.mrb[75].mxu0 }
0x7831   :  { %v5919_v35 = vadd.f32 %v5917_v33, %v4645_v34 }
0x7833   :  { %11069 = vtanh.f32 %v5919_v35  ;;  %v8791_v23 = vmul.f32 -1.442695, %v5919_v35 }
0x7835   :  { %11071 = vpow2.f32 %v8791_v23 }
0x783d   :  { %v11070_v38 = vpop.eup %11069 }
0x783e   :  { %5932 = vrot.lane.b32.xlu1 %v11070_v38, %s11308_s28  ;;  %v11262_v38 = vld [vmem:[%s13063_s9] ss:$0 sm:$0xff] }
0x783f   :  { %v11072_v22 = vpop.eup %11071  ;;  %v12558_v23 = vadd.f32 %v11262_v38, %v12373_v1 }
0x7840   :  { %v5923_v42 = vadd.f32 1.0, %v11072_v22 }
0x7842   :  { %11073 = vrcp.f32 %v5923_v42 }
0x784c   :  { %v11074_v29 = vpop.eup %11073 }
0x784d   :  { %v5930_v41 = vmul.f32 %v11074_v29, %v5928_v39 }
0x78b0   :  { %v5933_v6 = vpop.permute.xlu1 %5932 }
0x78b1   :  { %v5935_v32 = vmul.f32 %v11074_v29, %v5933_v6 }
0x78b3   :  { %5937 = vrot.lane.b32.xlu0 %v5935_v32, %s11309_s4 }
0x7925   :  { %v5938_v62 = vpop.permute.xlu0 %5937 }
0x7926   :  { %v5940_v40 = vadd.f32 %v5938_v62, %v5930_v41 }
0x7928   :  { %11075 = vtanh.f32 %v5940_v40  ;;  %v6036_v5 = vrot.slane %v5940_v40, 4 }
0x7932   :  { %v11076_v58 = vpop.eup %11075 }
0x7933   :  { %5943 = vrot.lane.b32.xlu1 %v11076_v58, %s11308_s28 }
0x79a5   :  { %v5944_v3 = vpop.permute.xlu1 %5943 }
0x79a6   :  { %v12522_v46 = vmul.f32 %v11074_v29, %v5944_v3 }
0x79a8   :  { %v5952_v48 = vrot.slane %v12522_v46, 4 }
0x79aa   :  { %5953 = vrot.lane.b32.xlu0 %v5952_v48, %s11309_s4 }
0x7a1c   :  { %v5954_v49 = vpop.permute.xlu0 %5953 }
0x7a1d   :  { %9914 = vmatmul.mubr.msk.f32.vlgmr.msra.gmra.mrb[60].mxu1 %vm109_vm0, %v5954_v49 }
0x7a1e   :  { %10500 = vmatpush3.bf16.msra.mxu1 %v12276_v60  ;;  %9935 = vmatprep.mubr.msk.f32.mxu1 %vm11306_vm1, %v11307_v19 }
0x7a1f   :  { %10501 = vmatprep.subr.bf16.mxu1 %v11305_v13 }
0x7a22   :  { %10503 = vmatpush3.bf16.msra.mxu1 %v12287_v9 }
0x7af0   :  { %v6023_v51 = vpop.f32.mrb[60].mxu1 }
0x7af1   :  { %v6027_v0 = vadd.f32 %v6023_v51, %v4650_v63  ;;  %v9915_v36 = vpop.f32.mrb[61].mxu1 }
0x7af2   :  { %v6390_v36 = vld [vmem:[%s13064_s10 + $0x10] sm:$0xff] }
0x7af3   :  { %11077 = vtanh.f32 %v6027_v0  ;;  %v8793_v2 = vmul.f32 -1.442695, %v6027_v0  ;;  %v6389_v0 = vld [vmem:[%s13064_s10 + $0x8] sm:$0xff] }
0x7af5   :  { %11079 = vpow2.f32 %v8793_v2 }
0x7afd   :  { %v11078_v21 = vpop.eup %11077 }
0x7afe   :  { %6040 = vrot.lane.b32.xlu1 %v11078_v21, %s11308_s28 }
0x7aff   :  { %v11080_v53 = vpop.eup %11079 }
0x7b00   :  { %v6031_v61 = vadd.f32 1.0, %v11080_v53 }
0x7b02   :  { %11081 = vrcp.f32 %v6031_v61 }
0x7b0c   :  { %v11082_v45 = vpop.eup %11081 }
0x7b0d   :  { %v6038_v34 = vmul.f32 %v11082_v45, %v6036_v5  ;;  %v6497_v5 = vld [vmem:[%s13065_s11 + $0x8] sm:$0xff] }
0x7b70   :  { %v6041_v31 = vpop.permute.xlu1 %6040 }
0x7b71   :  { %v6043_v57 = vmul.f32 %v11082_v45, %v6041_v31 }
0x7b73   :  { %6045 = vrot.lane.b32.xlu0 %v6043_v57, %s11309_s4  ;;  %v6496_v57 = vld [vmem:[%s13065_s11] sm:$0xff] }
0x7be5   :  { %v6046_v44 = vpop.permute.xlu0 %6045 }
0x7be6   :  { %v6048_v43 = vadd.f32 %v6046_v44, %v6038_v34  ;;  %v12599_v34 = vpack.c.bf16 %v6497_v5, %v6496_v57  ;;  %v6499_v44 = vld [vmem:[%s13065_s11 + $0x18] sm:$0xff] }
0x7be8   :  { %11083 = vtanh.f32 %v6048_v43 }
0x7bf2   :  { %v11084_v10 = vpop.eup %11083 }
0x7bf3   :  { %6051 = vrot.lane.b32.xlu1 %v11084_v10, %s11308_s28 }
0x7c65   :  { %v6052_v12 = vpop.permute.xlu1 %6051 }
0x7c66   :  { %v6054_v15 = vmul.f32 %v11082_v45, %v6052_v12 }
0x7c68   :  { %6056 = vrot.lane.b32.xlu0 %v6054_v15, %s11309_s4 }
0x7cda   :  { %v6057_v14 = vpop.permute.xlu0 %6056 }
0x7cdb   :  { %6059 = vst.msk [vmem:[#allocation4 + $0x18] sm:$0x3] %vm4761_vm7, %v6057_v14  ;;  %9925 = vmatmul.mubr.msk.f32.vlgmr.msra.gmra.mrb[76].mxu0 %vm109_vm0, %v6057_v14 }
0x7cdc   :  { %10506 = vmatpush3.bf16.msra.mxu0 %v12276_v60  ;;  %9946 = vmatprep.mubr.msk.f32.mxu0 %vm11306_vm1, %v11307_v19 }
0x7cdd   :  { %10507 = vmatprep.subr.bf16.mxu0 %v11305_v13 }
0x7ce0   :  { %10509 = vmatpush3.bf16.msra.mxu0 %v12287_v9  ;;  %v6144_v9 = vrot.slane %v6048_v43, 4 }
0x7ce1   :  { %10518 = vmatprep.subr.bf16.mxu0 %v11305_v13 }
0x7dae   :  { %v6128_v59 = vpop.f32.mrb[76].mxu0 }
0x7daf   :  { %v6133_v55 = vrot.slane %v6128_v59, 4  ;;  %v9926_v11 = vpop.f32.mrb[77].mxu0 }
0x7db1   :  { %v6135_v16 = vadd.f32 %v6133_v55, %v4650_v63 }
0x7db3   :  { %11085 = vtanh.f32 %v6135_v16  ;;  %v8795_v18 = vmul.f32 -1.442695, %v6135_v16 }
0x7db5   :  { %11087 = vpow2.f32 %v8795_v18  ;;  %v12634_v18 = vld [vmem:[%s13066_s12] ss:$0 sm:$0xff] }
0x7dbd   :  { %v11086_v8 = vpop.eup %11085 }
0x7dbe   :  { %6148 = vrot.lane.b32.xlu1 %v11086_v8, %s11308_s28 }
0x7dbf   :  { %v11088_v60 = vpop.eup %11087 }
0x7dc0   :  { %v6139_v50 = vadd.f32 1.0, %v11088_v60 }
0x7dc2   :  { %11089 = vrcp.f32 %v6139_v50 }
0x7dcc   :  { %v11090_v24 = vpop.eup %11089 }
0x7dcd   :  { %v6146_v7 = vmul.f32 %v11090_v24, %v6144_v9 }
0x7e30   :  { %v6149_v27 = vpop.permute.xlu1 %6148 }
0x7e31   :  { %v6151_v30 = vmul.f32 %v11090_v24, %v6149_v27 }
0x7e33   :  { %6153 = vrot.lane.b32.xlu0 %v6151_v30, %s11309_s4 }
0x7ea5   :  { %v6154_v26 = vpop.permute.xlu0 %6153 }
0x7ea6   :  { %v6156_v52 = vadd.f32 %v6154_v26, %v6146_v7 }
0x7ea8   :  { %11091 = vtanh.f32 %v6156_v52  ;;  %v6252_v1 = vrot.slane %v6156_v52, 4 }
0x7eb2   :  { %v11092_v47 = vpop.eup %11091 }
0x7eb3   :  { %6159 = vrot.lane.b32.xlu1 %v11092_v47, %s11308_s28 }
0x7f25   :  { %v6160_v28 = vpop.permute.xlu1 %6159 }
0x7f26   :  { %v12549_v33 = vmul.f32 %v11090_v24, %v6160_v28 }
0x7f28   :  { %v6168_v4 = vrot.slane %v12549_v33, 4 }
0x7f2a   :  { %6169 = vrot.lane.b32.xlu0 %v6168_v4, %s11309_s4 }
0x7f9c   :  { %v6170_v35 = vpop.permute.xlu0 %6169 }
0x7f9d   :  { %9936 = vmatmul.mubr.msk.f32.vlgmr.msra.gmra.mrb[62].mxu1 %vm109_vm0, %v6170_v35 }
0x8070   :  { %v6239_v22 = vpop.f32.mrb[62].mxu1 }
0x8071   :  { %v6243_v42 = vadd.f32 %v6239_v22, %v12558_v23  ;;  %v9937_v29 = vpop.f32.mrb[63].mxu1 }
0x8073   :  { %11093 = vtanh.f32 %v6243_v42  ;;  %v8797_v32 = vmul.f32 -1.442695, %v6243_v42 }
0x8075   :  { %11095 = vpow2.f32 %v8797_v32 }
0x807d   :  { %v11094_v6 = vpop.eup %11093 }
0x807e   :  { %6256 = vrot.lane.b32.xlu1 %v11094_v6, %s11308_s28 }
0x807f   :  { %v11096_v39 = vpop.eup %11095 }
0x8080   :  { %v6247_v41 = vadd.f32 1.0, %v11096_v39 }
0x8082   :  { %11097 = vrcp.f32 %v6247_v41 }
0x808c   :  { %v11098_v62 = vpop.eup %11097 }
0x808d   :  { %v6254_v3 = vmul.f32 %v11098_v62, %v6252_v1 }
0x80f0   :  { %v6257_v40 = vpop.permute.xlu1 %6256 }
0x80f1   :  { %v6259_v58 = vmul.f32 %v11098_v62, %v6257_v40 }
0x80f3   :  { %6261 = vrot.lane.b32.xlu0 %v6259_v58, %s11309_s4 }
0x80f7   :  { %5084 = vrot.lane.b32.xlu0 %v12410_v25, %s11309_s4  ;;  %v6388_v25 = vld [vmem:[%s13064_s10] sm:$0xff] }
0x80f8   :  { %v10510_v21 = vpack.c.bf16 %v6389_v0, %v6388_v25 }
0x80fa   :  { %10511 = vmatprep.subr.bf16.mxu1 %v10510_v21 }
0x80fb   :  { %10513 = vmatpush3.bf16.msra.mxu1 %v10510_v21 }
0x8165   :  { %v6262_v48 = vpop.permute.xlu0 %6261 }
0x8166   :  { %v12565_v49 = vadd.f32 %v6262_v48, %v6254_v3 }
0x8168   :  { %11099 = vtanh.f32 %v12565_v49  ;;  %v6360_v6 = vrot.slane %v12565_v49, 4 }
0x8169   :  { %v5085_v63 = vpop.permute.xlu0 %5084 }
0x816a   :  { %5087 = vst.msk [vmem:[#allocation4 + $0x2] sm:$0x30] %vm4870_vm8, %v5085_v63 }
0x8172   :  { %v11100_v51 = vpop.eup %11099 }
0x8173   :  { %6267 = vrot.lane.b32.xlu1 %v11100_v51, %s11308_s28 }
0x8177   :  { %4867 = vrot.lane.b32.xlu1 %v12382_v54, %s11309_s4  ;;  %v6391_v54 = vld [vmem:[%s13064_s10 + $0x18] sm:$0xff] }
0x8178   :  { %v10514_v2 = vpack.c.bf16 %v6391_v54, %v6390_v36 }
0x817a   :  { %10515 = vmatprep.subr.bf16.mxu1 %v10514_v2 }
0x817b   :  { %5300 = vrot.lane.b32.xlu1 %v12438_v20, %s11309_s4  ;;  %10517 = vmatpush3.bf16.msra.mxu1 %v10514_v2 }
0x817c   :  { %10524 = vmatprep.subr.bf16.mxu1 %v11305_v13 }
0x81e5   :  { %v6268_v20 = vpop.permute.xlu1 %6267 }
0x81e6   :  { %v6270_v53 = vmul.f32 %v11098_v62, %v6268_v20 }
0x81e8   :  { %6272 = vrot.lane.b32.xlu0 %v6270_v53, %s11309_s4 }
0x81e9   :  { %v4868_v61 = vpop.permute.xlu1 %4867 }
0x81ea   :  { %4871 = vst.msk [vmem:[#allocation4 - $0x2] sm:$0x30] %vm4870_vm8, %v4868_v61 }
0x81ec   :  { %5516 = vrot.lane.b32.xlu0 %v12466_v17, %s11309_s4  ;;  %v6498_v17 = vld [vmem:[%s13065_s11 + $0x10] sm:$0xff] }
0x81ed   :  { %v5301_v45 = vpop.permute.xlu1 %5300  ;;  %v12610_v10 = vpack.c.bf16 %v6499_v44, %v6498_v17 }
0x81ee   :  { %5303 = vst.msk [vmem:[#allocation4 + $0x6] sm:$0x30] %vm4870_vm8, %v5301_v45 }
0x81f1   :  { %v6384_v31 = vld [vmem:[#allocation4] sm:$0xff] }
0x81f2   :  { %9957 = vmatprep.mubr.msk.f32.mxu1 %vm109_vm0, %v6384_v31 }
0x825a   :  { %v6273_v43 = vpop.permute.xlu0 %6272 }
0x825b   :  { %6275 = vst.msk [vmem:[#allocation4 + $0x1c] sm:$0x3] %vm4761_vm7, %v6273_v43  ;;  %9947 = vmatmul.mubr.msk.f32.vlgmr.msra.gmra.mrb[78].mxu0 %vm109_vm0, %v6273_v43 }
0x825c   :  { %10520 = vmatpush3.bf16.msra.mxu0 %v12599_v34  ;;  %9971 = vmatprep.mubr.msk.f32.mxu0 %vm11306_vm1, %v11307_v19 }
0x825d   :  { %10521 = vmatprep.subr.bf16.mxu0 %v11305_v13 }
0x825e   :  { %v5517_v12 = vpop.permute.xlu0 %5516 }
0x825f   :  { %5519 = vst.msk [vmem:[#allocation4 + $0xa] sm:$0x30] %vm4870_vm8, %v5517_v12 }
0x8260   :  { %10523 = vmatpush3.bf16.msra.mxu0 %v12610_v10 }
0x8261   :  { %10530 = vmatprep.subr.bf16.mxu0 %v11305_v13 }
0x8263   :  { %9972 = vmatmul.mubr.f32.vlgmr.msra.gmra.mrb[80].mxu0 %v11307_v19 }
0x8264   :  { %10532 = vmatpush3.bf16.msra.mxu0 %v12599_v34  ;;  %9993 = vmatprep.mubr.msk.f32.mxu0 %vm11306_vm1, %v11307_v19 }
0x8265   :  { %10533 = vmatprep.subr.bf16.mxu0 %v11305_v13 }
0x8266   :  { %v6385_v15 = vld [vmem:[#allocation4 + $0x8] sm:$0xff] }
0x8267   :  { %9958 = vmatmul.mubr.msk.f32.vlgmr.msra.gmra.mrb[64].mxu1 %vm109_vm0, %v6385_v15 }
0x8268   :  { %10526 = vmatpush3.bf16.msra.mxu1 %v12599_v34  ;;  %10535 = vmatpush3.bf16.msra.mxu0 %v12610_v10 }
0x8269   :  { %10527 = vmatprep.subr.bf16.mxu1 %v11305_v13  ;;  %10542 = vmatprep.subr.bf16.mxu0 %v11305_v13 }
0x826c   :  { %10529 = vmatpush3.bf16.msra.mxu1 %v12610_v10 }
0x826d   :  { %10536 = vmatprep.subr.bf16.mxu1 %v11305_v13 }
0x832e   :  { %v6344_v14 = vpop.f32.mrb[78].mxu0 }
0x832f   :  { %v6349_v59 = vrot.slane %v6344_v14, 4  ;;  %v9948_v55 = vpop.f32.mrb[79].mxu0 }
0x8331   :  { %v6351_v11 = vadd.f32 %v6349_v59, %v12558_v23 }
0x8333   :  { %11101 = vtanh.f32 %v6351_v11  ;;  %v8799_v7 = vmul.f32 -1.442695, %v6351_v11 }
0x8336   :  { %v6566_v16 = vpop.f32.mrb[80].mxu0 }
0x8337   :  { %v9973_v8 = vpop.f32.mrb[81].mxu0 }
0x833a   :  { %v12636_v60 = vpop.f32.mrb[64].mxu1 }
0x833b   :  { %v6477_v50 = vpop.f32.mrb[65].mxu1 }
0x833c   :  { %v12639_v24 = vadd.f32 %v12634_v18, %v6477_v50 }
0x833d   :  { %v11102_v27 = vpop.eup %11101 }
0x833e   :  { %v6570_v30 = vadd.f32 %v6566_v16, %v12639_v24  ;;  %6364 = vrot.lane.b32.xlu1 %v11102_v27, %s11308_s28 }
0x8340   :  { %11103 = vtanh.f32 %v6570_v30  ;;  %v8805_v26 = vmul.f32 -1.442695, %v6570_v30 }
0x8341   :  { %11105 = vpow2.f32 %v8799_v7 }
0x8342   :  { %11107 = vpow2.f32 %v8805_v26 }
0x834a   :  { %v11104_v9 = vpop.eup %11103 }
0x834b   :  { %6580 = vrot.lane.b32.xlu0 %v11104_v9, %s11308_s28  ;;  %v11106_v52 = vpop.eup %11105 }
0x834c   :  { %v6355_v47 = vadd.f32 1.0, %v11106_v52  ;;  %v11108_v28 = vpop.eup %11107 }
0x834d   :  { %v6574_v4 = vadd.f32 1.0, %v11108_v28 }
0x834e   :  { %11109 = vrcp.f32 %v6355_v47 }
0x834f   :  { %11111 = vrcp.f32 %v6574_v4 }
0x8358   :  { %v11110_v35 = vpop.eup %11109 }
0x8359   :  { %v11112_v22 = vpop.eup %11111  ;;  %v6362_v32 = vmul.f32 %v11110_v35, %v6360_v6 }
0x835a   :  { %v6578_v62 = vmul.f32 0.0, %v11112_v22 }
0x83b0   :  { %v6365_v38 = vpop.permute.xlu1 %6364 }
0x83b1   :  { %v6367_v23 = vmul.f32 %v11110_v35, %v6365_v38 }
0x83b3   :  { %6369 = vrot.lane.b32.xlu1 %v6367_v23, %s11309_s4 }
0x83bd   :  { %v6581_v42 = vpop.permute.xlu0 %6580 }
0x83be   :  { %v6583_v29 = vmul.f32 %v11112_v22, %v6581_v42 }
0x83c0   :  { %6585 = vrot.lane.b32.xlu0 %v6583_v29, %s11309_s4 }
0x8425   :  { %v6370_v39 = vpop.permute.xlu1 %6369 }
0x8426   :  { %v6372_v41 = vadd.f32 %v6370_v39, %v6362_v32 }
0x8428   :  { %11113 = vtanh.f32 %v6372_v41 }
0x8432   :  { %v11114_v40 = vpop.eup %11113  ;;  %v6586_v58 = vpop.permute.xlu0 %6585 }
0x8433   :  { %v6588_v1 = vadd.f32 %v6586_v58, %v6578_v62  ;;  %6375 = vrot.lane.b32.xlu1 %v11114_v40, %s11308_s28 }
0x8435   :  { %11115 = vtanh.f32 %v6588_v1  ;;  %v6687_v15 = vrot.slane %v6588_v1, 6 }
0x8437   :  { %5732 = vrot.lane.b32.xlu1 %v12494_v56, %s11309_s4 }
0x843b   :  { %6164 = vrot.lane.b32.xlu1 %v12549_v33, %s11309_s4 }
0x843f   :  { %v11116_v3 = vpop.eup %11115 }
0x8440   :  { %6591 = vrot.lane.b32.xlu0 %v11116_v3, %s11308_s28 }
0x8444   :  { %5948 = vrot.lane.b32.xlu0 %v12522_v46, %s11309_s4 }
0x84a5   :  { %v6376_v48 = vpop.permute.xlu1 %6375 }
0x84a6   :  { %v6378_v49 = vmul.f32 %v11110_v35, %v6376_v48 }
0x84a8   :  { %6380 = vrot.lane.b32.xlu0 %v6378_v49, %s11309_s4 }
0x84a9   :  { %v5733_v63 = vpop.permute.xlu1 %5732 }
0x84aa   :  { %5735 = vst.msk [vmem:[#allocation4 + $0xe] sm:$0x30] %vm4870_vm8, %v5733_v63 }
0x84ad   :  { %v6165_v51 = vpop.permute.xlu1 %6164 }
0x84ae   :  { %6167 = vst.msk [vmem:[#allocation4 + $0x16] sm:$0x30] %vm4870_vm8, %v6165_v51 }
0x84b2   :  { %v6592_v56 = vpop.permute.xlu0 %6591 }
0x84b3   :  { %v6594_v25 = vmul.f32 %v11112_v22, %v6592_v56 }
0x84b5   :  { %6596 = vrot.lane.b32.xlu1 %v6594_v25, %s11309_s4 }
0x84b6   :  { %v5949_v33 = vpop.permute.xlu0 %5948 }
0x84b7   :  { %5951 = vst.msk [vmem:[#allocation4 + $0x12] sm:$0x30] %vm4870_vm8, %v5949_v33 }
0x84be   :  { %v6386_v0 = vld [vmem:[#allocation4 + $0x10] sm:$0xff] }
0x84bf   :  { %9960 = vmatprep.mubr.msk.f32.mxu1 %vm109_vm0, %v6386_v0 }
0x851a   :  { %v6381_v46 = vpop.permute.xlu0 %6380 }
0x851b   :  { %6383 = vst.msk [vmem:[#allocation4 + $0x1a] sm:$0x30] %vm4870_vm8, %v6381_v46 }
0x8522   :  { %v6387_v36 = vld [vmem:[#allocation4 + $0x18] sm:$0xff] }
0x8523   :  { %9961 = vmatmul.mubr.msk.f32.gmra.mrb[66].mxu1 %vm109_vm0, %v6387_v36 }
0x8524   :  { %9982 = vmatprep.mubr.msk.f32.mxu1 %vm11306_vm1, %v11307_v19 }
0x8527   :  { %v6597_v21 = vpop.permute.xlu1 %6596 }
0x8528   :  { %6600 = vst.msk [vmem:[#allocation5] sm:$0x1] %vm6599_vm9, %v6597_v21  ;;  %9983 = vmatmul.mubr.msk.f32.vlgmr.msra.gmra.mrb[68].mxu1 %vm109_vm0, %v6597_v21 }
0x8529   :  { %6602 = vst.msk [vmem:[#allocation5 + $0xf] sm:$0x2] %vm6601_vm10, %v6597_v21  ;;  %10538 = vmatpush3.bf16.msra.mxu1 %v12599_v34  ;;  %10004 = vmatprep.mubr.msk.f32.mxu1 %vm11306_vm1, %v11307_v19 }
0x852a   :  { %10539 = vmatprep.subr.bf16.mxu1 %v11305_v13 }
0x852d   :  { %10541 = vmatpush3.bf16.msra.mxu1 %v12610_v10 }
0x852e   :  { %10548 = vmatprep.subr.bf16.mxu1 %v11305_v13 }
0x85f6   :  { %v12674_v54 = vpop.f32.mrb[66].mxu1 }
0x85f7   :  { %v12676_v2 = vpop.f32.mrb[67].mxu1 }
0x85fb   :  { %v6671_v20 = vpop.f32.mrb[68].mxu1 }
0x85fc   :  { %v6676_v53 = vrot.slane %v6671_v20, 6  ;;  %v9984_v61 = vpop.f32.mrb[69].mxu1 }
0x85fe   :  { %v6678_v45 = vadd.f32 %v6676_v53, %v12639_v24 }
0x8600   :  { %11117 = vtanh.f32 %v6678_v45  ;;  %v8807_v57 = vmul.f32 -1.442695, %v6678_v45 }
0x8602   :  { %11119 = vpow2.f32 %v8807_v57  ;;  %v12725_v57 = vadd.f32 %v12636_v60, %v12634_v18 }
0x860a   :  { %v11118_v31 = vpop.eup %11117 }
0x860b   :  { %6691 = vrot.lane.b32.xlu0 %v11118_v31, %s11308_s28 }
0x860c   :  { %v11120_v5 = vpop.eup %11119 }
0x860d   :  { %v6682_v17 = vadd.f32 1.0, %v11120_v5 }
0x860f   :  { %11121 = vrcp.f32 %v6682_v17 }
0x8619   :  { %v11122_v44 = vpop.eup %11121 }
0x861a   :  { %v6689_v14 = vmul.f32 %v11122_v44, %v6687_v15 }
0x867d   :  { %v6692_v43 = vpop.permute.xlu0 %6691 }
0x867e   :  { %v6694_v12 = vmul.f32 %v11122_v44, %v6692_v43 }
0x8680   :  { %6696 = vrot.lane.b32.xlu1 %v6694_v12, %s11309_s4 }
0x86f2   :  { %v6697_v59 = vpop.permute.xlu1 %6696 }
0x86f3   :  { %v6699_v55 = vadd.f32 %v6697_v59, %v6689_v14 }
0x86f5   :  { %11123 = vtanh.f32 %v6699_v55  ;;  %v6801_v22 = vrot.slane %v6699_v55, 6 }
0x86ff   :  { %v11124_v11 = vpop.eup %11123 }
0x8700   :  { %6702 = vrot.lane.b32.xlu0 %v11124_v11, %s11308_s28 }
0x8772   :  { %v6703_v16 = vpop.permute.xlu0 %6702 }
0x8773   :  { %v12682_v8 = vmul.f32 %v11122_v44, %v6703_v16 }
0x8775   :  { %v6714_v50 = vrot.slane %v12682_v8, 2 }
0x8777   :  { %6715 = vrot.lane.b32.xlu1 %v6714_v50, %s11309_s4 }
0x87e9   :  { %v6716_v27 = vpop.permute.xlu1 %6715 }
0x87ea   :  { %9994 = vmatmul.mubr.msk.f32.vlgmr.msra.gmra.mrb[82].mxu0 %vm109_vm0, %v6716_v27 }
0x87eb   :  { %10544 = vmatpush3.bf16.msra.mxu0 %v12599_v34  ;;  %10015 = vmatprep.mubr.msk.f32.mxu0 %vm11306_vm1, %v11307_v19 }
0x87ec   :  { %10545 = vmatprep.subr.bf16.mxu0 %v11305_v13 }
0x87ef   :  { %10547 = vmatpush3.bf16.msra.mxu0 %v12610_v10 }
0x87f0   :  { %10554 = vmatprep.subr.bf16.mxu0 %v11305_v13 }
0x88bd   :  { %v6785_v30 = vpop.f32.mrb[82].mxu0 }
0x88be   :  { %v6790_v9 = vrot.slane %v6785_v30, 4  ;;  %v9995_v7 = vpop.f32.mrb[83].mxu0 }
0x88c0   :  { %v6792_v26 = vadd.f32 %v6790_v9, %v12639_v24 }
0x88c2   :  { %11125 = vtanh.f32 %v6792_v26  ;;  %v8809_v47 = vmul.f32 -1.442695, %v6792_v26 }
0x88c4   :  { %11127 = vpow2.f32 %v8809_v47 }
0x88cc   :  { %v11126_v52 = vpop.eup %11125 }
0x88cd   :  { %6805 = vrot.lane.b32.xlu0 %v11126_v52, %s11308_s28 }
0x88ce   :  { %v11128_v28 = vpop.eup %11127 }
0x88cf   :  { %v6796_v4 = vadd.f32 1.0, %v11128_v28 }
0x88d1   :  { %11129 = vrcp.f32 %v6796_v4 }
0x88db   :  { %v11130_v35 = vpop.eup %11129 }
0x88dc   :  { %v6803_v42 = vmul.f32 %v11130_v35, %v6801_v22 }
0x893f   :  { %v6806_v38 = vpop.permute.xlu0 %6805 }
0x8940   :  { %v6808_v23 = vmul.f32 %v11130_v35, %v6806_v38 }
0x8942   :  { %6810 = vrot.lane.b32.xlu1 %v6808_v23, %s11309_s4 }
0x89b4   :  { %v6811_v29 = vpop.permute.xlu1 %6810 }
0x89b5   :  { %v6813_v6 = vadd.f32 %v6811_v29, %v6803_v42 }
0x89b7   :  { %11131 = vtanh.f32 %v6813_v6  ;;  %v6915_v46 = vrot.slane %v6813_v6, 6 }
0x89c1   :  { %v11132_v32 = vpop.eup %11131 }
0x89c2   :  { %6816 = vrot.lane.b32.xlu0 %v11132_v32, %s11308_s28 }
0x8a34   :  { %v6817_v39 = vpop.permute.xlu0 %6816 }
0x8a35   :  { %v12697_v41 = vmul.f32 %v11130_v35, %v6817_v39 }
0x8a37   :  { %v6828_v62 = vrot.slane %v12697_v41, 4 }
0x8a39   :  { %6829 = vrot.lane.b32.xlu1 %v6828_v62, %s11309_s4 }
0x8aab   :  { %v6830_v40 = vpop.permute.xlu1 %6829 }
0x8aac   :  { %10005 = vmatmul.mubr.msk.f32.vlgmr.msra.gmra.mrb[70].mxu1 %vm109_vm0, %v6830_v40 }
0x8aad   :  { %10550 = vmatpush3.bf16.msra.mxu1 %v12599_v34  ;;  %10026 = vmatprep.mubr.msk.f32.mxu1 %vm11306_vm1, %v11307_v19 }
0x8aae   :  { %10551 = vmatprep.subr.bf16.mxu1 %v11305_v13 }
0x8ab1   :  { %10553 = vmatpush3.bf16.msra.mxu1 %v12610_v10 }
0x8ab2   :  { %10560 = vmatprep.subr.bf16.mxu1 %v11305_v13 }
0x8b7f   :  { %v6899_v58 = vpop.f32.mrb[70].mxu1 }
0x8b80   :  { %v6904_v1 = vrot.slane %v6899_v58, 2  ;;  %v10006_v3 = vpop.f32.mrb[71].mxu1 }
0x8b82   :  { %v6906_v48 = vadd.f32 %v6904_v1, %v12639_v24 }
0x8b84   :  { %11133 = vtanh.f32 %v6906_v48  ;;  %v8811_v63 = vmul.f32 -1.442695, %v6906_v48 }
0x8b86   :  { %11135 = vpow2.f32 %v8811_v63 }
0x8b8e   :  { %v11134_v49 = vpop.eup %11133 }
0x8b8f   :  { %6919 = vrot.lane.b32.xlu0 %v11134_v49, %s11308_s28 }
0x8b90   :  { %v11136_v51 = vpop.eup %11135 }
0x8b91   :  { %v6910_v56 = vadd.f32 1.0, %v11136_v51 }
0x8b93   :  { %11137 = vrcp.f32 %v6910_v56 }
0x8b9d   :  { %v11138_v25 = vpop.eup %11137 }
0x8b9e   :  { %v6917_v36 = vmul.f32 %v11138_v25, %v6915_v46 }
0x8c01   :  { %v6920_v33 = vpop.permute.xlu0 %6919 }
0x8c02   :  { %v6922_v0 = vmul.f32 %v11138_v25, %v6920_v33 }
0x8c04   :  { %6924 = vrot.lane.b32.xlu1 %v6922_v0, %s11309_s4 }
0x8c76   :  { %v6925_v21 = vpop.permute.xlu1 %6924 }
0x8c77   :  { %v6927_v20 = vadd.f32 %v6925_v21, %v6917_v36 }
0x8c79   :  { %11139 = vtanh.f32 %v6927_v20  ;;  %v7026_v60 = vrot.slane %v6927_v20, 6 }
0x8c83   :  { %v11140_v24 = vpop.eup %11139 }
0x8c84   :  { %6930 = vrot.lane.b32.xlu0 %v11140_v24, %s11308_s28 }
0x8cf6   :  { %v6931_v53 = vpop.permute.xlu0 %6930 }
0x8cf7   :  { %v12712_v61 = vmul.f32 %v11138_v25, %v6931_v53 }
0x8cf9   :  { %v6942_v45 = vrot.slane %v12712_v61, 6 }
0x8cfb   :  { %6943 = vrot.lane.b32.xlu1 %v6942_v45, %s11309_s4 }
0x8d6d   :  { %v6944_v31 = vpop.permute.xlu1 %6943 }
0x8d6e   :  { %10016 = vmatmul.mubr.msk.f32.vlgmr.msra.gmra.mrb[84].mxu0 %vm109_vm0, %v6944_v31 }
0x8d6f   :  { %10556 = vmatpush3.bf16.msra.mxu0 %v12599_v34  ;;  %10037 = vmatprep.mubr.msk.f32.mxu0 %vm11306_vm1, %v11307_v19 }
0x8d70   :  { %10557 = vmatprep.subr.bf16.mxu0 %v11305_v13 }
0x8d73   :  { %10559 = vmatpush3.bf16.msra.mxu0 %v12610_v10 }
0x8d74   :  { %10566 = vmatprep.subr.bf16.mxu0 %v11305_v13 }
0x8e41   :  { %v7013_v5 = vpop.f32.mrb[84].mxu0 }
0x8e42   :  { %v7017_v17 = vadd.f32 %v7013_v5, %v12725_v57  ;;  %v10017_v44 = vpop.f32.mrb[85].mxu0 }
0x8e44   :  { %11141 = vtanh.f32 %v7017_v17  ;;  %v8813_v12 = vmul.f32 -1.442695, %v7017_v17 }
0x8e46   :  { %11143 = vpow2.f32 %v8813_v12 }
0x8e4e   :  { %v11142_v43 = vpop.eup %11141 }
0x8e4f   :  { %7030 = vrot.lane.b32.xlu0 %v11142_v43, %s11308_s28 }
0x8e50   :  { %v11144_v15 = vpop.eup %11143 }
0x8e51   :  { %v7021_v14 = vadd.f32 1.0, %v11144_v15 }
0x8e53   :  { %11145 = vrcp.f32 %v7021_v14 }
0x8e5d   :  { %v11146_v59 = vpop.eup %11145 }
0x8e5e   :  { %v7028_v16 = vmul.f32 %v11146_v59, %v7026_v60 }
0x8ec1   :  { %v7031_v55 = vpop.permute.xlu0 %7030 }
0x8ec2   :  { %v7033_v11 = vmul.f32 %v11146_v59, %v7031_v55 }
0x8ec4   :  { %7035 = vrot.lane.b32.xlu1 %v7033_v11, %s11309_s4 }
0x8f36   :  { %v7036_v50 = vpop.permute.xlu1 %7035 }
0x8f37   :  { %v7038_v27 = vadd.f32 %v7036_v50, %v7028_v16 }
0x8f39   :  { %11147 = vtanh.f32 %v7038_v27  ;;  %v7135_v32 = vrot.slane %v7038_v27, 6 }
0x8f43   :  { %v11148_v30 = vpop.eup %11147 }
0x8f44   :  { %7041 = vrot.lane.b32.xlu0 %v11148_v30, %s11308_s28 }
0x8fb6   :  { %v7042_v9 = vpop.permute.xlu0 %7041 }
0x8fb7   :  { %v7044_v7 = vmul.f32 %v11146_v59, %v7042_v9 }
0x8fb9   :  { %7046 = vrot.lane.b32.xlu1 %v7044_v7, %s11309_s4 }
0x902b   :  { %v7047_v26 = vpop.permute.xlu1 %7046 }
0x902c   :  { %7049 = vst.msk [vmem:[#allocation5 + $0x4] sm:$0x1] %vm6599_vm9, %v7047_v26  ;;  %10027 = vmatmul.mubr.msk.f32.vlgmr.msra.gmra.mrb[72].mxu1 %vm109_vm0, %v7047_v26 }
0x902d   :  { %7050 = vst.msk [vmem:[#allocation5 + $0x13] sm:$0x2] %vm6601_vm10, %v7047_v26  ;;  %10562 = vmatpush3.bf16.msra.mxu1 %v12599_v34  ;;  %10048 = vmatprep.mubr.msk.f32.mxu1 %vm11306_vm1, %v11307_v19 }
0x902e   :  { %10563 = vmatprep.subr.bf16.mxu1 %v11305_v13 }
0x9031   :  { %10565 = vmatpush3.bf16.msra.mxu1 %v12610_v10 }
0x9032   :  { %10572 = vmatprep.subr.bf16.mxu1 %v11305_v13 }
0x90ff   :  { %v7119_v52 = vpop.f32.mrb[72].mxu1 }
0x9100   :  { %v7124_v47 = vrot.slane %v7119_v52, 6  ;;  %v10028_v28 = vpop.f32.mrb[73].mxu1 }
0x9102   :  { %v7126_v4 = vadd.f32 %v7124_v47, %v12725_v57 }
0x9104   :  { %11149 = vtanh.f32 %v7126_v4  ;;  %v8815_v38 = vmul.f32 -1.442695, %v7126_v4 }
0x9106   :  { %11151 = vpow2.f32 %v8815_v38 }
0x910e   :  { %v11150_v35 = vpop.eup %11149 }
0x910f   :  { %7139 = vrot.lane.b32.xlu0 %v11150_v35, %s11308_s28 }
0x9110   :  { %v11152_v23 = vpop.eup %11151 }
0x9111   :  { %v7130_v22 = vadd.f32 1.0, %v11152_v23 }
0x9113   :  { %11153 = vrcp.f32 %v7130_v22  ;;  %v12788_v22 = vadd.f32 %v12634_v18, %v12676_v2 }
0x911d   :  { %v11154_v42 = vpop.eup %11153 }
0x911e   :  { %v7137_v39 = vmul.f32 %v11154_v42, %v7135_v32 }
0x9181   :  { %v7140_v29 = vpop.permute.xlu0 %7139 }
0x9182   :  { %v7142_v6 = vmul.f32 %v11154_v42, %v7140_v29 }
0x9184   :  { %7144 = vrot.lane.b32.xlu1 %v7142_v6, %s11309_s4 }
0x91f6   :  { %v7145_v62 = vpop.permute.xlu1 %7144 }
0x91f7   :  { %v7147_v40 = vadd.f32 %v7145_v62, %v7137_v39 }
0x91f9   :  { %11155 = vtanh.f32 %v7147_v40  ;;  %v7247_v53 = vrot.slane %v7147_v40, 6 }
0x9203   :  { %v11156_v58 = vpop.eup %11155 }
0x9204   :  { %7150 = vrot.lane.b32.xlu0 %v11156_v58, %s11308_s28 }
0x9276   :  { %v7151_v1 = vpop.permute.xlu0 %7150 }
0x9277   :  { %v12745_v3 = vmul.f32 %v11154_v42, %v7151_v1 }
0x9279   :  { %v7160_v48 = vrot.slane %v12745_v3, 2 }
0x927b   :  { %7161 = vrot.lane.b32.xlu1 %v7160_v48, %s11309_s4 }
0x92ed   :  { %v7162_v49 = vpop.permute.xlu1 %7161 }
0x92ee   :  { %10038 = vmatmul.mubr.msk.f32.vlgmr.msra.gmra.mrb[86].mxu0 %vm109_vm0, %v7162_v49 }
0x92ef   :  { %10568 = vmatpush3.bf16.msra.mxu0 %v12599_v34  ;;  %10059 = vmatprep.mubr.msk.f32.mxu0 %vm11306_vm1, %v11307_v19 }
0x92f0   :  { %10569 = vmatprep.subr.bf16.mxu0 %v11305_v13 }
0x92f3   :  { %10571 = vmatpush3.bf16.msra.mxu0 %v12610_v10 }
0x92f4   :  { %10578 = vmatprep.subr.bf16.mxu0 %v11305_v13 }
0x93c1   :  { %v7231_v63 = vpop.f32.mrb[86].mxu0 }
0x93c2   :  { %v7236_v51 = vrot.slane %v7231_v63, 4  ;;  %v10039_v56 = vpop.f32.mrb[87].mxu0 }
0x93c4   :  { %v7238_v25 = vadd.f32 %v7236_v51, %v12725_v57 }
0x93c6   :  { %11157 = vtanh.f32 %v7238_v25  ;;  %v8817_v0 = vmul.f32 -1.442695, %v7238_v25 }
0x93c8   :  { %11159 = vpow2.f32 %v8817_v0 }
0x93d0   :  { %v11158_v33 = vpop.eup %11157 }
0x93d1   :  { %7251 = vrot.lane.b32.xlu0 %v11158_v33, %s11308_s28 }
0x93d2   :  { %v11160_v46 = vpop.eup %11159 }
0x93d3   :  { %v7242_v36 = vadd.f32 1.0, %v11160_v46 }
0x93d5   :  { %11161 = vrcp.f32 %v7242_v36 }
0x93df   :  { %v11162_v21 = vpop.eup %11161 }
0x93e0   :  { %v7249_v45 = vmul.f32 %v11162_v21, %v7247_v53 }
0x9443   :  { %v7252_v20 = vpop.permute.xlu0 %7251 }
0x9444   :  { %v7254_v24 = vmul.f32 %v11162_v21, %v7252_v20 }
0x9446   :  { %7256 = vrot.lane.b32.xlu1 %v7254_v24, %s11309_s4 }
0x94b8   :  { %v7257_v31 = vpop.permute.xlu1 %7256 }
0x94b9   :  { %v7259_v5 = vadd.f32 %v7257_v31, %v7249_v45 }
0x94bb   :  { %11163 = vtanh.f32 %v7259_v5  ;;  %v7359_v26 = vrot.slane %v7259_v5, 6 }
0x94c5   :  { %v11164_v17 = vpop.eup %11163 }
0x94c6   :  { %7262 = vrot.lane.b32.xlu0 %v11164_v17, %s11308_s28 }
0x9538   :  { %v7263_v44 = vpop.permute.xlu0 %7262 }
0x9539   :  { %v12760_v43 = vmul.f32 %v11162_v21, %v7263_v44 }
0x953b   :  { %v7272_v12 = vrot.slane %v12760_v43, 4 }
0x953d   :  { %7273 = vrot.lane.b32.xlu1 %v7272_v12, %s11309_s4 }
0x95af   :  { %v7274_v15 = vpop.permute.xlu1 %7273 }
0x95b0   :  { %10049 = vmatmul.mubr.msk.f32.vlgmr.msra.gmra.mrb[74].mxu1 %vm109_vm0, %v7274_v15 }
0x95b1   :  { %10574 = vmatpush3.bf16.msra.mxu1 %v12599_v34  ;;  %10070 = vmatprep.mubr.msk.f32.mxu1 %vm11306_vm1, %v11307_v19 }
0x95b2   :  { %10575 = vmatprep.subr.bf16.mxu1 %v11305_v13 }
0x95b5   :  { %10577 = vmatpush3.bf16.msra.mxu1 %v12610_v10 }
0x95b6   :  { %10584 = vmatprep.subr.bf16.mxu1 %v11305_v13 }
0x9683   :  { %v7343_v14 = vpop.f32.mrb[74].mxu1 }
0x9684   :  { %v7348_v59 = vrot.slane %v7343_v14, 2  ;;  %v10050_v55 = vpop.f32.mrb[75].mxu1 }
0x9686   :  { %v7350_v11 = vadd.f32 %v7348_v59, %v12725_v57 }
0x9688   :  { %11165 = vtanh.f32 %v7350_v11  ;;  %v8819_v16 = vmul.f32 -1.442695, %v7350_v11 }
0x968a   :  { %11167 = vpow2.f32 %v8819_v16 }
0x9692   :  { %v11166_v60 = vpop.eup %11165 }
0x9693   :  { %7363 = vrot.lane.b32.xlu0 %v11166_v60, %s11308_s28 }
0x9694   :  { %v11168_v50 = vpop.eup %11167 }
0x9695   :  { %v7354_v27 = vadd.f32 1.0, %v11168_v50 }
0x9697   :  { %11169 = vrcp.f32 %v7354_v27 }
0x96a1   :  { %v11170_v30 = vpop.eup %11169 }
0x96a2   :  { %v7361_v52 = vmul.f32 %v11170_v30, %v7359_v26 }
0x9705   :  { %v7364_v9 = vpop.permute.xlu0 %7363 }
0x9706   :  { %v7366_v7 = vmul.f32 %v11170_v30, %v7364_v9 }
0x9708   :  { %7368 = vrot.lane.b32.xlu1 %v7366_v7, %s11309_s4 }
0x977a   :  { %v7369_v47 = vpop.permute.xlu1 %7368 }
0x977b   :  { %v7371_v28 = vadd.f32 %v7369_v47, %v7361_v52 }
0x977d   :  { %11171 = vtanh.f32 %v7371_v28  ;;  %v7468_v2 = vrot.slane %v7371_v28, 6 }
0x9787   :  { %v11172_v57 = vpop.eup %11171 }
0x9788   :  { %7374 = vrot.lane.b32.xlu0 %v11172_v57, %s11308_s28 }
0x97fa   :  { %v7375_v4 = vpop.permute.xlu0 %7374 }
0x97fb   :  { %v12775_v35 = vmul.f32 %v11170_v30, %v7375_v4 }
0x97fd   :  { %v7384_v38 = vrot.slane %v12775_v35, 6 }
0x97ff   :  { %7385 = vrot.lane.b32.xlu1 %v7384_v38, %s11309_s4 }
0x9871   :  { %v7386_v23 = vpop.permute.xlu1 %7385 }
0x9872   :  { %10060 = vmatmul.mubr.msk.f32.vlgmr.msra.gmra.mrb[88].mxu0 %vm109_vm0, %v7386_v23 }
0x9873   :  { %10580 = vmatpush3.bf16.msra.mxu0 %v12599_v34  ;;  %10081 = vmatprep.mubr.msk.f32.mxu0 %vm11306_vm1, %v11307_v19 }
0x9874   :  { %10581 = vmatprep.subr.bf16.mxu0 %v11305_v13 }
0x9877   :  { %10583 = vmatpush3.bf16.msra.mxu0 %v12610_v10 }
0x9878   :  { %10590 = vmatprep.subr.bf16.mxu0 %v11305_v13 }
0x9945   :  { %v7455_v42 = vpop.f32.mrb[88].mxu0 }
0x9946   :  { %v7459_v29 = vadd.f32 %v7455_v42, %v12788_v22  ;;  %v10061_v6 = vpop.f32.mrb[89].mxu0 }
0x9948   :  { %11173 = vtanh.f32 %v7459_v29  ;;  %v8821_v39 = vmul.f32 -1.442695, %v7459_v29 }
0x994a   :  { %11175 = vpow2.f32 %v8821_v39 }
0x9952   :  { %v11174_v32 = vpop.eup %11173 }
0x9953   :  { %7472 = vrot.lane.b32.xlu0 %v11174_v32, %s11308_s28 }
0x9954   :  { %v11176_v62 = vpop.eup %11175 }
0x9955   :  { %v7463_v40 = vadd.f32 1.0, %v11176_v62 }
0x9957   :  { %11177 = vrcp.f32 %v7463_v40 }
0x9961   :  { %v11178_v58 = vpop.eup %11177 }
0x9962   :  { %v7470_v49 = vmul.f32 %v11178_v58, %v7468_v2 }
0x99c5   :  { %v7473_v1 = vpop.permute.xlu0 %7472 }
0x99c6   :  { %v7475_v48 = vmul.f32 %v11178_v58, %v7473_v1 }
0x99c8   :  { %7477 = vrot.lane.b32.xlu1 %v7475_v48, %s11309_s4 }
0x9a3a   :  { %v7478_v63 = vpop.permute.xlu1 %7477 }
0x9a3b   :  { %v7480_v51 = vadd.f32 %v7478_v63, %v7470_v49 }
0x9a3d   :  { %11179 = vtanh.f32 %v7480_v51  ;;  %v7577_v12 = vrot.slane %v7480_v51, 6 }
0x9a47   :  { %v11180_v56 = vpop.eup %11179 }
0x9a48   :  { %7483 = vrot.lane.b32.xlu0 %v11180_v56, %s11308_s28 }
0x9aba   :  { %v7484_v25 = vpop.permute.xlu0 %7483 }
0x9abb   :  { %v7486_v33 = vmul.f32 %v11178_v58, %v7484_v25 }
0x9abd   :  { %7488 = vrot.lane.b32.xlu1 %v7486_v33, %s11309_s4 }
0x9b2f   :  { %v7489_v0 = vpop.permute.xlu1 %7488 }
0x9b30   :  { %7491 = vst.msk [vmem:[#allocation5 + $0x8] sm:$0x1] %vm6599_vm9, %v7489_v0  ;;  %10071 = vmatmul.mubr.msk.f32.vlgmr.msra.gmra.mrb[76].mxu1 %vm109_vm0, %v7489_v0 }
0x9b31   :  { %7492 = vst.msk [vmem:[#allocation5 + $0x17] sm:$0x2] %vm6601_vm10, %v7489_v0  ;;  %10586 = vmatpush3.bf16.msra.mxu1 %v12599_v34  ;;  %10092 = vmatprep.mubr.msk.f32.mxu1 %vm11306_vm1, %v11307_v19 }
0x9b32   :  { %10587 = vmatprep.subr.bf16.mxu1 %v11305_v13 }
0x9b35   :  { %10589 = vmatpush3.bf16.msra.mxu1 %v12610_v10 }
0x9b36   :  { %10596 = vmatprep.subr.bf16.mxu1 %v11305_v13 }
0x9c03   :  { %v7561_v46 = vpop.f32.mrb[76].mxu1 }
0x9c04   :  { %v7566_v36 = vrot.slane %v7561_v46, 6  ;;  %v10072_v21 = vpop.f32.mrb[77].mxu1 }
0x9c06   :  { %v7568_v20 = vadd.f32 %v7566_v36, %v12788_v22 }
0x9c08   :  { %11181 = vtanh.f32 %v7568_v20  ;;  %v8823_v53 = vmul.f32 -1.442695, %v7568_v20 }
0x9c0a   :  { %11183 = vpow2.f32 %v8823_v53 }
0x9c12   :  { %v11182_v24 = vpop.eup %11181 }
0x9c13   :  { %7581 = vrot.lane.b32.xlu0 %v11182_v24, %s11308_s28 }
0x9c14   :  { %v11184_v45 = vpop.eup %11183 }
0x9c15   :  { %v7572_v31 = vadd.f32 1.0, %v11184_v45 }
0x9c17   :  { %11185 = vrcp.f32 %v7572_v31 }
0x9c21   :  { %v11186_v5 = vpop.eup %11185 }
0x9c22   :  { %v7579_v15 = vmul.f32 %v11186_v5, %v7577_v12 }
0x9c85   :  { %v7582_v17 = vpop.permute.xlu0 %7581 }
0x9c86   :  { %v7584_v44 = vmul.f32 %v11186_v5, %v7582_v17  ;;  %v12851_v17 = vadd.f32 %v12674_v54, %v12634_v18 }
0x9c88   :  { %7586 = vrot.lane.b32.xlu1 %v7584_v44, %s11309_s4 }
0x9cfa   :  { %v7587_v14 = vpop.permute.xlu1 %7586 }
0x9cfb   :  { %v7589_v59 = vadd.f32 %v7587_v14, %v7579_v15 }
0x9cfd   :  { %11187 = vtanh.f32 %v7589_v59  ;;  %v7689_v23 = vrot.slane %v7589_v59, 6 }
0x9d07   :  { %v11188_v55 = vpop.eup %11187 }
0x9d08   :  { %7592 = vrot.lane.b32.xlu0 %v11188_v55, %s11308_s28 }
0x9d7a   :  { %v7593_v11 = vpop.permute.xlu0 %7592 }
0x9d7b   :  { %v12808_v60 = vmul.f32 %v11186_v5, %v7593_v11 }
0x9d7d   :  { %v7602_v16 = vrot.slane %v12808_v60, 2 }
0x9d7f   :  { %7603 = vrot.lane.b32.xlu1 %v7602_v16, %s11309_s4 }
0x9df1   :  { %v7604_v50 = vpop.permute.xlu1 %7603 }
0x9df2   :  { %10082 = vmatmul.mubr.msk.f32.vlgmr.msra.gmra.mrb[90].mxu0 %vm109_vm0, %v7604_v50 }
0x9df3   :  { %10592 = vmatpush3.bf16.msra.mxu0 %v12599_v34  ;;  %10103 = vmatprep.mubr.msk.f32.mxu0 %vm11306_vm1, %v11307_v19 }
0x9df4   :  { %10593 = vmatprep.subr.bf16.mxu0 %v11305_v13 }
0x9df7   :  { %10595 = vmatpush3.bf16.msra.mxu0 %v12610_v10 }
0x9df8   :  { %10602 = vmatprep.subr.bf16.mxu0 %v11305_v13 }
0x9ec5   :  { %v7673_v27 = vpop.f32.mrb[90].mxu0 }
0x9ec6   :  { %v7678_v30 = vrot.slane %v7673_v27, 4  ;;  %v10083_v9 = vpop.f32.mrb[91].mxu0 }
0x9ec8   :  { %v7680_v7 = vadd.f32 %v7678_v30, %v12788_v22 }
0x9eca   :  { %11189 = vtanh.f32 %v7680_v7  ;;  %v8825_v52 = vmul.f32 -1.442695, %v7680_v7 }
0x9ecc   :  { %11191 = vpow2.f32 %v8825_v52 }
0x9ed4   :  { %v11190_v26 = vpop.eup %11189 }
0x9ed5   :  { %7693 = vrot.lane.b32.xlu0 %v11190_v26, %s11308_s28 }
0x9ed6   :  { %v11192_v47 = vpop.eup %11191 }
0x9ed7   :  { %v7684_v28 = vadd.f32 1.0, %v11192_v47 }
0x9ed9   :  { %11193 = vrcp.f32 %v7684_v28 }
0x9ee3   :  { %v11194_v57 = vpop.eup %11193 }
0x9ee4   :  { %v7691_v42 = vmul.f32 %v11194_v57, %v7689_v23 }
0x9f47   :  { %v7694_v4 = vpop.permute.xlu0 %7693 }
0x9f48   :  { %v7696_v38 = vmul.f32 %v11194_v57, %v7694_v4 }
0x9f4a   :  { %7698 = vrot.lane.b32.xlu1 %v7696_v38, %s11309_s4 }
0x9fbc   :  { %v7699_v29 = vpop.permute.xlu1 %7698 }
0x9fbd   :  { %v7701_v6 = vadd.f32 %v7699_v29, %v7691_v42 }
0x9fbf   :  { %11195 = vtanh.f32 %v7701_v6  ;;  %v7801_v36 = vrot.slane %v7701_v6, 6 }
0x9fc9   :  { %v11196_v32 = vpop.eup %11195 }
0x9fca   :  { %7704 = vrot.lane.b32.xlu0 %v11196_v32, %s11308_s28 }
0xa03c   :  { %v7705_v39 = vpop.permute.xlu0 %7704 }
0xa03d   :  { %v12823_v62 = vmul.f32 %v11194_v57, %v7705_v39 }
0xa03f   :  { %v7714_v40 = vrot.slane %v12823_v62, 4 }
0xa041   :  { %7715 = vrot.lane.b32.xlu1 %v7714_v40, %s11309_s4 }
0xa0b3   :  { %v7716_v58 = vpop.permute.xlu1 %7715 }
0xa0b4   :  { %10093 = vmatmul.mubr.msk.f32.vlgmr.msra.gmra.mrb[78].mxu1 %vm109_vm0, %v7716_v58 }
0xa0b5   :  { %10598 = vmatpush3.bf16.msra.mxu1 %v12599_v34  ;;  %10114 = vmatprep.mubr.msk.f32.mxu1 %vm11306_vm1, %v11307_v19 }
0xa0b6   :  { %10599 = vmatprep.subr.bf16.mxu1 %v11305_v13 }
0xa0b9   :  { %10601 = vmatpush3.bf16.msra.mxu1 %v12610_v10 }
0xa0ba   :  { %10608 = vmatprep.subr.bf16.mxu1 %v11305_v13 }
0xa187   :  { %v7785_v1 = vpop.f32.mrb[78].mxu1 }
0xa188   :  { %v7790_v48 = vrot.slane %v7785_v1, 2  ;;  %v10094_v2 = vpop.f32.mrb[79].mxu1 }
0xa18a   :  { %v7792_v49 = vadd.f32 %v7790_v48, %v12788_v22 }
0xa18c   :  { %11197 = vtanh.f32 %v7792_v49  ;;  %v8827_v51 = vmul.f32 -1.442695, %v7792_v49 }
0xa18e   :  { %11199 = vpow2.f32 %v8827_v51 }
0xa196   :  { %v11198_v63 = vpop.eup %11197 }
0xa197   :  { %7805 = vrot.lane.b32.xlu0 %v11198_v63, %s11308_s28 }
0xa198   :  { %v11200_v56 = vpop.eup %11199 }
0xa199   :  { %v7796_v25 = vadd.f32 1.0, %v11200_v56 }
0xa19b   :  { %11201 = vrcp.f32 %v7796_v25 }
0xa1a5   :  { %v11202_v33 = vpop.eup %11201 }
0xa1a6   :  { %v7803_v21 = vmul.f32 %v11202_v33, %v7801_v36 }
0xa209   :  { %v7806_v0 = vpop.permute.xlu0 %7805 }
0xa20a   :  { %v7808_v46 = vmul.f32 %v11202_v33, %v7806_v0 }
0xa20c   :  { %7810 = vrot.lane.b32.xlu1 %v7808_v46, %s11309_s4 }
0xa27e   :  { %v7811_v20 = vpop.permute.xlu1 %7810 }
0xa27f   :  { %v7813_v24 = vadd.f32 %v7811_v20, %v7803_v21 }
0xa281   :  { %11203 = vtanh.f32 %v7813_v24  ;;  %v7910_v18 = vrot.slane %v7813_v24, 6 }
0xa28b   :  { %v11204_v22 = vpop.eup %11203 }
0xa28c   :  { %7816 = vrot.lane.b32.xlu0 %v11204_v22, %s11308_s28 }
0xa2fe   :  { %v7817_v53 = vpop.permute.xlu0 %7816 }
0xa2ff   :  { %v12838_v45 = vmul.f32 %v11202_v33, %v7817_v53 }
0xa301   :  { %v7826_v31 = vrot.slane %v12838_v45, 6 }
0xa303   :  { %7827 = vrot.lane.b32.xlu1 %v7826_v31, %s11309_s4 }
0xa375   :  { %v7828_v5 = vpop.permute.xlu1 %7827 }
0xa376   :  { %10104 = vmatmul.mubr.msk.f32.vlgmr.msra.gmra.mrb[92].mxu0 %vm109_vm0, %v7828_v5 }
0xa377   :  { %10604 = vmatpush3.bf16.msra.mxu0 %v12599_v34  ;;  %10125 = vmatprep.mubr.msk.f32.mxu0 %vm11306_vm1, %v11307_v19 }
0xa378   :  { %10605 = vmatprep.subr.bf16.mxu0 %v11305_v13 }
0xa37b   :  { %10607 = vmatpush3.bf16.msra.mxu0 %v12610_v10 }
0xa37c   :  { %10614 = vmatprep.subr.bf16.mxu0 %v11305_v13 }
0xa449   :  { %v7897_v44 = vpop.f32.mrb[92].mxu0 }
0xa44a   :  { %v7901_v12 = vadd.f32 %v7897_v44, %v12851_v17  ;;  %v10105_v15 = vpop.f32.mrb[93].mxu0 }
0xa44c   :  { %11205 = vtanh.f32 %v7901_v12  ;;  %v8829_v59 = vmul.f32 -1.442695, %v7901_v12 }
0xa44e   :  { %11207 = vpow2.f32 %v8829_v59 }
0xa456   :  { %v11206_v14 = vpop.eup %11205 }
0xa457   :  { %7914 = vrot.lane.b32.xlu0 %v11206_v14, %s11308_s28 }
0xa458   :  { %v11208_v55 = vpop.eup %11207 }
0xa459   :  { %v7905_v11 = vadd.f32 1.0, %v11208_v55 }
0xa45b   :  { %11209 = vrcp.f32 %v7905_v11 }
0xa465   :  { %v11210_v16 = vpop.eup %11209 }
0xa466   :  { %v7912_v54 = vmul.f32 %v11210_v16, %v7910_v18 }
0xa4c9   :  { %v7915_v50 = vpop.permute.xlu0 %7914 }
0xa4ca   :  { %v7917_v27 = vmul.f32 %v11210_v16, %v7915_v50 }
0xa4cc   :  { %7919 = vrot.lane.b32.xlu1 %v7917_v27, %s11309_s4 }
0xa53e   :  { %v7920_v30 = vpop.permute.xlu1 %7919 }
0xa53f   :  { %v7922_v9 = vadd.f32 %v7920_v30, %v7912_v54 }
0xa541   :  { %11211 = vtanh.f32 %v7922_v9 }
0xa54b   :  { %v11212_v7 = vpop.eup %11211 }
0xa54c   :  { %7925 = vrot.lane.b32.xlu0 %v11212_v7, %s11308_s28 }
0xa5be   :  { %v7926_v26 = vpop.permute.xlu0 %7925 }
0xa5bf   :  { %v7928_v52 = vmul.f32 %v11210_v16, %v7926_v26 }
0xa5c1   :  { %7930 = vrot.lane.b32.xlu1 %v7928_v52, %s11309_s4 }
0xa633   :  { %v7931_v47 = vpop.permute.xlu1 %7930 }
0xa634   :  { %7933 = vst.msk [vmem:[#allocation5 + $0xc] sm:$0x1] %vm6599_vm9, %v7931_v47  ;;  %10115 = vmatmul.mubr.msk.f32.vlgmr.msra.gmra.mrb[80].mxu1 %vm109_vm0, %v7931_v47 }
0xa635   :  { %7934 = vst.msk [vmem:[#allocation5 + $0x1b] sm:$0x2] %vm6601_vm10, %v7931_v47  ;;  %10610 = vmatpush3.bf16.msra.mxu1 %v12599_v34  ;;  %10136 = vmatprep.mubr.msk.f32.mxu1 %vm11306_vm1, %v11307_v19 }
0xa636   :  { %10611 = vmatprep.subr.bf16.mxu1 %v11305_v13 }
0xa639   :  { %10613 = vmatpush3.bf16.msra.mxu1 %v12610_v10  ;;  %v8019_v10 = vrot.slane %v7922_v9, 6 }
0xa707   :  { %v8003_v28 = vpop.f32.mrb[80].mxu1 }
0xa708   :  { %v8008_v57 = vrot.slane %v8003_v28, 6  ;;  %v10116_v4 = vpop.f32.mrb[81].mxu1 }
0xa70a   :  { %v8010_v38 = vadd.f32 %v8008_v57, %v12851_v17 }
0xa70c   :  { %11213 = vtanh.f32 %v8010_v38  ;;  %v8831_v42 = vmul.f32 -1.442695, %v8010_v38 }
0xa70e   :  { %11215 = vpow2.f32 %v8831_v42 }
0xa716   :  { %v11214_v23 = vpop.eup %11213 }
0xa717   :  { %8023 = vrot.lane.b32.xlu0 %v11214_v23, %s11308_s28 }
0xa718   :  { %v11216_v29 = vpop.eup %11215 }
0xa719   :  { %v8014_v34 = vadd.f32 1.0, %v11216_v29 }
0xa71b   :  { %11217 = vrcp.f32 %v8014_v34  ;;  %v11310_v34 = vmov 0  }
0xa71c   :  { %10675 = vset.pattern.permute.xlu1 %v11310_v34  ;;  %10676 = vset.pattern.permute.xlu0 %v11310_v34 }
0xa725   :  { %v11218_v6 = vpop.eup %11217 }
0xa726   :  { %v8021_v40 = vmul.f32 %v11218_v6, %v8019_v10 }
0xa789   :  { %v8024_v32 = vpop.permute.xlu0 %8023 }
0xa78a   :  { %v8026_v39 = vmul.f32 %v11218_v6, %v8024_v32 }
0xa78c   :  { %8028 = vrot.lane.b32.xlu1 %v8026_v39, %s11309_s4 }
0xa7fe   :  { %v8029_v58 = vpop.permute.xlu1 %8028 }
0xa7ff   :  { %v8031_v1 = vadd.f32 %v8029_v58, %v8021_v40 }
0xa801   :  { %11219 = vtanh.f32 %v8031_v1 }
0xa80b   :  { %v11220_v48 = vpop.eup %11219 }
0xa80c   :  { %8034 = vrot.lane.b32.xlu0 %v11220_v48, %s11308_s28 }
0xa87e   :  { %v8035_v2 = vpop.permute.xlu0 %8034 }
0xa87f   :  { %v12870_v49 = vmul.f32 %v11218_v6, %v8035_v2  ;;  %v8268_v2 = vld [vmem:[%s13069_s15] sm:$0x3] }
0xa881   :  { %v8044_v63 = vrot.slane %v12870_v49, 2 }
0xa883   :  { %8045 = vrot.lane.b32.xlu1 %v8044_v63, %s11309_s4 }
0xa8f5   :  { %v8046_v51 = vpop.permute.xlu1 %8045 }
0xa8f6   :  { %10126 = vmatmul.mubr.msk.f32.vlgmr.msra.gmra.mrb[94].mxu0 %vm109_vm0, %v8046_v51 }
0xa8f7   :  { %10147 = vmatprep.mubr.msk.f32.mxu0 %vm11306_vm1, %v11307_v19  ;;  %v8131_v19 = vrot.slane %v8031_v1, 6  ;;  %vm6826_vm1 = vcmask 259077  }
0xa9c9   :  { %v8115_v56 = vpop.f32.mrb[94].mxu0 }
0xa9ca   :  { %v8120_v25 = vrot.slane %v8115_v56, 4  ;;  %v10127_v33 = vpop.f32.mrb[95].mxu0 }
0xa9cc   :  { %v8122_v0 = vadd.f32 %v8120_v25, %v12851_v17 }
0xa9ce   :  { %11221 = vtanh.f32 %v8122_v0  ;;  %v8833_v36 = vmul.f32 -1.442695, %v8122_v0  ;;  %v8406_v0 = vstv %s13094_s7 }
0xa9cf   :  { %vm8407_vm3 = vcmp.eq.s32.totalorder %v12163_v37, %v8406_v0 }
0xa9d0   :  { %11223 = vpow2.f32 %v8833_v36  ;;  %v8462_v36 = vstv %s13096_s26 }
0xa9d1   :  { %vm8463_vm4 = vcmp.eq.s32.totalorder %v12163_v37, %v8462_v36 }
0xa9d8   :  { %v11222_v46 = vpop.eup %11221 }
0xa9d9   :  { %8135 = vrot.lane.b32.xlu0 %v11222_v46, %s11308_s28 }
0xa9da   :  { %v11224_v21 = vpop.eup %11223 }
0xa9db   :  { %v8126_v20 = vadd.f32 1.0, %v11224_v21 }
0xa9dd   :  { %11225 = vrcp.f32 %v8126_v20 }
0xa9e7   :  { %v11226_v24 = vpop.eup %11225 }
0xa9e8   :  { %v8133_v31 = vmul.f32 %v11226_v24, %v8131_v19 }
0xaa4b   :  { %v8136_v22 = vpop.permute.xlu0 %8135 }
0xaa4c   :  { %v8138_v53 = vmul.f32 %v11226_v24, %v8136_v22 }
0xaa4e   :  { %8140 = vrot.lane.b32.xlu1 %v8138_v53, %s11309_s4 }
0xaac0   :  { %v8141_v5 = vpop.permute.xlu1 %8140 }
0xaac1   :  { %v8143_v44 = vadd.f32 %v8141_v5, %v8133_v31 }
0xaac3   :  { %11227 = vtanh.f32 %v8143_v44 }
0xaacd   :  { %v11228_v12 = vpop.eup %11227 }
0xaace   :  { %8146 = vrot.lane.b32.xlu0 %v11228_v12, %s11308_s28 }
0xab40   :  { %v8147_v15 = vpop.permute.xlu0 %8146 }
0xab41   :  { %v8149_v14 = vmul.f32 %v11226_v24, %v8147_v15 }
0xab43   :  { %v8156_v59 = vrot.slane %v8149_v14, 4 }
0xab45   :  { %8157 = vrot.lane.b32.xlu1 %v8156_v59, %s11309_s4 }
0xabb7   :  { %v8158_v55 = vpop.permute.xlu1 %8157 }
0xabb8   :  { %10137 = vmatmul.mubr.msk.f32.vlgmr.msra.gmra.mrb[82].mxu1 %vm109_vm0, %v8158_v55 }
0xac8b   :  { %v8227_v11 = vpop.f32.mrb[82].mxu1 }
0xac8c   :  { %v8232_v16 = vrot.slane %v8227_v11, 2  ;;  %v10138_v50 = vpop.f32.mrb[83].mxu1 }
0xac8e   :  { %v8234_v27 = vadd.f32 %v8232_v16, %v12851_v17  ;;  %v8243_v17 = vrot.slane %v8143_v44, 6 }
0xac90   :  { %11229 = vtanh.f32 %v8234_v27  ;;  %v8835_v54 = vmul.f32 -1.442695, %v8234_v27 }
0xac92   :  { %11231 = vpow2.f32 %v8835_v54 }
0xac9a   :  { %v11230_v18 = vpop.eup %11229 }
0xac9b   :  { %8247 = vrot.lane.b32.xlu0 %v11230_v18, %s11308_s28 }
0xac9c   :  { %v11232_v30 = vpop.eup %11231 }
0xac9d   :  { %v8238_v9 = vadd.f32 1.0, %v11232_v30 }
0xac9f   :  { %11233 = vrcp.f32 %v8238_v9 }
0xaca9   :  { %v11234_v7 = vpop.eup %11233 }
0xacaa   :  { %v8245_v47 = vmul.f32 %v11234_v7, %v8243_v17 }
0xad0d   :  { %v8248_v26 = vpop.permute.xlu0 %8247 }
0xad0e   :  { %v8250_v52 = vmul.f32 %v11234_v7, %v8248_v26 }
0xad10   :  { %8252 = vrot.lane.b32.xlu1 %v8250_v52, %s11309_s4 }
0xad14   :  { %6707 = vrot.lane.b32.xlu1 %v12682_v8, %s11309_s4 }
0xad18   :  { %6935 = vrot.lane.b32.xlu1 %v12712_v61, %s11309_s4 }
0xad1c   :  { %7267 = vrot.lane.b32.xlu1 %v12760_v43, %s11309_s4 }
0xad20   :  { %7597 = vrot.lane.b32.xlu1 %v12808_v60, %s11309_s4 }
0xad24   :  { %7821 = vrot.lane.b32.xlu1 %v12838_v45, %s11309_s4 }
0xad28   :  { %8151 = vrot.lane.b32.xlu1 %v8149_v14, %s11309_s4 }
0xad82   :  { %v8253_v28 = vpop.permute.xlu1 %8252 }
0xad83   :  { %v8255_v57 = vadd.f32 %v8253_v28, %v8245_v47 }
0xad85   :  { %11235 = vtanh.f32 %v8255_v57 }
0xad86   :  { %v6708_v8 = vpop.permute.xlu1 %6707 }
0xad87   :  { %6711 = vst.msk [vmem:[#allocation5 - $0x1] sm:$0x4] %vm6710_vm11, %v6708_v8 }
0xad88   :  { %6713 = vst.msk [vmem:[#allocation5 + $0xe] sm:$0x8] %vm6712_vm12, %v6708_v8 }
0xad8a   :  { %v6936_v61 = vpop.permute.xlu1 %6935 }
0xad8b   :  { %6939 = vst.msk [vmem:[#allocation5 - $0x3] sm:$0x40] %vm6938_vm13, %v6936_v61 }
0xad8c   :  { %6941 = vst.msk [vmem:[#allocation5 + $0xc] sm:$0x80] %vm6940_vm14, %v6936_v61 }
0xad8e   :  { %v7268_v43 = vpop.permute.xlu1 %7267 }
0xad8f   :  { %v11236_v60 = vpop.eup %11235  ;;  %7270 = vst.msk [vmem:[#allocation5 + $0x2] sm:$0x10] %vm6824_vm15, %v7268_v43 }
0xad90   :  { %7271 = vst.msk [vmem:[#allocation5 + $0x11] sm:$0x20] %vm6826_vm1, %v7268_v43  ;;  %8258 = vrot.lane.b32.xlu0 %v11236_v60, %s11308_s28  ;;  %s8545_s28 = scvt.s32.f32 %s13000_s6 }
0xad92   :  { %v7598_v45 = vpop.permute.xlu1 %7597 }
0xad93   :  { %7600 = vst.msk [vmem:[#allocation5 + $0x7] sm:$0x4] %vm6710_vm11, %v7598_v45 }
0xad94   :  { %7601 = vst.msk [vmem:[#allocation5 + $0x16] sm:$0x8] %vm6712_vm12, %v7598_v45  ;;  %6821 = vrot.lane.b32.xlu0 %v12697_v41, %s11309_s4 }
0xad96   :  { %v7822_v4 = vpop.permute.xlu1 %7821 }
0xad97   :  { %7824 = vst.msk [vmem:[#allocation5 + $0x5] sm:$0x40] %vm6938_vm13, %v7822_v4 }
0xad98   :  { %7825 = vst.msk [vmem:[#allocation5 + $0x14] sm:$0x80] %vm6940_vm14, %v7822_v4  ;;  %7155 = vrot.lane.b32.xlu0 %v12745_v3, %s11309_s4 }
0xad9a   :  { %v8152_v38 = vpop.permute.xlu1 %8151 }
0xad9b   :  { %8154 = vst.msk [vmem:[#allocation5 + $0xa] sm:$0x10] %vm6824_vm15, %v8152_v38 }
0xad9c   :  { %8155 = vst.msk [vmem:[#allocation5 + $0x19] sm:$0x20] %vm6826_vm1, %v8152_v38  ;;  %7379 = vrot.lane.b32.xlu0 %v12775_v35, %s11309_s4 }
0xada0   :  { %7709 = vrot.lane.b32.xlu0 %v12823_v62, %s11309_s4  ;;  %v8269_v62 = vld [vmem:[%s13070_s16] sm:$0x3] }
0xada1   :  { %8276 = vperm.xlu1 %10675, %v8269_v62  }
0xada4   :  { %8039 = vrot.lane.b32.xlu0 %v12870_v49, %s11309_s4 }
0xae02   :  { %v8259_v41 = vpop.permute.xlu0 %8258 }
0xae03   :  { %v8261_v23 = vmul.f32 %v11234_v7, %v8259_v41 }
0xae05   :  { %8263 = vrot.lane.b32.xlu0 %v8261_v23, %s11309_s4 }
0xae06   :  { %v6822_v42 = vpop.permute.xlu0 %6821 }
0xae07   :  { %6825 = vst.msk [vmem:[#allocation5 - $0x2] sm:$0x10] %vm6824_vm15, %v6822_v42 }
0xae08   :  { %6827 = vst.msk [vmem:[#allocation5 + $0xd] sm:$0x20] %vm6826_vm1, %v6822_v42 }
0xae0a   :  { %v7156_v3 = vpop.permute.xlu0 %7155 }
0xae0b   :  { %7158 = vst.msk [vmem:[#allocation5 + $0x3] sm:$0x4] %vm6710_vm11, %v7156_v3 }
0xae0c   :  { %7159 = vst.msk [vmem:[#allocation5 + $0x12] sm:$0x8] %vm6712_vm12, %v7156_v3 }
0xae0e   :  { %v7380_v35 = vpop.permute.xlu0 %7379 }
0xae0f   :  { %7382 = vst.msk [vmem:[#allocation5 + $0x1] sm:$0x40] %vm6938_vm13, %v7380_v35 }
0xae10   :  { %7383 = vst.msk [vmem:[#allocation5 + $0x10] sm:$0x80] %vm6940_vm14, %v7380_v35 }
0xae12   :  { %v7710_v29 = vpop.permute.xlu0 %7709 }
0xae13   :  { %7712 = vst.msk [vmem:[#allocation5 + $0x6] sm:$0x10] %vm6824_vm15, %v7710_v29 }
0xae14   :  { %7713 = vst.msk [vmem:[#allocation5 + $0x15] sm:$0x20] %vm6826_vm1, %v7710_v29 }
0xae16   :  { %v8040_v6 = vpop.permute.xlu0 %8039  ;;  %v8270_v39 = vld [vmem:[#allocation5] sm:$0xff] }
0xae17   :  { %8042 = vst.msk [vmem:[#allocation5 + $0xb] sm:$0x4] %vm6710_vm11, %v8040_v6  ;;  %v8272_v1 = vld [vmem:[#allocation5 + $0x10] sm:$0xff] }
0xae18   :  { %8043 = vst.msk [vmem:[#allocation5 + $0x1a] sm:$0x8] %vm6712_vm12, %v8040_v6 }
0xae20   :  { %v8277_v49 = vpop.permute.xlu1 %8276 }
0xae77   :  { %v8264_v32 = vpop.permute.xlu0 %8263 }
0xae78   :  { %8266 = vst.msk [vmem:[#allocation5 + $0x9] sm:$0x40] %vm6938_vm13, %v8264_v32 }
0xae79   :  { %8267 = vst.msk [vmem:[#allocation5 + $0x18] sm:$0x80] %vm6940_vm14, %v8264_v32 }
0xae7f   :  { %v8271_v10 = vld [vmem:[#allocation5 + $0x8] sm:$0xff] }
0xae80   :  { %v10615_v40 = vpack.c.bf16 %v8271_v10, %v8270_v39  ;;  %v8273_v58 = vld [vmem:[#allocation5 + $0x18] sm:$0xff] }
0xae81   :  { %v10619_v48 = vpack.c.bf16 %v8273_v58, %v8272_v1 }
0xae82   :  { %10617 = vmatpush3.bf16.xpose.msk.msra.mxu0 %vm10616_vm2, %v10615_v40 }
0xae83   :  { %10618 = vmatprep.subr.bf16.mxu0 %v11305_v13 }
0xae8a   :  { %10621 = vmatpush3.bf16.xpose.msk.msra.mxu0 %vm10616_vm2, %v10619_v48 }
0xae91   :  { %10148 = vmatmul.mubr.msk.f32.vlgmr.msra.gmra.mrb[96].mxu0 %vm109_vm0, %v8268_v2  ;;  %vm8376_vm0 = vcmask 122880  }
0xaf64   :  { %v8360_v63 = vpop.f32.mrb[96].mxu0 }
0xaf65   :  { %v8361_v51 = vadd.f32 %v8360_v63, %v8277_v49  ;;  %v10149_v56 = vpop.f32.mrb[97].mxu0 }
0xaf67   :  { %v8841_v25 = vmul.f32 -1.442695, %v8361_v51 }
0xaf69   :  { %11237 = vpow2.f32 %v8841_v25 }
0xaf73   :  { %v11238_v13 = vpop.eup %11237 }
0xaf74   :  { %v8367_v33 = vadd.f32 1.0, %v11238_v13 }
0xaf76   :  { %11239 = vrcp.f32 %v8367_v33 }
0xaf80   :  { %v12949_v46 = vpop.eup %11239 }
0xaf81   :  { %8370 = vst.msk [vmem:[%s13074_s20] sm:$0x3] %vm4761_vm7, %v12949_v46  ;;  %v8377_v21 = vsel %vm8376_vm0, %v12949_v46, -inf  ;;  %v8408_v20 = vsel %vm8407_vm3, %v12949_v46, 0.0  ;;  %v8464_v22 = vsel %vm8463_vm4, %v12949_v46, 0.0  ;;  %v8430_v53 = vsel %vm8429_vm5, %v12949_v46, -inf }
0xaf82   :  { %8378 = vmax.xlane.f32.xlu0 %v8377_v21  ;;  %v8409_v24 = vsel %vm8376_vm0, %v8408_v20, 0.0  ;;  %v8466_v19 = vrot.slane %v8464_v22, 1  ;;  %v8493_v58 = vsel %vm8492_vm6, %v12949_v46, -inf  ;;  %vm8553_vm7 = vcmask 255105  }
0xaf84   :  { %v8468_v31 = vsel %vm8376_vm0, %v8466_v19, 0.0 }
0xaf86   :  { %8410 = vadd.xlane.f32.xlu0 %v8409_v24 }
0xaf8a   :  { %8431 = vmax.xlane.f32.xlu0 %v8430_v53 }
0xaf8e   :  { %8469 = vadd.xlane.f32.xlu0 %v8468_v31 }
0xb00f   :  { %v8379_v5 = vpop.xlane.xlu0 %8378 }
0xb010   :  { %v8380_v44 = vrot.slane %v8379_v5, 4 }
0xb012   :  { %v8381_v12 = vmax.f32 %v8379_v5, %v8380_v44 }
0xb013   :  { %v8411_v47 = vpop.xlane.xlu0 %8410 }
0xb014   :  { %v8382_v15 = vrot.slane %v8381_v12, 2  ;;  %v8412_v57 = vrot.slane %v8411_v47, 4 }
0xb016   :  { %v8383_v14 = vmax.f32 %v8381_v12, %v8382_v15  ;;  %v8413_v61 = vadd.f32 %v8412_v57, %v8411_v47 }
0xb017   :  { %v8432_v28 = vpop.xlane.xlu0 %8431 }
0xb018   :  { %v8384_v59 = vrot.slane %v8383_v14, 1  ;;  %v8433_v8 = vrot.slane %v8432_v28, 4  ;;  %v8414_v45 = vrot.slane %v8413_v61, 2 }
0xb01a   :  { %v8385_v55 = vmax.f32 %v8383_v14, %v8384_v59  ;;  %v8434_v43 = vmax.f32 %v8432_v28, %v8433_v8  ;;  %v8415_v38 = vadd.f32 %v8414_v45, %v8413_v61 }
0xb01b   :  { %v8470_v25 = vpop.xlane.xlu0 %8469 }
0xb01c   :  { %10628 = vpush %v8385_v55  ;;  %v8435_v4 = vrot.slane %v8434_v43, 2  ;;  %v8416_v23 = vrot.slane %v8415_v38, 1  ;;  %v8471_v33 = vrot.slane %v8470_v25, 4 }
0xb01e   :  { %v8436_v41 = vmax.f32 %v8434_v43, %v8435_v4  ;;  %v8417_v62 = vadd.f32 %v8416_v23, %v8415_v38  ;;  %v8472_v36 = vadd.f32 %v8471_v33, %v8470_v25 }
0xb020   :  { %v8437_v42 = vrot.slane %v8436_v41, 1  ;;  %v8473_v24 = vrot.slane %v8472_v36, 2 }
0xb022   :  { %v8438_v29 = vmax.f32 %v8436_v41, %v8437_v42  ;;  %v8474_v53 = vadd.f32 %v8473_v24, %v8472_v36 }
0xb024   :  { %v8475_v31 = vrot.slane %v8474_v53, 1 }
0xb026   :  { %v8476_v15 = vadd.f32 %v8475_v31, %v8474_v53 }
0xb04d   :  { %s12965_s20 = spop %10628 }
0xb04e   :  { %v8387_v11 = vstv %s12965_s20 }
0xb04f   :  { %v8388_v16 = vsub.f32 %v12949_v46, %v8387_v11 }
0xb051   :  { %v8389_v50 = vmul.f32 1.442695, %v8388_v16 }
0xb053   :  { %11241 = vpow2.f32 %v8389_v50 }
0xb05d   :  { %v11242_v27 = vpop.eup %11241 }
0xb05e   :  { %v8391_v18 = vsel %vm8376_vm0, %v11242_v27, 0.0 }
0xb05f   :  { %8392 = vadd.xlane.f32.xlu1 %v8391_v18  ;;  %v8554_v18 = vsel %vm8553_vm7, %v12949_v46, -inf }
0xb0ec   :  { %v8393_v54 = vpop.xlane.xlu1 %8392 }
0xb0ed   :  { %v8394_v30 = vrot.slane %v8393_v54, 4 }
0xb0ef   :  { %v8395_v9 = vadd.f32 %v8394_v30, %v8393_v54  ;;  %v8526_v54 = vstv %s13098_s22 }
0xb0f0   :  { %vm8527_vm8 = vcmp.eq.s32.totalorder %v12163_v37, %v8526_v54 }
0xb0f1   :  { %v8396_v7 = vrot.slane %v8395_v9, 2 }
0xb0f3   :  { %v8397_v26 = vadd.f32 %v8396_v7, %v8395_v9 }
0xb0f5   :  { %v8398_v52 = vrot.slane %v8397_v26, 1 }
0xb0f7   :  { %v8399_v17 = vadd.f32 %v8398_v52, %v8397_v26 }
0xb0f9   :  { %10630 = vpush %v8399_v17 }
0xb12a   :  { %s10631_s27 = spop %10630 }
0xb12b   :  { %v8401_v60 = vstv %s10631_s27 }
0xb12c   :  { %11243 = vlog2.f32 %v8401_v60 }
0xb136   :  { %v11244_v3 = vpop.eup %11243 }
0xb137   :  { %v8403_v35 = vmul.f32 0.6931472, %v11244_v3 }
0xb139   :  { %10632 = vpush %v8403_v35 }
0xb13a   :  { %10634 = vpush %v8417_v62 }
0xb13b   :  { %10636 = vpush %v8438_v29 }
0xb16a   :  { %s10633_s17 = spop %10632 }
0xb16b   :  { %s8405_s9 = sadd.f32 %s10633_s17, %s12965_s20  ;;  %s10635_s18 = spop %10634 }
0xb16c   :  { %s12971_s29 = spop %10636  ;;  %s8858_s20 = sld [smem:[#allocation9 + $0x1]] }
0xb16d   :  { %s12973_s13 = ssub.f32 %s8405_s9, %s10635_s18  ;;  %v8440_v34 = vstv %s12971_s29 }
0xb16e   :  { %v8441_v6 = vsub.f32 %v12949_v46, %v8440_v34  ;;  %s13029_s18 = scalar_select %p8478_p7, 1, 0 }
0xb16f   :  { %s13010_s7 = smul.f32 %s12973_s13, %s8421_s25 }
0xb170   :  { %v8442_v32 = vmul.f32 1.442695, %v8441_v6  ;;  %s8480_s13 = scvt.s32.f32 %s13029_s18 }
0xb172   :  { %11245 = vpow2.f32 %v8442_v32  ;;  %p8549_p4 = scmp.gt.s32.totalorder %s8858_s20, 0  ;;  %p8859_p5 = scmp.lt.s32.totalorder %s8858_s20, 16 }
0xb174   :  { %s8550_s27 = scalar_select %p8549_p4, %s8858_s20, 0 }
0xb176   :  { %s13100_s27 = smov (!%p8859_p5, %s8550_s27), 16 }
0xb177   :  { %p8605_p6 = scmp.lt.s32.totalorder %s13100_s27, 16 }
0xb179   :  { %s13027_s9 = scalar_select %p8605_p6, 1, 0 }
0xb17c   :  { %v11246_v39 = vpop.eup %11245 }
0xb17d   :  { %v8445_v10 = vrot.slane %v11246_v39, 1 }
0xb17f   :  { %v8447_v40 = vsel %vm8376_vm0, %v8445_v10, 0.0 }
0xb180   :  { %8448 = vadd.xlane.f32.xlu1 %v8447_v40 }
0xb184   :  { %8494 = vmax.xlane.f32.xlu1 %v8493_v58 }
0xb20d   :  { %v8449_v1 = vpop.xlane.xlu1 %8448 }
0xb20e   :  { %v8450_v48 = vrot.slane %v8449_v1, 4 }
0xb210   :  { %v8451_v2 = vadd.f32 %v8450_v48, %v8449_v1 }
0xb211   :  { %v8495_v13 = vpop.xlane.xlu1 %8494 }
0xb212   :  { %v8452_v49 = vrot.slane %v8451_v2, 2  ;;  %v8496_v0 = vrot.slane %v8495_v13, 4 }
0xb214   :  { %v8453_v63 = vadd.f32 %v8452_v49, %v8451_v2  ;;  %v8497_v21 = vmax.f32 %v8495_v13, %v8496_v0 }
0xb216   :  { %v8454_v51 = vrot.slane %v8453_v63, 1  ;;  %v8498_v22 = vrot.slane %v8497_v21, 2 }
0xb218   :  { %v8455_v56 = vadd.f32 %v8454_v51, %v8453_v63  ;;  %v8499_v19 = vmax.f32 %v8497_v21, %v8498_v22  ;;  %v8590_v63 = vrot.slane %v12949_v46, 1  ;;  %v8588_v51 = vstv %s13100_s27 }
0xb219   :  { %vm8589_vm9 = vcmp.eq.s32.totalorder %v12163_v37, %v8588_v51 }
0xb21a   :  { %10638 = vpush %v8455_v56  ;;  %v8500_v5 = vrot.slane %v8499_v19, 1 }
0xb21c   :  { %v8501_v14 = vmax.f32 %v8499_v19, %v8500_v5 }
0xb24b   :  { %s10639_s14 = spop %10638 }
0xb24c   :  { %v8457_v20 = vstv %s10639_s14  ;;  %s8611_s14 = sadd.f32 %s8545_s28, %s8421_s25 }
0xb24d   :  { %11247 = vlog2.f32 %v8457_v20 }
0xb257   :  { %v11248_v44 = vpop.eup %11247 }
0xb258   :  { %v8459_v12 = vmul.f32 0.6931472, %v11248_v44 }
0xb25a   :  { %10640 = vpush %v8459_v12 }
0xb25b   :  { %10642 = vpush %v8476_v15 }
0xb25c   :  { %10644 = vpush %v8501_v14 }
0xb28b   :  { %s10641_s30 = spop %10640 }
0xb28c   :  { %s8461_s0 = sadd.f32 %s10641_s30, %s12971_s29  ;;  %s10643_s21 = spop %10642 }
0xb28d   :  { %s12980_s10 = spop %10644  ;;  %s8607_s29 = scvt.s32.f32 %s13027_s9 }
0xb28e   :  { %s12982_s2 = ssub.f32 %s8461_s0, %s10643_s21  ;;  %v8503_v59 = vstv %s12980_s10  ;;  %s11312_s0 = smov 1.0  }
0xb28f   :  { %v8504_v55 = vsub.f32 %v12949_v46, %v8503_v59  ;;  %s8613_s30 = sadd.f32 %s8607_s29, %s8480_s13  ;;  %s8614_s21 = smax.f32 %s11312_s0, %s8611_s14 }
0xb290   :  { %v8615_v37 = vstv %s8614_s21 }
0xb291   :  { %v8505_v11 = vmul.f32 1.442695, %v8504_v55 }
0xb293   :  { %11249 = vpow2.f32 %v8505_v11 }
0xb29d   :  { %v11250_v16 = vpop.eup %11249 }
0xb29e   :  { %8508 = vrot.lane.b32.xlu0 %v11250_v16, %s11311_s1 }
0xb310   :  { %v8509_v50 = vpop.permute.xlu0 %8508 }
0xb311   :  { %v8511_v27 = vsel %vm8376_vm0, %v8509_v50, 0.0 }
0xb312   :  { %8512 = vadd.xlane.f32.xlu1 %v8511_v27 }
0xb323   :  { %8529 = vrot.lane.b32.xlu1 %v12949_v46, %s11311_s1 }
0xb347   :  { %8555 = vmax.xlane.f32.xlu1 %v8554_v18 }
0xb39f   :  { %v8513_v30 = vpop.xlane.xlu1 %8512 }
0xb3a0   :  { %v8514_v9 = vrot.slane %v8513_v30, 4 }
0xb3a2   :  { %v8515_v7 = vadd.f32 %v8514_v9, %v8513_v30 }
0xb3a3   :  { %v8530_v26 = vpop.permute.xlu1 %8529 }
0xb3a4   :  { %v8516_v52 = vrot.slane %v8515_v7, 2  ;;  %v8532_v17 = vsel %vm8527_vm8, %v8530_v26, 0.0 }
0xb3a5   :  { %v8533_v47 = vsel %vm8376_vm0, %v8532_v17, 0.0 }
0xb3a6   :  { %8534 = vadd.xlane.f32.xlu0 %v8533_v47  ;;  %v8517_v28 = vadd.f32 %v8516_v52, %v8515_v7 }
0xb3a8   :  { %v8518_v57 = vrot.slane %v8517_v28, 1 }
0xb3aa   :  { %v8519_v8 = vadd.f32 %v8518_v57, %v8517_v28 }
0xb3ac   :  { %10646 = vpush %v8519_v8 }
0xb3d4   :  { %v8556_v45 = vpop.xlane.xlu1 %8555 }
0xb3d5   :  { %v8557_v4 = vrot.slane %v8556_v45, 4 }
0xb3d7   :  { %v8558_v38 = vmax.f32 %v8556_v45, %v8557_v4 }
0xb3d9   :  { %v8559_v41 = vrot.slane %v8558_v38, 2 }
0xb3db   :  { %v8560_v35 = vmax.f32 %v8558_v38, %v8559_v41 }
0xb3dd   :  { %s10647_s23 = spop %10646  ;;  %v8561_v34 = vrot.slane %v8560_v35, 1 }
0xb3de   :  { %v8521_v61 = vstv %s10647_s23  ;;  %s8482_s23 = smul.f32 %s12982_s2, %s8480_s13 }
0xb3df   :  { %11251 = vlog2.f32 %v8521_v61  ;;  %v8562_v39 = vmax.f32 %v8560_v35, %v8561_v34 }
0xb3e9   :  { %v11252_v43 = vpop.eup %11251 }
0xb3ea   :  { %v8523_v60 = vmul.f32 0.6931472, %v11252_v43 }
0xb3ec   :  { %10648 = vpush %v8523_v60 }
0xb41d   :  { %s10649_s11 = spop %10648 }
0xb41e   :  { %s8525_s12 = sadd.f32 %s10649_s11, %s12980_s10  ;;  %s8619_s10 = smax.f32 %s11312_s0, %s8613_s30 }
0xb41f   :  { %v8620_v31 = vstv %s8619_s10 }
0xb433   :  { %v8535_v23 = vpop.xlane.xlu0 %8534 }
0xb434   :  { %v8536_v42 = vrot.slane %v8535_v23, 4 }
0xb436   :  { %v8537_v3 = vadd.f32 %v8536_v42, %v8535_v23 }
0xb438   :  { %v8538_v62 = vrot.slane %v8537_v3, 2 }
0xb43a   :  { %v8539_v29 = vadd.f32 %v8538_v62, %v8537_v3 }
0xb43c   :  { %v8540_v6 = vrot.slane %v8539_v29, 1 }
0xb43e   :  { %v8541_v32 = vadd.f32 %v8540_v6, %v8539_v29 }
0xb440   :  { %10650 = vpush %v8541_v32 }
0xb441   :  { %10652 = vpush %v8562_v39 }
0xb471   :  { %s10651_s16 = spop %10650 }
0xb472   :  { %s8546_s4 = ssub.f32 %s8525_s12, %s10651_s16  ;;  %s13005_s3 = spop %10652 }
0xb473   :  { %v8564_v10 = vstv %s13005_s3 }
0xb474   :  { %s13015_s15 = smul.f32 %s8546_s4, %s8545_s28  ;;  %v8565_v40 = vsub.f32 %v12949_v46, %v8564_v10 }
0xb476   :  { %v8566_v58 = vmul.f32 1.442695, %v8565_v40  ;;  %s8610_s8 = sadd.f32 %s13015_s15, %s13010_s7 }
0xb478   :  { %11253 = vpow2.f32 %v8566_v58 }
0xb482   :  { %v11254_v1 = vpop.eup %11253 }
0xb483   :  { %v8569_v48 = vrot.slane %v11254_v1, 1 }
0xb485   :  { %8570 = vrot.lane.b32.xlu0 %v8569_v48, %s11311_s1 }
0xb4f7   :  { %v8571_v2 = vpop.permute.xlu0 %8570 }
0xb4f8   :  { %v8573_v49 = vsel %vm8376_vm0, %v8571_v2, 0.0 }
0xb4f9   :  { %8574 = vadd.xlane.f32.xlu1 %v8573_v49 }
0xb50a   :  { %8591 = vrot.lane.b32.xlu1 %v8590_v63, %s11311_s1 }
0xb586   :  { %v8575_v56 = vpop.xlane.xlu1 %8574 }
0xb587   :  { %v8576_v25 = vrot.slane %v8575_v56, 4 }
0xb589   :  { %v8577_v13 = vadd.f32 %v8576_v25, %v8575_v56 }
0xb58a   :  { %v8592_v33 = vpop.permute.xlu1 %8591 }
0xb58b   :  { %v8578_v0 = vrot.slane %v8577_v13, 2  ;;  %v8594_v36 = vsel %vm8589_vm9, %v8592_v33, 0.0 }
0xb58c   :  { %v8595_v21 = vsel %vm8376_vm0, %v8594_v36, 0.0 }
0xb58d   :  { %8596 = vadd.xlane.f32.xlu0 %v8595_v21  ;;  %v8579_v46 = vadd.f32 %v8578_v0, %v8577_v13 }
0xb58f   :  { %v8580_v20 = vrot.slane %v8579_v46, 1 }
0xb591   :  { %v8581_v24 = vadd.f32 %v8580_v20, %v8579_v46 }
0xb593   :  { %10654 = vpush %v8581_v24 }
0xb5c4   :  { %s10655_s17 = spop %10654 }
0xb5c5   :  { %v8583_v22 = vstv %s10655_s17  ;;  %s11287_s17 = scalar_lea.hbm %s13073_s19, 16 }
0xb5c6   :  { %11255 = vlog2.f32 %v8583_v22  ;;  %p11288_p8 = scmp.ne.s32.totalorder %s13073_s19, %s11287_s17  ;;  %p11291_p9 = scmp.lt.u32.totalorder %s11287_s17, %s13073_s19 }
0xb5c7   :  { %11257 = vrcp.f32 %v8615_v37 }
0xb5c8   :  { %11259 = vrcp.f32 %v8620_v31  ;;  %p11293_p10 = pnand %p11291_p9, %p11288_p8 }
0xb5d0   :  { %v11256_v53 = vpop.eup %11255 }
0xb5d1   :  { %v8585_v19 = vmul.f32 0.6931472, %v11256_v53  ;;  %v11258_v55 = vpop.eup %11257 }
0xb5d2   :  { %v11260_v16 = vpop.eup %11259 }
0xb5d3   :  { %10656 = vpush %v8585_v19 }
0xb604   :  { %s10657_s26 = spop %10656 }
0xb605   :  { %s8587_s1 = sadd.f32 %s10657_s26, %s13005_s3 }
0xb61a   :  { %v8597_v5 = vpop.xlane.xlu0 %8596 }
0xb61b   :  { %v8598_v44 = vrot.slane %v8597_v5, 4 }
0xb61d   :  { %v8599_v12 = vadd.f32 %v8598_v44, %v8597_v5 }
0xb61f   :  { %v8600_v15 = vrot.slane %v8599_v12, 2 }
0xb621   :  { %v8601_v14 = vadd.f32 %v8600_v15, %v8599_v12 }
0xb623   :  { %v8602_v59 = vrot.slane %v8601_v14, 1 }
0xb625   :  { %v8603_v11 = vadd.f32 %v8602_v59, %v8601_v14 }
0xb627   :  { %10658 = vpush %v8603_v11 }
0xb628   :  { %10660 = vpush %v11258_v55 }
0xb629   :  { %10662 = vpush %v11260_v16 }
0xb658   :  { %s10659_s5 = spop %10658 }
0xb659   :  { %s8608_s22 = ssub.f32 %s8587_s1, %s10659_s5  ;;  %s10661_s6 = spop %10660 }
0xb65a   :  { %s10663_s11 = spop %10662  ;;  %s8618_s12 = smul.f32 %s10661_s6, %s8610_s8 }
0xb65b   :  { %s8609_s24 = smul.f32 %s8608_s22, %s8607_s29 }
0xb65d   :  { %s8612_s25 = sadd.f32 %s8609_s24, %s8482_s23 }
0xb65f   :  { %s8623_s28 = smul.f32 %s10663_s11, %s8612_s25 }
0xb661   :  { %s8624_s16 = sadd.f32 %s8623_s28, %s8618_s12 }
0xb663   :  { %s8625_s4 = smul.f32 0.5, %s8624_s16 }
0xb665   :  { %8627 = sst [smem:[#allocation11]] %s8625_s4 }
0xb666   :  { %11296 = shalt.err (!%p11293_p10)
}
0xb667   :  { %s11313_s7 = smov [#allocation11]  }
0xb668   :  { %8635 = dma.smem_to_hbm %s11313_s7, 16, %s13073_s19, [#allocation7]  }
0xb669   :  { %11301 = dma.done.wait [#allocation7], 16  }
0xb66a   :  { %11302 = vsyncadd [#allocation7], 4294967280 }
0xb66b   :  { %8643 = sfence }
0xb66c   :  { %8644 = vsyncpa [#allocation7], 1 }
0xb66d   :  { %8645 = vsyncpa [#allocation8], 1 }
0xb66e   :  { %8646 = vsyncpa [#allocation10], 1 }

</bundles_post_ra>
